<compile_context>
chip_gen: v7x
topology: tpu7x:2x2x1
jax: 0.10.0
libtpu: 0.0.40
codegen_flags: <defaults>
</compile_context>

<pallas_src>
import functools

import jax
import jax.numpy as jnp
from jax.experimental import pallas as pl
from jax.experimental.pallas import tpu as pltpu


# ----------------------------------------------------------------------------
# Kernel
# ----------------------------------------------------------------------------
def _decoder_kernel(H,
                    z0x_ref, enc_out_ref, enc_h_ref, enc_c_ref,
                    whh0_ref, wih1_ref, whh1_ref, b1_ref,
                    watt_top_ref, watt_bot_ref, batt_ref,
                    out_ref, hc_ref):
    H2 = 2 * H
    T_dec = z0x_ref.shape[0]
    B = enc_h_ref.shape[0]
    T_enc = enc_out_ref.shape[1]

    # Only small loop-invariant values are hoisted (a few vregs).  The large
    # packed weights stay in VMEM and are read at each use so they are not
    # live across the fully-unrolled recurrence.
    enc_out = enc_out_ref[...]                     # (B, T_enc, 2H)
    b1 = b1_ref[...]                               # (1, 8H)
    batt = batt_ref[...]                           # (1, 2H)

    # Fold the context half of the attention output projection into the
    # encoder outputs once, before the loop:
    #   ctx @ watt_top == softmax(s) @ (enc_out @ watt_top)
    enc_2d = enc_out.reshape(B * T_enc, H2)
    enc_proj = jnp.dot(enc_2d, watt_top_ref[...],
                       preferred_element_type=jnp.float32).reshape(B, T_enc, H2)

    def fused_gates(z, c_prev):
        # Packed gate layout: [i_f i_b | f_f f_b | o_f o_b | g_f g_b]
        # -> one sigmoid over the three sigmoid gates, one tanh over g.
        sig = jax.nn.sigmoid(z[:, :3 * H2])
        i = sig[:, 0 * H2:1 * H2]
        f = sig[:, 1 * H2:2 * H2]
        o = sig[:, 2 * H2:3 * H2]
        g = jnp.tanh(z[:, 3 * H2:])
        c_new = f * c_prev + i * g
        h_new = o * jnp.tanh(c_new)
        return h_new, c_new

    # Recurrent state: [fwd | bwd] packed along lanes, one (B, 2H) tile/layer.
    h0 = enc_h_ref[...]
    c0 = enc_c_ref[...]
    h1 = h0
    c1 = c0

    outs = []
    # Fully-unrolled static loop (T_dec is small); all indices are static.
    for t in range(T_dec):
        # layer 0, fwd+bwd fused; x-projection was precomputed in the wrapper.
        z0 = z0x_ref[t] + jnp.dot(h0, whh0_ref[...],
                                  preferred_element_type=jnp.float32)
        h0, c0 = fused_gates(z0, c0)

        # layer 1, fwd+bwd fused (block-diagonal weights).
        z1 = (jnp.dot(h0, wih1_ref[...], preferred_element_type=jnp.float32)
              + jnp.dot(h1, whh1_ref[...], preferred_element_type=jnp.float32)
              + b1)
        h1, c1 = fused_gates(z1, c1)

        # Query half of the output projection (MXU; overlaps with the softmax).
        q_proj = jnp.dot(h1, watt_bot_ref[...],
                         preferred_element_type=jnp.float32)        # (B, 2H)

        # Luong dot attention on VPU/XLU (B, T_enc tiny -> MXU would only add
        # fill/drain latency on the recurrent critical path).
        s = jnp.sum(h1[:, None, :] * enc_out, axis=-1)               # (B, T_enc)
        m = jnp.max(s, axis=-1, keepdims=True)
        e = jnp.exp(s - m)
        w = e / jnp.sum(e, axis=-1, keepdims=True)                   # exact recip
        ctx_proj = jnp.sum(w[:, :, None] * enc_proj, axis=1)         # (B, 2H)

        att = jnp.tanh(ctx_proj + q_proj + batt)                     # (B, 2H)
        outs.append(att)

    # One lane-dense store: (B, T_dec*2H); wrapper reshapes to (B, T_dec, 2H).
    out_ref[...] = jnp.concatenate(outs, axis=-1).astype(out_ref.dtype)
    # Final (h, c): h = attention output of the last step, c = [c1_f | c1_b].
    hc_ref[...] = jnp.concatenate([outs[-1], c1], axis=-1).astype(hc_ref.dtype)


# ----------------------------------------------------------------------------
# pallas_call builder + JAX wrapper
# ----------------------------------------------------------------------------
def make_decoder_call(B, T_dec, T_enc, H):
    D2, D4, D8 = 2 * H, 4 * H, 8 * H
    in_shapes = [
        (T_dec, B, D8),                    # precomputed x projection z0_x
        (B, T_enc, D2), (B, D2), (B, D2),  # encoder_out, encoder_h, encoder_c
        (D2, D8), (D2, D8), (D2, D8), (1, D8),   # whh0, wih1, whh1, b1
        (D2, D2), (D2, D2), (1, D2),             # watt_top, watt_bot, batt
    ]

    def full_spec(shape):
        nd = len(shape)
        return pl.BlockSpec(shape, lambda i, nd=nd: (0,) * nd)

    out_shape = (
        jax.ShapeDtypeStruct((B, T_dec * D2), jnp.float32),
        jax.ShapeDtypeStruct((B, D4), jnp.float32),
    )
    out_specs = (full_spec((B, T_dec * D2)), full_spec((B, D4)))
    return pl.pallas_call(
        functools.partial(_decoder_kernel, H),
        out_shape=out_shape,
        grid_spec=pltpu.PrefetchScalarGridSpec(
            num_scalar_prefetch=0,
            grid=(1,),
            in_specs=[full_spec(s) for s in in_shapes],
            out_specs=out_specs),
        compiler_params=pltpu.CompilerParams(
            dimension_semantics=("arbitrary",)),
    )


def pack_fused_params(p, H):
    """Pack per-cell PyTorch-style weights into fused fwd/bwd kernel weights.

    Call ONCE outside the hot path (weights are call-invariant).
    Gate order is permuted (i,f,g,o) -> (i,f,o,g) so the three sigmoid gates
    are contiguous in the packed 8H-wide gate output.
    """
    H8 = 8 * H
    perm = [0, 1, 3, 2]                         # torch (i,f,g,o) -> (i,f,o,g)

    def interleave(wf, wb):
        K = wf.shape[0]
        a = wf.reshape(K, 4, H)[:, perm, :]
        b = wb.reshape(K, 4, H)[:, perm, :]
        # per-gate column interleave [g_f | g_b]
        return jnp.stack([a, b], axis=2).reshape(K, H8)

    def blockdiag(wf, wb):
        # fwd rows drive only fwd gate columns, bwd rows only bwd gate columns
        top = interleave(wf, jnp.zeros_like(wf))
        bot = interleave(jnp.zeros_like(wb), wb)
        return jnp.concatenate([top, bot], axis=0)

    fp = {}
    # layer 0: both directions consume x_t; torch.flip(input, [1]) is folded
    # into the backward input weight by flipping its rows.
    fp["wih0"] = interleave(p["wih0f"], p["wih0b"][::-1, :])
    fp["whh0"] = blockdiag(p["whh0f"], p["whh0b"])
    fp["b0"] = interleave(p["b0f"], p["b0b"])
    # layer 1: fwd cell consumes h0_f (first H lanes), bwd cell h0_b.
    fp["wih1"] = blockdiag(p["wih1f"], p["wih1b"])
    fp["whh1"] = blockdiag(p["whh1f"], p["whh1b"])
    fp["b1"] = interleave(p["b1f"], p["b1b"])
    # attention output projection split: cq@watt = ctx@watt_top + q@watt_bot
    fp["watt_top"] = p["watt"][:2 * H, :]
    fp["watt_bot"] = p["watt"][2 * H:, :]
    fp["batt"] = p["batt"]
    return fp


def modal_attention_bilstm_decoder(x, encoder_out, encoder_h, packed, H):
    enc_out, _enc_c_out = encoder_out      # encoder_c_out unused (no inter_modal_out)
    enc_h, enc_c = encoder_h
    B, T_dec, _I = x.shape
    T_enc = enc_out.shape[1]

    # Precompute the layer-0 input projection for every step as one XLA matmul
    # (this also replaces the time-major transpose of x):  (T_dec, B, 8H).
    z0x = jnp.einsum("bti,ik->tbk", x, packed["wih0"]) + packed["b0"]

    call = make_decoder_call(B, T_dec, T_enc, H)
    out_flat, hc = call(
        z0x, enc_out, enc_h, enc_c,
        packed["whh0"], packed["wih1"], packed["whh1"], packed["b1"],
        packed["watt_top"], packed["watt_bot"], packed["batt"])
    out = out_flat.reshape(B, T_dec, 2 * H)      # free reshape, no transpose
    h_last = hc[:, :2 * H]
    c_last = hc[:, 2 * H:]
    return out, (h_last, c_last)


# ----------------------------------------------------------------------------
# Deterministic parameter init (mimics PyTorch uniform(-1/sqrt(H), 1/sqrt(H)))
# ----------------------------------------------------------------------------
def init_params(key, I, H):
    ks = jax.random.split(key, 20)

    def u(k, shape, bound):
        return jax.random.uniform(k, shape, jnp.float32, -bound, bound)

    p = {}
    k_lstm = 1.0 / float(H) ** 0.5
    idx = 0
    for name, in_dim in [("0f", I), ("0b", I), ("1f", H), ("1b", H)]:
        wih = u(ks[idx], (4 * H, in_dim), k_lstm); idx += 1
        whh = u(ks[idx], (4 * H, H), k_lstm); idx += 1
        bih = u(ks[idx], (4 * H,), k_lstm); idx += 1
        bhh = u(ks[idx], (4 * H,), k_lstm); idx += 1
        p["wih" + name] = wih.T                       # (in_dim, 4H), torch gate order
        p["whh" + name] = whh.T                       # (H, 4H)
        p["b" + name] = (bih + bhh).reshape(1, 4 * H)
    k_att = 1.0 / float(4 * H) ** 0.5
    watt = u(ks[idx], (2 * H, 4 * H), k_att); idx += 1
    batt = u(ks[idx], (2 * H,), k_att); idx += 1
    p["watt"] = watt.T                                # (4H, 2H)
    p["batt"] = batt.reshape(1, 2 * H)
    return p


# ----------------------------------------------------------------------------
# Pure-JAX reference (same math, unfused weights) for verification
# ----------------------------------------------------------------------------
def reference_forward(x, encoder_out, encoder_h, p, H):
    enc_out, _ = encoder_out
    enc_h, enc_c = encoder_h

    def cell(x_t, h, c, wih_t, whh_t, b):
        z = x_t @ wih_t + h @ whh_t + b
        i = jax.nn.sigmoid(z[:, :H])
        f = jax.nn.sigmoid(z[:, H:2 * H])
        g = jnp.tanh(z[:, 2 * H:3 * H])
        o = jax.nn.sigmoid(z[:, 3 * H:])
        c_n = f * c + i * g
        return o * jnp.tanh(c_n), c_n

    h0f = h1f = enc_h[:, :H]
    h0b = h1b = enc_h[:, H:]
    c0f = c1f = enc_c[:, :H]
    c0b = c1b = enc_c[:, H:]
    outs = []
    for t in range(x.shape[1]):
        x_t = x[:, t]
        xr_t = x_t[:, ::-1]
        h0f, c0f = cell(x_t, h0f, c0f, p["wih0f"], p["whh0f"], p["b0f"])
        h0b, c0b = cell(xr_t, h0b, c0b, p["wih0b"], p["whh0b"], p["b0b"])
        h1f, c1f = cell(h0f, h1f, c1f, p["wih1f"], p["whh1f"], p["b1f"])
        h1b, c1b = cell(h0b, h1b, c1b, p["wih1b"], p["whh1b"], p["b1b"])
        q = jnp.concatenate([h1f, h1b], axis=1)
        scores = jnp.einsum("bd,btd->bt", q, enc_out)
        w = jax.nn.softmax(scores, axis=-1)
        ctx = jnp.einsum("bt,btd->bd", w, enc_out)
        h_att = jnp.tanh(jnp.concatenate([ctx, q], axis=1) @ p["watt"] + p["batt"])
        outs.append(h_att)
    out = jnp.stack(outs, axis=1)
    c = jnp.concatenate([c1f, c1b], axis=1)
    return out, (h_att, c)


# ----------------------------------------------------------------------------
if __name__ == "__main__":
    # f32-accurate reference matmuls so the comparison is apples-to-apples with
    # the kernel's in-Pallas f32 matmuls.
    jax.config.update("jax_default_matmul_precision", "highest")

    B, T_dec, T_enc, I, H = 2, 8, 8, 16, 32
    key = jax.random.PRNGKey(0)
    kp, kx, ke, kec, kh, kc = jax.random.split(key, 6)

    params = init_params(kp, I, H)
    x = jax.random.normal(kx, (B, T_dec, I), jnp.float32)
    enc_out = jax.random.normal(ke, (B, T_enc, 2 * H), jnp.float32)
    enc_c_out = jax.random.normal(kec, (B, T_enc, 2 * H), jnp.float32)
    enc_h = jax.random.normal(kh, (B, 2 * H), jnp.float32)
    enc_c = jax.random.normal(kc, (B, 2 * H), jnp.float32)

    # Pack fused weights once, outside the hot path (call-invariant).
    packed = pack_fused_params(params, H)
    packed = jax.tree_util.tree_map(jax.block_until_ready, packed)

    decoder = jax.jit(functools.partial(modal_attention_bilstm_decoder, H=H))
    out, (h, c) = decoder(x, (enc_out, enc_c_out), (enc_h, enc_c), packed)
    jax.block_until_ready((out, h, c))

    out_r, (h_r, c_r) = reference_forward(
        x, (enc_out, enc_c_out), (enc_h, enc_c), params, H)

    assert out.shape == (B, T_dec, 2 * H)
    assert h.shape == (B, 2 * H) and c.shape == (B, 2 * H)
    assert jnp.allclose(out, out_r, atol=2e-3, rtol=2e-3)
    assert jnp.allclose(h, h_r, atol=2e-3, rtol=2e-3)
    assert jnp.allclose(c, c_r, atol=2e-3, rtol=2e-3)
    print("KERNEL_OK")
</pallas_src>

<mosaic_0001>
module attributes {stable_mosaic.version = 11 : i64} {
  func.func @_decoder_kernel(%arg0: i32, %arg1: memref<8x2x256xf32, #tpu.memory_space<vmem>>, %arg2: memref<2x8x64xf32, #tpu.memory_space<vmem>>, %arg3: memref<2x64xf32, #tpu.memory_space<vmem>>, %arg4: memref<2x64xf32, #tpu.memory_space<vmem>>, %arg5: memref<64x256xf32, #tpu.memory_space<vmem>>, %arg6: memref<64x256xf32, #tpu.memory_space<vmem>>, %arg7: memref<64x256xf32, #tpu.memory_space<vmem>>, %arg8: memref<1x256xf32, #tpu.memory_space<vmem>>, %arg9: memref<64x64xf32, #tpu.memory_space<vmem>>, %arg10: memref<64x64xf32, #tpu.memory_space<vmem>>, %arg11: memref<1x64xf32, #tpu.memory_space<vmem>>, %arg12: memref<2x512xf32, #tpu.memory_space<vmem>>, %arg13: memref<2x128xf32, #tpu.memory_space<vmem>>) attributes {dimension_semantics = [#tpu.dimension_semantics<arbitrary>], iteration_bounds = array<i64: 1>, scalar_prefetch = 0 : i64, scratch_operands = 0 : i64, tpu.core_type = #tpu.core_type<tc>, window_params = [{pipeline_mode = #tpu.pipeline_mode<synchronous>, transform_indices = @transform_0, window_bounds = array<i64: 8, 2, 256>}, {pipeline_mode = #tpu.pipeline_mode<synchronous>, transform_indices = @transform_1, window_bounds = array<i64: 2, 8, 64>}, {pipeline_mode = #tpu.pipeline_mode<synchronous>, transform_indices = @transform_2, window_bounds = array<i64: 2, 64>}, {pipeline_mode = #tpu.pipeline_mode<synchronous>, transform_indices = @transform_3, window_bounds = array<i64: 2, 64>}, {pipeline_mode = #tpu.pipeline_mode<synchronous>, transform_indices = @transform_4, window_bounds = array<i64: 64, 256>}, {pipeline_mode = #tpu.pipeline_mode<synchronous>, transform_indices = @transform_5, window_bounds = array<i64: 64, 256>}, {pipeline_mode = #tpu.pipeline_mode<synchronous>, transform_indices = @transform_6, window_bounds = array<i64: 64, 256>}, {pipeline_mode = #tpu.pipeline_mode<synchronous>, transform_indices = @transform_7, window_bounds = array<i64: 1, 256>}, {pipeline_mode = #tpu.pipeline_mode<synchronous>, transform_indices = @transform_8, window_bounds = array<i64: 64, 64>}, {pipeline_mode = #tpu.pipeline_mode<synchronous>, transform_indices = @transform_9, window_bounds = array<i64: 64, 64>}, {pipeline_mode = #tpu.pipeline_mode<synchronous>, transform_indices = @transform_10, window_bounds = array<i64: 1, 64>}, {pipeline_mode = #tpu.pipeline_mode<synchronous>, transform_indices = @transform_11, window_bounds = array<i64: 2, 512>}, {pipeline_mode = #tpu.pipeline_mode<synchronous>, transform_indices = @transform_12, window_bounds = array<i64: 2, 128>}]} {
    %c0 = arith.constant 0 : index
    %c0_0 = arith.constant 0 : index
    %c0_1 = arith.constant 0 : index
    %0 = vector.load %arg2[%c0, %c0_0, %c0_1] : memref<2x8x64xf32, #tpu.memory_space<vmem>>, vector<2x8x64xf32>
    %c0_2 = arith.constant 0 : index
    %c0_3 = arith.constant 0 : index
    %1 = vector.load %arg8[%c0_2, %c0_3] : memref<1x256xf32, #tpu.memory_space<vmem>>, vector<1x256xf32>
    %c0_4 = arith.constant 0 : index
    %c0_5 = arith.constant 0 : index
    %2 = vector.load %arg11[%c0_4, %c0_5] : memref<1x64xf32, #tpu.memory_space<vmem>>, vector<1x64xf32>
    %3 = vector.shape_cast %0 : vector<2x8x64xf32> to vector<16x64xf32>
    %c0_6 = arith.constant 0 : index
    %c0_7 = arith.constant 0 : index
    %4 = vector.load %arg9[%c0_6, %c0_7] : memref<64x64xf32, #tpu.memory_space<vmem>>, vector<64x64xf32>
    %cst = arith.constant dense<0.000000e+00> : vector<16x64xf32>
    %5 = tpu.matmul %3, %4, %cst {dimension_numbers = #tpu.dot_dimension_numbers<[1], [0], [0], [1], [0, 0, 1, 1], [], []>, precision = #tpu.contract_precision<fp32>} : vector<16x64xf32>, vector<64x64xf32>, vector<16x64xf32> -> vector<16x64xf32>
    %6 = vector.shape_cast %5 : vector<16x64xf32> to vector<2x8x64xf32>
    %c0_8 = arith.constant 0 : index
    %c0_9 = arith.constant 0 : index
    %7 = vector.load %arg3[%c0_8, %c0_9] : memref<2x64xf32, #tpu.memory_space<vmem>>, vector<2x64xf32>
    %c0_10 = arith.constant 0 : index
    %c0_11 = arith.constant 0 : index
    %8 = vector.load %arg4[%c0_10, %c0_11] : memref<2x64xf32, #tpu.memory_space<vmem>>, vector<2x64xf32>
    %c0_12 = arith.constant 0 : index
    %c0_13 = arith.constant 0 : index
    %c0_14 = arith.constant 0 : index
    %9 = vector.load %arg1[%c0_12, %c0_13, %c0_14] : memref<8x2x256xf32, #tpu.memory_space<vmem>>, vector<1x2x256xf32>
    %10 = vector.shape_cast %9 : vector<1x2x256xf32> to vector<2x256xf32>
    %c0_15 = arith.constant 0 : index
    %c0_16 = arith.constant 0 : index
    %11 = vector.load %arg5[%c0_15, %c0_16] : memref<64x256xf32, #tpu.memory_space<vmem>>, vector<64x256xf32>
    %cst_17 = arith.constant dense<0.000000e+00> : vector<2x256xf32>
    %12 = tpu.matmul %7, %11, %cst_17 {dimension_numbers = #tpu.dot_dimension_numbers<[1], [0], [0], [1], [0, 0, 1, 1], [], []>, precision = #tpu.contract_precision<fp32>} : vector<2x64xf32>, vector<64x256xf32>, vector<2x256xf32> -> vector<2x256xf32>
    %13 = arith.addf %10, %12 : vector<2x256xf32>
    %14 = vector.extract_strided_slice %13 {offsets = [0, 0], sizes = [2, 192], strides = [1, 1]} : vector<2x256xf32> to vector<2x192xf32>
    %15 = arith.negf %14 : vector<2x192xf32>
    %16 = math.exp %15 : vector<2x192xf32>
    %cst_18 = arith.constant 1.000000e+00 : f32
    %17 = vector.broadcast %cst_18 : f32 to vector<2x192xf32>
    %18 = arith.addf %17, %16 : vector<2x192xf32>
    %19 = arith.divf %17, %18 : vector<2x192xf32>
    %20 = vector.extract_strided_slice %19 {offsets = [0, 0], sizes = [2, 64], strides = [1, 1]} : vector<2x192xf32> to vector<2x64xf32>
    %21 = vector.extract_strided_slice %19 {offsets = [0, 64], sizes = [2, 64], strides = [1, 1]} : vector<2x192xf32> to vector<2x64xf32>
    %22 = vector.extract_strided_slice %19 {offsets = [0, 128], sizes = [2, 64], strides = [1, 1]} : vector<2x192xf32> to vector<2x64xf32>
    %23 = vector.extract_strided_slice %13 {offsets = [0, 192], sizes = [2, 64], strides = [1, 1]} : vector<2x256xf32> to vector<2x64xf32>
    %24 = math.tanh %23 : vector<2x64xf32>
    %25 = arith.mulf %21, %8 : vector<2x64xf32>
    %26 = arith.mulf %20, %24 : vector<2x64xf32>
    %27 = arith.addf %25, %26 : vector<2x64xf32>
    %28 = math.tanh %27 : vector<2x64xf32>
    %29 = arith.mulf %22, %28 : vector<2x64xf32>
    %c0_19 = arith.constant 0 : index
    %c0_20 = arith.constant 0 : index
    %30 = vector.load %arg6[%c0_19, %c0_20] : memref<64x256xf32, #tpu.memory_space<vmem>>, vector<64x256xf32>
    %cst_21 = arith.constant dense<0.000000e+00> : vector<2x256xf32>
    %31 = tpu.matmul %29, %30, %cst_21 {dimension_numbers = #tpu.dot_dimension_numbers<[1], [0], [0], [1], [0, 0, 1, 1], [], []>, precision = #tpu.contract_precision<fp32>} : vector<2x64xf32>, vector<64x256xf32>, vector<2x256xf32> -> vector<2x256xf32>
    %c0_22 = arith.constant 0 : index
    %c0_23 = arith.constant 0 : index
    %32 = vector.load %arg7[%c0_22, %c0_23] : memref<64x256xf32, #tpu.memory_space<vmem>>, vector<64x256xf32>
    %cst_24 = arith.constant dense<0.000000e+00> : vector<2x256xf32>
    %33 = tpu.matmul %7, %32, %cst_24 {dimension_numbers = #tpu.dot_dimension_numbers<[1], [0], [0], [1], [0, 0, 1, 1], [], []>, precision = #tpu.contract_precision<fp32>} : vector<2x64xf32>, vector<64x256xf32>, vector<2x256xf32> -> vector<2x256xf32>
    %34 = arith.addf %31, %33 : vector<2x256xf32>
    %35 = vector.broadcast %1 : vector<1x256xf32> to vector<2x256xf32>
    %36 = arith.addf %34, %35 : vector<2x256xf32>
    %37 = vector.extract_strided_slice %36 {offsets = [0, 0], sizes = [2, 192], strides = [1, 1]} : vector<2x256xf32> to vector<2x192xf32>
    %38 = arith.negf %37 : vector<2x192xf32>
    %39 = math.exp %38 : vector<2x192xf32>
    %cst_25 = arith.constant 1.000000e+00 : f32
    %40 = vector.broadcast %cst_25 : f32 to vector<2x192xf32>
    %41 = arith.addf %40, %39 : vector<2x192xf32>
    %42 = arith.divf %40, %41 : vector<2x192xf32>
    %43 = vector.extract_strided_slice %42 {offsets = [0, 0], sizes = [2, 64], strides = [1, 1]} : vector<2x192xf32> to vector<2x64xf32>
    %44 = vector.extract_strided_slice %42 {offsets = [0, 64], sizes = [2, 64], strides = [1, 1]} : vector<2x192xf32> to vector<2x64xf32>
    %45 = vector.extract_strided_slice %42 {offsets = [0, 128], sizes = [2, 64], strides = [1, 1]} : vector<2x192xf32> to vector<2x64xf32>
    %46 = vector.extract_strided_slice %36 {offsets = [0, 192], sizes = [2, 64], strides = [1, 1]} : vector<2x256xf32> to vector<2x64xf32>
    %47 = math.tanh %46 : vector<2x64xf32>
    %48 = arith.mulf %44, %8 : vector<2x64xf32>
    %49 = arith.mulf %43, %47 : vector<2x64xf32>
    %50 = arith.addf %48, %49 : vector<2x64xf32>
    %51 = math.tanh %50 : vector<2x64xf32>
    %52 = arith.mulf %45, %51 : vector<2x64xf32>
    %c0_26 = arith.constant 0 : index
    %c0_27 = arith.constant 0 : index
    %53 = vector.load %arg10[%c0_26, %c0_27] : memref<64x64xf32, #tpu.memory_space<vmem>>, vector<64x64xf32>
    %cst_28 = arith.constant dense<0.000000e+00> : vector<2x64xf32>
    %54 = tpu.matmul %52, %53, %cst_28 {dimension_numbers = #tpu.dot_dimension_numbers<[1], [0], [0], [1], [0, 0, 1, 1], [], []>, precision = #tpu.contract_precision<fp32>} : vector<2x64xf32>, vector<64x64xf32>, vector<2x64xf32> -> vector<2x64xf32>
    %55 = vector.shape_cast %52 : vector<2x64xf32> to vector<2x1x64xf32>
    %56 = vector.broadcast %55 : vector<2x1x64xf32> to vector<2x8x64xf32>
    %57 = arith.mulf %56, %0 : vector<2x8x64xf32>
    %cst_29 = arith.constant dense<0.000000e+00> : vector<2x8xf32>
    %58 = vector.multi_reduction <add>, %57, %cst_29 [2] : vector<2x8x64xf32> to vector<2x8xf32>
    %cst_30 = arith.constant dense<0xFF800000> : vector<2xf32>
    %59 = vector.multi_reduction <maximumf>, %58, %cst_30 [1] : vector<2x8xf32> to vector<2xf32>
    %60 = vector.shape_cast %59 : vector<2xf32> to vector<2x1xf32>
    %61 = vector.broadcast %60 : vector<2x1xf32> to vector<2x8xf32>
    %62 = arith.subf %58, %61 : vector<2x8xf32>
    %63 = math.exp %62 : vector<2x8xf32>
    %cst_31 = arith.constant dense<0.000000e+00> : vector<2xf32>
    %64 = vector.multi_reduction <add>, %63, %cst_31 [1] : vector<2x8xf32> to vector<2xf32>
    %65 = vector.shape_cast %64 : vector<2xf32> to vector<2x1xf32>
    %66 = vector.broadcast %65 : vector<2x1xf32> to vector<2x8xf32>
    %67 = arith.divf %63, %66 : vector<2x8xf32>
    %68 = vector.shape_cast %67 : vector<2x8xf32> to vector<2x8x1xf32>
    %69 = vector.broadcast %68 : vector<2x8x1xf32> to vector<2x8x64xf32>
    %70 = arith.mulf %69, %6 : vector<2x8x64xf32>
    %cst_32 = arith.constant dense<0.000000e+00> : vector<2x64xf32>
    %71 = vector.multi_reduction <add>, %70, %cst_32 [1] : vector<2x8x64xf32> to vector<2x64xf32>
    %72 = arith.addf %71, %54 : vector<2x64xf32>
    %73 = vector.broadcast %2 : vector<1x64xf32> to vector<2x64xf32>
    %74 = arith.addf %72, %73 : vector<2x64xf32>
    %75 = math.tanh %74 : vector<2x64xf32>
    %c1 = arith.constant 1 : index
    %c0_33 = arith.constant 0 : index
    %c0_34 = arith.constant 0 : index
    %76 = vector.load %arg1[%c1, %c0_33, %c0_34] : memref<8x2x256xf32, #tpu.memory_space<vmem>>, vector<1x2x256xf32>
    %77 = vector.shape_cast %76 : vector<1x2x256xf32> to vector<2x256xf32>
    %c0_35 = arith.constant 0 : index
    %c0_36 = arith.constant 0 : index
    %78 = vector.load %arg5[%c0_35, %c0_36] : memref<64x256xf32, #tpu.memory_space<vmem>>, vector<64x256xf32>
    %cst_37 = arith.constant dense<0.000000e+00> : vector<2x256xf32>
    %79 = tpu.matmul %29, %78, %cst_37 {dimension_numbers = #tpu.dot_dimension_numbers<[1], [0], [0], [1], [0, 0, 1, 1], [], []>, precision = #tpu.contract_precision<fp32>} : vector<2x64xf32>, vector<64x256xf32>, vector<2x256xf32> -> vector<2x256xf32>
    %80 = arith.addf %77, %79 : vector<2x256xf32>
    %81 = vector.extract_strided_slice %80 {offsets = [0, 0], sizes = [2, 192], strides = [1, 1]} : vector<2x256xf32> to vector<2x192xf32>
    %82 = arith.negf %81 : vector<2x192xf32>
    %83 = math.exp %82 : vector<2x192xf32>
    %cst_38 = arith.constant 1.000000e+00 : f32
    %84 = vector.broadcast %cst_38 : f32 to vector<2x192xf32>
    %85 = arith.addf %84, %83 : vector<2x192xf32>
    %86 = arith.divf %84, %85 : vector<2x192xf32>
    %87 = vector.extract_strided_slice %86 {offsets = [0, 0], sizes = [2, 64], strides = [1, 1]} : vector<2x192xf32> to vector<2x64xf32>
    %88 = vector.extract_strided_slice %86 {offsets = [0, 64], sizes = [2, 64], strides = [1, 1]} : vector<2x192xf32> to vector<2x64xf32>
    %89 = vector.extract_strided_slice %86 {offsets = [0, 128], sizes = [2, 64], strides = [1, 1]} : vector<2x192xf32> to vector<2x64xf32>
    %90 = vector.extract_strided_slice %80 {offsets = [0, 192], sizes = [2, 64], strides = [1, 1]} : vector<2x256xf32> to vector<2x64xf32>
    %91 = math.tanh %90 : vector<2x64xf32>
    %92 = arith.mulf %88, %27 : vector<2x64xf32>
    %93 = arith.mulf %87, %91 : vector<2x64xf32>
    %94 = arith.addf %92, %93 : vector<2x64xf32>
    %95 = math.tanh %94 : vector<2x64xf32>
    %96 = arith.mulf %89, %95 : vector<2x64xf32>
    %c0_39 = arith.constant 0 : index
    %c0_40 = arith.constant 0 : index
    %97 = vector.load %arg6[%c0_39, %c0_40] : memref<64x256xf32, #tpu.memory_space<vmem>>, vector<64x256xf32>
    %cst_41 = arith.constant dense<0.000000e+00> : vector<2x256xf32>
    %98 = tpu.matmul %96, %97, %cst_41 {dimension_numbers = #tpu.dot_dimension_numbers<[1], [0], [0], [1], [0, 0, 1, 1], [], []>, precision = #tpu.contract_precision<fp32>} : vector<2x64xf32>, vector<64x256xf32>, vector<2x256xf32> -> vector<2x256xf32>
    %c0_42 = arith.constant 0 : index
    %c0_43 = arith.constant 0 : index
    %99 = vector.load %arg7[%c0_42, %c0_43] : memref<64x256xf32, #tpu.memory_space<vmem>>, vector<64x256xf32>
    %cst_44 = arith.constant dense<0.000000e+00> : vector<2x256xf32>
    %100 = tpu.matmul %52, %99, %cst_44 {dimension_numbers = #tpu.dot_dimension_numbers<[1], [0], [0], [1], [0, 0, 1, 1], [], []>, precision = #tpu.contract_precision<fp32>} : vector<2x64xf32>, vector<64x256xf32>, vector<2x256xf32> -> vector<2x256xf32>
    %101 = arith.addf %98, %100 : vector<2x256xf32>
    %102 = vector.broadcast %1 : vector<1x256xf32> to vector<2x256xf32>
    %103 = arith.addf %101, %102 : vector<2x256xf32>
    %104 = vector.extract_strided_slice %103 {offsets = [0, 0], sizes = [2, 192], strides = [1, 1]} : vector<2x256xf32> to vector<2x192xf32>
    %105 = arith.negf %104 : vector<2x192xf32>
    %106 = math.exp %105 : vector<2x192xf32>
    %cst_45 = arith.constant 1.000000e+00 : f32
    %107 = vector.broadcast %cst_45 : f32 to vector<2x192xf32>
    %108 = arith.addf %107, %106 : vector<2x192xf32>
    %109 = arith.divf %107, %108 : vector<2x192xf32>
    %110 = vector.extract_strided_slice %109 {offsets = [0, 0], sizes = [2, 64], strides = [1, 1]} : vector<2x192xf32> to vector<2x64xf32>
    %111 = vector.extract_strided_slice %109 {offsets = [0, 64], sizes = [2, 64], strides = [1, 1]} : vector<2x192xf32> to vector<2x64xf32>
    %112 = vector.extract_strided_slice %109 {offsets = [0, 128], sizes = [2, 64], strides = [1, 1]} : vector<2x192xf32> to vector<2x64xf32>
    %113 = vector.extract_strided_slice %103 {offsets = [0, 192], sizes = [2, 64], strides = [1, 1]} : vector<2x256xf32> to vector<2x64xf32>
    %114 = math.tanh %113 : vector<2x64xf32>
    %115 = arith.mulf %111, %50 : vector<2x64xf32>
    %116 = arith.mulf %110, %114 : vector<2x64xf32>
    %117 = arith.addf %115, %116 : vector<2x64xf32>
    %118 = math.tanh %117 : vector<2x64xf32>
    %119 = arith.mulf %112, %118 : vector<2x64xf32>
    %c0_46 = arith.constant 0 : index
    %c0_47 = arith.constant 0 : index
    %120 = vector.load %arg10[%c0_46, %c0_47] : memref<64x64xf32, #tpu.memory_space<vmem>>, vector<64x64xf32>
    %cst_48 = arith.constant dense<0.000000e+00> : vector<2x64xf32>
    %121 = tpu.matmul %119, %120, %cst_48 {dimension_numbers = #tpu.dot_dimension_numbers<[1], [0], [0], [1], [0, 0, 1, 1], [], []>, precision = #tpu.contract_precision<fp32>} : vector<2x64xf32>, vector<64x64xf32>, vector<2x64xf32> -> vector<2x64xf32>
    %122 = vector.shape_cast %119 : vector<2x64xf32> to vector<2x1x64xf32>
    %123 = vector.broadcast %122 : vector<2x1x64xf32> to vector<2x8x64xf32>
    %124 = arith.mulf %123, %0 : vector<2x8x64xf32>
    %cst_49 = arith.constant dense<0.000000e+00> : vector<2x8xf32>
    %125 = vector.multi_reduction <add>, %124, %cst_49 [2] : vector<2x8x64xf32> to vector<2x8xf32>
    %cst_50 = arith.constant dense<0xFF800000> : vector<2xf32>
    %126 = vector.multi_reduction <maximumf>, %125, %cst_50 [1] : vector<2x8xf32> to vector<2xf32>
    %127 = vector.shape_cast %126 : vector<2xf32> to vector<2x1xf32>
    %128 = vector.broadcast %127 : vector<2x1xf32> to vector<2x8xf32>
    %129 = arith.subf %125, %128 : vector<2x8xf32>
    %130 = math.exp %129 : vector<2x8xf32>
    %cst_51 = arith.constant dense<0.000000e+00> : vector<2xf32>
    %131 = vector.multi_reduction <add>, %130, %cst_51 [1] : vector<2x8xf32> to vector<2xf32>
    %132 = vector.shape_cast %131 : vector<2xf32> to vector<2x1xf32>
    %133 = vector.broadcast %132 : vector<2x1xf32> to vector<2x8xf32>
    %134 = arith.divf %130, %133 : vector<2x8xf32>
    %135 = vector.shape_cast %134 : vector<2x8xf32> to vector<2x8x1xf32>
    %136 = vector.broadcast %135 : vector<2x8x1xf32> to vector<2x8x64xf32>
    %137 = arith.mulf %136, %6 : vector<2x8x64xf32>
    %cst_52 = arith.constant dense<0.000000e+00> : vector<2x64xf32>
    %138 = vector.multi_reduction <add>, %137, %cst_52 [1] : vector<2x8x64xf32> to vector<2x64xf32>
    %139 = arith.addf %138, %121 : vector<2x64xf32>
    %140 = vector.broadcast %2 : vector<1x64xf32> to vector<2x64xf32>
    %141 = arith.addf %139, %140 : vector<2x64xf32>
    %142 = math.tanh %141 : vector<2x64xf32>
    %c2 = arith.constant 2 : index
    %c0_53 = arith.constant 0 : index
    %c0_54 = arith.constant 0 : index
    %143 = vector.load %arg1[%c2, %c0_53, %c0_54] : memref<8x2x256xf32, #tpu.memory_space<vmem>>, vector<1x2x256xf32>
    %144 = vector.shape_cast %143 : vector<1x2x256xf32> to vector<2x256xf32>
    %c0_55 = arith.constant 0 : index
    %c0_56 = arith.constant 0 : index
    %145 = vector.load %arg5[%c0_55, %c0_56] : memref<64x256xf32, #tpu.memory_space<vmem>>, vector<64x256xf32>
    %cst_57 = arith.constant dense<0.000000e+00> : vector<2x256xf32>
    %146 = tpu.matmul %96, %145, %cst_57 {dimension_numbers = #tpu.dot_dimension_numbers<[1], [0], [0], [1], [0, 0, 1, 1], [], []>, precision = #tpu.contract_precision<fp32>} : vector<2x64xf32>, vector<64x256xf32>, vector<2x256xf32> -> vector<2x256xf32>
    %147 = arith.addf %144, %146 : vector<2x256xf32>
    %148 = vector.extract_strided_slice %147 {offsets = [0, 0], sizes = [2, 192], strides = [1, 1]} : vector<2x256xf32> to vector<2x192xf32>
    %149 = arith.negf %148 : vector<2x192xf32>
    %150 = math.exp %149 : vector<2x192xf32>
    %cst_58 = arith.constant 1.000000e+00 : f32
    %151 = vector.broadcast %cst_58 : f32 to vector<2x192xf32>
    %152 = arith.addf %151, %150 : vector<2x192xf32>
    %153 = arith.divf %151, %152 : vector<2x192xf32>
    %154 = vector.extract_strided_slice %153 {offsets = [0, 0], sizes = [2, 64], strides = [1, 1]} : vector<2x192xf32> to vector<2x64xf32>
    %155 = vector.extract_strided_slice %153 {offsets = [0, 64], sizes = [2, 64], strides = [1, 1]} : vector<2x192xf32> to vector<2x64xf32>
    %156 = vector.extract_strided_slice %153 {offsets = [0, 128], sizes = [2, 64], strides = [1, 1]} : vector<2x192xf32> to vector<2x64xf32>
    %157 = vector.extract_strided_slice %147 {offsets = [0, 192], sizes = [2, 64], strides = [1, 1]} : vector<2x256xf32> to vector<2x64xf32>
    %158 = math.tanh %157 : vector<2x64xf32>
    %159 = arith.mulf %155, %94 : vector<2x64xf32>
    %160 = arith.mulf %154, %158 : vector<2x64xf32>
    %161 = arith.addf %159, %160 : vector<2x64xf32>
    %162 = math.tanh %161 : vector<2x64xf32>
    %163 = arith.mulf %156, %162 : vector<2x64xf32>
    %c0_59 = arith.constant 0 : index
    %c0_60 = arith.constant 0 : index
    %164 = vector.load %arg6[%c0_59, %c0_60] : memref<64x256xf32, #tpu.memory_space<vmem>>, vector<64x256xf32>
    %cst_61 = arith.constant dense<0.000000e+00> : vector<2x256xf32>
    %165 = tpu.matmul %163, %164, %cst_61 {dimension_numbers = #tpu.dot_dimension_numbers<[1], [0], [0], [1], [0, 0, 1, 1], [], []>, precision = #tpu.contract_precision<fp32>} : vector<2x64xf32>, vector<64x256xf32>, vector<2x256xf32> -> vector<2x256xf32>
    %c0_62 = arith.constant 0 : index
    %c0_63 = arith.constant 0 : index
    %166 = vector.load %arg7[%c0_62, %c0_63] : memref<64x256xf32, #tpu.memory_space<vmem>>, vector<64x256xf32>
    %cst_64 = arith.constant dense<0.000000e+00> : vector<2x256xf32>
    %167 = tpu.matmul %119, %166, %cst_64 {dimension_numbers = #tpu.dot_dimension_numbers<[1], [0], [0], [1], [0, 0, 1, 1], [], []>, precision = #tpu.contract_precision<fp32>} : vector<2x64xf32>, vector<64x256xf32>, vector<2x256xf32> -> vector<2x256xf32>
    %168 = arith.addf %165, %167 : vector<2x256xf32>
    %169 = vector.broadcast %1 : vector<1x256xf32> to vector<2x256xf32>
    %170 = arith.addf %168, %169 : vector<2x256xf32>
    %171 = vector.extract_strided_slice %170 {offsets = [0, 0], sizes = [2, 192], strides = [1, 1]} : vector<2x256xf32> to vector<2x192xf32>
    %172 = arith.negf %171 : vector<2x192xf32>
    %173 = math.exp %172 : vector<2x192xf32>
    %cst_65 = arith.constant 1.000000e+00 : f32
    %174 = vector.broadcast %cst_65 : f32 to vector<2x192xf32>
    %175 = arith.addf %174, %173 : vector<2x192xf32>
    %176 = arith.divf %174, %175 : vector<2x192xf32>
    %177 = vector.extract_strided_slice %176 {offsets = [0, 0], sizes = [2, 64], strides = [1, 1]} : vector<2x192xf32> to vector<2x64xf32>
    %178 = vector.extract_strided_slice %176 {offsets = [0, 64], sizes = [2, 64], strides = [1, 1]} : vector<2x192xf32> to vector<2x64xf32>
    %179 = vector.extract_strided_slice %176 {offsets = [0, 128], sizes = [2, 64], strides = [1, 1]} : vector<2x192xf32> to vector<2x64xf32>
    %180 = vector.extract_strided_slice %170 {offsets = [0, 192], sizes = [2, 64], strides = [1, 1]} : vector<2x256xf32> to vector<2x64xf32>
    %181 = math.tanh %180 : vector<2x64xf32>
    %182 = arith.mulf %178, %117 : vector<2x64xf32>
    %183 = arith.mulf %177, %181 : vector<2x64xf32>
    %184 = arith.addf %182, %183 : vector<2x64xf32>
    %185 = math.tanh %184 : vector<2x64xf32>
    %186 = arith.mulf %179, %185 : vector<2x64xf32>
    %c0_66 = arith.constant 0 : index
    %c0_67 = arith.constant 0 : index
    %187 = vector.load %arg10[%c0_66, %c0_67] : memref<64x64xf32, #tpu.memory_space<vmem>>, vector<64x64xf32>
    %cst_68 = arith.constant dense<0.000000e+00> : vector<2x64xf32>
    %188 = tpu.matmul %186, %187, %cst_68 {dimension_numbers = #tpu.dot_dimension_numbers<[1], [0], [0], [1], [0, 0, 1, 1], [], []>, precision = #tpu.contract_precision<fp32>} : vector<2x64xf32>, vector<64x64xf32>, vector<2x64xf32> -> vector<2x64xf32>
    %189 = vector.shape_cast %186 : vector<2x64xf32> to vector<2x1x64xf32>
    %190 = vector.broadcast %189 : vector<2x1x64xf32> to vector<2x8x64xf32>
    %191 = arith.mulf %190, %0 : vector<2x8x64xf32>
    %cst_69 = arith.constant dense<0.000000e+00> : vector<2x8xf32>
    %192 = vector.multi_reduction <add>, %191, %cst_69 [2] : vector<2x8x64xf32> to vector<2x8xf32>
    %cst_70 = arith.constant dense<0xFF800000> : vector<2xf32>
    %193 = vector.multi_reduction <maximumf>, %192, %cst_70 [1] : vector<2x8xf32> to vector<2xf32>
    %194 = vector.shape_cast %193 : vector<2xf32> to vector<2x1xf32>
    %195 = vector.broadcast %194 : vector<2x1xf32> to vector<2x8xf32>
    %196 = arith.subf %192, %195 : vector<2x8xf32>
    %197 = math.exp %196 : vector<2x8xf32>
    %cst_71 = arith.constant dense<0.000000e+00> : vector<2xf32>
    %198 = vector.multi_reduction <add>, %197, %cst_71 [1] : vector<2x8xf32> to vector<2xf32>
    %199 = vector.shape_cast %198 : vector<2xf32> to vector<2x1xf32>
    %200 = vector.broadcast %199 : vector<2x1xf32> to vector<2x8xf32>
    %201 = arith.divf %197, %200 : vector<2x8xf32>
    %202 = vector.shape_cast %201 : vector<2x8xf32> to vector<2x8x1xf32>
    %203 = vector.broadcast %202 : vector<2x8x1xf32> to vector<2x8x64xf32>
    %204 = arith.mulf %203, %6 : vector<2x8x64xf32>
    %cst_72 = arith.constant dense<0.000000e+00> : vector<2x64xf32>
    %205 = vector.multi_reduction <add>, %204, %cst_72 [1] : vector<2x8x64xf32> to vector<2x64xf32>
    %206 = arith.addf %205, %188 : vector<2x64xf32>
    %207 = vector.broadcast %2 : vector<1x64xf32> to vector<2x64xf32>
    %208 = arith.addf %206, %207 : vector<2x64xf32>
    %209 = math.tanh %208 : vector<2x64xf32>
    %c3 = arith.constant 3 : index
    %c0_73 = arith.constant 0 : index
    %c0_74 = arith.constant 0 : index
    %210 = vector.load %arg1[%c3, %c0_73, %c0_74] : memref<8x2x256xf32, #tpu.memory_space<vmem>>, vector<1x2x256xf32>
    %211 = vector.shape_cast %210 : vector<1x2x256xf32> to vector<2x256xf32>
    %c0_75 = arith.constant 0 : index
    %c0_76 = arith.constant 0 : index
    %212 = vector.load %arg5[%c0_75, %c0_76] : memref<64x256xf32, #tpu.memory_space<vmem>>, vector<64x256xf32>
    %cst_77 = arith.constant dense<0.000000e+00> : vector<2x256xf32>
    %213 = tpu.matmul %163, %212, %cst_77 {dimension_numbers = #tpu.dot_dimension_numbers<[1], [0], [0], [1], [0, 0, 1, 1], [], []>, precision = #tpu.contract_precision<fp32>} : vector<2x64xf32>, vector<64x256xf32>, vector<2x256xf32> -> vector<2x256xf32>
    %214 = arith.addf %211, %213 : vector<2x256xf32>
    %215 = vector.extract_strided_slice %214 {offsets = [0, 0], sizes = [2, 192], strides = [1, 1]} : vector<2x256xf32> to vector<2x192xf32>
    %216 = arith.negf %215 : vector<2x192xf32>
    %217 = math.exp %216 : vector<2x192xf32>
    %cst_78 = arith.constant 1.000000e+00 : f32
    %218 = vector.broadcast %cst_78 : f32 to vector<2x192xf32>
    %219 = arith.addf %218, %217 : vector<2x192xf32>
    %220 = arith.divf %218, %219 : vector<2x192xf32>
    %221 = vector.extract_strided_slice %220 {offsets = [0, 0], sizes = [2, 64], strides = [1, 1]} : vector<2x192xf32> to vector<2x64xf32>
    %222 = vector.extract_strided_slice %220 {offsets = [0, 64], sizes = [2, 64], strides = [1, 1]} : vector<2x192xf32> to vector<2x64xf32>
    %223 = vector.extract_strided_slice %220 {offsets = [0, 128], sizes = [2, 64], strides = [1, 1]} : vector<2x192xf32> to vector<2x64xf32>
    %224 = vector.extract_strided_slice %214 {offsets = [0, 192], sizes = [2, 64], strides = [1, 1]} : vector<2x256xf32> to vector<2x64xf32>
    %225 = math.tanh %224 : vector<2x64xf32>
    %226 = arith.mulf %222, %161 : vector<2x64xf32>
    %227 = arith.mulf %221, %225 : vector<2x64xf32>
    %228 = arith.addf %226, %227 : vector<2x64xf32>
    %229 = math.tanh %228 : vector<2x64xf32>
    %230 = arith.mulf %223, %229 : vector<2x64xf32>
    %c0_79 = arith.constant 0 : index
    %c0_80 = arith.constant 0 : index
    %231 = vector.load %arg6[%c0_79, %c0_80] : memref<64x256xf32, #tpu.memory_space<vmem>>, vector<64x256xf32>
    %cst_81 = arith.constant dense<0.000000e+00> : vector<2x256xf32>
    %232 = tpu.matmul %230, %231, %cst_81 {dimension_numbers = #tpu.dot_dimension_numbers<[1], [0], [0], [1], [0, 0, 1, 1], [], []>, precision = #tpu.contract_precision<fp32>} : vector<2x64xf32>, vector<64x256xf32>, vector<2x256xf32> -> vector<2x256xf32>
    %c0_82 = arith.constant 0 : index
    %c0_83 = arith.constant 0 : index
    %233 = vector.load %arg7[%c0_82, %c0_83] : memref<64x256xf32, #tpu.memory_space<vmem>>, vector<64x256xf32>
    %cst_84 = arith.constant dense<0.000000e+00> : vector<2x256xf32>
    %234 = tpu.matmul %186, %233, %cst_84 {dimension_numbers = #tpu.dot_dimension_numbers<[1], [0], [0], [1], [0, 0, 1, 1], [], []>, precision = #tpu.contract_precision<fp32>} : vector<2x64xf32>, vector<64x256xf32>, vector<2x256xf32> -> vector<2x256xf32>
    %235 = arith.addf %232, %234 : vector<2x256xf32>
    %236 = vector.broadcast %1 : vector<1x256xf32> to vector<2x256xf32>
    %237 = arith.addf %235, %236 : vector<2x256xf32>
    %238 = vector.extract_strided_slice %237 {offsets = [0, 0], sizes = [2, 192], strides = [1, 1]} : vector<2x256xf32> to vector<2x192xf32>
    %239 = arith.negf %238 : vector<2x192xf32>
    %240 = math.exp %239 : vector<2x192xf32>
    %cst_85 = arith.constant 1.000000e+00 : f32
    %241 = vector.broadcast %cst_85 : f32 to vector<2x192xf32>
    %242 = arith.addf %241, %240 : vector<2x192xf32>
    %243 = arith.divf %241, %242 : vector<2x192xf32>
    %244 = vector.extract_strided_slice %243 {offsets = [0, 0], sizes = [2, 64], strides = [1, 1]} : vector<2x192xf32> to vector<2x64xf32>
    %245 = vector.extract_strided_slice %243 {offsets = [0, 64], sizes = [2, 64], strides = [1, 1]} : vector<2x192xf32> to vector<2x64xf32>
    %246 = vector.extract_strided_slice %243 {offsets = [0, 128], sizes = [2, 64], strides = [1, 1]} : vector<2x192xf32> to vector<2x64xf32>
    %247 = vector.extract_strided_slice %237 {offsets = [0, 192], sizes = [2, 64], strides = [1, 1]} : vector<2x256xf32> to vector<2x64xf32>
    %248 = math.tanh %247 : vector<2x64xf32>
    %249 = arith.mulf %245, %184 : vector<2x64xf32>
    %250 = arith.mulf %244, %248 : vector<2x64xf32>
    %251 = arith.addf %249, %250 : vector<2x64xf32>
    %252 = math.tanh %251 : vector<2x64xf32>
    %253 = arith.mulf %246, %252 : vector<2x64xf32>
    %c0_86 = arith.constant 0 : index
    %c0_87 = arith.constant 0 : index
    %254 = vector.load %arg10[%c0_86, %c0_87] : memref<64x64xf32, #tpu.memory_space<vmem>>, vector<64x64xf32>
    %cst_88 = arith.constant dense<0.000000e+00> : vector<2x64xf32>
    %255 = tpu.matmul %253, %254, %cst_88 {dimension_numbers = #tpu.dot_dimension_numbers<[1], [0], [0], [1], [0, 0, 1, 1], [], []>, precision = #tpu.contract_precision<fp32>} : vector<2x64xf32>, vector<64x64xf32>, vector<2x64xf32> -> vector<2x64xf32>
    %256 = vector.shape_cast %253 : vector<2x64xf32> to vector<2x1x64xf32>
    %257 = vector.broadcast %256 : vector<2x1x64xf32> to vector<2x8x64xf32>
    %258 = arith.mulf %257, %0 : vector<2x8x64xf32>
    %cst_89 = arith.constant dense<0.000000e+00> : vector<2x8xf32>
    %259 = vector.multi_reduction <add>, %258, %cst_89 [2] : vector<2x8x64xf32> to vector<2x8xf32>
    %cst_90 = arith.constant dense<0xFF800000> : vector<2xf32>
    %260 = vector.multi_reduction <maximumf>, %259, %cst_90 [1] : vector<2x8xf32> to vector<2xf32>
    %261 = vector.shape_cast %260 : vector<2xf32> to vector<2x1xf32>
    %262 = vector.broadcast %261 : vector<2x1xf32> to vector<2x8xf32>
    %263 = arith.subf %259, %262 : vector<2x8xf32>
    %264 = math.exp %263 : vector<2x8xf32>
    %cst_91 = arith.constant dense<0.000000e+00> : vector<2xf32>
    %265 = vector.multi_reduction <add>, %264, %cst_91 [1] : vector<2x8xf32> to vector<2xf32>
    %266 = vector.shape_cast %265 : vector<2xf32> to vector<2x1xf32>
    %267 = vector.broadcast %266 : vector<2x1xf32> to vector<2x8xf32>
    %268 = arith.divf %264, %267 : vector<2x8xf32>
    %269 = vector.shape_cast %268 : vector<2x8xf32> to vector<2x8x1xf32>
    %270 = vector.broadcast %269 : vector<2x8x1xf32> to vector<2x8x64xf32>
    %271 = arith.mulf %270, %6 : vector<2x8x64xf32>
    %cst_92 = arith.constant dense<0.000000e+00> : vector<2x64xf32>
    %272 = vector.multi_reduction <add>, %271, %cst_92 [1] : vector<2x8x64xf32> to vector<2x64xf32>
    %273 = arith.addf %272, %255 : vector<2x64xf32>
    %274 = vector.broadcast %2 : vector<1x64xf32> to vector<2x64xf32>
    %275 = arith.addf %273, %274 : vector<2x64xf32>
    %276 = math.tanh %275 : vector<2x64xf32>
    %c4 = arith.constant 4 : index
    %c0_93 = arith.constant 0 : index
    %c0_94 = arith.constant 0 : index
    %277 = vector.load %arg1[%c4, %c0_93, %c0_94] : memref<8x2x256xf32, #tpu.memory_space<vmem>>, vector<1x2x256xf32>
    %278 = vector.shape_cast %277 : vector<1x2x256xf32> to vector<2x256xf32>
    %c0_95 = arith.constant 0 : index
    %c0_96 = arith.constant 0 : index
    %279 = vector.load %arg5[%c0_95, %c0_96] : memref<64x256xf32, #tpu.memory_space<vmem>>, vector<64x256xf32>
    %cst_97 = arith.constant dense<0.000000e+00> : vector<2x256xf32>
    %280 = tpu.matmul %230, %279, %cst_97 {dimension_numbers = #tpu.dot_dimension_numbers<[1], [0], [0], [1], [0, 0, 1, 1], [], []>, precision = #tpu.contract_precision<fp32>} : vector<2x64xf32>, vector<64x256xf32>, vector<2x256xf32> -> vector<2x256xf32>
    %281 = arith.addf %278, %280 : vector<2x256xf32>
    %282 = vector.extract_strided_slice %281 {offsets = [0, 0], sizes = [2, 192], strides = [1, 1]} : vector<2x256xf32> to vector<2x192xf32>
    %283 = arith.negf %282 : vector<2x192xf32>
    %284 = math.exp %283 : vector<2x192xf32>
    %cst_98 = arith.constant 1.000000e+00 : f32
    %285 = vector.broadcast %cst_98 : f32 to vector<2x192xf32>
    %286 = arith.addf %285, %284 : vector<2x192xf32>
    %287 = arith.divf %285, %286 : vector<2x192xf32>
    %288 = vector.extract_strided_slice %287 {offsets = [0, 0], sizes = [2, 64], strides = [1, 1]} : vector<2x192xf32> to vector<2x64xf32>
    %289 = vector.extract_strided_slice %287 {offsets = [0, 64], sizes = [2, 64], strides = [1, 1]} : vector<2x192xf32> to vector<2x64xf32>
    %290 = vector.extract_strided_slice %287 {offsets = [0, 128], sizes = [2, 64], strides = [1, 1]} : vector<2x192xf32> to vector<2x64xf32>
    %291 = vector.extract_strided_slice %281 {offsets = [0, 192], sizes = [2, 64], strides = [1, 1]} : vector<2x256xf32> to vector<2x64xf32>
    %292 = math.tanh %291 : vector<2x64xf32>
    %293 = arith.mulf %289, %228 : vector<2x64xf32>
    %294 = arith.mulf %288, %292 : vector<2x64xf32>
    %295 = arith.addf %293, %294 : vector<2x64xf32>
    %296 = math.tanh %295 : vector<2x64xf32>
    %297 = arith.mulf %290, %296 : vector<2x64xf32>
    %c0_99 = arith.constant 0 : index
    %c0_100 = arith.constant 0 : index
    %298 = vector.load %arg6[%c0_99, %c0_100] : memref<64x256xf32, #tpu.memory_space<vmem>>, vector<64x256xf32>
    %cst_101 = arith.constant dense<0.000000e+00> : vector<2x256xf32>
    %299 = tpu.matmul %297, %298, %cst_101 {dimension_numbers = #tpu.dot_dimension_numbers<[1], [0], [0], [1], [0, 0, 1, 1], [], []>, precision = #tpu.contract_precision<fp32>} : vector<2x64xf32>, vector<64x256xf32>, vector<2x256xf32> -> vector<2x256xf32>
    %c0_102 = arith.constant 0 : index
    %c0_103 = arith.constant 0 : index
    %300 = vector.load %arg7[%c0_102, %c0_103] : memref<64x256xf32, #tpu.memory_space<vmem>>, vector<64x256xf32>
    %cst_104 = arith.constant dense<0.000000e+00> : vector<2x256xf32>
    %301 = tpu.matmul %253, %300, %cst_104 {dimension_numbers = #tpu.dot_dimension_numbers<[1], [0], [0], [1], [0, 0, 1, 1], [], []>, precision = #tpu.contract_precision<fp32>} : vector<2x64xf32>, vector<64x256xf32>, vector<2x256xf32> -> vector<2x256xf32>
    %302 = arith.addf %299, %301 : vector<2x256xf32>
    %303 = vector.broadcast %1 : vector<1x256xf32> to vector<2x256xf32>
    %304 = arith.addf %302, %303 : vector<2x256xf32>
    %305 = vector.extract_strided_slice %304 {offsets = [0, 0], sizes = [2, 192], strides = [1, 1]} : vector<2x256xf32> to vector<2x192xf32>
    %306 = arith.negf %305 : vector<2x192xf32>
    %307 = math.exp %306 : vector<2x192xf32>
    %cst_105 = arith.constant 1.000000e+00 : f32
    %308 = vector.broadcast %cst_105 : f32 to vector<2x192xf32>
    %309 = arith.addf %308, %307 : vector<2x192xf32>
    %310 = arith.divf %308, %309 : vector<2x192xf32>
    %311 = vector.extract_strided_slice %310 {offsets = [0, 0], sizes = [2, 64], strides = [1, 1]} : vector<2x192xf32> to vector<2x64xf32>
    %312 = vector.extract_strided_slice %310 {offsets = [0, 64], sizes = [2, 64], strides = [1, 1]} : vector<2x192xf32> to vector<2x64xf32>
    %313 = vector.extract_strided_slice %310 {offsets = [0, 128], sizes = [2, 64], strides = [1, 1]} : vector<2x192xf32> to vector<2x64xf32>
    %314 = vector.extract_strided_slice %304 {offsets = [0, 192], sizes = [2, 64], strides = [1, 1]} : vector<2x256xf32> to vector<2x64xf32>
    %315 = math.tanh %314 : vector<2x64xf32>
    %316 = arith.mulf %312, %251 : vector<2x64xf32>
    %317 = arith.mulf %311, %315 : vector<2x64xf32>
    %318 = arith.addf %316, %317 : vector<2x64xf32>
    %319 = math.tanh %318 : vector<2x64xf32>
    %320 = arith.mulf %313, %319 : vector<2x64xf32>
    %c0_106 = arith.constant 0 : index
    %c0_107 = arith.constant 0 : index
    %321 = vector.load %arg10[%c0_106, %c0_107] : memref<64x64xf32, #tpu.memory_space<vmem>>, vector<64x64xf32>
    %cst_108 = arith.constant dense<0.000000e+00> : vector<2x64xf32>
    %322 = tpu.matmul %320, %321, %cst_108 {dimension_numbers = #tpu.dot_dimension_numbers<[1], [0], [0], [1], [0, 0, 1, 1], [], []>, precision = #tpu.contract_precision<fp32>} : vector<2x64xf32>, vector<64x64xf32>, vector<2x64xf32> -> vector<2x64xf32>
    %323 = vector.shape_cast %320 : vector<2x64xf32> to vector<2x1x64xf32>
    %324 = vector.broadcast %323 : vector<2x1x64xf32> to vector<2x8x64xf32>
    %325 = arith.mulf %324, %0 : vector<2x8x64xf32>
    %cst_109 = arith.constant dense<0.000000e+00> : vector<2x8xf32>
    %326 = vector.multi_reduction <add>, %325, %cst_109 [2] : vector<2x8x64xf32> to vector<2x8xf32>
    %cst_110 = arith.constant dense<0xFF800000> : vector<2xf32>
    %327 = vector.multi_reduction <maximumf>, %326, %cst_110 [1] : vector<2x8xf32> to vector<2xf32>
    %328 = vector.shape_cast %327 : vector<2xf32> to vector<2x1xf32>
    %329 = vector.broadcast %328 : vector<2x1xf32> to vector<2x8xf32>
    %330 = arith.subf %326, %329 : vector<2x8xf32>
    %331 = math.exp %330 : vector<2x8xf32>
    %cst_111 = arith.constant dense<0.000000e+00> : vector<2xf32>
    %332 = vector.multi_reduction <add>, %331, %cst_111 [1] : vector<2x8xf32> to vector<2xf32>
    %333 = vector.shape_cast %332 : vector<2xf32> to vector<2x1xf32>
    %334 = vector.broadcast %333 : vector<2x1xf32> to vector<2x8xf32>
    %335 = arith.divf %331, %334 : vector<2x8xf32>
    %336 = vector.shape_cast %335 : vector<2x8xf32> to vector<2x8x1xf32>
    %337 = vector.broadcast %336 : vector<2x8x1xf32> to vector<2x8x64xf32>
    %338 = arith.mulf %337, %6 : vector<2x8x64xf32>
    %cst_112 = arith.constant dense<0.000000e+00> : vector<2x64xf32>
    %339 = vector.multi_reduction <add>, %338, %cst_112 [1] : vector<2x8x64xf32> to vector<2x64xf32>
    %340 = arith.addf %339, %322 : vector<2x64xf32>
    %341 = vector.broadcast %2 : vector<1x64xf32> to vector<2x64xf32>
    %342 = arith.addf %340, %341 : vector<2x64xf32>
    %343 = math.tanh %342 : vector<2x64xf32>
    %c5 = arith.constant 5 : index
    %c0_113 = arith.constant 0 : index
    %c0_114 = arith.constant 0 : index
    %344 = vector.load %arg1[%c5, %c0_113, %c0_114] : memref<8x2x256xf32, #tpu.memory_space<vmem>>, vector<1x2x256xf32>
    %345 = vector.shape_cast %344 : vector<1x2x256xf32> to vector<2x256xf32>
    %c0_115 = arith.constant 0 : index
    %c0_116 = arith.constant 0 : index
    %346 = vector.load %arg5[%c0_115, %c0_116] : memref<64x256xf32, #tpu.memory_space<vmem>>, vector<64x256xf32>
    %cst_117 = arith.constant dense<0.000000e+00> : vector<2x256xf32>
    %347 = tpu.matmul %297, %346, %cst_117 {dimension_numbers = #tpu.dot_dimension_numbers<[1], [0], [0], [1], [0, 0, 1, 1], [], []>, precision = #tpu.contract_precision<fp32>} : vector<2x64xf32>, vector<64x256xf32>, vector<2x256xf32> -> vector<2x256xf32>
    %348 = arith.addf %345, %347 : vector<2x256xf32>
    %349 = vector.extract_strided_slice %348 {offsets = [0, 0], sizes = [2, 192], strides = [1, 1]} : vector<2x256xf32> to vector<2x192xf32>
    %350 = arith.negf %349 : vector<2x192xf32>
    %351 = math.exp %350 : vector<2x192xf32>
    %cst_118 = arith.constant 1.000000e+00 : f32
    %352 = vector.broadcast %cst_118 : f32 to vector<2x192xf32>
    %353 = arith.addf %352, %351 : vector<2x192xf32>
    %354 = arith.divf %352, %353 : vector<2x192xf32>
    %355 = vector.extract_strided_slice %354 {offsets = [0, 0], sizes = [2, 64], strides = [1, 1]} : vector<2x192xf32> to vector<2x64xf32>
    %356 = vector.extract_strided_slice %354 {offsets = [0, 64], sizes = [2, 64], strides = [1, 1]} : vector<2x192xf32> to vector<2x64xf32>
    %357 = vector.extract_strided_slice %354 {offsets = [0, 128], sizes = [2, 64], strides = [1, 1]} : vector<2x192xf32> to vector<2x64xf32>
    %358 = vector.extract_strided_slice %348 {offsets = [0, 192], sizes = [2, 64], strides = [1, 1]} : vector<2x256xf32> to vector<2x64xf32>
    %359 = math.tanh %358 : vector<2x64xf32>
    %360 = arith.mulf %356, %295 : vector<2x64xf32>
    %361 = arith.mulf %355, %359 : vector<2x64xf32>
    %362 = arith.addf %360, %361 : vector<2x64xf32>
    %363 = math.tanh %362 : vector<2x64xf32>
    %364 = arith.mulf %357, %363 : vector<2x64xf32>
    %c0_119 = arith.constant 0 : index
    %c0_120 = arith.constant 0 : index
    %365 = vector.load %arg6[%c0_119, %c0_120] : memref<64x256xf32, #tpu.memory_space<vmem>>, vector<64x256xf32>
    %cst_121 = arith.constant dense<0.000000e+00> : vector<2x256xf32>
    %366 = tpu.matmul %364, %365, %cst_121 {dimension_numbers = #tpu.dot_dimension_numbers<[1], [0], [0], [1], [0, 0, 1, 1], [], []>, precision = #tpu.contract_precision<fp32>} : vector<2x64xf32>, vector<64x256xf32>, vector<2x256xf32> -> vector<2x256xf32>
    %c0_122 = arith.constant 0 : index
    %c0_123 = arith.constant 0 : index
    %367 = vector.load %arg7[%c0_122, %c0_123] : memref<64x256xf32, #tpu.memory_space<vmem>>, vector<64x256xf32>
    %cst_124 = arith.constant dense<0.000000e+00> : vector<2x256xf32>
    %368 = tpu.matmul %320, %367, %cst_124 {dimension_numbers = #tpu.dot_dimension_numbers<[1], [0], [0], [1], [0, 0, 1, 1], [], []>, precision = #tpu.contract_precision<fp32>} : vector<2x64xf32>, vector<64x256xf32>, vector<2x256xf32> -> vector<2x256xf32>
    %369 = arith.addf %366, %368 : vector<2x256xf32>
    %370 = vector.broadcast %1 : vector<1x256xf32> to vector<2x256xf32>
    %371 = arith.addf %369, %370 : vector<2x256xf32>
    %372 = vector.extract_strided_slice %371 {offsets = [0, 0], sizes = [2, 192], strides = [1, 1]} : vector<2x256xf32> to vector<2x192xf32>
    %373 = arith.negf %372 : vector<2x192xf32>
    %374 = math.exp %373 : vector<2x192xf32>
    %cst_125 = arith.constant 1.000000e+00 : f32
    %375 = vector.broadcast %cst_125 : f32 to vector<2x192xf32>
    %376 = arith.addf %375, %374 : vector<2x192xf32>
    %377 = arith.divf %375, %376 : vector<2x192xf32>
    %378 = vector.extract_strided_slice %377 {offsets = [0, 0], sizes = [2, 64], strides = [1, 1]} : vector<2x192xf32> to vector<2x64xf32>
    %379 = vector.extract_strided_slice %377 {offsets = [0, 64], sizes = [2, 64], strides = [1, 1]} : vector<2x192xf32> to vector<2x64xf32>
    %380 = vector.extract_strided_slice %377 {offsets = [0, 128], sizes = [2, 64], strides = [1, 1]} : vector<2x192xf32> to vector<2x64xf32>
    %381 = vector.extract_strided_slice %371 {offsets = [0, 192], sizes = [2, 64], strides = [1, 1]} : vector<2x256xf32> to vector<2x64xf32>
    %382 = math.tanh %381 : vector<2x64xf32>
    %383 = arith.mulf %379, %318 : vector<2x64xf32>
    %384 = arith.mulf %378, %382 : vector<2x64xf32>
    %385 = arith.addf %383, %384 : vector<2x64xf32>
    %386 = math.tanh %385 : vector<2x64xf32>
    %387 = arith.mulf %380, %386 : vector<2x64xf32>
    %c0_126 = arith.constant 0 : index
    %c0_127 = arith.constant 0 : index
    %388 = vector.load %arg10[%c0_126, %c0_127] : memref<64x64xf32, #tpu.memory_space<vmem>>, vector<64x64xf32>
    %cst_128 = arith.constant dense<0.000000e+00> : vector<2x64xf32>
    %389 = tpu.matmul %387, %388, %cst_128 {dimension_numbers = #tpu.dot_dimension_numbers<[1], [0], [0], [1], [0, 0, 1, 1], [], []>, precision = #tpu.contract_precision<fp32>} : vector<2x64xf32>, vector<64x64xf32>, vector<2x64xf32> -> vector<2x64xf32>
    %390 = vector.shape_cast %387 : vector<2x64xf32> to vector<2x1x64xf32>
    %391 = vector.broadcast %390 : vector<2x1x64xf32> to vector<2x8x64xf32>
    %392 = arith.mulf %391, %0 : vector<2x8x64xf32>
    %cst_129 = arith.constant dense<0.000000e+00> : vector<2x8xf32>
    %393 = vector.multi_reduction <add>, %392, %cst_129 [2] : vector<2x8x64xf32> to vector<2x8xf32>
    %cst_130 = arith.constant dense<0xFF800000> : vector<2xf32>
    %394 = vector.multi_reduction <maximumf>, %393, %cst_130 [1] : vector<2x8xf32> to vector<2xf32>
    %395 = vector.shape_cast %394 : vector<2xf32> to vector<2x1xf32>
    %396 = vector.broadcast %395 : vector<2x1xf32> to vector<2x8xf32>
    %397 = arith.subf %393, %396 : vector<2x8xf32>
    %398 = math.exp %397 : vector<2x8xf32>
    %cst_131 = arith.constant dense<0.000000e+00> : vector<2xf32>
    %399 = vector.multi_reduction <add>, %398, %cst_131 [1] : vector<2x8xf32> to vector<2xf32>
    %400 = vector.shape_cast %399 : vector<2xf32> to vector<2x1xf32>
    %401 = vector.broadcast %400 : vector<2x1xf32> to vector<2x8xf32>
    %402 = arith.divf %398, %401 : vector<2x8xf32>
    %403 = vector.shape_cast %402 : vector<2x8xf32> to vector<2x8x1xf32>
    %404 = vector.broadcast %403 : vector<2x8x1xf32> to vector<2x8x64xf32>
    %405 = arith.mulf %404, %6 : vector<2x8x64xf32>
    %cst_132 = arith.constant dense<0.000000e+00> : vector<2x64xf32>
    %406 = vector.multi_reduction <add>, %405, %cst_132 [1] : vector<2x8x64xf32> to vector<2x64xf32>
    %407 = arith.addf %406, %389 : vector<2x64xf32>
    %408 = vector.broadcast %2 : vector<1x64xf32> to vector<2x64xf32>
    %409 = arith.addf %407, %408 : vector<2x64xf32>
    %410 = math.tanh %409 : vector<2x64xf32>
    %c6 = arith.constant 6 : index
    %c0_133 = arith.constant 0 : index
    %c0_134 = arith.constant 0 : index
    %411 = vector.load %arg1[%c6, %c0_133, %c0_134] : memref<8x2x256xf32, #tpu.memory_space<vmem>>, vector<1x2x256xf32>
    %412 = vector.shape_cast %411 : vector<1x2x256xf32> to vector<2x256xf32>
    %c0_135 = arith.constant 0 : index
    %c0_136 = arith.constant 0 : index
    %413 = vector.load %arg5[%c0_135, %c0_136] : memref<64x256xf32, #tpu.memory_space<vmem>>, vector<64x256xf32>
    %cst_137 = arith.constant dense<0.000000e+00> : vector<2x256xf32>
    %414 = tpu.matmul %364, %413, %cst_137 {dimension_numbers = #tpu.dot_dimension_numbers<[1], [0], [0], [1], [0, 0, 1, 1], [], []>, precision = #tpu.contract_precision<fp32>} : vector<2x64xf32>, vector<64x256xf32>, vector<2x256xf32> -> vector<2x256xf32>
    %415 = arith.addf %412, %414 : vector<2x256xf32>
    %416 = vector.extract_strided_slice %415 {offsets = [0, 0], sizes = [2, 192], strides = [1, 1]} : vector<2x256xf32> to vector<2x192xf32>
    %417 = arith.negf %416 : vector<2x192xf32>
    %418 = math.exp %417 : vector<2x192xf32>
    %cst_138 = arith.constant 1.000000e+00 : f32
    %419 = vector.broadcast %cst_138 : f32 to vector<2x192xf32>
    %420 = arith.addf %419, %418 : vector<2x192xf32>
    %421 = arith.divf %419, %420 : vector<2x192xf32>
    %422 = vector.extract_strided_slice %421 {offsets = [0, 0], sizes = [2, 64], strides = [1, 1]} : vector<2x192xf32> to vector<2x64xf32>
    %423 = vector.extract_strided_slice %421 {offsets = [0, 64], sizes = [2, 64], strides = [1, 1]} : vector<2x192xf32> to vector<2x64xf32>
    %424 = vector.extract_strided_slice %421 {offsets = [0, 128], sizes = [2, 64], strides = [1, 1]} : vector<2x192xf32> to vector<2x64xf32>
    %425 = vector.extract_strided_slice %415 {offsets = [0, 192], sizes = [2, 64], strides = [1, 1]} : vector<2x256xf32> to vector<2x64xf32>
    %426 = math.tanh %425 : vector<2x64xf32>
    %427 = arith.mulf %423, %362 : vector<2x64xf32>
    %428 = arith.mulf %422, %426 : vector<2x64xf32>
    %429 = arith.addf %427, %428 : vector<2x64xf32>
    %430 = math.tanh %429 : vector<2x64xf32>
    %431 = arith.mulf %424, %430 : vector<2x64xf32>
    %c0_139 = arith.constant 0 : index
    %c0_140 = arith.constant 0 : index
    %432 = vector.load %arg6[%c0_139, %c0_140] : memref<64x256xf32, #tpu.memory_space<vmem>>, vector<64x256xf32>
    %cst_141 = arith.constant dense<0.000000e+00> : vector<2x256xf32>
    %433 = tpu.matmul %431, %432, %cst_141 {dimension_numbers = #tpu.dot_dimension_numbers<[1], [0], [0], [1], [0, 0, 1, 1], [], []>, precision = #tpu.contract_precision<fp32>} : vector<2x64xf32>, vector<64x256xf32>, vector<2x256xf32> -> vector<2x256xf32>
    %c0_142 = arith.constant 0 : index
    %c0_143 = arith.constant 0 : index
    %434 = vector.load %arg7[%c0_142, %c0_143] : memref<64x256xf32, #tpu.memory_space<vmem>>, vector<64x256xf32>
    %cst_144 = arith.constant dense<0.000000e+00> : vector<2x256xf32>
    %435 = tpu.matmul %387, %434, %cst_144 {dimension_numbers = #tpu.dot_dimension_numbers<[1], [0], [0], [1], [0, 0, 1, 1], [], []>, precision = #tpu.contract_precision<fp32>} : vector<2x64xf32>, vector<64x256xf32>, vector<2x256xf32> -> vector<2x256xf32>
    %436 = arith.addf %433, %435 : vector<2x256xf32>
    %437 = vector.broadcast %1 : vector<1x256xf32> to vector<2x256xf32>
    %438 = arith.addf %436, %437 : vector<2x256xf32>
    %439 = vector.extract_strided_slice %438 {offsets = [0, 0], sizes = [2, 192], strides = [1, 1]} : vector<2x256xf32> to vector<2x192xf32>
    %440 = arith.negf %439 : vector<2x192xf32>
    %441 = math.exp %440 : vector<2x192xf32>
    %cst_145 = arith.constant 1.000000e+00 : f32
    %442 = vector.broadcast %cst_145 : f32 to vector<2x192xf32>
    %443 = arith.addf %442, %441 : vector<2x192xf32>
    %444 = arith.divf %442, %443 : vector<2x192xf32>
    %445 = vector.extract_strided_slice %444 {offsets = [0, 0], sizes = [2, 64], strides = [1, 1]} : vector<2x192xf32> to vector<2x64xf32>
    %446 = vector.extract_strided_slice %444 {offsets = [0, 64], sizes = [2, 64], strides = [1, 1]} : vector<2x192xf32> to vector<2x64xf32>
    %447 = vector.extract_strided_slice %444 {offsets = [0, 128], sizes = [2, 64], strides = [1, 1]} : vector<2x192xf32> to vector<2x64xf32>
    %448 = vector.extract_strided_slice %438 {offsets = [0, 192], sizes = [2, 64], strides = [1, 1]} : vector<2x256xf32> to vector<2x64xf32>
    %449 = math.tanh %448 : vector<2x64xf32>
    %450 = arith.mulf %446, %385 : vector<2x64xf32>
    %451 = arith.mulf %445, %449 : vector<2x64xf32>
    %452 = arith.addf %450, %451 : vector<2x64xf32>
    %453 = math.tanh %452 : vector<2x64xf32>
    %454 = arith.mulf %447, %453 : vector<2x64xf32>
    %c0_146 = arith.constant 0 : index
    %c0_147 = arith.constant 0 : index
    %455 = vector.load %arg10[%c0_146, %c0_147] : memref<64x64xf32, #tpu.memory_space<vmem>>, vector<64x64xf32>
    %cst_148 = arith.constant dense<0.000000e+00> : vector<2x64xf32>
    %456 = tpu.matmul %454, %455, %cst_148 {dimension_numbers = #tpu.dot_dimension_numbers<[1], [0], [0], [1], [0, 0, 1, 1], [], []>, precision = #tpu.contract_precision<fp32>} : vector<2x64xf32>, vector<64x64xf32>, vector<2x64xf32> -> vector<2x64xf32>
    %457 = vector.shape_cast %454 : vector<2x64xf32> to vector<2x1x64xf32>
    %458 = vector.broadcast %457 : vector<2x1x64xf32> to vector<2x8x64xf32>
    %459 = arith.mulf %458, %0 : vector<2x8x64xf32>
    %cst_149 = arith.constant dense<0.000000e+00> : vector<2x8xf32>
    %460 = vector.multi_reduction <add>, %459, %cst_149 [2] : vector<2x8x64xf32> to vector<2x8xf32>
    %cst_150 = arith.constant dense<0xFF800000> : vector<2xf32>
    %461 = vector.multi_reduction <maximumf>, %460, %cst_150 [1] : vector<2x8xf32> to vector<2xf32>
    %462 = vector.shape_cast %461 : vector<2xf32> to vector<2x1xf32>
    %463 = vector.broadcast %462 : vector<2x1xf32> to vector<2x8xf32>
    %464 = arith.subf %460, %463 : vector<2x8xf32>
    %465 = math.exp %464 : vector<2x8xf32>
    %cst_151 = arith.constant dense<0.000000e+00> : vector<2xf32>
    %466 = vector.multi_reduction <add>, %465, %cst_151 [1] : vector<2x8xf32> to vector<2xf32>
    %467 = vector.shape_cast %466 : vector<2xf32> to vector<2x1xf32>
    %468 = vector.broadcast %467 : vector<2x1xf32> to vector<2x8xf32>
    %469 = arith.divf %465, %468 : vector<2x8xf32>
    %470 = vector.shape_cast %469 : vector<2x8xf32> to vector<2x8x1xf32>
    %471 = vector.broadcast %470 : vector<2x8x1xf32> to vector<2x8x64xf32>
    %472 = arith.mulf %471, %6 : vector<2x8x64xf32>
    %cst_152 = arith.constant dense<0.000000e+00> : vector<2x64xf32>
    %473 = vector.multi_reduction <add>, %472, %cst_152 [1] : vector<2x8x64xf32> to vector<2x64xf32>
    %474 = arith.addf %473, %456 : vector<2x64xf32>
    %475 = vector.broadcast %2 : vector<1x64xf32> to vector<2x64xf32>
    %476 = arith.addf %474, %475 : vector<2x64xf32>
    %477 = math.tanh %476 : vector<2x64xf32>
    %c7 = arith.constant 7 : index
    %c0_153 = arith.constant 0 : index
    %c0_154 = arith.constant 0 : index
    %478 = vector.load %arg1[%c7, %c0_153, %c0_154] : memref<8x2x256xf32, #tpu.memory_space<vmem>>, vector<1x2x256xf32>
    %479 = vector.shape_cast %478 : vector<1x2x256xf32> to vector<2x256xf32>
    %c0_155 = arith.constant 0 : index
    %c0_156 = arith.constant 0 : index
    %480 = vector.load %arg5[%c0_155, %c0_156] : memref<64x256xf32, #tpu.memory_space<vmem>>, vector<64x256xf32>
    %cst_157 = arith.constant dense<0.000000e+00> : vector<2x256xf32>
    %481 = tpu.matmul %431, %480, %cst_157 {dimension_numbers = #tpu.dot_dimension_numbers<[1], [0], [0], [1], [0, 0, 1, 1], [], []>, precision = #tpu.contract_precision<fp32>} : vector<2x64xf32>, vector<64x256xf32>, vector<2x256xf32> -> vector<2x256xf32>
    %482 = arith.addf %479, %481 : vector<2x256xf32>
    %483 = vector.extract_strided_slice %482 {offsets = [0, 0], sizes = [2, 192], strides = [1, 1]} : vector<2x256xf32> to vector<2x192xf32>
    %484 = arith.negf %483 : vector<2x192xf32>
    %485 = math.exp %484 : vector<2x192xf32>
    %cst_158 = arith.constant 1.000000e+00 : f32
    %486 = vector.broadcast %cst_158 : f32 to vector<2x192xf32>
    %487 = arith.addf %486, %485 : vector<2x192xf32>
    %488 = arith.divf %486, %487 : vector<2x192xf32>
    %489 = vector.extract_strided_slice %488 {offsets = [0, 0], sizes = [2, 64], strides = [1, 1]} : vector<2x192xf32> to vector<2x64xf32>
    %490 = vector.extract_strided_slice %488 {offsets = [0, 64], sizes = [2, 64], strides = [1, 1]} : vector<2x192xf32> to vector<2x64xf32>
    %491 = vector.extract_strided_slice %488 {offsets = [0, 128], sizes = [2, 64], strides = [1, 1]} : vector<2x192xf32> to vector<2x64xf32>
    %492 = vector.extract_strided_slice %482 {offsets = [0, 192], sizes = [2, 64], strides = [1, 1]} : vector<2x256xf32> to vector<2x64xf32>
    %493 = math.tanh %492 : vector<2x64xf32>
    %494 = arith.mulf %490, %429 : vector<2x64xf32>
    %495 = arith.mulf %489, %493 : vector<2x64xf32>
    %496 = arith.addf %494, %495 : vector<2x64xf32>
    %497 = math.tanh %496 : vector<2x64xf32>
    %498 = arith.mulf %491, %497 : vector<2x64xf32>
    %c0_159 = arith.constant 0 : index
    %c0_160 = arith.constant 0 : index
    %499 = vector.load %arg6[%c0_159, %c0_160] : memref<64x256xf32, #tpu.memory_space<vmem>>, vector<64x256xf32>
    %cst_161 = arith.constant dense<0.000000e+00> : vector<2x256xf32>
    %500 = tpu.matmul %498, %499, %cst_161 {dimension_numbers = #tpu.dot_dimension_numbers<[1], [0], [0], [1], [0, 0, 1, 1], [], []>, precision = #tpu.contract_precision<fp32>} : vector<2x64xf32>, vector<64x256xf32>, vector<2x256xf32> -> vector<2x256xf32>
    %c0_162 = arith.constant 0 : index
    %c0_163 = arith.constant 0 : index
    %501 = vector.load %arg7[%c0_162, %c0_163] : memref<64x256xf32, #tpu.memory_space<vmem>>, vector<64x256xf32>
    %cst_164 = arith.constant dense<0.000000e+00> : vector<2x256xf32>
    %502 = tpu.matmul %454, %501, %cst_164 {dimension_numbers = #tpu.dot_dimension_numbers<[1], [0], [0], [1], [0, 0, 1, 1], [], []>, precision = #tpu.contract_precision<fp32>} : vector<2x64xf32>, vector<64x256xf32>, vector<2x256xf32> -> vector<2x256xf32>
    %503 = arith.addf %500, %502 : vector<2x256xf32>
    %504 = vector.broadcast %1 : vector<1x256xf32> to vector<2x256xf32>
    %505 = arith.addf %503, %504 : vector<2x256xf32>
    %506 = vector.extract_strided_slice %505 {offsets = [0, 0], sizes = [2, 192], strides = [1, 1]} : vector<2x256xf32> to vector<2x192xf32>
    %507 = arith.negf %506 : vector<2x192xf32>
    %508 = math.exp %507 : vector<2x192xf32>
    %cst_165 = arith.constant 1.000000e+00 : f32
    %509 = vector.broadcast %cst_165 : f32 to vector<2x192xf32>
    %510 = arith.addf %509, %508 : vector<2x192xf32>
    %511 = arith.divf %509, %510 : vector<2x192xf32>
    %512 = vector.extract_strided_slice %511 {offsets = [0, 0], sizes = [2, 64], strides = [1, 1]} : vector<2x192xf32> to vector<2x64xf32>
    %513 = vector.extract_strided_slice %511 {offsets = [0, 64], sizes = [2, 64], strides = [1, 1]} : vector<2x192xf32> to vector<2x64xf32>
    %514 = vector.extract_strided_slice %511 {offsets = [0, 128], sizes = [2, 64], strides = [1, 1]} : vector<2x192xf32> to vector<2x64xf32>
    %515 = vector.extract_strided_slice %505 {offsets = [0, 192], sizes = [2, 64], strides = [1, 1]} : vector<2x256xf32> to vector<2x64xf32>
    %516 = math.tanh %515 : vector<2x64xf32>
    %517 = arith.mulf %513, %452 : vector<2x64xf32>
    %518 = arith.mulf %512, %516 : vector<2x64xf32>
    %519 = arith.addf %517, %518 : vector<2x64xf32>
    %520 = math.tanh %519 : vector<2x64xf32>
    %521 = arith.mulf %514, %520 : vector<2x64xf32>
    %c0_166 = arith.constant 0 : index
    %c0_167 = arith.constant 0 : index
    %522 = vector.load %arg10[%c0_166, %c0_167] : memref<64x64xf32, #tpu.memory_space<vmem>>, vector<64x64xf32>
    %cst_168 = arith.constant dense<0.000000e+00> : vector<2x64xf32>
    %523 = tpu.matmul %521, %522, %cst_168 {dimension_numbers = #tpu.dot_dimension_numbers<[1], [0], [0], [1], [0, 0, 1, 1], [], []>, precision = #tpu.contract_precision<fp32>} : vector<2x64xf32>, vector<64x64xf32>, vector<2x64xf32> -> vector<2x64xf32>
    %524 = vector.shape_cast %521 : vector<2x64xf32> to vector<2x1x64xf32>
    %525 = vector.broadcast %524 : vector<2x1x64xf32> to vector<2x8x64xf32>
    %526 = arith.mulf %525, %0 : vector<2x8x64xf32>
    %cst_169 = arith.constant dense<0.000000e+00> : vector<2x8xf32>
    %527 = vector.multi_reduction <add>, %526, %cst_169 [2] : vector<2x8x64xf32> to vector<2x8xf32>
    %cst_170 = arith.constant dense<0xFF800000> : vector<2xf32>
    %528 = vector.multi_reduction <maximumf>, %527, %cst_170 [1] : vector<2x8xf32> to vector<2xf32>
    %529 = vector.shape_cast %528 : vector<2xf32> to vector<2x1xf32>
    %530 = vector.broadcast %529 : vector<2x1xf32> to vector<2x8xf32>
    %531 = arith.subf %527, %530 : vector<2x8xf32>
    %532 = math.exp %531 : vector<2x8xf32>
    %cst_171 = arith.constant dense<0.000000e+00> : vector<2xf32>
    %533 = vector.multi_reduction <add>, %532, %cst_171 [1] : vector<2x8xf32> to vector<2xf32>
    %534 = vector.shape_cast %533 : vector<2xf32> to vector<2x1xf32>
    %535 = vector.broadcast %534 : vector<2x1xf32> to vector<2x8xf32>
    %536 = arith.divf %532, %535 : vector<2x8xf32>
    %537 = vector.shape_cast %536 : vector<2x8xf32> to vector<2x8x1xf32>
    %538 = vector.broadcast %537 : vector<2x8x1xf32> to vector<2x8x64xf32>
    %539 = arith.mulf %538, %6 : vector<2x8x64xf32>
    %cst_172 = arith.constant dense<0.000000e+00> : vector<2x64xf32>
    %540 = vector.multi_reduction <add>, %539, %cst_172 [1] : vector<2x8x64xf32> to vector<2x64xf32>
    %541 = arith.addf %540, %523 : vector<2x64xf32>
    %542 = vector.broadcast %2 : vector<1x64xf32> to vector<2x64xf32>
    %543 = arith.addf %541, %542 : vector<2x64xf32>
    %544 = math.tanh %543 : vector<2x64xf32>
    %545 = tpu.concatenate %75, %142, %209, %276, %343, %410, %477, %544 in 1 : vector<2x64xf32>, vector<2x64xf32>, vector<2x64xf32>, vector<2x64xf32>, vector<2x64xf32>, vector<2x64xf32>, vector<2x64xf32>, vector<2x64xf32> -> vector<2x512xf32>
    %c0_173 = arith.constant 0 : index
    %c0_174 = arith.constant 0 : index
    %546 = vector.load %arg12[%c0_173, %c0_174] : memref<2x512xf32, #tpu.memory_space<vmem>>, vector<2x512xf32>
    tpu.vector_store %arg12[%c0_173, %c0_174], %545 {strides = array<i32>} : memref<2x512xf32, #tpu.memory_space<vmem>>, vector<2x512xf32>,
    %547 = tpu.concatenate %544, %519 in 1 : vector<2x64xf32>, vector<2x64xf32> -> vector<2x128xf32>
    %c0_175 = arith.constant 0 : index
    %c0_176 = arith.constant 0 : index
    %548 = vector.load %arg13[%c0_175, %c0_176] : memref<2x128xf32, #tpu.memory_space<vmem>>, vector<2x128xf32>
    tpu.vector_store %arg13[%c0_175, %c0_176], %547 {strides = array<i32>} : memref<2x128xf32, #tpu.memory_space<vmem>>, vector<2x128xf32>,
    return
  }
  func.func @transform_0(%arg0: i32) -> (i32, i32, i32) {
    %c0_i32 = arith.constant 0 : i32
    %c0_i32_0 = arith.constant 0 : i32
    %c0_i32_1 = arith.constant 0 : i32
    %c0_i32_2 = arith.constant 0 : i32
    return %c0_i32, %c0_i32_0, %c0_i32_1 : i32, i32, i32
  }
  func.func @transform_1(%arg0: i32) -> (i32, i32, i32) {
    %c0_i32 = arith.constant 0 : i32
    %c0_i32_0 = arith.constant 0 : i32
    %c0_i32_1 = arith.constant 0 : i32
    %c0_i32_2 = arith.constant 0 : i32
    return %c0_i32, %c0_i32_0, %c0_i32_1 : i32, i32, i32
  }
  func.func @transform_2(%arg0: i32) -> (i32, i32) {
    %c0_i32 = arith.constant 0 : i32
    %c0_i32_0 = arith.constant 0 : i32
    %c0_i32_1 = arith.constant 0 : i32
    return %c0_i32, %c0_i32_0 : i32, i32
  }
  func.func @transform_3(%arg0: i32) -> (i32, i32) {
    %c0_i32 = arith.constant 0 : i32
    %c0_i32_0 = arith.constant 0 : i32
    %c0_i32_1 = arith.constant 0 : i32
    return %c0_i32, %c0_i32_0 : i32, i32
  }
  func.func @transform_4(%arg0: i32) -> (i32, i32) {
    %c0_i32 = arith.constant 0 : i32
    %c0_i32_0 = arith.constant 0 : i32
    %c0_i32_1 = arith.constant 0 : i32
    return %c0_i32, %c0_i32_0 : i32, i32
  }
  func.func @transform_5(%arg0: i32) -> (i32, i32) {
    %c0_i32 = arith.constant 0 : i32
    %c0_i32_0 = arith.constant 0 : i32
    %c0_i32_1 = arith.constant 0 : i32
    return %c0_i32, %c0_i32_0 : i32, i32
  }
  func.func @transform_6(%arg0: i32) -> (i32, i32) {
    %c0_i32 = arith.constant 0 : i32
    %c0_i32_0 = arith.constant 0 : i32
    %c0_i32_1 = arith.constant 0 : i32
    return %c0_i32, %c0_i32_0 : i32, i32
  }
  func.func @transform_7(%arg0: i32) -> (i32, i32) {
    %c0_i32 = arith.constant 0 : i32
    %c0_i32_0 = arith.constant 0 : i32
    %c0_i32_1 = arith.constant 0 : i32
    return %c0_i32, %c0_i32_0 : i32, i32
  }
  func.func @transform_8(%arg0: i32) -> (i32, i32) {
    %c0_i32 = arith.constant 0 : i32
    %c0_i32_0 = arith.constant 0 : i32
    %c0_i32_1 = arith.constant 0 : i32
    return %c0_i32, %c0_i32_0 : i32, i32
  }
  func.func @transform_9(%arg0: i32) -> (i32, i32) {
    %c0_i32 = arith.constant 0 : i32
    %c0_i32_0 = arith.constant 0 : i32
    %c0_i32_1 = arith.constant 0 : i32
    return %c0_i32, %c0_i32_0 : i32, i32
  }
  func.func @transform_10(%arg0: i32) -> (i32, i32) {
    %c0_i32 = arith.constant 0 : i32
    %c0_i32_0 = arith.constant 0 : i32
    %c0_i32_1 = arith.constant 0 : i32
    return %c0_i32, %c0_i32_0 : i32, i32
  }
  func.func @transform_11(%arg0: i32) -> (i32, i32) {
    %c0_i32 = arith.constant 0 : i32
    %c0_i32_0 = arith.constant 0 : i32
    %c0_i32_1 = arith.constant 0 : i32
    return %c0_i32, %c0_i32_0 : i32, i32
  }
  func.func @transform_12(%arg0: i32) -> (i32, i32) {
    %c0_i32 = arith.constant 0 : i32
    %c0_i32_0 = arith.constant 0 : i32
    %c0_i32_1 = arith.constant 0 : i32
    return %c0_i32, %c0_i32_0 : i32, i32
  }
}

</mosaic_0001>

<bundles_post_ra>
// kernel: modal_attention_bilstm_decoder.1
= control target key start
LH: loop header
LB: loop body
LE: loop exit
PB: predicated region body
PF: predicated region fallthrough
CT: control target
= control target key end

     0   :  { %18 = vsyncpa [#allocation3], 0  ;;  %s31399_s0 = inlined_call_operand.vmem [shape: f32[8,2,256], index: 0, kind: input, shape index: {}]   ;;  %s31400_s1 = inlined_call_operand.vmem [shape: f32[2,8,64], index: 1, kind: input, shape index: {}]   ;;  %s31401_s2 = inlined_call_operand.vmem [shape: f32[2,64], index: 2, kind: input, shape index: {}]   ;;  %s31402_s3 = inlined_call_operand.vmem [shape: f32[2,64], index: 3, kind: input, shape index: {}]   ;;  %s31403_s4 = inlined_call_operand.vmem [shape: f32[64,256], index: 4, kind: input, shape index: {}]   ;;  %s31404_s5 = inlined_call_operand.hbm [shape: f32[64,256], index: 5, kind: input, shape index: {}]   ;;  %s31405_s6 = inlined_call_operand.hbm [shape: f32[64,256], index: 6, kind: input, shape index: {}]   ;;  %s31406_s7 = inlined_call_operand.vmem [shape: f32[1,256], index: 7, kind: input, shape index: {}]   ;;  %s31407_s8 = inlined_call_operand.hbm [shape: f32[64,64], index: 8, kind: input, shape index: {}]   ;;  %s31408_s9 = inlined_call_operand.hbm [shape: f32[64,64], index: 9, kind: input, shape index: {}]   ;;  %s31409_s10 = inlined_call_operand.vmem [shape: f32[1,64], index: 10, kind: input, shape index: {}]   ;;  %s31410_s11 = inlined_call_operand.vmem [shape: f32[2,512], index: 11, kind: output, shape index: {0}]   ;;  %s31411_s12 = inlined_call_operand.vmem [shape: f32[2,128], index: 12, kind: output, shape index: {1}]  }
   0x1   :  { %19 = vsyncpa [#allocation5], 0 }
   0x2   :  { %20 = vsyncpa [#allocation8], 0  ;;  %s27736_s21 = smov [#allocation4]   ;;  %s27737_s23 = smov [#allocation2]  }
   0x3   :  { %s48_s22 = sshll.u32 %s27736_s21, 4  ;;  %s36_s24 = sshll.u32 %s27737_s23, 4  ;;  %s49_s22 = int_to_ptr.vmem [resolvable:$true] %s48_s22  ;;  %s27816_s24 = int_to_ptr.vmem [resolvable:$true] %s36_s24 }
   0x4   :  { %s27642_s27 = scalar_lea.hbm %s31405_s6, 2048 }
   0x5   :  { %p27643_p0 = scmp.ne.s32.totalorder %s31405_s6, %s27642_s27  ;;  %p27646_p1 = scmp.lt.u32.totalorder %s27642_s27, %s31405_s6 }
   0x7   :  { %p27648_p2 = pnand %p27646_p1, %p27643_p0 }
   0x9   :  { %27651 = shalt.err (!%p27648_p2)
}
   0xa   :  { %s27652_s14 = scalar_lea.vmem %s49_s22, 2048  ;;  %p27657_p4 = scmp.lt.s32.totalorder %s49_s22, %s49_s22 }
   0xb   :  { %p27653_p3 = scmp.ne.s32.totalorder %s49_s22, %s27652_s14  ;;  %p27658_p5 = scmp.lt.s32.totalorder %s27652_s14, %s27652_s14 }
   0xd   :  { %p27659_p6 = por %p27658_p5, %p27657_p4 }
   0xf   :  { %p27660_p7 = pnand %p27659_p6, %p27653_p3 }
  0x11   :  { %27663 = shalt.err (!%p27660_p7)
}
  0x12   :  { %s27738_s15 = smov 256   ;;  %s27739_s16 = smov 16  }
  0x13   :  { %54 = dma.hbm_to_vmem [thread:$0]  %s31405_s6, 2048, %s49_s22, [#allocation5], %s27738_s15, %s27738_s15, %s27739_s16  }
  0x14   :  { %s27664_s21 = scalar_lea.hbm %s31404_s5, 2048 }
  0x15   :  { %p27665_p8 = scmp.ne.s32.totalorder %s31404_s5, %s27664_s21  ;;  %p27668_p9 = scmp.lt.u32.totalorder %s27664_s21, %s31404_s5 }
  0x17   :  { %p27670_p10 = pnand %p27668_p9, %p27665_p8 }
  0x19   :  { %27673 = shalt.err (!%p27670_p10)
}
  0x1a   :  { %s27674_s28 = scalar_lea.vmem %s27816_s24, 2048  ;;  %p27679_p12 = scmp.lt.s32.totalorder %s27816_s24, %s27816_s24 }
  0x1b   :  { %p27675_p11 = scmp.ne.s32.totalorder %s27816_s24, %s27674_s28  ;;  %p27680_p13 = scmp.lt.s32.totalorder %s27674_s28, %s27674_s28 }
  0x1d   :  { %p27681_p0 = por %p27680_p13, %p27679_p12 }
  0x1f   :  { %p27682_p1 = pnand %p27681_p0, %p27675_p11 }
  0x21   :  { %27685 = shalt.err (!%p27682_p1)
}
  0x22   :  { %42 = dma.hbm_to_vmem [thread:$0]  %s31404_s5, 2048, %s27816_s24, [#allocation3], %s27738_s15, %s27738_s15, %s27739_s16  }
  0x23   :  { %s27740_s29 = smov [#allocation6]   ;;  %s27686_s17 = scalar_lea.hbm %s31407_s8, 1024 }
  0x24   :  { %s62_s30 = sshll.u32 %s27740_s29, 4  ;;  %p27687_p2 = scmp.ne.s32.totalorder %s31407_s8, %s27686_s17  ;;  %s63_s30 = int_to_ptr.vmem [resolvable:$true] %s62_s30 }
  0x25   :  { %p27690_p3 = scmp.lt.u32.totalorder %s27686_s17, %s31407_s8 }
  0x27   :  { %p27692_p4 = pnand %p27690_p3, %p27687_p2 }
  0x29   :  { %27695 = shalt.err (!%p27692_p4)
}
  0x2a   :  { %s27696_s23 = scalar_lea.vmem %s63_s30, 1024  ;;  %p27701_p6 = scmp.lt.s32.totalorder %s63_s30, %s63_s30 }
  0x2b   :  { %p27697_p5 = scmp.ne.s32.totalorder %s63_s30, %s27696_s23  ;;  %p27702_p7 = scmp.lt.s32.totalorder %s27696_s23, %s27696_s23 }
  0x2d   :  { %p27703_p8 = por %p27702_p7, %p27701_p6 }
  0x2f   :  { %p27704_p9 = pnand %p27703_p8, %p27697_p5 }
  0x31   :  { %27707 = shalt.err (!%p27704_p9)
}
  0x32   :  { %s27741_s5 = smov 128   ;;  %s27742_s24 = smov 8  }
  0x33   :  { %68 = dma.hbm_to_vmem [thread:$0]  %s31407_s8, 1024, %s63_s30, [#allocation5], %s27741_s5, %s27741_s5, %s27742_s24  }
  0x34   :  { %s27743_s25 = smov [#allocation7]   ;;  %s27708_s6 = scalar_lea.hbm %s31408_s9, 1024 }
  0x35   :  { %s74_s26 = sshll.u32 %s27743_s25, 4  ;;  %p27709_p10 = scmp.ne.s32.totalorder %s31408_s9, %s27708_s6  ;;  %s75_s26 = int_to_ptr.vmem [resolvable:$true] %s74_s26 }
  0x36   :  { %p27712_p11 = scmp.lt.u32.totalorder %s27708_s6, %s31408_s9 }
  0x38   :  { %p27714_p12 = pnand %p27712_p11, %p27709_p10 }
  0x3a   :  { %27717 = shalt.err (!%p27714_p12)
}
  0x3b   :  { %s27718_s17 = scalar_lea.vmem %s75_s26, 1024  ;;  %p27723_p0 = scmp.lt.s32.totalorder %s75_s26, %s75_s26 }
  0x3c   :  { %p27719_p13 = scmp.ne.s32.totalorder %s75_s26, %s27718_s17  ;;  %p27724_p1 = scmp.lt.s32.totalorder %s27718_s17, %s27718_s17 }
  0x3e   :  { %p27725_p2 = por %p27724_p1, %p27723_p0 }
  0x40   :  { %p27726_p3 = pnand %p27725_p2, %p27719_p13 }
  0x42   :  { %27729 = shalt.err (!%p27726_p3)
}
  0x43   :  { %80 = dma.hbm_to_vmem [thread:$0]  %s31408_s9, 1024, %s75_s26, [#allocation8], %s27741_s5, %s27741_s5, %s27742_s24  }
  0x44   :  { %27730 = dma.done.wait [#allocation3], 2048  }
  0x45   :  { %27731 = vsyncadd [#allocation3], 4294965248 }
  0x46   :  { %27732 = dma.done.wait [#allocation5], 3072  }
  0x47   :  { %27733 = vsyncadd [#allocation5], 4294964224 }
  0x48   :  { %27734 = dma.done.wait [#allocation8], 1024  }
  0x49   :  { %27735 = vsyncadd [#allocation8], 4294966272  ;;  %v99_v0 = vld [vmem:[#allocation6] sm:$0xff]  ;;  %v100_v1 = vld [vmem:[#allocation6 + $0x8] sm:$0xff]  ;;  %vm107_vm0 = vcmask 523264   ;;  %s27746_s14 = smov 64  }
  0x4a   :  { %v101_v2 = vld [vmem:[#allocation6 + $0x10] sm:$0xff]  ;;  %v115_v3 = vand.u32 4294901760, %v99_v0  ;;  %v118_v4 = vand.u32 4294901760, %v100_v1  ;;  %v102_v5 = vld [vmem:[#allocation6 + $0x18] sm:$0xff]  ;;  %v103_v7 = vld [vmem:[#allocation6 + $0x20] sm:$0xff]  ;;  %vm27748_vm1 = vmmov 0  }
  0x4b   :  { %v121_v6 = vand.u32 4294901760, %v101_v2  ;;  %v104_v8 = vld [vmem:[#allocation6 + $0x28] sm:$0xff]  ;;  %v124_v9 = vand.u32 4294901760, %v102_v5  ;;  %v127_v10 = vand.u32 4294901760, %v103_v7  ;;  %v105_v12 = vld [vmem:[#allocation6 + $0x30] sm:$0xff]  ;;  %v106_v13 = vld [vmem:[#allocation6 + $0x38] sm:$0xff] }
  0x4c   :  { %v130_v11 = vand.u32 4294901760, %v104_v8  ;;  %v95_v14 = vld [vmem:[%s31400_s1] sm:$0xff]  ;;  %v27874_v15 = vpack.c.bf16 %v118_v4, %v115_v3  ;;  %v133_v16 = vand.u32 4294901760, %v105_v12  ;;  %v96_v18 = vld [vmem:[%s31400_s1 + $0x8] sm:$0xff]  ;;  %v136_v20 = vand.u32 4294901760, %v106_v13 }
  0x4d   :  { %v109_v17 = vsel %vm107_vm0, %v95_v14, 0  ;;  %v27880_v19 = vpack.c.bf16 %v124_v9, %v121_v6  ;;  %v27884_v22 = vsub.f32 %v99_v0, %v115_v3  ;;  %v27890_v24 = vsub.f32 %v100_v1, %v118_v4  ;;  %v700_v14 = vld [vmem:[%s31403_s4 + $0x18] sm:$0xff] }
  0x4e   :  { %v27882_v21 = vand.u32 4294901760, %v109_v17  ;;  %24045 = vmatprep.subr.bf16.mxu1 %v27874_v15  ;;  %24093 = vmatprep.subr.bf16.mxu0 %v27874_v15  ;;  %v27888_v23 = vpack.c.bf16 %v130_v11, %v127_v10  ;;  %v112_v25 = vsel %vm107_vm0, %v96_v18, 0  ;;  %v27893_v26 = vsub.f32 %v101_v2, %v121_v6  ;;  %v699_v18 = vld [vmem:[%s31403_s4 + $0x10] sm:$0xff] }
  0x4f   :  { %24047 = vmatpush3.bf16.msra.mxu1 %v27874_v15  ;;  %24095 = vmatpush3.bf16.msra.mxu0 %v27874_v15  ;;  %v210_v28 = vand.u32 4294901760, %v27884_v22  ;;  %v27901_v29 = vand.u32 4294901760, %v112_v25  ;;  %v27903_v30 = vsub.f32 %v102_v5, %v124_v9  ;;  %v217_v31 = vand.u32 4294901760, %v27890_v24 }
  0x50   :  { %v27898_v27 = vsub.f32 %v109_v17, %v27882_v21  ;;  %24049 = vmatprep.subr.bf16.mxu1 %v27880_v19  ;;  %24097 = vmatprep.subr.bf16.mxu0 %v27880_v19  ;;  %v224_v32 = vand.u32 4294901760, %v27893_v26  ;;  %v27909_v33 = vsub.f32 %v103_v7, %v127_v10  ;;  %v27911_v34 = vsub.f32 %v104_v8, %v130_v11  ;;  %v697_v17 = vld [vmem:[%s31403_s4] sm:$0xff] }
  0x51   :  { %v211_v36 = vsub.f32 %v27884_v22, %v210_v28  ;;  %v27916_v37 = vsub.f32 %v112_v25, %v27901_v29  ;;  %v231_v38 = vand.u32 4294901760, %v27903_v30  ;;  %v218_v39 = vsub.f32 %v27890_v24, %v217_v31  ;;  %v701_v25 = vld [vmem:[%s31403_s4 + $0x20] sm:$0xff] }
  0x52   :  { %v189_v35 = vand.u32 4294901760, %v27898_v27  ;;  %v225_v40 = vsub.f32 %v27893_v26, %v224_v32  ;;  %v238_v44 = vand.u32 4294901760, %v27909_v33  ;;  %v27929_v45 = vpack.c.bf16 %v136_v20, %v133_v16 }
  0x53   :  { %24051 = vmatpush3.bf16.msra.mxu1 %v27880_v19  ;;  %24099 = vmatpush3.bf16.msra.mxu0 %v27880_v19  ;;  %v199_v42 = vand.u32 4294901760, %v27916_v37  ;;  %v232_v43 = vsub.f32 %v27903_v30, %v231_v38  ;;  %v212_v46 = vand.u32 4294901760, %v211_v36  ;;  %v219_v47 = vand.u32 4294901760, %v218_v39  ;;  %v708_v39 = vld [vmem:[%s31403_s4 + $0x58] sm:$0xff] }
  0x54   :  { %v190_v41 = vsub.f32 %v27898_v27, %v189_v35  ;;  %24053 = vmatprep.subr.bf16.mxu1 %v27888_v23  ;;  %24101 = vmatprep.subr.bf16.mxu0 %v27888_v23  ;;  %v245_v49 = vand.u32 4294901760, %v27911_v34  ;;  %v27933_v51 = vsub.f32 %v105_v12, %v133_v16  ;;  %v27935_v52 = vsub.f32 %v106_v13, %v136_v20  ;;  %v698_v12 = vld [vmem:[%s31403_s4 + $0x8] sm:$0xff]  ;;  %v694_v20 = vld [vmem:[%s31401_s2] sm:$0x3] }
  0x55   :  { %23091 = vmatprep.mubr.f32.mxu0 %v189_v35  ;;  %v200_v50 = vsub.f32 %v27916_v37, %v199_v42  ;;  %v24108_v53 = vpack.c.bf16 %v217_v31, %v210_v28  ;;  %v226_v54 = vand.u32 4294901760, %v225_v40  ;;  %v233_v55 = vand.u32 4294901760, %v232_v43 }
  0x56   :  { %v191_v48 = vand.u32 4294901760, %v190_v41  ;;  %v239_v56 = vsub.f32 %v27909_v33, %v238_v44  ;;  %v24060_v57 = vpack.c.bf16 %v219_v47, %v212_v46  ;;  %v246_v58 = vsub.f32 %v27911_v34, %v245_v49  ;;  %v707_v41 = vld [vmem:[%s31403_s4 + $0x50] sm:$0xff] }
  0x57   :  { %24055 = vmatpush3.bf16.msra.mxu1 %v27888_v23  ;;  %24103 = vmatpush3.bf16.msra.mxu0 %v27888_v23  ;;  %v252_v59 = vand.u32 4294901760, %v27933_v51  ;;  %v259_v60 = vand.u32 4294901760, %v27935_v52  ;;  %v201_v61 = vand.u32 4294901760, %v200_v50  ;;  %v24112_v62 = vpack.c.bf16 %v231_v38, %v224_v32  ;;  %v706_v38 = vld [vmem:[%s31403_s4 + $0x48] sm:$0xff] }
  0x58   :  { %24057 = vmatprep.subr.bf16.mxu1 %v27929_v45  ;;  %24105 = vmatprep.subr.bf16.mxu0 %v27929_v45  ;;  %v240_v63 = vand.u32 4294901760, %v239_v56  ;;  %v24064_v0 = vpack.c.bf16 %v233_v55, %v226_v54  ;;  %v247_v1 = vand.u32 4294901760, %v246_v58  ;;  %v24116_v5 = vpack.c.bf16 %v245_v49, %v238_v44 }
  0x59   :  { %23034 = vmatprep.mubr.f32.mxu1 %v191_v48  ;;  %v253_v2 = vsub.f32 %v27933_v51, %v252_v59  ;;  %v260_v3 = vsub.f32 %v27935_v52, %v259_v60  ;;  %v24120_v9 = vpack.c.bf16 %v259_v60, %v252_v59  ;;  %v24076_v10 = vpack.c.bf16 %v27890_v24, %v27884_v22  ;;  %v704_v22 = vld [vmem:[%s31403_s4 + $0x38] sm:$0xff]  ;;  %v709_v59 = vld [vmem:[%s31403_s4 + $0x60] sm:$0xff] }
  0x5a   :  { %v24068_v4 = vpack.c.bf16 %v247_v1, %v240_v63  ;;  %v24080_v11 = vpack.c.bf16 %v27903_v30, %v27893_v26  ;;  %v24084_v13 = vpack.c.bf16 %v27911_v34, %v27909_v33  ;;  %v716_v16 = vand.u32 4294901760, %v698_v12  ;;  %v703_v26 = vld [vmem:[%s31403_s4 + $0x30] sm:$0xff] }
  0x5b   :  { %24059 = vmatpush3.bf16.msra.mxu1 %v27929_v45  ;;  %24107 = vmatpush3.bf16.msra.mxu0 %v27929_v45  ;;  %v254_v6 = vand.u32 4294901760, %v253_v2  ;;  %v261_v7 = vand.u32 4294901760, %v260_v3  ;;  %v718_v28 = vand.u32 4294901760, %v697_v17  ;;  %v722_v30 = vand.u32 4294901760, %v699_v18 }
  0x5c   :  { %24061 = vmatprep.subr.bf16.mxu1 %v24060_v57  ;;  %24109 = vmatprep.subr.bf16.mxu0 %v24108_v53  ;;  %v27989_v24 = vsub.f32 %v698_v12, %v716_v16  ;;  %v714_v31 = vsel %vm107_vm0, %v694_v20, 0  ;;  %v728_v33 = vand.u32 4294901760, %v704_v22  ;;  %v726_v35 = vand.u32 4294901760, %v701_v25 }
  0x5d   :  { %v24072_v8 = vpack.c.bf16 %v261_v7, %v254_v6  ;;  %v730_v36 = vand.u32 4294901760, %v703_v26  ;;  %v28021_v44 = vand.u32 4294901760, %v714_v31  ;;  %v28023_v46 = vsub.f32 %v697_v17, %v718_v28 }
  0x5e   :  { %23035 = vmatmul.mubr.f32.vlgmr.msra.gmra.mrb[0].mxu1 %v201_v61  ;;  %23092 = vmatmul.mubr.f32.vlgmr.msra.gmra.mrb[0].mxu0 %v199_v42  ;;  %v810_v40 = vand.u32 4294901760, %v27989_v24  ;;  %v710_v42 = vld [vmem:[%s31403_s4 + $0x68] sm:$0xff]  ;;  %v28025_v47 = vpack.c.bf16 %v722_v30, %v718_v28  ;;  %v28027_v48 = vsub.f32 %v699_v18, %v722_v30  ;;  %v28031_v50 = vsub.f32 %v704_v22, %v728_v33 }
  0x5f   :  { %24063 = vmatpush3.bf16.msra.mxu1 %v24060_v57  ;;  %24111 = vmatpush3.bf16.msra.mxu0 %v24108_v53  ;;  %v736_v53 = vand.u32 4294901760, %v708_v39  ;;  %v28037_v55 = vpack.c.bf16 %v730_v36, %v726_v35  ;;  %v738_v56 = vand.u32 4294901760, %v707_v41  ;;  %v712_v57 = vld [vmem:[%s31403_s4 + $0x78] sm:$0xff]  ;;  %v740_v58 = vand.u32 4294901760, %v710_v42 }
  0x60   :  { %24065 = vmatprep.subr.bf16.mxu1 %v24064_v0  ;;  %24113 = vmatprep.subr.bf16.mxu0 %v24112_v62  ;;  %31683 = vst [vmem:[#allocation13_spill] sm:$0xff] %v28025_v47  ;;  %v811_v60 = vsub.f32 %v27989_v24, %v810_v40  ;;  %v816_v63 = vand.u32 4294901760, %v28023_v46  ;;  %v828_v1 = vand.u32 4294901760, %v28027_v48  ;;  %v846_v3 = vand.u32 4294901760, %v28031_v50 }
  0x61   :  { %23053 = vmatprep.mubr.f32.mxu1 %v27882_v21  ;;  %23110 = vmatprep.mubr.f32.mxu0 %v27882_v21  ;;  %31685 = vst [vmem:[#allocation15_spill] sm:$0xff] %v28037_v55  ;;  %v744_v6 = vand.u32 4294901760, %v712_v57  ;;  %v742_v7 = vand.u32 4294901760, %v709_v59  ;;  %v28108_v30 = vsub.f32 %v710_v42, %v740_v58  ;;  %vm3389_vm2 = vcmask 1041409  }
  0x62   :  { %v847_v18 = vsub.f32 %v28031_v50, %v846_v3  ;;  %vm3392_vm3 = vcmask 58368  }
  0x63   :  { %24067 = vmatpush3.bf16.msra.mxu1 %v24064_v0  ;;  %24115 = vmatpush3.bf16.msra.mxu0 %v24112_v62  ;;  %v28055_v62 = vsub.f32 %v714_v31, %v28021_v44  ;;  %v28058_v0 = vsub.f32 %v701_v25, %v726_v35  ;;  %v28103_v25 = vsub.f32 %v707_v41, %v738_v56 }
  0x64   :  { %24069 = vmatprep.subr.bf16.mxu1 %v24068_v4  ;;  %24117 = vmatprep.subr.bf16.mxu0 %v24116_v5  ;;  %v28110_v31 = vsub.f32 %v712_v57, %v744_v6 }
  0x67   :  { %24071 = vmatpush3.bf16.msra.mxu1 %v24068_v4  ;;  %24119 = vmatpush3.bf16.msra.mxu0 %v24116_v5  ;;  %v28065_v4 = vsub.f32 %v703_v26, %v730_v36 }
  0x68   :  { %24073 = vmatprep.subr.bf16.mxu1 %v24072_v8  ;;  %24121 = vmatprep.subr.bf16.mxu0 %v24120_v9 }
  0x69   :  { %v852_v20 = vand.u32 4294901760, %v28065_v4 }
  0x6b   :  { %24075 = vmatpush3.bf16.msra.mxu1 %v24072_v8  ;;  %24123 = vmatpush3.bf16.msra.mxu0 %v24120_v9  ;;  %v31413_v9 = vmov 0.0   ;;  %v853_v41 = vsub.f32 %v28065_v4, %v852_v20 }
  0x6c   :  { %24077 = vmatprep.subr.bf16.mxu1 %v24076_v10  ;;  %24125 = vmatprep.subr.bf16.mxu0 %v27874_v15 }
  0x6e   :  { %23054 = vmatmul.mubr.f32.vlgmr.msra.gmra.mrb[0].mxu1 %v27901_v29  ;;  %23111 = vmatmul.mubr.f32.vlgmr.msra.gmra.mrb[0].mxu0 %v27901_v29 }
  0x6f   :  { %24079 = vmatpush3.bf16.msra.mxu1 %v24076_v10  ;;  %24127 = vmatpush3.bf16.msra.mxu0 %v27874_v15  ;;  %v720_v15 = vand.u32 4294901760, %v700_v14 }
  0x70   :  { %24081 = vmatprep.subr.bf16.mxu1 %v24080_v11  ;;  %24129 = vmatprep.subr.bf16.mxu0 %v27880_v19 }
  0x71   :  { %23072 = vmatprep.mubr.f32.mxu1 %v27898_v27  ;;  %23129 = vmatprep.mubr.f32.mxu0 %v27882_v21  ;;  %v24088_v21 = vpack.c.bf16 %v27935_v52, %v27933_v51  ;;  %v27997_v27 = vsub.f32 %v700_v14, %v720_v15  ;;  %v28002_v34 = vpack.c.bf16 %v720_v15, %v716_v16  ;;  %v732_v52 = vand.u32 4294901760, %v706_v38 }
  0x72   :  { %v817_v14 = vsub.f32 %v28023_v46, %v816_v63  ;;  %v840_v16 = vand.u32 4294901760, %v28058_v0  ;;  %v829_v15 = vsub.f32 %v28027_v48, %v828_v1 }
  0x73   :  { %24083 = vmatpush3.bf16.msra.mxu1 %v24080_v11  ;;  %24131 = vmatpush3.bf16.msra.mxu0 %v27880_v19  ;;  %v702_v19 = vld [vmem:[%s31403_s4 + $0x28] sm:$0xff]  ;;  %31682 = vst [vmem:[#allocation12_spill] sm:$0xff] %v28002_v34  ;;  %v822_v43 = vand.u32 4294901760, %v27997_v27  ;;  %v28068_v5 = vpack.c.bf16 %v736_v53, %v732_v52  ;;  %v28074_v10 = vsub.f32 %v706_v38, %v732_v52  ;;  %v876_v52 = vand.u32 4294901760, %v28103_v25 }
  0x74   :  { %24085 = vmatprep.subr.bf16.mxu1 %v24084_v13  ;;  %24133 = vmatprep.subr.bf16.mxu0 %v27888_v23  ;;  %v724_v32 = vand.u32 4294901760, %v702_v19  ;;  %v28076_v11 = vsub.f32 %v708_v39, %v736_v53  ;;  %v818_v35 = vand.u32 4294901760, %v817_v14  ;;  %v841_v36 = vsub.f32 %v28058_v0, %v840_v16 }
  0x75   :  { %v823_v61 = vsub.f32 %v27997_v27, %v822_v43  ;;  %31686 = vst [vmem:[#allocation16_spill] sm:$0xff] %v28068_v5  ;;  %v858_v26 = vand.u32 4294901760, %v28074_v10  ;;  %v830_v38 = vand.u32 4294901760, %v829_v15  ;;  %v28125_v53 = vsub.f32 %v709_v59, %v742_v7 }
  0x76   :  { %v28029_v49 = vsub.f32 %v702_v19, %v724_v32  ;;  %v28034_v51 = vpack.c.bf16 %v728_v33, %v724_v32  ;;  %v870_v28 = vand.u32 4294901760, %v28076_v11 }
  0x77   :  { %24087 = vmatpush3.bf16.msra.mxu1 %v24084_v13  ;;  %24135 = vmatpush3.bf16.msra.mxu0 %v27888_v23  ;;  %v705_v23 = vld [vmem:[%s31403_s4 + $0x40] sm:$0xff]  ;;  %v824_v12 = vand.u32 4294901760, %v823_v61  ;;  %v28080_v13 = vand.u32 4294901760, %v28055_v62  ;;  %v28140_v59 = vpack.c.bf16 %v830_v38, %v818_v35 }
  0x78   :  { %24089 = vmatprep.subr.bf16.mxu1 %v24088_v21  ;;  %24137 = vmatprep.subr.bf16.mxu0 %v27929_v45  ;;  %31684 = vst [vmem:[#allocation14_spill] sm:$0xff] %v28034_v51  ;;  %v734_v54 = vand.u32 4294901760, %v705_v23  ;;  %v834_v2 = vand.u32 4294901760, %v28029_v49  ;;  %v871_v57 = vsub.f32 %v28076_v11, %v870_v28 }
  0x79   :  { %v800_v33 = vsub.f32 %v28055_v62, %v28080_v13  ;;  %31691 = vst [vmem:[#allocation21_spill] sm:$0xff] %v28140_v59 }
  0x7a   :  { %v835_v17 = vsub.f32 %v28029_v49, %v834_v2  ;;  %v28101_v22 = vsub.f32 %v705_v23, %v734_v54  ;;  %v848_v23 = vand.u32 4294901760, %v847_v18 }
  0x7b   :  { %24091 = vmatpush3.bf16.msra.mxu1 %v24088_v21  ;;  %24139 = vmatpush3.bf16.msra.mxu0 %v27929_v45  ;;  %v711_v45 = vld [vmem:[%s31403_s4 + $0x70] sm:$0xff]  ;;  %v28097_v21 = vpack.c.bf16 %v744_v6, %v740_v58  ;;  %v882_v58 = vand.u32 4294901760, %v28108_v30  ;;  %v28138_v61 = vand.u32 4294901760, %v800_v33  ;;  %v842_v6 = vand.u32 4294901760, %v841_v36 }
  0x7c   :  { %24141 = vmatprep.subr.bf16.mxu1 %v28002_v34  ;;  %v746_v8 = vand.u32 4294901760, %v711_v45  ;;  %v836_v39 = vand.u32 4294901760, %v835_v17  ;;  %v864_v42 = vand.u32 4294901760, %v28101_v22  ;;  %v872_v17 = vand.u32 4294901760, %v871_v57 }
  0x7d   :  { %31688 = vst [vmem:[#allocation18_spill] sm:$0xff] %v28097_v21  ;;  %v883_v18 = vsub.f32 %v28108_v30, %v882_v58 }
  0x7e   :  { %23073 = vmatmul.mubr.f32.vlgmr.msra.gmra.mrb[0].mxu1 %v27916_v37  ;;  %23130 = vmatmul.mubr.f32.vlgmr.msra.gmra.mrb[0].mxu0 %v27901_v29  ;;  %v28072_v29 = vpack.c.bf16 %v738_v56, %v734_v54  ;;  %v812_v37 = vand.u32 4294901760, %v811_v60  ;;  %v28099_v19 = vpack.c.bf16 %v746_v8, %v742_v7  ;;  %v28127_v54 = vsub.f32 %v711_v45, %v746_v8 }
  0x7f   :  { %24143 = vmatpush1.bf16.msra.mxu1 %v28025_v47  ;;  %796 = vmatprep.mubr.f32.mxu1 %v31413_v9  ;;  %v859_v56 = vsub.f32 %v28074_v10, %v858_v26  ;;  %v894_v60 = vand.u32 4294901760, %v28110_v31  ;;  %v28142_v45 = vpack.c.bf16 %v848_v23, %v836_v39  ;;  %v854_v7 = vand.u32 4294901760, %v853_v41 }
  0x80   :  { %24145 = vmatprep.subr.bf16.mxu1 %v28034_v51  ;;  %31687 = vst [vmem:[#allocation17_spill] sm:$0xff] %v28072_v29  ;;  %1526 = vmatprep.mubr.f32.mxu0 %v31413_v9  ;;  %31689 = vst [vmem:[#allocation19_spill] sm:$0xff] %v28099_v19  ;;  %v28112_v32 = vpack.c.bf16 %v824_v12, %v812_v37  ;;  %v865_v8 = vsub.f32 %v28101_v22, %v864_v42  ;;  %v888_v12 = vand.u32 4294901760, %v28125_v53 }
  0x81   :  { %31692 = vst [vmem:[#allocation22_spill] sm:$0xff] %v28142_v45  ;;  %v877_v37 = vsub.f32 %v28103_v25, %v876_v52  ;;  %v31412_v14 = vand.u32 4294901760, %v28127_v54  ;;  %v860_v15 = vand.u32 4294901760, %v859_v56  ;;  %v895_v33 = vsub.f32 %v28110_v31, %v894_v60 }
  0x82   :  { %31690 = vst [vmem:[#allocation20_spill] sm:$0xff] %v28112_v32  ;;  %v28161_v35 = vpack.c.bf16 %v854_v7, %v842_v6  ;;  %v866_v36 = vand.u32 4294901760, %v865_v8  ;;  %v889_v39 = vsub.f32 %v28125_v53, %v888_v12  ;;  %v884_v56 = vand.u32 4294901760, %v883_v18 }
  0x83   :  { %24147 = vmatpush1.bf16.msra.mxu1 %v28037_v55  ;;  %v878_v38 = vand.u32 4294901760, %v877_v37  ;;  %v901_v23 = vsub.f32 %v28127_v54, %v31412_v14  ;;  %v28172_v41 = vpack.c.bf16 %v872_v17, %v860_v15  ;;  %v896_v57 = vand.u32 4294901760, %v895_v33 }
  0x84   :  { %24149 = vmatprep.subr.bf16.mxu1 %v28068_v5  ;;  %31693 = vst [vmem:[#allocation23_spill] sm:$0xff] %v28161_v35  ;;  %v890_v7 = vand.u32 4294901760, %v889_v39  ;;  %v28186_v15 = vpack.c.bf16 %v27997_v27, %v27989_v24  ;;  %v28191_v17 = vpack.c.bf16 %v28027_v48, %v28023_v46  ;;  %v28196_v18 = vpack.c.bf16 %v28031_v50, %v28029_v49 }
  0x85   :  { %31694 = vst [vmem:[#allocation24_spill] sm:$0xff] %v28172_v41  ;;  %v28175_v6 = vpack.c.bf16 %v878_v38, %v866_v36  ;;  %v902_v8 = vand.u32 4294901760, %v901_v23  ;;  %v28178_v37 = vpack.c.bf16 %v896_v57, %v884_v56  ;;  %v28202_v33 = vpack.c.bf16 %v28065_v4, %v28058_v0 }
  0x86   :  { %31698 = vst [vmem:[#allocation28_spill] sm:$0xff] %v28186_v15  ;;  %31699 = vst [vmem:[#allocation29_spill] sm:$0xff] %v28191_v17  ;;  %v28208_v36 = vpack.c.bf16 %v28076_v11, %v28074_v10  ;;  %v28213_v38 = vpack.c.bf16 %v28103_v25, %v28101_v22  ;;  %v28218_v39 = vpack.c.bf16 %v28110_v31, %v28108_v30  ;;  %v31713_v46 = vand.u32 4294901760, %v28127_v54  ;;  %v696_v31 = vld [vmem:[%s31399_s0] sm:$0xf] }
  0x87   :  { %24151 = vmatpush1.bf16.msra.mxu1 %v28072_v29  ;;  %31695 = vst [vmem:[#allocation25_spill] sm:$0xff] %v28175_v6  ;;  %31696 = vst [vmem:[#allocation26_spill] sm:$0xff] %v28178_v37  ;;  %v28181_v14 = vpack.c.bf16 %v902_v8, %v890_v7  ;;  %v28223_v23 = vpack.c.bf16 %v28127_v54, %v28125_v53  ;;  %v28240_v56 = vpack.c.bf16 %v822_v43, %v810_v40  ;;  %v1369_v49 = vlaneseq }
  0x88   :  { %24153 = vmatprep.subr.bf16.mxu1 %v28097_v21  ;;  %31700 = vst [vmem:[#allocation30_spill] sm:$0xff] %v28196_v18  ;;  %31701 = vst [vmem:[#allocation31_spill] sm:$0xff] %v28202_v33  ;;  %v28247_v57 = vpack.c.bf16 %v828_v1, %v816_v63  ;;  %v28254_v7 = vpack.c.bf16 %v846_v3, %v834_v2  ;;  %v28262_v24 = vpack.c.bf16 %v852_v20, %v840_v16  ;;  %v27745_v16 = vmov 1983009808  }
  0x89   :  { %31697 = vst [vmem:[#allocation27_spill] sm:$0xff] %v28181_v14  ;;  %31702 = vst [vmem:[#allocation32_spill] sm:$0xff] %v28208_v36  ;;  %v28270_v27 = vpack.c.bf16 %v870_v28, %v858_v26  ;;  %v28277_v40 = vpack.c.bf16 %v876_v52, %v864_v42  ;;  %v28284_v43 = vpack.c.bf16 %v894_v60, %v882_v58  ;;  %v28306_v50 = vshrl.u32 %v1369_v49, 7  ;;  %v28325_v52 = vld [vmem:[%s31402_s3] sm:$0x3] }
  0x8a   :  { %31703 = vst [vmem:[#allocation33_spill] sm:$0xff] %v28213_v38  ;;  %31704 = vst [vmem:[#allocation34_spill] sm:$0xff] %v28218_v39  ;;  %v28291_v48 = vpack.c.bf16 %v31713_v46, %v888_v12  ;;  %v3380_v63 = vand.u32 127, %v1369_v49  ;;  %v1367_v20 = vunpack.c.l.s4 %v27745_v16 }
  0x8b   :  { %24155 = vmatpush1.bf16.msra.mxu1 %v28099_v19  ;;  %31705 = vst [vmem:[#allocation35_spill] sm:$0xff] %v28223_v23  ;;  %31706 = vst [vmem:[#allocation36_spill] sm:$0xff] %v28240_v56 }
  0x8c   :  { %24157 = vmatprep.subr.bf16.mxu1 %v28112_v32  ;;  %31707 = vst [vmem:[#allocation37_spill] sm:$0xff] %v28247_v57  ;;  %31708 = vst [vmem:[#allocation38_spill] sm:$0xff] %v28254_v7  ;;  %v28309_v0 = vsub.s32 %v3380_v63, %v28306_v50  ;;  %v1368_v22 = vunpack.c.0.s8 %v1367_v20 }
  0x8d   :  { %31709 = vst [vmem:[#allocation39_spill] sm:$0xff] %v28262_v24  ;;  %31710 = vst [vmem:[#allocation40_spill] sm:$0xff] %v28270_v27 }
  0x8e   :  { %802 = vmatmul.mubr.f32.vlgmr.msra.gmra.mrb[2].mxu1 %v28138_v61  ;;  %31711 = vst [vmem:[#allocation41_spill] sm:$0xff] %v28277_v40  ;;  %31712 = vst [vmem:[#allocation42_spill] sm:$0xff] %v28284_v43  ;;  %v28316_v26 = vsub.s32 %v1368_v22, %v28306_v50  ;;  %v1432_v22 = vld [vmem:[#allocation4 + $0x10] sm:$0xff] }
  0x8f   :  { %24159 = vmatpush1.bf16.msra.mxu1 %v28140_v59  ;;  %952 = vmatprep.mubr.f32.mxu1 %v31413_v9  ;;  %31714 = vst [vmem:[#allocation43_spill] sm:$0xff] %v28291_v48  ;;  %31715 = vst [vmem:[#allocation44_spill] sm:$0xff] %v28306_v50 }
  0x90   :  { %24161 = vmatprep.subr.bf16.mxu1 %v28142_v45  ;;  %31716 = vst [vmem:[#allocation45_spill] sm:$0xff] %v28309_v0  ;;  %31719 = vst [vmem:[#allocation48_spill] sm:$0xff] %v28316_v26  ;;  %v1394_v54 = vrot.slane %v28325_v52, %v28316_v26 }
  0x93   :  { %24163 = vmatpush1.bf16.msra.mxu1 %v28161_v35 }
  0x94   :  { %24165 = vmatprep.subr.bf16.mxu1 %v28172_v41 }
  0x97   :  { %24167 = vmatpush1.bf16.msra.mxu1 %v28175_v6 }
  0x98   :  { %24169 = vmatprep.subr.bf16.mxu1 %v28178_v37 }
  0x9b   :  { %24171 = vmatpush1.bf16.msra.mxu1 %v28181_v14 }
  0x9c   :  { %24173 = vmatprep.subr.bf16.mxu1 %v28186_v15 }
  0x9e   :  { %954 = vmatmul.mubr.f32.vlgmr.msra.gmra.mrb[2].mxu1 %v28021_v44 }
  0x9f   :  { %24175 = vmatpush1.bf16.msra.mxu1 %v28191_v17  ;;  %1056 = vmatprep.mubr.f32.mxu1 %v31413_v9 }
  0xa0   :  { %24177 = vmatprep.subr.bf16.mxu1 %v28196_v18 }
  0xa3   :  { %24179 = vmatpush1.bf16.msra.mxu1 %v28202_v33 }
  0xa4   :  { %24181 = vmatprep.subr.bf16.mxu1 %v28208_v36 }
  0xa7   :  { %24183 = vmatpush1.bf16.msra.mxu1 %v28213_v38 }
  0xa8   :  { %24185 = vmatprep.subr.bf16.mxu1 %v28218_v39 }
  0xab   :  { %24187 = vmatpush1.bf16.msra.mxu1 %v28223_v23  ;;  %v28355_v23 = vld [vmem:[#allocation4 + $0x70] sm:$0xff] }
  0xac   :  { %24189 = vmatprep.subr.bf16.mxu1 %v28002_v34  ;;  %v31469_v36 = vand.u32 4294901760, %v28355_v23 }
  0xae   :  { %1059 = vmatmul.mubr.f32.vlgmr.msra.gmra.mrb[2].mxu1 %v28055_v62 }
  0xaf   :  { %24191 = vmatpush1.bf16.msra.mxu1 %v28025_v47  ;;  %1145 = vmatprep.mubr.f32.mxu1 %v31413_v9 }
  0xb0   :  { %24193 = vmatprep.subr.bf16.mxu1 %v28034_v51 }
  0xb3   :  { %24195 = vmatpush1.bf16.msra.mxu1 %v28037_v55 }
  0xb4   :  { %24197 = vmatprep.subr.bf16.mxu1 %v28068_v5 }
  0xb7   :  { %24199 = vmatpush1.bf16.msra.mxu1 %v28072_v29 }
  0xb8   :  { %24201 = vmatprep.subr.bf16.mxu1 %v28097_v21 }
  0xbb   :  { %24203 = vmatpush1.bf16.msra.mxu1 %v28099_v19 }
  0xbc   :  { %24205 = vmatprep.subr.bf16.mxu1 %v28240_v56 }
  0xbe   :  { %1149 = vmatmul.mubr.f32.vlgmr.msra.gmra.mrb[2].mxu1 %v28080_v13 }
  0xbf   :  { %24207 = vmatpush1.bf16.msra.mxu1 %v28247_v57  ;;  %1267 = vmatprep.mubr.f32.mxu1 %v31413_v9 }
  0xc0   :  { %24209 = vmatprep.subr.bf16.mxu1 %v28254_v7 }
  0xc3   :  { %24211 = vmatpush1.bf16.msra.mxu1 %v28262_v24 }
  0xc4   :  { %24213 = vmatprep.subr.bf16.mxu1 %v28270_v27  ;;  %v28348_v27 = vld [vmem:[#allocation4 + $0x60] sm:$0xff] }
  0xc5   :  { %v1472_v38 = vand.u32 4294901760, %v28348_v27 }
  0xc7   :  { %24215 = vmatpush1.bf16.msra.mxu1 %v28277_v40  ;;  %v28346_v40 = vld [vmem:[#allocation4 + $0x78] sm:$0xff]  ;;  %v28375_v37 = vpack.c.bf16 %v31469_v36, %v1472_v38 }
  0xc8   :  { %24217 = vmatprep.subr.bf16.mxu1 %v28284_v43  ;;  %v1443_v43 = vld [vmem:[#allocation4 + $0x68] sm:$0xff]  ;;  %v1474_v56 = vand.u32 4294901760, %v28346_v40 }
  0xc9   :  { %v1470_v57 = vand.u32 4294901760, %v1443_v43  ;;  %31723 = vst [vmem:[#allocation52_spill] sm:$0xff] %v28375_v37 }
  0xcb   :  { %24219 = vmatpush1.bf16.msra.mxu1 %v28291_v48  ;;  %v28367_v17 = vpack.c.bf16 %v1474_v56, %v1470_v57 }
  0xcc   :  { %24221 = vmatprep.subr.bf16.mxu1 %v28002_v34  ;;  %v1424_v34 = vld [vmem:[#allocation2 + $0x50] sm:$0xff] }
  0xcd   :  { %31722 = vst [vmem:[#allocation51_spill] sm:$0xff] %v28367_v17 }
  0xce   :  { %1269 = vmatmul.mubr.f32.vlgmr.msra.gmra.mrb[2].mxu1 %v28021_v44 }
  0xcf   :  { %24223 = vmatpush1.bf16.msra.mxu1 %v28025_v47  ;;  %1355 = vmatprep.mubr.f32.mxu1 %v31413_v9  ;;  %v28337_v9 = vld [vmem:[#allocation4 + $0x40] sm:$0xff] }
  0xd0   :  { %24225 = vmatprep.subr.bf16.mxu1 %v28034_v51  ;;  %v1464_v48 = vand.u32 4294901760, %v28337_v9  ;;  %v1422_v47 = vld [vmem:[#allocation2 + $0x40] sm:$0xff] }
  0xd3   :  { %24227 = vmatpush1.bf16.msra.mxu1 %v28037_v55 }
  0xd4   :  { %24229 = vmatprep.subr.bf16.mxu1 %v28068_v5 }
  0xd7   :  { %24231 = vmatpush1.bf16.msra.mxu1 %v28072_v29  ;;  %v1425_v29 = vld [vmem:[#allocation2 + $0x58] sm:$0xff] }
  0xd8   :  { %24233 = vmatprep.subr.bf16.mxu1 %v28097_v21  ;;  %v2116_v51 = vand.u32 4294901760, %v1425_v29 }
  0xdb   :  { %24235 = vmatpush1.bf16.msra.mxu1 %v28099_v19 }
  0xde   :  { %1357 = vmatmul.mubr.f32.vlgmr.msra.gmra.mrb[2].mxu1 %v28021_v44 }
 0x151   :  { %v23074_v1 = vpop.f32.mrb[0].mxu1  ;;  %v23131_v2 = vpop.f32.mrb[0].mxu0 }
 0x152   :  { %v28311_v3 = vadd.f32 %v23131_v2, %v23074_v1  ;;  %v408_v4 = vpop.f32.mrb[1].mxu1  ;;  %v684_v10 = vpop.f32.mrb[1].mxu0  ;;  %v1431_v2 = vld [vmem:[#allocation4 + $0x8] sm:$0xff] }
 0x153   :  { %v28313_v11 = vadd.f32 %v684_v10, %v408_v4  ;;  %v1433_v4 = vld [vmem:[#allocation4 + $0x18] sm:$0xff]  ;;  %v1430_v10 = vld [vmem:[#allocation4] sm:$0xff]  ;;  %v1446_v16 = vand.u32 4294901760, %v1431_v2 }
 0x154   :  { %31717 = vst [vmem:[#allocation46_spill] sm:$0xff] %v28311_v3  ;;  %v1450_v20 = vand.u32 4294901760, %v1433_v4  ;;  %v28339_v3 = vld [vmem:[#allocation4 + $0x50] sm:$0xff] }
 0x155   :  { %31718 = vst [vmem:[#allocation47_spill] sm:$0xff] %v28313_v11  ;;  %v1468_v7 = vand.u32 4294901760, %v28339_v3  ;;  %v28362_v33 = vsub.f32 %v1431_v2, %v1446_v16 }
 0x156   :  { %v28369_v15 = vsub.f32 %v1433_v4, %v1450_v20 }
 0x157   :  { %v28365_v18 = vpack.c.bf16 %v1468_v7, %v1464_v48  ;;  %v31466_v6 = vand.u32 4294901760, %v28362_v33 }
 0x159   :  { %31721 = vst [vmem:[#allocation50_spill] sm:$0xff] %v28365_v18 }
 0x1b1   :  { %v1358_v25 = vpop.f32.mrb[2].mxu1 }
 0x1b2   :  { %v1360_v28 = vpop.f32.mrb[3].mxu1 }
 0x1b3   :  { %v1365_v30 = vcombine.low %v1358_v25, %v1360_v28  ;;  %v1448_v25 = vand.u32 4294901760, %v1430_v10  ;;  %v1435_v28 = vld [vmem:[#allocation4 + $0x28] sm:$0xff] }
 0x1b5   :  { %v1372_v42 = vrot.slane %v1365_v30, %v28316_v26  ;;  %v1437_v30 = vld [vmem:[#allocation4 + $0x38] sm:$0xff]  ;;  %v28371_v14 = vsub.f32 %v1430_v10, %v1448_v25  ;;  %v1541_v10 = vsub.f32 %v28362_v33, %v31466_v6 }
 0x1b7   :  { %v1374_v53 = vadd.f32 %v1372_v42, %v696_v31  ;;  %v1452_v31 = vand.u32 4294901760, %v1432_v22  ;;  %v1454_v42 = vand.u32 4294901760, %v1435_v28  ;;  %v31465_v35 = vand.u32 4294901760, %v28371_v14 }
 0x1b9   :  { %1382 = vrot.lane.b32.xlu0 %v1374_v53, %s27746_s14  ;;  %v22494_v58 = vmul.f32 -1.442695, %v1374_v53  ;;  %v1458_v53 = vand.u32 4294901760, %v1437_v30  ;;  %v28341_v11 = vpack.c.bf16 %v1452_v31, %v1448_v25  ;;  %v28378_v41 = vsub.f32 %v1432_v22, %v1452_v31 }
 0x1ba   :  { %v28380_v2 = vsub.f32 %v1435_v28, %v1454_v42 }
 0x1bb   :  { %27383 = vpow2.f32 %v22494_v58  ;;  %v1436_v58 = vld [vmem:[#allocation4 + $0x30] sm:$0xff]  ;;  %v28343_v0 = vpack.c.bf16 %v1458_v53, %v1454_v42  ;;  %v28384_v45 = vsub.f32 %v1437_v30, %v1458_v53  ;;  %v1547_v30 = vsub.f32 %v28371_v14, %v31465_v35 }
 0x1bc   :  { %v31468_v22 = vand.u32 4294901760, %v28380_v2  ;;  %v1542_v53 = vand.u32 4294901760, %v1541_v10 }
 0x1bd   :  { %1395 = vrot.lane.b32.xlu0 %v1394_v54, %s27746_s14  ;;  %v1434_v54 = vld [vmem:[#allocation4 + $0x20] sm:$0xff]  ;;  %v31470_v31 = vand.u32 4294901760, %v28384_v45 }
 0x1bf   :  { %v1577_v35 = vsub.f32 %v28384_v45, %v31470_v31 }
 0x1c5   :  { %v27384_v60 = vpop.eup %27383 }
 0x1c6   :  { %v1378_v12 = vadd.f32 1.0, %v27384_v60  ;;  %v1439_v60 = vld [vmem:[#allocation4 + $0x48] sm:$0xff] }
 0x1c8   :  { %27385 = vrcp.f32 %v1378_v12  ;;  %v28335_v12 = vpack.c.bf16 %v1450_v20, %v1446_v16  ;;  %v31464_v16 = vand.u32 4294901760, %v28369_v15  ;;  %v31467_v20 = vand.u32 4294901760, %v28378_v41 }
 0x1ca   :  { %24237 = vmatprep.subr.bf16.mxu0 %v28335_v12  ;;  %v1553_v28 = vsub.f32 %v28369_v15, %v31464_v16  ;;  %v1548_v16 = vand.u32 4294901760, %v1547_v30  ;;  %v1578_v30 = vand.u32 4294901760, %v1577_v35 }
 0x1cb   :  { %24239 = vmatpush1.bf16.msra.mxu0 %v28341_v11 }
 0x1cc   :  { %24241 = vmatprep.subr.bf16.mxu0 %v28343_v0 }
 0x1d2   :  { %v28331_v49 = vpop.eup %27385 }
 0x22b   :  { %v1383_v8 = vpop.permute.xlu0 %1382 }
 0x22c   :  { %v1384_v46 = vrot.slane %v1383_v8, 2  ;;  %v1456_v8 = vand.u32 4294901760, %v1434_v54 }
 0x22e   :  { %27387 = vtanh.f32 %v1384_v46  ;;  %v1460_v46 = vand.u32 4294901760, %v1436_v58  ;;  %v28386_v4 = vsub.f32 %v1434_v54, %v1456_v8  ;;  %v1559_v54 = vsub.f32 %v28378_v41, %v31467_v20 }
 0x230   :  { %v28351_v24 = vpack.c.bf16 %v1460_v46, %v1456_v8  ;;  %v28394_v25 = vsub.f32 %v1436_v58, %v1460_v46  ;;  %v31473_v42 = vand.u32 4294901760, %v28386_v4  ;;  %v1565_v58 = vsub.f32 %v28380_v2, %v31468_v22 }
 0x231   :  { %v1554_v46 = vand.u32 4294901760, %v1553_v28  ;;  %v1560_v6 = vand.u32 4294901760, %v1559_v54  ;;  %v28433_v54 = vsub.f32 %v28337_v9, %v1464_v48  ;;  %v28449_v9 = vsub.f32 %v28346_v40, %v1474_v56 }
 0x232   :  { %24243 = vmatpush1.bf16.msra.mxu0 %v28351_v24  ;;  %v31476_v8 = vand.u32 4294901760, %v28394_v25  ;;  %v1571_v10 = vsub.f32 %v28386_v4, %v31473_v42  ;;  %v1566_v20 = vand.u32 4294901760, %v1565_v58  ;;  %v28458_v48 = vsub.f32 %v28348_v27, %v1472_v38 }
 0x233   :  { %v28425_v28 = vpack.c.bf16 %v1554_v46, %v1542_v53  ;;  %v28429_v59 = vpack.c.bf16 %v1560_v6, %v1548_v16  ;;  %v31477_v56 = vand.u32 4294901760, %v28449_v9  ;;  %v31727_v40 = vand.u32 4294901760, %v28355_v23 }
 0x234   :  { %v1583_v22 = vsub.f32 %v28394_v25, %v31476_v8  ;;  %v1572_v42 = vand.u32 4294901760, %v1571_v10  ;;  %v28442_v35 = vpack.c.bf16 %v1578_v30, %v1566_v20  ;;  %v31729_v10 = vmov 0.0  }
 0x235   :  { %31724 = vst [vmem:[#allocation53_spill] sm:$0xff] %v28425_v28  ;;  %31725 = vst [vmem:[#allocation54_spill] sm:$0xff] %v28429_v59  ;;  %v28467_v16 = vsub.f32 %v28355_v23, %v31727_v40  ;;  %23148 = vmatprep.mubr.msk.f32.mxu1 %vm27748_vm1, %v31729_v10 }
 0x236   :  { %v1584_v58 = vand.u32 4294901760, %v1583_v22  ;;  %31726 = vst [vmem:[#allocation55_spill] sm:$0xff] %v28442_v35  ;;  %v31480_v22 = vand.u32 4294901760, %v28458_v48 }
 0x237   :  { %v1630_v23 = vand.u32 4294901760, %v28467_v16 }
 0x238   :  { %v27388_v63 = vpop.eup %27387  ;;  %v28478_v53 = vpack.c.bf16 %v1584_v58, %v1572_v42  ;;  %v1619_v42 = vsub.f32 %v28458_v48, %v31480_v22  ;;  %v31748_v22 = vand.u32 4294901760, %v28380_v2 }
 0x239   :  { %v1399_v1 = vmul.f32 %v27388_v63, %v28331_v49  ;;  %v1441_v63 = vld [vmem:[#allocation4 + $0x58] sm:$0xff] }
 0x23a   :  { %v1466_v26 = vand.u32 4294901760, %v1441_v63  ;;  %31728 = vst [vmem:[#allocation56_spill] sm:$0xff] %v28478_v53 }
 0x23b   :  { %1401 = vrot.lane.b32.xlu1 %v1399_v1, %s27746_s14  ;;  %v1462_v1 = vand.u32 4294901760, %v1439_v60 }
 0x23c   :  { %v28427_v31 = vsub.f32 %v1441_v63, %v1466_v26 }
 0x23d   :  { %v28358_v39 = vpack.c.bf16 %v1466_v26, %v1462_v1  ;;  %v28422_v36 = vsub.f32 %v1439_v60, %v1462_v1  ;;  %v28437_v60 = vsub.f32 %v28339_v3, %v1468_v7  ;;  %v28439_v1 = vsub.f32 %v1443_v43, %v1470_v57 }
 0x23e   :  { %v31482_v8 = vand.u32 4294901760, %v28427_v31  ;;  %v31481_v26 = vand.u32 4294901760, %v28433_v54 }
 0x23f   :  { %31720 = vst [vmem:[#allocation49_spill] sm:$0xff] %v28358_v39  ;;  %24245 = vmatprep.subr.bf16.mxu0 %v28358_v39  ;;  %v1588_v32 = vand.u32 4294901760, %v28422_v36  ;;  %v31479_v7 = vand.u32 4294901760, %v28437_v60  ;;  %v31478_v43 = vand.u32 4294901760, %v28439_v1 }
 0x240   :  { %24247 = vmatpush1.bf16.msra.mxu0 %v28365_v18  ;;  %v1601_v57 = vsub.f32 %v28427_v31, %v31482_v8  ;;  %v1595_v63 = vsub.f32 %v28433_v54, %v31481_v26  ;;  %v31749_v26 = vand.u32 4294901760, %v28384_v45 }
 0x241   :  { %24249 = vmatprep.subr.bf16.mxu0 %v28367_v17  ;;  %v1589_v6 = vsub.f32 %v28422_v36, %v1588_v32  ;;  %v1607_v38 = vsub.f32 %v28437_v60, %v31479_v7  ;;  %v1613_v27 = vsub.f32 %v28439_v1, %v31478_v43 }
 0x242   :  { %v1602_v20 = vand.u32 4294901760, %v1601_v57  ;;  %v1596_v46 = vand.u32 4294901760, %v1595_v63  ;;  %v1631_v63 = vsub.f32 %v28467_v16, %v1630_v23  ;;  %v28572_v8 = vpack.c.bf16 %v31749_v26, %v31748_v22 }
 0x243   :  { %v1590_v3 = vand.u32 4294901760, %v1589_v6  ;;  %v1608_v6 = vand.u32 4294901760, %v1607_v38  ;;  %v1614_v57 = vand.u32 4294901760, %v1613_v27  ;;  %v28509_v38 = vpack.c.bf16 %v28378_v41, %v28371_v14 }
 0x244   :  { %24251 = vmatpush1.bf16.msra.mxu0 %v28375_v37  ;;  %v1632_v43 = vand.u32 4294901760, %v1631_v63  ;;  %v28514_v27 = vpack.c.bf16 %v28384_v45, %v28380_v2  ;;  %31750 = vst [vmem:[#allocation71_spill] sm:$0xff] %v28572_v8  ;;  %v31754_v45 = vand.u32 4294901760, %v28427_v31  ;;  %v31757_v2 = vand.u32 4294901760, %v28437_v60 }
 0x245   :  { %24253 = vmatprep.subr.bf16.mxu0 %v28425_v28  ;;  %v28486_v30 = vpack.c.bf16 %v1602_v20, %v1590_v3  ;;  %v28493_v40 = vpack.c.bf16 %v1608_v6, %v1596_v46  ;;  %v28504_v20 = vpack.c.bf16 %v28369_v15, %v28362_v33  ;;  %31735 = vst [vmem:[#allocation62_spill] sm:$0xff] %v28509_v38  ;;  %v31760_v26 = vand.u32 4294901760, %v28449_v9 }
 0x246   :  { %31736 = vst [vmem:[#allocation63_spill] sm:$0xff] %v28514_v27  ;;  %v28531_v46 = vpack.c.bf16 %v28437_v60, %v28433_v54  ;;  %v28541_v6 = vpack.c.bf16 %v28467_v16, %v28458_v48  ;;  %v31742_v16 = vand.u32 4294901760, %v28362_v33 }
 0x247   :  { %1532 = vmatmul.mubr.f32.vlgmr.msra.gmra.mrb[2].mxu0 %v28138_v61  ;;  %v1625_v61 = vsub.f32 %v28449_v9, %v31477_v56  ;;  %31730 = vst [vmem:[#allocation57_spill] sm:$0xff] %v28486_v30  ;;  %31731 = vst [vmem:[#allocation58_spill] sm:$0xff] %v28493_v40  ;;  %v1620_v56 = vand.u32 4294901760, %v1619_v42 }
 0x248   :  { %24255 = vmatpush1.bf16.msra.mxu0 %v28429_v59  ;;  %1682 = vmatprep.mubr.f32.mxu0 %v31729_v10  ;;  %31734 = vst [vmem:[#allocation61_spill] sm:$0xff] %v28504_v20  ;;  %31739 = vst [vmem:[#allocation66_spill] sm:$0xff] %v28531_v46 }
 0x249   :  { %24257 = vmatprep.subr.bf16.mxu0 %v28442_v35  ;;  %v1626_v58 = vand.u32 4294901760, %v1625_v61  ;;  %v28499_v3 = vpack.c.bf16 %v1632_v43, %v1620_v56  ;;  %v28520_v43 = vpack.c.bf16 %v28394_v25, %v28386_v4  ;;  %v28526_v56 = vpack.c.bf16 %v28427_v31, %v28422_v36  ;;  %31741 = vst [vmem:[#allocation68_spill] sm:$0xff] %v28541_v6  ;;  %v1415_v31 = vld [vmem:[#allocation2 + $0x8] sm:$0xff] }
 0x24a   :  { %v28536_v61 = vpack.c.bf16 %v28449_v9, %v28439_v1  ;;  %v2096_v60 = vand.u32 4294901760, %v1415_v31  ;;  %v28618_v9 = vld [vmem:[#allocation2] sm:$0xff] }
 0x24b   :  { %v28496_v7 = vpack.c.bf16 %v1626_v58, %v1614_v57  ;;  %31733 = vst [vmem:[#allocation60_spill] sm:$0xff] %v28499_v3  ;;  %31737 = vst [vmem:[#allocation64_spill] sm:$0xff] %v28520_v43  ;;  %v31743_v57 = vand.u32 4294901760, %v28369_v15  ;;  %v31746_v58 = vand.u32 4294901760, %v28378_v41  ;;  %v31751_v15 = vand.u32 4294901760, %v28386_v4 }
 0x24c   :  { %24259 = vmatpush1.bf16.msra.mxu0 %v28478_v53  ;;  %31738 = vst [vmem:[#allocation65_spill] sm:$0xff] %v28526_v56  ;;  %31740 = vst [vmem:[#allocation67_spill] sm:$0xff] %v28536_v61  ;;  %v28588_v41 = vpack.c.bf16 %v31754_v45, %v1588_v32  ;;  %v31762_v32 = vand.u32 4294901760, %v28458_v48  ;;  %v28620_v48 = vld [vmem:[#allocation2 + $0x10] sm:$0xff] }
 0x24d   :  { %24261 = vmatprep.subr.bf16.mxu0 %v28486_v30  ;;  %31732 = vst [vmem:[#allocation59_spill] sm:$0xff] %v28496_v7  ;;  %v28558_v42 = vpack.c.bf16 %v31743_v57, %v31742_v16  ;;  %v31483_v16 = vand.u32 4294901760, %v28620_v48 }
 0x24e   :  { %31755 = vst [vmem:[#allocation73_spill] sm:$0xff] %v28588_v41  ;;  %v28607_v36 = vpack.c.bf16 %v1630_v23, %v31762_v32  ;;  %v31484_v23 = vand.u32 4294901760, %v28618_v9 }
 0x24f   :  { %31744 = vst [vmem:[#allocation69_spill] sm:$0xff] %v28558_v42 }
 0x250   :  { %24263 = vmatpush1.bf16.msra.mxu0 %v28493_v40  ;;  %31763 = vst [vmem:[#allocation76_spill] sm:$0xff] %v28607_v36 }
 0x251   :  { %24265 = vmatprep.subr.bf16.mxu0 %v28496_v7 }
 0x254   :  { %24267 = vmatpush1.bf16.msra.mxu0 %v28499_v3 }
 0x255   :  { %24269 = vmatprep.subr.bf16.mxu0 %v28504_v20 }
 0x257   :  { %1684 = vmatmul.mubr.f32.vlgmr.msra.gmra.mrb[2].mxu0 %v28021_v44 }
 0x258   :  { %24271 = vmatpush1.bf16.msra.mxu0 %v28509_v38  ;;  %1786 = vmatprep.mubr.f32.mxu0 %v31729_v10 }
 0x259   :  { %24273 = vmatprep.subr.bf16.mxu0 %v28514_v27 }
 0x25c   :  { %24275 = vmatpush1.bf16.msra.mxu0 %v28520_v43 }
 0x25d   :  { %24277 = vmatprep.subr.bf16.mxu0 %v28526_v56 }
 0x260   :  { %24279 = vmatpush1.bf16.msra.mxu0 %v28531_v46 }
 0x261   :  { %24281 = vmatprep.subr.bf16.mxu0 %v28536_v61 }
 0x264   :  { %24283 = vmatpush1.bf16.msra.mxu0 %v28541_v6  ;;  %v1428_v6 = vld [vmem:[#allocation2 + $0x70] sm:$0xff] }
 0x265   :  { %24285 = vmatprep.subr.bf16.mxu0 %v28335_v12 }
 0x267   :  { %1789 = vmatmul.mubr.f32.vlgmr.msra.gmra.mrb[2].mxu0 %v28055_v62  ;;  %v31745_v62 = vand.u32 4294901760, %v28371_v14  ;;  %v31752_v14 = vand.u32 4294901760, %v28394_v25  ;;  %v31759_v25 = vand.u32 4294901760, %v28439_v1 }
 0x268   :  { %24287 = vmatpush1.bf16.msra.mxu0 %v28341_v11  ;;  %1875 = vmatprep.mubr.f32.mxu0 %v31729_v10 }
 0x269   :  { %24289 = vmatprep.subr.bf16.mxu0 %v28343_v0  ;;  %v28565_v63 = vpack.c.bf16 %v31746_v58, %v31745_v62  ;;  %v28580_v33 = vpack.c.bf16 %v31752_v14, %v31751_v15  ;;  %v28602_v22 = vpack.c.bf16 %v31760_v26, %v31759_v25  ;;  %v28633_v62 = vpack.c.bf16 %v31483_v16, %v31484_v23  ;;  %v1396_v58 = vpop.permute.xlu0 %1395  ;;  %v1419_v15 = vld [vmem:[#allocation2 + $0x28] sm:$0xff]  ;;  %v1421_v14 = vld [vmem:[#allocation2 + $0x38] sm:$0xff]  ;;  %v1420_v25 = vld [vmem:[#allocation2 + $0x30] sm:$0xff] }
 0x26a   :  { %v2104_v45 = vand.u32 4294901760, %v1419_v15  ;;  %v2110_v32 = vand.u32 4294901760, %v1420_v25  ;;  %v1398_v16 = vmul.f32 %v28331_v49, %v1396_v58 }
 0x26b   :  { %31747 = vst [vmem:[#allocation70_spill] sm:$0xff] %v28565_v63  ;;  %31753 = vst [vmem:[#allocation72_spill] sm:$0xff] %v28580_v33 }
 0x26c   :  { %24291 = vmatpush1.bf16.msra.mxu0 %v28351_v24  ;;  %31761 = vst [vmem:[#allocation75_spill] sm:$0xff] %v28602_v22  ;;  %v28671_v43 = vsub.f32 %v1419_v15, %v2104_v45  ;;  %v28680_v7 = vsub.f32 %v1420_v25, %v2110_v32 }
 0x26d   :  { %24293 = vmatprep.subr.bf16.mxu0 %v28358_v39 }
 0x270   :  { %24295 = vmatpush1.bf16.msra.mxu0 %v28365_v18 }
 0x271   :  { %24297 = vmatprep.subr.bf16.mxu0 %v28367_v17 }
 0x274   :  { %24299 = vmatpush1.bf16.msra.mxu0 %v28375_v37 }
 0x275   :  { %24301 = vmatprep.subr.bf16.mxu0 %v28558_v42  ;;  %v1426_v42 = vld [vmem:[#allocation2 + $0x60] sm:$0xff] }
 0x277   :  { %1879 = vmatmul.mubr.f32.vlgmr.msra.gmra.mrb[2].mxu0 %v28080_v13  ;;  %v31756_v13 = vand.u32 4294901760, %v28433_v54  ;;  %v1417_v54 = vld [vmem:[#allocation2 + $0x18] sm:$0xff] }
 0x278   :  { %24303 = vmatpush1.bf16.msra.mxu0 %v28565_v63  ;;  %1997 = vmatprep.mubr.f32.mxu0 %v31729_v10  ;;  %v2100_v1 = vand.u32 4294901760, %v1417_v54 }
 0x279   :  { %24305 = vmatprep.subr.bf16.mxu0 %v28572_v8  ;;  %v28595_v4 = vpack.c.bf16 %v31757_v2, %v31756_v13  ;;  %v2108_v13 = vand.u32 4294901760, %v1421_v14  ;;  %v1418_v2 = vld [vmem:[#allocation2 + $0x20] sm:$0xff] }
 0x27a   :  { %v28626_v57 = vpack.c.bf16 %v2100_v1, %v2096_v60  ;;  %v2106_v26 = vand.u32 4294901760, %v1418_v2 }
 0x27b   :  { %31758 = vst [vmem:[#allocation74_spill] sm:$0xff] %v28595_v4  ;;  %v28640_v23 = vpack.c.bf16 %v2108_v13, %v2104_v45  ;;  %v28674_v20 = vsub.f32 %v1421_v14, %v2108_v13  ;;  %v2232_v14 = vand.u32 4294901760, %v28680_v7 }
 0x27c   :  { %24307 = vmatpush1.bf16.msra.mxu0 %v28580_v33  ;;  %v28642_v21 = vpack.c.bf16 %v2110_v32, %v2106_v26  ;;  %v1429_v33 = vld [vmem:[#allocation2 + $0x78] sm:$0xff]  ;;  %v28676_v3 = vsub.f32 %v1418_v2, %v2106_v26 }
 0x27d   :  { %24309 = vmatprep.subr.bf16.mxu0 %v28588_v41  ;;  %v28653_v41 = vsub.f32 %v1417_v54, %v2100_v1  ;;  %v2124_v63 = vand.u32 4294901760, %v1429_v33  ;;  %v2233_v32 = vsub.f32 %v28680_v7, %v2232_v14 }
 0x27e   :  { %v2220_v15 = vand.u32 4294901760, %v28676_v3 }
 0x280   :  { %24311 = vmatpush1.bf16.msra.mxu0 %v28595_v4  ;;  %v28651_v4 = vsub.f32 %v1415_v31, %v2096_v60  ;;  %v2122_v31 = vand.u32 4294901760, %v1426_v42  ;;  %v2126_v60 = vand.u32 4294901760, %v1428_v6  ;;  %v2221_v25 = vsub.f32 %v28676_v3, %v2220_v15 }
 0x281   :  { %24313 = vmatprep.subr.bf16.mxu0 %v28602_v22  ;;  %v2118_v22 = vand.u32 4294901760, %v1424_v34 }
 0x282   :  { %v31536_v61 = vand.u32 4294901760, %v28651_v4  ;;  %v28669_v56 = vpack.c.bf16 %v2126_v60, %v2122_v31  ;;  %v2222_v53 = vand.u32 4294901760, %v2221_v25  ;;  %v2267_v25 = vsub.f32 %v1426_v42, %v2122_v31 }
 0x283   :  { %v2255_v30 = vsub.f32 %v1424_v34, %v2118_v22  ;;  %v28715_v42 = vpack.c.bf16 %v28674_v20, %v28671_v43 }
 0x284   :  { %24315 = vmatpush1.bf16.msra.mxu0 %v28607_v36  ;;  %v2114_v36 = vand.u32 4294901760, %v1422_v47  ;;  %v2191_v1 = vsub.f32 %v28651_v4, %v31536_v61  ;;  %v31544_v61 = vand.u32 4294901760, %v28671_v43 }
 0x285   :  { %24317 = vmatprep.subr.bf16.mxu0 %v28335_v12  ;;  %31773 = vst [vmem:[#allocation86_spill] sm:$0xff] %v28715_v42 }
 0x286   :  { %v2192_v27 = vand.u32 4294901760, %v2191_v1 }
 0x287   :  { %1999 = vmatmul.mubr.f32.vlgmr.msra.gmra.mrb[2].mxu0 %v28021_v44 }
 0x288   :  { %24319 = vmatpush1.bf16.msra.mxu0 %v28341_v11  ;;  %2085 = vmatprep.mubr.f32.mxu0 %v31729_v10 }
 0x289   :  { %24321 = vmatprep.subr.bf16.mxu0 %v28343_v0 }
 0x28c   :  { %24323 = vmatpush1.bf16.msra.mxu0 %v28351_v24 }
 0x28d   :  { %24325 = vmatprep.subr.bf16.mxu0 %v28358_v39 }
 0x290   :  { %24327 = vmatpush1.bf16.msra.mxu0 %v28365_v18 }
 0x291   :  { %24329 = vmatprep.subr.bf16.mxu0 %v28367_v17 }
 0x294   :  { %24331 = vmatpush1.bf16.msra.mxu0 %v28375_v37 }
 0x295   :  { %24333 = vmatprep.subr.bf16.mxu0 %v28626_v57 }
 0x297   :  { %2087 = vmatmul.mubr.f32.vlgmr.msra.gmra.mrb[2].mxu0 %v28021_v44  ;;  %v1423_v44 = vld [vmem:[#allocation2 + $0x48] sm:$0xff] }
 0x298   :  { %24335 = vmatpush1.bf16.msra.mxu0 %v28633_v62  ;;  %2176 = vmatprep.mubr.f32.mxu0 %v31729_v10  ;;  %v2112_v55 = vand.u32 4294901760, %v1423_v44 }
 0x299   :  { %24337 = vmatprep.subr.bf16.mxu0 %v28640_v23 }
 0x29a   :  { %v28649_v58 = vpack.c.bf16 %v2116_v51, %v2112_v55  ;;  %v2237_v45 = vsub.f32 %v1423_v44, %v2112_v55  ;;  %v2234_v44 = vand.u32 4294901760, %v2233_v32 }
 0x29c   :  { %24339 = vmatpush1.bf16.msra.mxu0 %v28642_v21  ;;  %v2238_v1 = vand.u32 4294901760, %v2237_v45 }
 0x29d   :  { %24341 = vmatprep.subr.bf16.mxu0 %v28649_v58 }
 0x29e   :  { %v2239_v59 = vsub.f32 %v2237_v45, %v2238_v1 }
 0x2ad   :  { %v1402_v19 = vpop.permute.xlu1 %1401 }
 0x2ae   :  { %v28644_v5 = vadd.f32 %v1402_v19, %v1398_v16  ;;  %v28655_v19 = vpack.c.bf16 %v2118_v22, %v2114_v36  ;;  %v1427_v16 = vld [vmem:[#allocation2 + $0x68] sm:$0xff] }
 0x2af   :  { %v2120_v8 = vand.u32 4294901760, %v1427_v16 }
 0x2b0   :  { %31764 = vst [vmem:[#allocation77_spill] sm:$0xff] %v28644_v5  ;;  %27389 = vtanh.f32 %v28644_v5  ;;  %v31541_v5 = vand.u32 4294901760, %v28653_v41  ;;  %24343 = vmatpush1.bf16.msra.mxu0 %v28655_v19 }
 0x2b1   :  { %v28661_v54 = vpack.c.bf16 %v2124_v63, %v2120_v8  ;;  %v2261_v50 = vsub.f32 %v1427_v16, %v2120_v8  ;;  %v2279_v8 = vsub.f32 %v1428_v6, %v2126_v60  ;;  %v28711_v6 = vpack.c.bf16 %v28653_v41, %v28651_v4 }
 0x2b2   :  { %v2203_v46 = vsub.f32 %v28653_v41, %v31541_v5  ;;  %v2226_v5 = vand.u32 4294901760, %v28674_v20 }
 0x2b3   :  { %24345 = vmatprep.subr.bf16.mxu0 %v28661_v54  ;;  %31772 = vst [vmem:[#allocation85_spill] sm:$0xff] %v28711_v6 }
 0x2b4   :  { %v2204_v38 = vand.u32 4294901760, %v2203_v46  ;;  %24347 = vmatpush1.bf16.msra.mxu0 %v28669_v56  ;;  %v2215_v46 = vsub.f32 %v28671_v43, %v31544_v61  ;;  %v2227_v2 = vsub.f32 %v28674_v20, %v2226_v5  ;;  %v31782_v20 = vand.u32 4294901760, %v28671_v43 }
 0x2b6   :  { %v28682_v40 = vpack.c.bf16 %v2204_v38, %v2192_v27  ;;  %v2249_v38 = vsub.f32 %v1425_v29, %v2116_v51  ;;  %v2243_v27 = vsub.f32 %v1422_v47, %v2114_v36  ;;  %v2216_v26 = vand.u32 4294901760, %v2215_v46 }
 0x2b7   :  { %v2228_v61 = vand.u32 4294901760, %v2227_v2  ;;  %v2273_v47 = vsub.f32 %v1429_v33, %v2124_v63  ;;  %v28697_v29 = vpack.c.bf16 %v2234_v44, %v2222_v53  ;;  %v2240_v36 = vand.u32 4294901760, %v2239_v59 }
 0x2b8   :  { %31765 = vst [vmem:[#allocation78_spill] sm:$0xff] %v28682_v40  ;;  %24349 = vmatprep.subr.bf16.mxu0 %v28682_v40  ;;  %v2250_v35 = vand.u32 4294901760, %v2249_v38  ;;  %v2244_v55 = vand.u32 4294901760, %v2243_v27  ;;  %v2256_v40 = vand.u32 4294901760, %v2255_v30  ;;  %v2280_v59 = vand.u32 4294901760, %v2279_v8 }
 0x2b9   :  { %v28695_v28 = vpack.c.bf16 %v2228_v61, %v2216_v26  ;;  %31767 = vst [vmem:[#allocation80_spill] sm:$0xff] %v28697_v29  ;;  %v2274_v2 = vand.u32 4294901760, %v2273_v47  ;;  %v2268_v26 = vand.u32 4294901760, %v2267_v25  ;;  %v28721_v31 = vpack.c.bf16 %v2249_v38, %v2237_v45 }
 0x2ba   :  { %v27390_v13 = vpop.eup %27389  ;;  %v2251_v37 = vsub.f32 %v2249_v38, %v2250_v35  ;;  %v2245_v51 = vsub.f32 %v2243_v27, %v2244_v55  ;;  %v2257_v46 = vsub.f32 %v2255_v30, %v2256_v40  ;;  %v2281_v18 = vsub.f32 %v2279_v8, %v2280_v59 }
 0x2bb   :  { %1410 = vrot.lane.b32.xlu1 %v27390_v13, %s27746_s14  ;;  %31766 = vst [vmem:[#allocation79_spill] sm:$0xff] %v28695_v28  ;;  %v2262_v13 = vand.u32 4294901760, %v2261_v50  ;;  %v2275_v16 = vsub.f32 %v2273_v47, %v2274_v2  ;;  %v2269_v44 = vsub.f32 %v2267_v25, %v2268_v26  ;;  %31775 = vst [vmem:[#allocation88_spill] sm:$0xff] %v28721_v31  ;;  %v31790_v38 = vand.u32 4294901760, %v28620_v48 }
 0x2bc   :  { %v2252_v34 = vand.u32 4294901760, %v2251_v37  ;;  %v2246_v22 = vand.u32 4294901760, %v2245_v51  ;;  %v2258_v32 = vand.u32 4294901760, %v2257_v46  ;;  %v28723_v60 = vpack.c.bf16 %v2255_v30, %v2243_v27 }
 0x2bd   :  { %v2263_v17 = vsub.f32 %v2261_v50, %v2262_v13  ;;  %v2276_v33 = vand.u32 4294901760, %v2275_v16  ;;  %v2270_v37 = vand.u32 4294901760, %v2269_v44  ;;  %v31779_v46 = vand.u32 4294901760, %v28651_v4  ;;  %v31797_v44 = vld [vmem:[#allocation52_spill] sm:$0xff] }
 0x2be   :  { %v28701_v61 = vpack.c.bf16 %v2252_v34, %v2240_v36  ;;  %v28703_v63 = vpack.c.bf16 %v2258_v32, %v2246_v22  ;;  %31776 = vst [vmem:[#allocation89_spill] sm:$0xff] %v28723_v60  ;;  %v28725_v36 = vpack.c.bf16 %v2273_v47, %v2261_v50  ;;  %v31780_v34 = vand.u32 4294901760, %v28653_v41 }
 0x2bf   :  { %2769 = vrot.lane.b32.xlu1 %v28325_v52, %s27746_s14  ;;  %v2264_v53 = vand.u32 4294901760, %v2263_v17  ;;  %v2282_v52 = vand.u32 4294901760, %v2281_v18  ;;  %v28719_v17 = vpack.c.bf16 %v28680_v7, %v28676_v3  ;;  %v28727_v18 = vpack.c.bf16 %v2279_v8, %v2267_v25 }
 0x2c0   :  { %31768 = vst [vmem:[#allocation81_spill] sm:$0xff] %v28701_v61  ;;  %31769 = vst [vmem:[#allocation82_spill] sm:$0xff] %v28703_v63  ;;  %v28733_v22 = vpack.c.bf16 %v31780_v34, %v31779_v46  ;;  %v28737_v32 = vpack.c.bf16 %v2226_v5, %v31782_v20  ;;  %v28739_v7 = vpack.c.bf16 %v2232_v14, %v2220_v15  ;;  %v31789_v4 = vand.u32 4294901760, %v28618_v9  ;;  %v97_v34 = vld [vmem:[%s31406_s7] sm:$0x3] }
 0x2c1   :  { %v28705_v39 = vpack.c.bf16 %v2276_v33, %v2264_v53  ;;  %v28707_v51 = vpack.c.bf16 %v2282_v52, %v2270_v37  ;;  %31774 = vst [vmem:[#allocation87_spill] sm:$0xff] %v28719_v17  ;;  %31777 = vst [vmem:[#allocation90_spill] sm:$0xff] %v28725_v36  ;;  %v28741_v3 = vpack.c.bf16 %v2250_v35, %v2238_v1  ;;  %v1407_v5 = vrot.slane %v28331_v49, 2  ;;  %v31794_v53 = vld [vmem:[#allocation49_spill] sm:$0xff]  ;;  %v31796_v33 = vld [vmem:[#allocation51_spill] sm:$0xff] }
 0x2c2   :  { %31778 = vst [vmem:[#allocation91_spill] sm:$0xff] %v28727_v18  ;;  %31781 = vst [vmem:[#allocation92_spill] sm:$0xff] %v28733_v22  ;;  %v28743_v30 = vpack.c.bf16 %v2256_v40, %v2244_v55  ;;  %v28745_v50 = vpack.c.bf16 %v2274_v2, %v2262_v13  ;;  %v28747_v45 = vpack.c.bf16 %v2280_v59, %v2268_v26  ;;  %v31795_v59 = vld [vmem:[#allocation50_spill] sm:$0xff]  ;;  %v31798_v37 = vld [vmem:[#allocation53_spill] sm:$0xff] }
 0x2c3   :  { %31770 = vst [vmem:[#allocation83_spill] sm:$0xff] %v28705_v39  ;;  %31771 = vst [vmem:[#allocation84_spill] sm:$0xff] %v28707_v51  ;;  %v2195_v41 = vsub.f32 %v28618_v9, %v31789_v4  ;;  %v2207_v43 = vsub.f32 %v28620_v48, %v31790_v38  ;;  %v31799_v52 = vld [vmem:[#allocation44_spill] sm:$0xff] }
 0x2c4   :  { %31783 = vst [vmem:[#allocation93_spill] sm:$0xff] %v28737_v32  ;;  %31784 = vst [vmem:[#allocation94_spill] sm:$0xff] %v28739_v7  ;;  %v28836_v46 = vsub.s32 1, %v31799_v52 }
 0x2c5   :  { %31785 = vst [vmem:[#allocation95_spill] sm:$0xff] %v28741_v3  ;;  %31786 = vst [vmem:[#allocation96_spill] sm:$0xff] %v28743_v30  ;;  %v2196_v15 = vand.u32 4294901760, %v2195_v41  ;;  %v2208_v14 = vand.u32 4294901760, %v2207_v43  ;;  %v28780_v16 = vpack.c.bf16 %v2207_v43, %v2195_v41 }
 0x2c6   :  { %31787 = vst [vmem:[#allocation97_spill] sm:$0xff] %v28745_v50  ;;  %31788 = vst [vmem:[#allocation98_spill] sm:$0xff] %v28747_v45  ;;  %v28842_v20 = vrot.slane %v97_v34, %v28836_v46 }
 0x2c7   :  { %v2197_v1 = vsub.f32 %v2195_v41, %v2196_v15  ;;  %v2209_v55 = vsub.f32 %v2207_v43, %v2208_v14  ;;  %31792 = vst [vmem:[#allocation100_spill] sm:$0xff] %v28780_v16  ;;  %v28802_v26 = vpack.c.bf16 %v2208_v14, %v2196_v15  ;;  %31800 = vst [vmem:[#allocation49_spill] sm:$0xff] %v28836_v46 }
 0x2c8   :  { %31801 = vst [vmem:[#allocation50_spill] sm:$0xff] %v28842_v20 }
 0x2c9   :  { %v2198_v9 = vand.u32 4294901760, %v2197_v1  ;;  %v2210_v2 = vand.u32 4294901760, %v2209_v55  ;;  %31793 = vst [vmem:[#allocation101_spill] sm:$0xff] %v28802_v26 }
 0x2cb   :  { %v28767_v48 = vpack.c.bf16 %v2210_v2, %v2198_v9  ;;  %v28857_v2 = vld [vmem:[#allocation7] sm:$0xff] }
 0x2cd   :  { %31791 = vst [vmem:[#allocation99_spill] sm:$0xff] %v28767_v48 }
 0x32d   :  { %v1411_v35 = vpop.permute.xlu1 %1410 }
 0x32e   :  { %v1413_v27 = vmul.f32 %v1411_v35, %v1407_v5  ;;  %v28850_v5 = vsub.s32 0, %v31799_v52 }
 0x330   :  { %v2094_v40 = vsel %vm107_vm0, %v1413_v27, 0  ;;  %31802 = vst [vmem:[#allocation51_spill] sm:$0xff] %v28850_v5  ;;  %v28853_v15 = vrot.slane %v97_v34, %v28850_v5  ;;  %v31575_v34 = vand.u32 4294901760, %v28857_v2 }
 0x331   :  { %v28757_v47 = vand.u32 4294901760, %v2094_v40 }
 0x332   :  { %31803 = vst [vmem:[#allocation52_spill] sm:$0xff] %v28853_v15 }
 0x333   :  { %v28760_v13 = vsub.f32 %v2094_v40, %v28757_v47 }
 0x335   :  { %v28763_v25 = vand.u32 4294901760, %v28760_v13 }
 0x337   :  { %v2180_v49 = vsub.f32 %v28760_v13, %v28763_v25 }
 0x339   :  { %v28769_v8 = vand.u32 4294901760, %v2180_v49  ;;  %v28859_v49 = vld [vmem:[#allocation7 + $0x8] sm:$0xff] }
 0x33b   :  { %2182 = vmatmul.mubr.f32.vlgmr.msra.gmra.mrb[2].mxu0 %v28769_v8 }
 0x33c   :  { %24351 = vmatpush1.bf16.msra.mxu0 %v28767_v48  ;;  %2332 = vmatprep.mubr.f32.mxu0 %v31729_v10 }
 0x33d   :  { %24353 = vmatprep.subr.bf16.mxu0 %v28695_v28 }
 0x340   :  { %24355 = vmatpush1.bf16.msra.mxu0 %v28697_v29 }
 0x341   :  { %24357 = vmatprep.subr.bf16.mxu0 %v28701_v61 }
 0x344   :  { %24359 = vmatpush1.bf16.msra.mxu0 %v28703_v63 }
 0x345   :  { %24361 = vmatprep.subr.bf16.mxu0 %v28705_v39 }
 0x348   :  { %24363 = vmatpush1.bf16.msra.mxu0 %v28707_v51 }
 0x349   :  { %24365 = vmatprep.subr.bf16.mxu0 %v28711_v6 }
 0x34b   :  { %2334 = vmatmul.mubr.f32.vlgmr.msra.gmra.mrb[2].mxu0 %v28757_v47 }
 0x34c   :  { %24367 = vmatpush1.bf16.msra.mxu0 %v28780_v16  ;;  %2436 = vmatprep.mubr.f32.mxu0 %v31729_v10 }
 0x34d   :  { %24369 = vmatprep.subr.bf16.mxu0 %v28715_v42 }
 0x350   :  { %24371 = vmatpush1.bf16.msra.mxu0 %v28719_v17 }
 0x351   :  { %24373 = vmatprep.subr.bf16.mxu0 %v28721_v31 }
 0x354   :  { %24375 = vmatpush1.bf16.msra.mxu0 %v28723_v60 }
 0x355   :  { %24377 = vmatprep.subr.bf16.mxu0 %v28725_v36 }
 0x358   :  { %24379 = vmatpush1.bf16.msra.mxu0 %v28727_v18 }
 0x359   :  { %24381 = vmatprep.subr.bf16.mxu0 %v28626_v57 }
 0x35b   :  { %2439 = vmatmul.mubr.f32.vlgmr.msra.gmra.mrb[2].mxu0 %v28760_v13 }
 0x35c   :  { %24383 = vmatpush1.bf16.msra.mxu0 %v28633_v62  ;;  %2525 = vmatprep.mubr.f32.mxu0 %v31729_v10 }
 0x35d   :  { %24385 = vmatprep.subr.bf16.mxu0 %v28640_v23 }
 0x360   :  { %24387 = vmatpush1.bf16.msra.mxu0 %v28642_v21 }
 0x361   :  { %24389 = vmatprep.subr.bf16.mxu0 %v28649_v58 }
 0x364   :  { %24391 = vmatpush1.bf16.msra.mxu0 %v28655_v19 }
 0x365   :  { %24393 = vmatprep.subr.bf16.mxu0 %v28661_v54 }
 0x368   :  { %24395 = vmatpush1.bf16.msra.mxu0 %v28669_v56 }
 0x369   :  { %24397 = vmatprep.subr.bf16.mxu0 %v28733_v22 }
 0x36b   :  { %2529 = vmatmul.mubr.f32.vlgmr.msra.gmra.mrb[2].mxu0 %v28763_v25 }
 0x36c   :  { %24399 = vmatpush1.bf16.msra.mxu0 %v28802_v26  ;;  %2647 = vmatprep.mubr.f32.mxu0 %v31729_v10 }
 0x36d   :  { %24401 = vmatprep.subr.bf16.mxu0 %v28737_v32 }
 0x370   :  { %24403 = vmatpush1.bf16.msra.mxu0 %v28739_v7 }
 0x371   :  { %24405 = vmatprep.subr.bf16.mxu0 %v28741_v3 }
 0x374   :  { %24407 = vmatpush1.bf16.msra.mxu0 %v28743_v30 }
 0x375   :  { %24409 = vmatprep.subr.bf16.mxu0 %v28745_v50  ;;  %v2796_v50 = vld [vmem:[#allocation7 + $0x38] sm:$0xff] }
 0x378   :  { %24411 = vmatpush1.bf16.msra.mxu0 %v28747_v45  ;;  %v2795_v45 = vld [vmem:[#allocation7 + $0x30] sm:$0xff] }
 0x379   :  { %24413 = vmatprep.subr.bf16.mxu0 %v28626_v57 }
 0x37b   :  { %2649 = vmatmul.mubr.f32.vlgmr.msra.gmra.mrb[2].mxu0 %v28757_v47 }
 0x37c   :  { %24415 = vmatpush1.bf16.msra.mxu0 %v28633_v62  ;;  %2735 = vmatprep.mubr.f32.mxu0 %v31729_v10 }
 0x37d   :  { %24417 = vmatprep.subr.bf16.mxu0 %v28640_v23 }
 0x380   :  { %24419 = vmatpush1.bf16.msra.mxu0 %v28642_v21 }
 0x381   :  { %24421 = vmatprep.subr.bf16.mxu0 %v28649_v58 }
 0x384   :  { %24423 = vmatpush1.bf16.msra.mxu0 %v28655_v19 }
 0x385   :  { %24425 = vmatprep.subr.bf16.mxu0 %v28661_v54 }
 0x388   :  { %24427 = vmatpush1.bf16.msra.mxu0 %v28669_v56 }
 0x389   :  { %24597 = vmatprep.subr.bf16.mxu0 %v28335_v12 }
 0x38b   :  { %2737 = vmatmul.mubr.f32.vlgmr.msra.gmra.mrb[2].mxu0 %v28757_v47 }
 0x38c   :  { %24599 = vmatpush1.bf16.msra.mxu0 %v28341_v11  ;;  %4260 = vmatprep.mubr.f32.mxu0 %v31729_v10 }
 0x38d   :  { %24601 = vmatprep.subr.bf16.mxu0 %v28343_v0 }
 0x390   :  { %24603 = vmatpush1.bf16.msra.mxu0 %v28351_v24 }
 0x391   :  { %24605 = vmatprep.subr.bf16.mxu0 %v31794_v53 }
 0x394   :  { %24607 = vmatpush1.bf16.msra.mxu0 %v31795_v59 }
 0x395   :  { %24609 = vmatprep.subr.bf16.mxu0 %v31796_v33 }
 0x398   :  { %24611 = vmatpush1.bf16.msra.mxu0 %v31797_v44 }
 0x399   :  { %24613 = vmatprep.subr.bf16.mxu0 %v31798_v37 }
 0x45e   :  { %v2738_v4 = vpop.f32.mrb[2].mxu0 }
 0x45f   :  { %v2740_v41 = vpop.f32.mrb[3].mxu0  ;;  %v2754_v14 = vadd.f32 %v28853_v15, %v2738_v4  ;;  %v31574_v4 = vand.u32 4294901760, %v28859_v49  ;;  %v2793_v15 = vld [vmem:[#allocation7 + $0x20] sm:$0xff] }
 0x460   :  { %v28845_v38 = vadd.f32 %v28842_v20, %v2740_v41  ;;  %v31605_v41 = vmov 0.0|0.0   ;;  %v2794_v20 = vld [vmem:[#allocation7 + $0x28] sm:$0xff] }
 0x461   :  { %v22495_v35 = vmul.f32 -1.442695, %v2754_v14  ;;  %24428 = vmatprep.subr.bf16.mxu1 %v31605_v41  ;;  %v2770_v14 = vpop.permute.xlu1 %2769 }
 0x462   :  { %27391 = vtanh.f32 %v28845_v38 }
 0x463   :  { %27393 = vpow2.f32 %v22495_v35  ;;  %v2791_v35 = vld [vmem:[#allocation7 + $0x10] sm:$0xff] }
 0x46c   :  { %v27392_v43 = vpop.eup %27391 }
 0x46d   :  { %2774 = vrot.lane.b32.xlu0 %v27392_v43, %s27746_s14  ;;  %v27394_v27 = vpop.eup %27393  ;;  %v28868_v43 = vpack.c.bf16 %v31574_v4, %v31575_v34  ;;  %v2813_v4 = vand.u32 4294901760, %v2793_v15  ;;  %v2816_v34 = vand.u32 4294901760, %v2794_v20 }
 0x46e   :  { %v2762_v40 = vadd.f32 1.0, %v27394_v27  ;;  %v2792_v27 = vld [vmem:[#allocation7 + $0x18] sm:$0xff] }
 0x46f   :  { %24430 = vmatpush3.bf16.msra.mxu1 %v28868_v43  ;;  %v28879_v37 = vpack.c.bf16 %v2816_v34, %v2813_v4  ;;  %v2913_v22 = vsub.f32 %v2793_v15, %v2813_v4  ;;  %v2920_v18 = vsub.f32 %v2794_v20, %v2816_v34  ;;  %v22496_v4 = vmul.f32 -1.442695, %v28845_v38 }
 0x470   :  { %27395 = vrcp.f32 %v2762_v40  ;;  %24431 = vmatprep.subr.bf16.mxu1 %v31605_v41  ;;  %v2807_v40 = vand.u32 4294901760, %v2791_v35 }
 0x471   :  { %v2914_v31 = vand.u32 4294901760, %v2913_v22  ;;  %v2921_v17 = vand.u32 4294901760, %v2920_v18 }
 0x47a   :  { %v27396_v1 = vpop.eup %27395 }
 0x4df   :  { %v2775_v55 = vpop.permute.xlu0 %2774 }
 0x4e0   :  { %v2777_v9 = vmul.f32 %v27396_v1, %v2775_v55  ;;  %v2810_v55 = vand.u32 4294901760, %v2792_v27 }
 0x4e2   :  { %2779 = vrot.lane.b32.xlu0 %v2777_v9, %s27746_s14  ;;  %v2772_v9 = vmul.f32 %v27396_v1, %v2770_v14  ;;  %v28872_v5 = vpack.c.bf16 %v2810_v55, %v2807_v40  ;;  %v2819_v1 = vand.u32 4294901760, %v2795_v45  ;;  %v2822_v14 = vand.u32 4294901760, %v2796_v50 }
 0x4e4   :  { %24433 = vmatpush3.bf16.msra.mxu1 %v28872_v5 }
 0x4e5   :  { %24434 = vmatprep.subr.bf16.mxu1 %v31605_v41 }
 0x4e8   :  { %24436 = vmatpush3.bf16.msra.mxu1 %v28879_v37 }
 0x4e9   :  { %24437 = vmatprep.subr.bf16.mxu1 %v31605_v41 }
 0x554   :  { %v2780_v46 = vpop.permute.xlu0 %2779 }
 0x555   :  { %v28874_v52 = vadd.f32 %v2780_v46, %v2772_v9  ;;  %v28885_v46 = vpack.c.bf16 %v2822_v14, %v2819_v1  ;;  %v2899_v9 = vsub.f32 %v2791_v35, %v2807_v40  ;;  %v2915_v35 = vsub.f32 %v2913_v22, %v2914_v31 }
 0x556   :  { %v2934_v40 = vsub.f32 %v2796_v50, %v2822_v14 }
 0x557   :  { %31804 = vst [vmem:[#allocation102_spill] sm:$0xff] %v28874_v52  ;;  %27397 = vtanh.f32 %v28874_v52  ;;  %v2906_v52 = vsub.f32 %v2792_v27, %v2810_v55  ;;  %24439 = vmatpush3.bf16.msra.mxu1 %v28885_v46  ;;  %v2900_v30 = vand.u32 4294901760, %v2899_v9  ;;  %v2927_v27 = vsub.f32 %v2795_v45, %v2819_v1 }
 0x558   :  { %24440 = vmatprep.subr.bf16.mxu1 %v31605_v41  ;;  %v2922_v55 = vsub.f32 %v2920_v18, %v2921_v17  ;;  %v2916_v41 = vand.u32 4294901760, %v2915_v35  ;;  %v2935_v6 = vand.u32 4294901760, %v2934_v40  ;;  %v28904_v45 = vpack.c.bf16 %v2921_v17, %v2914_v31 }
 0x559   :  { %v2907_v3 = vand.u32 4294901760, %v2906_v52  ;;  %v2901_v32 = vsub.f32 %v2899_v9, %v2900_v30  ;;  %v2928_v16 = vand.u32 4294901760, %v2927_v27  ;;  %27399 = vpow2.f32 %v22496_v4  ;;  %v31816_v4 = vld [vmem:[#allocation56_spill] sm:$0xff] }
 0x55a   :  { %v2923_v51 = vand.u32 4294901760, %v2922_v55  ;;  %v2936_v63 = vsub.f32 %v2934_v40, %v2935_v6  ;;  %31808 = vst [vmem:[#allocation106_spill] sm:$0xff] %v28904_v45  ;;  %v31813_v55 = vld [vmem:[#allocation54_spill] sm:$0xff] }
 0x55b   :  { %v2908_v26 = vsub.f32 %v2906_v52, %v2907_v3  ;;  %v2902_v36 = vand.u32 4294901760, %v2901_v32  ;;  %v2929_v39 = vsub.f32 %v2927_v27, %v2928_v16  ;;  %v28902_v50 = vpack.c.bf16 %v2907_v3, %v2900_v30 }
 0x55c   :  { %v28892_v15 = vpack.c.bf16 %v2923_v51, %v2916_v41  ;;  %v2937_v20 = vand.u32 4294901760, %v2936_v63  ;;  %v28906_v34 = vpack.c.bf16 %v2935_v6, %v2928_v16  ;;  %v31810_v63 = vand.u32 4294901760, %v28857_v2 }
 0x55d   :  { %v2909_v60 = vand.u32 4294901760, %v2908_v26  ;;  %v28896_v26 = vpack.c.bf16 %v2906_v52, %v2899_v9  ;;  %31807 = vst [vmem:[#allocation105_spill] sm:$0xff] %v28902_v50 }
 0x55e   :  { %31809 = vst [vmem:[#allocation107_spill] sm:$0xff] %v28906_v34  ;;  %v28912_v52 = vsub.f32 %v28857_v2, %v31810_v63  ;;  %v31819_v63 = vld [vmem:[#allocation59_spill] sm:$0xff] }
 0x55f   :  { %v28890_v42 = vpack.c.bf16 %v2909_v60, %v2902_v36  ;;  %v28898_v60 = vpack.c.bf16 %v2920_v18, %v2913_v22  ;;  %v28900_v36 = vpack.c.bf16 %v2934_v40, %v2927_v27  ;;  %v31811_v18 = vand.u32 4294901760, %v28859_v49 }
 0x560   :  { %v2886_v17 = vand.u32 4294901760, %v28912_v52 }
 0x561   :  { %v27398_v7 = vpop.eup %27397  ;;  %31805 = vst [vmem:[#allocation103_spill] sm:$0xff] %v28898_v60  ;;  %31806 = vst [vmem:[#allocation104_spill] sm:$0xff] %v28900_v36  ;;  %v28917_v22 = vsub.f32 %v28859_v49, %v31811_v18  ;;  %v31820_v18 = vld [vmem:[#allocation60_spill] sm:$0xff] }
 0x562   :  { %2785 = vrot.lane.b32.xlu1 %v27398_v7, %s27746_s14  ;;  %v2930_v7 = vand.u32 4294901760, %v2929_v39  ;;  %v2887_v38 = vsub.f32 %v28912_v52, %v2886_v17 }
 0x563   :  { %v27400_v51 = vpop.eup %27399  ;;  %v2893_v6 = vand.u32 4294901760, %v28917_v22 }
 0x564   :  { %v28894_v32 = vpack.c.bf16 %v2937_v20, %v2930_v7  ;;  %v2763_v39 = vadd.f32 1.0, %v27400_v51  ;;  %v2888_v1 = vand.u32 4294901760, %v2887_v38  ;;  %v31814_v7 = vmov 0.0|0.0   ;;  %v31815_v20 = vld [vmem:[#allocation55_spill] sm:$0xff]  ;;  %v31817_v51 = vld [vmem:[#allocation57_spill] sm:$0xff] }
 0x565   :  { %v2894_v2 = vsub.f32 %v28917_v22, %v2893_v6  ;;  %v31823_v38 = vld [vmem:[#allocation63_spill] sm:$0xff] }
 0x566   :  { %27401 = vrcp.f32 %v2763_v39  ;;  %v31818_v39 = vld [vmem:[#allocation58_spill] sm:$0xff] }
 0x567   :  { %v2895_v14 = vand.u32 4294901760, %v2894_v2  ;;  %v31824_v2 = vld [vmem:[#allocation64_spill] sm:$0xff] }
 0x569   :  { %v28937_v27 = vpack.c.bf16 %v2895_v14, %v2888_v1  ;;  %v31825_v1 = vld [vmem:[#allocation65_spill] sm:$0xff]  ;;  %v31826_v14 = vld [vmem:[#allocation66_spill] sm:$0xff] }
 0x570   :  { %v27402_v31 = vpop.eup %27401 }
 0x5d4   :  { %v2786_v3 = vpop.permute.xlu1 %2785 }
 0x5d5   :  { %v28921_v30 = vmul.f32 %v27402_v31, %v2786_v3  ;;  %v28958_v31 = vpack.c.bf16 %v28917_v22, %v28912_v52  ;;  %v31821_v3 = vld [vmem:[#allocation61_spill] sm:$0xff]  ;;  %v31833_v52 = vld [vmem:[#allocation72_spill] sm:$0xff] }
 0x5d6   :  { %v31834_v22 = vld [vmem:[#allocation73_spill] sm:$0xff] }
 0x5d7   :  { %31812 = vst [vmem:[#allocation108_spill] sm:$0xff] %v28921_v30  ;;  %v2798_v16 = vsel %vm107_vm0, %v28921_v30, 0  ;;  %v31830_v30 = vld [vmem:[#allocation69_spill] sm:$0xff] }
 0x5d8   :  { %v28931_v49 = vand.u32 4294901760, %v2798_v16 }
 0x5da   :  { %v2874_v41 = vsub.f32 %v2798_v16, %v28931_v49  ;;  %v31822_v16 = vld [vmem:[#allocation62_spill] sm:$0xff] }
 0x5dc   :  { %v28934_v9 = vand.u32 4294901760, %v2874_v41 }
 0x5de   :  { %v2876_v35 = vsub.f32 %v2874_v41, %v28934_v9 }
 0x5e0   :  { %v2877_v40 = vand.u32 4294901760, %v2876_v35  ;;  %v31827_v35 = vld [vmem:[#allocation67_spill] sm:$0xff] }
 0x5e2   :  { %23149 = vmatmul.mubr.f32.vlgmr.msra.gmra.mrb[4].mxu1 %v2877_v40  ;;  %4266 = vmatmul.mubr.f32.vlgmr.msra.gmra.mrb[4].mxu0 %v2877_v40  ;;  %v31828_v40 = vld [vmem:[#allocation68_spill] sm:$0xff] }
 0x5e3   :  { %24442 = vmatpush3.bf16.msra.mxu1 %v28937_v27  ;;  %24615 = vmatpush1.bf16.msra.mxu0 %v31813_v55 }
 0x5e4   :  { %24443 = vmatprep.subr.bf16.mxu1 %v31814_v7  ;;  %24617 = vmatprep.subr.bf16.mxu0 %v31815_v20 }
 0x5e5   :  { %23167 = vmatprep.mubr.msk.f32.mxu1 %vm27748_vm1, %v31729_v10  ;;  %4416 = vmatprep.mubr.f32.mxu0 %v31729_v10 }
 0x5e7   :  { %24445 = vmatpush3.bf16.msra.mxu1 %v28890_v42  ;;  %24619 = vmatpush1.bf16.msra.mxu0 %v31816_v4 }
 0x5e8   :  { %24446 = vmatprep.subr.bf16.mxu1 %v31814_v7  ;;  %24621 = vmatprep.subr.bf16.mxu0 %v31817_v51 }
 0x5eb   :  { %24448 = vmatpush3.bf16.msra.mxu1 %v28892_v15  ;;  %24623 = vmatpush1.bf16.msra.mxu0 %v31818_v39 }
 0x5ec   :  { %24449 = vmatprep.subr.bf16.mxu1 %v31814_v7  ;;  %24625 = vmatprep.subr.bf16.mxu0 %v31819_v63 }
 0x5ef   :  { %24451 = vmatpush3.bf16.msra.mxu1 %v28894_v32  ;;  %24627 = vmatpush1.bf16.msra.mxu0 %v31820_v18 }
 0x5f0   :  { %24452 = vmatprep.subr.bf16.mxu1 %v31814_v7  ;;  %24629 = vmatprep.subr.bf16.mxu0 %v31821_v3 }
 0x5f2   :  { %23168 = vmatmul.mubr.f32.vlgmr.msra.gmra.mrb[4].mxu1 %v28931_v49  ;;  %4418 = vmatmul.mubr.f32.vlgmr.msra.gmra.mrb[4].mxu0 %v28931_v49 }
 0x5f3   :  { %24454 = vmatpush3.bf16.msra.mxu1 %v28958_v31  ;;  %24631 = vmatpush1.bf16.msra.mxu0 %v31822_v16 }
 0x5f4   :  { %24455 = vmatprep.subr.bf16.mxu1 %v31814_v7  ;;  %24633 = vmatprep.subr.bf16.mxu0 %v31823_v38 }
 0x5f5   :  { %23186 = vmatprep.mubr.msk.f32.mxu1 %vm27748_vm1, %v31729_v10  ;;  %4520 = vmatprep.mubr.f32.mxu0 %v31729_v10 }
 0x5f7   :  { %24457 = vmatpush3.bf16.msra.mxu1 %v28896_v26  ;;  %24635 = vmatpush1.bf16.msra.mxu0 %v31824_v2 }
 0x5f8   :  { %24458 = vmatprep.subr.bf16.mxu1 %v31814_v7  ;;  %24637 = vmatprep.subr.bf16.mxu0 %v31825_v1  ;;  %v31855_v1 = vld [vmem:[#allocation28_spill] sm:$0xff] }
 0x5fb   :  { %24460 = vmatpush3.bf16.msra.mxu1 %v28898_v60  ;;  %24639 = vmatpush1.bf16.msra.mxu0 %v31826_v14  ;;  %v31852_v14 = vld [vmem:[#allocation25_spill] sm:$0xff]  ;;  %v31853_v60 = vld [vmem:[#allocation26_spill] sm:$0xff] }
 0x5fc   :  { %24461 = vmatprep.subr.bf16.mxu1 %v31814_v7  ;;  %24641 = vmatprep.subr.bf16.mxu0 %v31827_v35  ;;  %v31851_v35 = vld [vmem:[#allocation24_spill] sm:$0xff] }
 0x5ff   :  { %24463 = vmatpush3.bf16.msra.mxu1 %v28900_v36  ;;  %24643 = vmatpush1.bf16.msra.mxu0 %v31828_v40  ;;  %v31831_v40 = vld [vmem:[#allocation70_spill] sm:$0xff]  ;;  %v31832_v36 = vld [vmem:[#allocation71_spill] sm:$0xff] }
 0x600   :  { %24464 = vmatprep.subr.bf16.mxu1 %v31814_v7  ;;  %24645 = vmatprep.subr.bf16.mxu0 %v28335_v12 }
 0x602   :  { %23187 = vmatmul.mubr.f32.vlgmr.msra.gmra.mrb[4].mxu1 %v2874_v41  ;;  %4523 = vmatmul.mubr.f32.vlgmr.msra.gmra.mrb[4].mxu0 %v2874_v41  ;;  %v29004_v41 = vpack.c.bf16 %v2893_v6, %v2886_v17  ;;  %v31835_v17 = vld [vmem:[#allocation74_spill] sm:$0xff]  ;;  %v31836_v6 = vld [vmem:[#allocation75_spill] sm:$0xff] }
 0x603   :  { %24466 = vmatpush3.bf16.msra.mxu1 %v28868_v43  ;;  %24647 = vmatpush1.bf16.msra.mxu0 %v28341_v11 }
 0x604   :  { %24467 = vmatprep.subr.bf16.mxu1 %v31814_v7  ;;  %24649 = vmatprep.subr.bf16.mxu0 %v28343_v0  ;;  %31829 = vst [vmem:[#allocation54_spill] sm:$0xff] %v29004_v41 }
 0x605   :  { %23205 = vmatprep.mubr.msk.f32.mxu1 %vm27748_vm1, %v31729_v10  ;;  %4609 = vmatprep.mubr.f32.mxu0 %v31729_v10 }
 0x607   :  { %24469 = vmatpush3.bf16.msra.mxu1 %v28872_v5  ;;  %24651 = vmatpush1.bf16.msra.mxu0 %v28351_v24 }
 0x608   :  { %24470 = vmatprep.subr.bf16.mxu1 %v31814_v7  ;;  %24653 = vmatprep.subr.bf16.mxu0 %v31794_v53 }
 0x60b   :  { %24472 = vmatpush3.bf16.msra.mxu1 %v28879_v37  ;;  %24655 = vmatpush1.bf16.msra.mxu0 %v31795_v59 }
 0x60c   :  { %24473 = vmatprep.subr.bf16.mxu1 %v31814_v7  ;;  %24657 = vmatprep.subr.bf16.mxu0 %v31796_v33 }
 0x60f   :  { %24475 = vmatpush3.bf16.msra.mxu1 %v28885_v46  ;;  %24659 = vmatpush1.bf16.msra.mxu0 %v31797_v44 }
 0x610   :  { %24476 = vmatprep.subr.bf16.mxu1 %v31814_v7  ;;  %24661 = vmatprep.subr.bf16.mxu0 %v31830_v30  ;;  %v31850_v30 = vld [vmem:[#allocation23_spill] sm:$0xff] }
 0x612   :  { %23206 = vmatmul.mubr.f32.vlgmr.msra.gmra.mrb[4].mxu1 %v28934_v9  ;;  %4613 = vmatmul.mubr.f32.vlgmr.msra.gmra.mrb[4].mxu0 %v28934_v9  ;;  %v31837_v9 = vld [vmem:[#allocation76_spill] sm:$0xff] }
 0x613   :  { %24478 = vmatpush3.bf16.msra.mxu1 %v29004_v41  ;;  %24663 = vmatpush1.bf16.msra.mxu0 %v31831_v40  ;;  %v31848_v40 = vld [vmem:[#allocation21_spill] sm:$0xff]  ;;  %v31849_v41 = vld [vmem:[#allocation22_spill] sm:$0xff] }
 0x614   :  { %24479 = vmatprep.subr.bf16.mxu1 %v31814_v7  ;;  %24665 = vmatprep.subr.bf16.mxu0 %v31832_v36  ;;  %v31847_v36 = vld [vmem:[#allocation78_spill] sm:$0xff] }
 0x615   :  { %23224 = vmatprep.mubr.msk.f32.mxu1 %vm27748_vm1, %v31729_v10  ;;  %4731 = vmatprep.mubr.f32.mxu0 %v31729_v10 }
 0x617   :  { %24481 = vmatpush3.bf16.msra.mxu1 %v28902_v50  ;;  %24667 = vmatpush1.bf16.msra.mxu0 %v31833_v52  ;;  %v31845_v52 = vld [vmem:[#allocation19_spill] sm:$0xff]  ;;  %v31846_v50 = vld [vmem:[#allocation20_spill] sm:$0xff] }
 0x618   :  { %24482 = vmatprep.subr.bf16.mxu1 %v31814_v7  ;;  %24669 = vmatprep.subr.bf16.mxu0 %v31834_v22  ;;  %v31844_v22 = vld [vmem:[#allocation18_spill] sm:$0xff] }
 0x61b   :  { %24484 = vmatpush3.bf16.msra.mxu1 %v28904_v45  ;;  %24671 = vmatpush1.bf16.msra.mxu0 %v31835_v17  ;;  %v31841_v17 = vld [vmem:[#allocation15_spill] sm:$0xff]  ;;  %v31842_v45 = vld [vmem:[#allocation16_spill] sm:$0xff] }
 0x61c   :  { %24485 = vmatprep.subr.bf16.mxu1 %v31814_v7  ;;  %24673 = vmatprep.subr.bf16.mxu0 %v31836_v6  ;;  %v31840_v6 = vld [vmem:[#allocation14_spill] sm:$0xff] }
 0x61f   :  { %24487 = vmatpush3.bf16.msra.mxu1 %v28906_v34  ;;  %24675 = vmatpush1.bf16.msra.mxu0 %v31837_v9  ;;  %v31838_v9 = vld [vmem:[#allocation12_spill] sm:$0xff]  ;;  %v31839_v34 = vld [vmem:[#allocation13_spill] sm:$0xff] }
 0x620   :  { %24488 = vmatprep.subr.bf16.mxu1 %v31814_v7  ;;  %24677 = vmatprep.subr.bf16.mxu0 %v28335_v12 }
 0x622   :  { %23225 = vmatmul.mubr.f32.vlgmr.msra.gmra.mrb[4].mxu1 %v28931_v49  ;;  %4733 = vmatmul.mubr.f32.vlgmr.msra.gmra.mrb[4].mxu0 %v28931_v49 }
 0x623   :  { %24490 = vmatpush3.bf16.msra.mxu1 %v28868_v43  ;;  %24679 = vmatpush1.bf16.msra.mxu0 %v28341_v11 }
 0x624   :  { %24491 = vmatprep.subr.bf16.mxu1 %v31814_v7  ;;  %24681 = vmatprep.subr.bf16.mxu0 %v28343_v0 }
 0x625   :  { %23243 = vmatprep.mubr.msk.f32.mxu1 %vm27748_vm1, %v31729_v10  ;;  %4819 = vmatprep.mubr.f32.mxu0 %v31729_v10 }
 0x627   :  { %24493 = vmatpush3.bf16.msra.mxu1 %v28872_v5  ;;  %24683 = vmatpush1.bf16.msra.mxu0 %v28351_v24 }
 0x628   :  { %24494 = vmatprep.subr.bf16.mxu1 %v31814_v7  ;;  %24685 = vmatprep.subr.bf16.mxu0 %v31794_v53 }
 0x62b   :  { %24496 = vmatpush3.bf16.msra.mxu1 %v28879_v37  ;;  %24687 = vmatpush1.bf16.msra.mxu0 %v31795_v59 }
 0x62c   :  { %24497 = vmatprep.subr.bf16.mxu1 %v31814_v7  ;;  %24689 = vmatprep.subr.bf16.mxu0 %v31796_v33 }
 0x62f   :  { %24499 = vmatpush3.bf16.msra.mxu1 %v28885_v46  ;;  %24691 = vmatpush1.bf16.msra.mxu0 %v31797_v44 }
 0x630   :  { %24501 = vmatprep.subr.bf16.mxu1 %v31838_v9  ;;  %24693 = vmatprep.subr.bf16.mxu0 %v28626_v57 }
 0x632   :  { %23244 = vmatmul.mubr.f32.vlgmr.msra.gmra.mrb[4].mxu1 %v28931_v49  ;;  %4821 = vmatmul.mubr.f32.vlgmr.msra.gmra.mrb[4].mxu0 %v28931_v49  ;;  %v31843_v49 = vld [vmem:[#allocation17_spill] sm:$0xff] }
 0x633   :  { %24503 = vmatpush1.bf16.msra.mxu1 %v31839_v34  ;;  %3573 = vmatprep.mubr.f32.mxu1 %v31729_v10 }
 0x634   :  { %24505 = vmatprep.subr.bf16.mxu1 %v31840_v6  ;;  %24695 = vmatpush1.bf16.msra.mxu0 %v28633_v62 }
 0x635   :  { %24697 = vmatprep.subr.bf16.mxu0 %v28640_v23  ;;  %4910 = vmatprep.mubr.f32.mxu0 %v31729_v10 }
 0x637   :  { %24507 = vmatpush1.bf16.msra.mxu1 %v31841_v17 }
 0x638   :  { %24509 = vmatprep.subr.bf16.mxu1 %v31842_v45  ;;  %24699 = vmatpush1.bf16.msra.mxu0 %v28642_v21 }
 0x639   :  { %24701 = vmatprep.subr.bf16.mxu0 %v28649_v58 }
 0x63b   :  { %24511 = vmatpush1.bf16.msra.mxu1 %v31843_v49 }
 0x63c   :  { %24513 = vmatprep.subr.bf16.mxu1 %v31844_v22  ;;  %24703 = vmatpush1.bf16.msra.mxu0 %v28655_v19 }
 0x63d   :  { %24705 = vmatprep.subr.bf16.mxu0 %v28661_v54 }
 0x63f   :  { %24515 = vmatpush1.bf16.msra.mxu1 %v31845_v52 }
 0x640   :  { %24517 = vmatprep.subr.bf16.mxu1 %v31846_v50  ;;  %24707 = vmatpush1.bf16.msra.mxu0 %v28669_v56  ;;  %v31854_v50 = vld [vmem:[#allocation27_spill] sm:$0xff] }
 0x641   :  { %24709 = vmatprep.subr.bf16.mxu0 %v31847_v36 }
 0x642   :  { %3579 = vmatmul.mubr.f32.vlgmr.msra.gmra.mrb[6].mxu1 %v28769_v8  ;;  %v31856_v8 = vld [vmem:[#allocation29_spill] sm:$0xff] }
 0x643   :  { %24519 = vmatpush1.bf16.msra.mxu1 %v31848_v40  ;;  %3729 = vmatprep.mubr.f32.mxu1 %v31729_v10  ;;  %v31857_v40 = vld [vmem:[#allocation30_spill] sm:$0xff] }
 0x644   :  { %24521 = vmatprep.subr.bf16.mxu1 %v31849_v41  ;;  %v31858_v41 = vld [vmem:[#allocation31_spill] sm:$0xff] }
 0x647   :  { %24523 = vmatpush1.bf16.msra.mxu1 %v31850_v30  ;;  %v31859_v30 = vld [vmem:[#allocation32_spill] sm:$0xff] }
 0x648   :  { %24525 = vmatprep.subr.bf16.mxu1 %v31851_v35  ;;  %v31860_v35 = vld [vmem:[#allocation33_spill] sm:$0xff] }
 0x64b   :  { %24527 = vmatpush1.bf16.msra.mxu1 %v31852_v14  ;;  %v31861_v14 = vld [vmem:[#allocation34_spill] sm:$0xff] }
 0x64c   :  { %24529 = vmatprep.subr.bf16.mxu1 %v31853_v60  ;;  %v31862_v60 = vld [vmem:[#allocation35_spill] sm:$0xff] }
 0x64f   :  { %24531 = vmatpush1.bf16.msra.mxu1 %v31854_v50 }
 0x650   :  { %24533 = vmatprep.subr.bf16.mxu1 %v31855_v1 }
 0x652   :  { %3731 = vmatmul.mubr.f32.vlgmr.msra.gmra.mrb[6].mxu1 %v28757_v47 }
 0x653   :  { %24535 = vmatpush1.bf16.msra.mxu1 %v31856_v8  ;;  %3833 = vmatprep.mubr.f32.mxu1 %v31729_v10  ;;  %v31870_v8 = vld [vmem:[#allocation43_spill] sm:$0xff] }
 0x654   :  { %24537 = vmatprep.subr.bf16.mxu1 %v31857_v40  ;;  %v31869_v40 = vld [vmem:[#allocation42_spill] sm:$0xff] }
 0x657   :  { %24539 = vmatpush1.bf16.msra.mxu1 %v31858_v41  ;;  %v31868_v41 = vld [vmem:[#allocation41_spill] sm:$0xff] }
 0x658   :  { %24541 = vmatprep.subr.bf16.mxu1 %v31859_v30  ;;  %v31867_v30 = vld [vmem:[#allocation40_spill] sm:$0xff] }
 0x65b   :  { %24543 = vmatpush1.bf16.msra.mxu1 %v31860_v35  ;;  %v31866_v35 = vld [vmem:[#allocation39_spill] sm:$0xff] }
 0x65c   :  { %24545 = vmatprep.subr.bf16.mxu1 %v31861_v14  ;;  %v31865_v14 = vld [vmem:[#allocation38_spill] sm:$0xff] }
 0x65f   :  { %24547 = vmatpush1.bf16.msra.mxu1 %v31862_v60  ;;  %v31863_v60 = vld [vmem:[#allocation36_spill] sm:$0xff] }
 0x660   :  { %24549 = vmatprep.subr.bf16.mxu1 %v31838_v9 }
 0x662   :  { %3836 = vmatmul.mubr.f32.vlgmr.msra.gmra.mrb[6].mxu1 %v28760_v13  ;;  %v31864_v13 = vld [vmem:[#allocation37_spill] sm:$0xff] }
 0x663   :  { %24551 = vmatpush1.bf16.msra.mxu1 %v31839_v34  ;;  %3922 = vmatprep.mubr.f32.mxu1 %v31729_v10 }
 0x664   :  { %24553 = vmatprep.subr.bf16.mxu1 %v31840_v6 }
 0x667   :  { %24555 = vmatpush1.bf16.msra.mxu1 %v31841_v17 }
 0x668   :  { %24557 = vmatprep.subr.bf16.mxu1 %v31842_v45 }
 0x66b   :  { %24559 = vmatpush1.bf16.msra.mxu1 %v31843_v49 }
 0x66c   :  { %24561 = vmatprep.subr.bf16.mxu1 %v31844_v22 }
 0x66f   :  { %24563 = vmatpush1.bf16.msra.mxu1 %v31845_v52 }
 0x670   :  { %24565 = vmatprep.subr.bf16.mxu1 %v31863_v60 }
 0x672   :  { %3926 = vmatmul.mubr.f32.vlgmr.msra.gmra.mrb[6].mxu1 %v28763_v25 }
 0x673   :  { %24567 = vmatpush1.bf16.msra.mxu1 %v31864_v13  ;;  %4044 = vmatprep.mubr.f32.mxu1 %v31729_v10 }
 0x674   :  { %24569 = vmatprep.subr.bf16.mxu1 %v31865_v14 }
 0x677   :  { %24571 = vmatpush1.bf16.msra.mxu1 %v31866_v35  ;;  %v31872_v35 = vld [vmem:[#allocation48_spill] sm:$0xff] }
 0x678   :  { %24573 = vmatprep.subr.bf16.mxu1 %v31867_v30  ;;  %v22498_v30 = vld [vmem:[%s31399_s0 + $0x4] sm:$0xf] }
 0x67b   :  { %24575 = vmatpush1.bf16.msra.mxu1 %v31868_v41 }
 0x67c   :  { %24577 = vmatprep.subr.bf16.mxu1 %v31869_v40 }
 0x67f   :  { %24579 = vmatpush1.bf16.msra.mxu1 %v31870_v8 }
 0x680   :  { %24581 = vmatprep.subr.bf16.mxu1 %v31838_v9 }
 0x682   :  { %4046 = vmatmul.mubr.f32.vlgmr.msra.gmra.mrb[6].mxu1 %v28757_v47 }
 0x683   :  { %24583 = vmatpush1.bf16.msra.mxu1 %v31839_v34  ;;  %4132 = vmatprep.mubr.f32.mxu1 %v31729_v10 }
 0x684   :  { %24585 = vmatprep.subr.bf16.mxu1 %v31840_v6 }
 0x687   :  { %24587 = vmatpush1.bf16.msra.mxu1 %v31841_v17 }
 0x688   :  { %24589 = vmatprep.subr.bf16.mxu1 %v31842_v45 }
 0x68b   :  { %24591 = vmatpush1.bf16.msra.mxu1 %v31843_v49 }
 0x68c   :  { %24593 = vmatprep.subr.bf16.mxu1 %v31844_v22 }
 0x68f   :  { %24595 = vmatpush1.bf16.msra.mxu1 %v31845_v52 }
 0x690   :  { %24788 = vmatprep.subr.bf16.mxu1 %v31814_v7 }
 0x692   :  { %4134 = vmatmul.mubr.f32.vlgmr.msra.gmra.mrb[6].mxu1 %v28757_v47 }
 0x693   :  { %24790 = vmatpush3.bf16.msra.mxu1 %v28868_v43  ;;  %23262 = vmatprep.mubr.msk.f32.mxu1 %vm27748_vm1, %v31729_v10 }
 0x694   :  { %24791 = vmatprep.subr.bf16.mxu1 %v31814_v7 }
 0x697   :  { %24793 = vmatpush3.bf16.msra.mxu1 %v28872_v5 }
 0x698   :  { %24794 = vmatprep.subr.bf16.mxu1 %v31814_v7 }
 0x69b   :  { %24796 = vmatpush3.bf16.msra.mxu1 %v28879_v37 }
 0x69c   :  { %24797 = vmatprep.subr.bf16.mxu1 %v31814_v7 }
 0x69f   :  { %24799 = vmatpush3.bf16.msra.mxu1 %v28885_v46 }
 0x6a0   :  { %24800 = vmatprep.subr.bf16.mxu1 %v31814_v7 }
 0x705   :  { %v29131_v47 = vpop.f32.mrb[4].mxu1 }
 0x706   :  { %31871 = vst [vmem:[#allocation55_spill] sm:$0xff] %v29131_v47  ;;  %v23245_v25 = vpop.f32.mrb[5].mxu1 }
 0x765   :  { %v4135_v8 = vpop.f32.mrb[6].mxu1 }
 0x766   :  { %v4137_v40 = vpop.f32.mrb[7].mxu1 }
 0x767   :  { %v4142_v41 = vcombine.low %v4135_v8, %v4137_v40  ;;  %v31873_v8 = vld [vmem:[#allocation77_spill] sm:$0xff] }
 0x769   :  { %v4149_v14 = vrot.slane %v4142_v41, %v31872_v35 }
 0x76b   :  { %v4151_v13 = vadd.f32 %v22498_v30, %v4149_v14 }
 0x76d   :  { %4159 = vrot.lane.b32.xlu0 %v4151_v13, %s27746_s14  ;;  %v22499_v60 = vmul.f32 -1.442695, %v4151_v13 }
 0x76f   :  { %27403 = vpow2.f32 %v22499_v60 }
 0x779   :  { %v27404_v1 = vpop.eup %27403 }
 0x77a   :  { %v4155_v50 = vadd.f32 1.0, %v27404_v1 }
 0x77c   :  { %27405 = vrcp.f32 %v4155_v50 }
 0x786   :  { %v27406_v25 = vpop.eup %27405 }
 0x787   :  { %v4164_v22 = vmul.f32 %v27406_v25, %v31873_v8  ;;  %v4173_v60 = vrot.slane %v27406_v25, 2  ;;  %v31878_v8 = vld [vmem:[#allocation85_spill] sm:$0xff] }
 0x7df   :  { %v4160_v36 = vpop.permute.xlu0 %4159 }
 0x7e0   :  { %v4161_v52 = vrot.slane %v4160_v36, 2 }
 0x7e2   :  { %27407 = vtanh.f32 %v4161_v52 }
 0x7ec   :  { %v27408_v47 = vpop.eup %27407 }
 0x7ed   :  { %v4165_v40 = vmul.f32 %v27408_v47, %v27406_v25  ;;  %v31875_v47 = vld [vmem:[#allocation82_spill] sm:$0xff]  ;;  %v31876_v25 = vld [vmem:[#allocation83_spill] sm:$0xff] }
 0x7ef   :  { %4167 = vrot.lane.b32.xlu1 %v4165_v40, %s27746_s14  ;;  %v31877_v40 = vld [vmem:[#allocation84_spill] sm:$0xff] }
 0x861   :  { %v4168_v49 = vpop.permute.xlu1 %4167 }
 0x862   :  { %v29140_v41 = vadd.f32 %v4168_v49, %v4164_v22 }
 0x864   :  { %31874 = vst [vmem:[#allocation56_spill] sm:$0xff] %v29140_v41  ;;  %27409 = vtanh.f32 %v29140_v41 }
 0x86e   :  { %v27410_v30 = vpop.eup %27409 }
 0x86f   :  { %4176 = vrot.lane.b32.xlu0 %v27410_v30, %s27746_s14  ;;  %v31879_v30 = vld [vmem:[#allocation100_spill] sm:$0xff] }
 0x8e1   :  { %v4177_v1 = vpop.permute.xlu0 %4176 }
 0x8e2   :  { %v4179_v36 = vmul.f32 %v4177_v1, %v4173_v60  ;;  %v31880_v60 = vld [vmem:[#allocation86_spill] sm:$0xff]  ;;  %v31881_v1 = vld [vmem:[#allocation87_spill] sm:$0xff] }
 0x8e4   :  { %v4828_v50 = vsel %vm107_vm0, %v4179_v36, 0  ;;  %v31882_v36 = vld [vmem:[#allocation88_spill] sm:$0xff] }
 0x8e5   :  { %v29145_v14 = vand.u32 4294901760, %v4828_v50 }
 0x8e7   :  { %v29148_v52 = vsub.f32 %v4828_v50, %v29145_v14  ;;  %v31883_v50 = vld [vmem:[#allocation89_spill] sm:$0xff] }
 0x8e9   :  { %v29151_v13 = vand.u32 4294901760, %v29148_v52 }
 0x8eb   :  { %v4914_v22 = vsub.f32 %v29148_v52, %v29151_v13 }
 0x8ed   :  { %v29155_v49 = vand.u32 4294901760, %v4914_v22  ;;  %v31884_v22 = vld [vmem:[#allocation90_spill] sm:$0xff] }
 0x8ef   :  { %4916 = vmatmul.mubr.f32.vlgmr.msra.gmra.mrb[4].mxu0 %v29155_v49 }
 0x8f0   :  { %24711 = vmatpush1.bf16.msra.mxu0 %v28767_v48  ;;  %5066 = vmatprep.mubr.f32.mxu0 %v31729_v10 }
 0x8f1   :  { %24713 = vmatprep.subr.bf16.mxu0 %v28695_v28 }
 0x8f4   :  { %24715 = vmatpush1.bf16.msra.mxu0 %v28697_v29 }
 0x8f5   :  { %24717 = vmatprep.subr.bf16.mxu0 %v28701_v61 }
 0x8f8   :  { %24719 = vmatpush1.bf16.msra.mxu0 %v31875_v47 }
 0x8f9   :  { %24721 = vmatprep.subr.bf16.mxu0 %v31876_v25  ;;  %v31885_v25 = vld [vmem:[#allocation91_spill] sm:$0xff] }
 0x8fc   :  { %24723 = vmatpush1.bf16.msra.mxu0 %v31877_v40 }
 0x8fd   :  { %24725 = vmatprep.subr.bf16.mxu0 %v31878_v8  ;;  %v31893_v8 = vld [vmem:[#allocation98_spill] sm:$0xff] }
 0x8ff   :  { %5068 = vmatmul.mubr.f32.vlgmr.msra.gmra.mrb[4].mxu0 %v29145_v14 }
 0x900   :  { %24727 = vmatpush1.bf16.msra.mxu0 %v31879_v30  ;;  %5170 = vmatprep.mubr.f32.mxu0 %v31729_v10  ;;  %v31892_v30 = vld [vmem:[#allocation97_spill] sm:$0xff] }
 0x901   :  { %24729 = vmatprep.subr.bf16.mxu0 %v31880_v60  ;;  %v31891_v60 = vld [vmem:[#allocation96_spill] sm:$0xff] }
 0x904   :  { %24731 = vmatpush1.bf16.msra.mxu0 %v31881_v1  ;;  %v31890_v1 = vld [vmem:[#allocation95_spill] sm:$0xff] }
 0x905   :  { %24733 = vmatprep.subr.bf16.mxu0 %v31882_v36  ;;  %v31889_v36 = vld [vmem:[#allocation94_spill] sm:$0xff] }
 0x908   :  { %24735 = vmatpush1.bf16.msra.mxu0 %v31883_v50  ;;  %v31888_v50 = vld [vmem:[#allocation93_spill] sm:$0xff] }
 0x909   :  { %24737 = vmatprep.subr.bf16.mxu0 %v31884_v22  ;;  %v31887_v22 = vld [vmem:[#allocation101_spill] sm:$0xff] }
 0x90c   :  { %24739 = vmatpush1.bf16.msra.mxu0 %v31885_v25  ;;  %v31886_v25 = vld [vmem:[#allocation92_spill] sm:$0xff] }
 0x90d   :  { %24741 = vmatprep.subr.bf16.mxu0 %v28626_v57 }
 0x90f   :  { %5173 = vmatmul.mubr.f32.vlgmr.msra.gmra.mrb[4].mxu0 %v29148_v52 }
 0x910   :  { %24743 = vmatpush1.bf16.msra.mxu0 %v28633_v62  ;;  %5259 = vmatprep.mubr.f32.mxu0 %v31729_v10 }
 0x911   :  { %24745 = vmatprep.subr.bf16.mxu0 %v28640_v23 }
 0x914   :  { %24747 = vmatpush1.bf16.msra.mxu0 %v28642_v21 }
 0x915   :  { %24749 = vmatprep.subr.bf16.mxu0 %v28649_v58 }
 0x918   :  { %24751 = vmatpush1.bf16.msra.mxu0 %v28655_v19 }
 0x919   :  { %24753 = vmatprep.subr.bf16.mxu0 %v28661_v54 }
 0x91c   :  { %24755 = vmatpush1.bf16.msra.mxu0 %v28669_v56 }
 0x91d   :  { %24757 = vmatprep.subr.bf16.mxu0 %v31886_v25 }
 0x91f   :  { %5263 = vmatmul.mubr.f32.vlgmr.msra.gmra.mrb[4].mxu0 %v29151_v13 }
 0x920   :  { %24759 = vmatpush1.bf16.msra.mxu0 %v31887_v22  ;;  %5381 = vmatprep.mubr.f32.mxu0 %v31729_v10  ;;  %v31896_v22 = vld [vmem:[#allocation52_spill] sm:$0xff] }
 0x921   :  { %24761 = vmatprep.subr.bf16.mxu0 %v31888_v50 }
 0x924   :  { %24763 = vmatpush1.bf16.msra.mxu0 %v31889_v36 }
 0x925   :  { %24765 = vmatprep.subr.bf16.mxu0 %v31890_v1  ;;  %v31895_v1 = vld [vmem:[#allocation50_spill] sm:$0xff] }
 0x928   :  { %24767 = vmatpush1.bf16.msra.mxu0 %v31891_v60 }
 0x929   :  { %24769 = vmatprep.subr.bf16.mxu0 %v31892_v30 }
 0x92c   :  { %24771 = vmatpush1.bf16.msra.mxu0 %v31893_v8  ;;  %v31894_v8 = vld [vmem:[#allocation53_spill] sm:$0xff] }
 0x92d   :  { %24773 = vmatprep.subr.bf16.mxu0 %v28626_v57 }
 0x92f   :  { %5383 = vmatmul.mubr.f32.vlgmr.msra.gmra.mrb[4].mxu0 %v29145_v14 }
 0x930   :  { %24775 = vmatpush1.bf16.msra.mxu0 %v28633_v62  ;;  %5469 = vmatprep.mubr.f32.mxu0 %v31729_v10 }
 0x931   :  { %24777 = vmatprep.subr.bf16.mxu0 %v28640_v23 }
 0x934   :  { %24779 = vmatpush1.bf16.msra.mxu0 %v28642_v21 }
 0x935   :  { %24781 = vmatprep.subr.bf16.mxu0 %v28649_v58 }
 0x938   :  { %24783 = vmatpush1.bf16.msra.mxu0 %v28655_v19 }
 0x939   :  { %24785 = vmatprep.subr.bf16.mxu0 %v28661_v54 }
 0x93c   :  { %24787 = vmatpush1.bf16.msra.mxu0 %v28669_v56 }
 0x93d   :  { %24957 = vmatprep.subr.bf16.mxu0 %v28335_v12 }
 0x93f   :  { %5471 = vmatmul.mubr.f32.vlgmr.msra.gmra.mrb[4].mxu0 %v29145_v14 }
 0x940   :  { %24959 = vmatpush1.bf16.msra.mxu0 %v28341_v11  ;;  %6962 = vmatprep.mubr.f32.mxu0 %v31729_v10 }
 0x941   :  { %24961 = vmatprep.subr.bf16.mxu0 %v28343_v0 }
 0x944   :  { %24963 = vmatpush1.bf16.msra.mxu0 %v28351_v24 }
 0x945   :  { %24965 = vmatprep.subr.bf16.mxu0 %v31794_v53 }
 0x948   :  { %24967 = vmatpush1.bf16.msra.mxu0 %v31795_v59 }
 0x949   :  { %24969 = vmatprep.subr.bf16.mxu0 %v31796_v33 }
 0x94c   :  { %24971 = vmatpush1.bf16.msra.mxu0 %v31797_v44 }
 0x94d   :  { %24973 = vmatprep.subr.bf16.mxu0 %v31894_v8  ;;  %v31897_v8 = vld [vmem:[#allocation102_spill] sm:$0xff] }
 0xa12   :  { %v5472_v30 = vpop.f32.mrb[4].mxu0 }
 0xa13   :  { %v5474_v60 = vpop.f32.mrb[5].mxu0  ;;  %v5477_v25 = vadd.f32 %v5472_v30, %v31896_v22 }
 0xa14   :  { %v5478_v36 = vadd.f32 %v5474_v60, %v31895_v1 }
 0xa15   :  { %v22500_v40 = vmul.f32 -1.442695, %v5477_v25 }
 0xa16   :  { %27411 = vtanh.f32 %v5478_v36  ;;  %v22501_v25 = vmul.f32 -1.442695, %v5478_v36 }
 0xa17   :  { %27413 = vpow2.f32 %v22500_v40 }
 0xa20   :  { %v27412_v50 = vpop.eup %27411 }
 0xa21   :  { %5494 = vrot.lane.b32.xlu1 %v27412_v50, %s27746_s14  ;;  %v27414_v47 = vpop.eup %27413 }
 0xa22   :  { %v5485_v61 = vadd.f32 1.0, %v27414_v47 }
 0xa24   :  { %27415 = vrcp.f32 %v5485_v61 }
 0xa2e   :  { %v27416_v29 = vpop.eup %27415 }
 0xa2f   :  { %v5492_v41 = vmul.f32 %v27416_v29, %v31897_v8 }
 0xa93   :  { %v5495_v28 = vpop.permute.xlu1 %5494 }
 0xa94   :  { %v5497_v48 = vmul.f32 %v27416_v29, %v5495_v28 }
 0xa96   :  { %5499 = vrot.lane.b32.xlu0 %v5497_v48, %s27746_s14 }
 0xb08   :  { %v5500_v35 = vpop.permute.xlu0 %5499 }
 0xb09   :  { %v29222_v60 = vadd.f32 %v5500_v35, %v5492_v41 }
 0xb0b   :  { %27417 = vtanh.f32 %v29222_v60 }
 0xb0c   :  { %27419 = vpow2.f32 %v22501_v25  ;;  %v31900_v25 = vld [vmem:[#allocation103_spill] sm:$0xff] }
 0xb15   :  { %v27418_v50 = vpop.eup %27417 }
 0xb16   :  { %5505 = vrot.lane.b32.xlu1 %v27418_v50, %s27746_s14  ;;  %v27420_v40 = vpop.eup %27419  ;;  %v31899_v50 = vld [vmem:[#allocation65_spill] sm:$0xff] }
 0xb17   :  { %v5486_v47 = vadd.f32 1.0, %v27420_v40  ;;  %v31901_v40 = vld [vmem:[#allocation66_spill] sm:$0xff] }
 0xb19   :  { %27421 = vrcp.f32 %v5486_v47  ;;  %v31902_v47 = vld [vmem:[#allocation67_spill] sm:$0xff] }
 0xb23   :  { %v27422_v61 = vpop.eup %27421 }
 0xb88   :  { %v5506_v30 = vpop.permute.xlu1 %5505 }
 0xb89   :  { %v29226_v28 = vmul.f32 %v27422_v61, %v5506_v30  ;;  %v31903_v61 = vld [vmem:[#allocation104_spill] sm:$0xff] }
 0xb8a   :  { %v31904_v30 = vld [vmem:[#allocation68_spill] sm:$0xff] }
 0xb8b   :  { %31898 = vst [vmem:[#allocation57_spill] sm:$0xff] %v29226_v28  ;;  %v5510_v29 = vsel %vm107_vm0, %v29226_v28, 0  ;;  %v31909_v28 = vld [vmem:[#allocation105_spill] sm:$0xff] }
 0xb8c   :  { %v29230_v48 = vand.u32 4294901760, %v5510_v29 }
 0xb8e   :  { %v5586_v35 = vsub.f32 %v5510_v29, %v29230_v48  ;;  %v31905_v29 = vld [vmem:[#allocation69_spill] sm:$0xff] }
 0xb90   :  { %v29233_v41 = vand.u32 4294901760, %v5586_v35 }
 0xb92   :  { %v5588_v8 = vsub.f32 %v5586_v35, %v29233_v41 }
 0xb94   :  { %v5589_v36 = vand.u32 4294901760, %v5588_v8  ;;  %v31907_v8 = vld [vmem:[#allocation70_spill] sm:$0xff] }
 0xb96   :  { %23263 = vmatmul.mubr.f32.vlgmr.msra.gmra.mrb[8].mxu1 %v5589_v36  ;;  %6968 = vmatmul.mubr.f32.vlgmr.msra.gmra.mrb[6].mxu0 %v5589_v36  ;;  %v31908_v36 = vld [vmem:[#allocation71_spill] sm:$0xff] }
 0xb97   :  { %24802 = vmatpush3.bf16.msra.mxu1 %v28937_v27  ;;  %24975 = vmatpush1.bf16.msra.mxu0 %v31813_v55 }
 0xb98   :  { %24803 = vmatprep.subr.bf16.mxu1 %v31814_v7  ;;  %24977 = vmatprep.subr.bf16.mxu0 %v31815_v20 }
 0xb99   :  { %23281 = vmatprep.mubr.msk.f32.mxu1 %vm27748_vm1, %v31729_v10  ;;  %7118 = vmatprep.mubr.f32.mxu0 %v31729_v10 }
 0xb9b   :  { %24805 = vmatpush3.bf16.msra.mxu1 %v28890_v42  ;;  %24979 = vmatpush1.bf16.msra.mxu0 %v31816_v4 }
 0xb9c   :  { %24806 = vmatprep.subr.bf16.mxu1 %v31814_v7  ;;  %24981 = vmatprep.subr.bf16.mxu0 %v31817_v51 }
 0xb9f   :  { %24808 = vmatpush3.bf16.msra.mxu1 %v28892_v15  ;;  %24983 = vmatpush1.bf16.msra.mxu0 %v31818_v39 }
 0xba0   :  { %24809 = vmatprep.subr.bf16.mxu1 %v31814_v7  ;;  %24985 = vmatprep.subr.bf16.mxu0 %v31819_v63 }
 0xba3   :  { %24811 = vmatpush3.bf16.msra.mxu1 %v28894_v32  ;;  %24987 = vmatpush1.bf16.msra.mxu0 %v31820_v18 }
 0xba4   :  { %24812 = vmatprep.subr.bf16.mxu1 %v31814_v7  ;;  %24989 = vmatprep.subr.bf16.mxu0 %v31821_v3 }
 0xba6   :  { %23282 = vmatmul.mubr.f32.vlgmr.msra.gmra.mrb[8].mxu1 %v29230_v48  ;;  %7120 = vmatmul.mubr.f32.vlgmr.msra.gmra.mrb[6].mxu0 %v29230_v48 }
 0xba7   :  { %24814 = vmatpush3.bf16.msra.mxu1 %v28958_v31  ;;  %24991 = vmatpush1.bf16.msra.mxu0 %v31822_v16 }
 0xba8   :  { %24815 = vmatprep.subr.bf16.mxu1 %v31814_v7  ;;  %24993 = vmatprep.subr.bf16.mxu0 %v31823_v38 }
 0xba9   :  { %23300 = vmatprep.mubr.msk.f32.mxu1 %vm27748_vm1, %v31729_v10  ;;  %7222 = vmatprep.mubr.f32.mxu0 %v31729_v10 }
 0xbab   :  { %24817 = vmatpush3.bf16.msra.mxu1 %v28896_v26  ;;  %24995 = vmatpush1.bf16.msra.mxu0 %v31824_v2 }
 0xbac   :  { %24818 = vmatprep.subr.bf16.mxu1 %v31814_v7  ;;  %24997 = vmatprep.subr.bf16.mxu0 %v31899_v50 }
 0xbaf   :  { %24820 = vmatpush3.bf16.msra.mxu1 %v31900_v25  ;;  %24999 = vmatpush1.bf16.msra.mxu0 %v31901_v40  ;;  %v31927_v40 = vld [vmem:[#allocation26_spill] sm:$0xff]  ;;  %v31929_v25 = vld [vmem:[#allocation28_spill] sm:$0xff] }
 0xbb0   :  { %24821 = vmatprep.subr.bf16.mxu1 %v31814_v7  ;;  %25001 = vmatprep.subr.bf16.mxu0 %v31902_v47  ;;  %v31926_v47 = vld [vmem:[#allocation25_spill] sm:$0xff] }
 0xbb3   :  { %24823 = vmatpush3.bf16.msra.mxu1 %v31903_v61  ;;  %25003 = vmatpush1.bf16.msra.mxu0 %v31904_v30  ;;  %v31915_v30 = vld [vmem:[#allocation107_spill] sm:$0xff]  ;;  %v31916_v61 = vld [vmem:[#allocation76_spill] sm:$0xff] }
 0xbb4   :  { %24824 = vmatprep.subr.bf16.mxu1 %v31814_v7  ;;  %25005 = vmatprep.subr.bf16.mxu0 %v28335_v12 }
 0xbb6   :  { %23301 = vmatmul.mubr.f32.vlgmr.msra.gmra.mrb[8].mxu1 %v5586_v35  ;;  %7225 = vmatmul.mubr.f32.vlgmr.msra.gmra.mrb[6].mxu0 %v5586_v35  ;;  %v31906_v35 = vld [vmem:[#allocation54_spill] sm:$0xff] }
 0xbb7   :  { %24826 = vmatpush3.bf16.msra.mxu1 %v28868_v43  ;;  %25007 = vmatpush1.bf16.msra.mxu0 %v28341_v11 }
 0xbb8   :  { %24827 = vmatprep.subr.bf16.mxu1 %v31814_v7  ;;  %25009 = vmatprep.subr.bf16.mxu0 %v28343_v0 }
 0xbb9   :  { %23319 = vmatprep.mubr.msk.f32.mxu1 %vm27748_vm1, %v31729_v10  ;;  %7311 = vmatprep.mubr.f32.mxu0 %v31729_v10 }
 0xbbb   :  { %24829 = vmatpush3.bf16.msra.mxu1 %v28872_v5  ;;  %25011 = vmatpush1.bf16.msra.mxu0 %v28351_v24 }
 0xbbc   :  { %24830 = vmatprep.subr.bf16.mxu1 %v31814_v7  ;;  %25013 = vmatprep.subr.bf16.mxu0 %v31794_v53 }
 0xbbf   :  { %24832 = vmatpush3.bf16.msra.mxu1 %v28879_v37  ;;  %25015 = vmatpush1.bf16.msra.mxu0 %v31795_v59 }
 0xbc0   :  { %24833 = vmatprep.subr.bf16.mxu1 %v31814_v7  ;;  %25017 = vmatprep.subr.bf16.mxu0 %v31796_v33 }
 0xbc3   :  { %24835 = vmatpush3.bf16.msra.mxu1 %v28885_v46  ;;  %25019 = vmatpush1.bf16.msra.mxu0 %v31797_v44 }
 0xbc4   :  { %24836 = vmatprep.subr.bf16.mxu1 %v31814_v7  ;;  %25021 = vmatprep.subr.bf16.mxu0 %v31905_v29  ;;  %v31910_v29 = vld [vmem:[#allocation72_spill] sm:$0xff] }
 0xbc6   :  { %23320 = vmatmul.mubr.f32.vlgmr.msra.gmra.mrb[8].mxu1 %v29233_v41  ;;  %7315 = vmatmul.mubr.f32.vlgmr.msra.gmra.mrb[6].mxu0 %v29233_v41  ;;  %v31911_v41 = vld [vmem:[#allocation73_spill] sm:$0xff] }
 0xbc7   :  { %24838 = vmatpush3.bf16.msra.mxu1 %v31906_v35  ;;  %25023 = vmatpush1.bf16.msra.mxu0 %v31907_v8  ;;  %v31912_v35 = vld [vmem:[#allocation106_spill] sm:$0xff] }
 0xbc8   :  { %24839 = vmatprep.subr.bf16.mxu1 %v31814_v7  ;;  %25025 = vmatprep.subr.bf16.mxu0 %v31908_v36  ;;  %v31913_v8 = vld [vmem:[#allocation74_spill] sm:$0xff]  ;;  %v31914_v36 = vld [vmem:[#allocation75_spill] sm:$0xff] }
 0xbc9   :  { %23338 = vmatprep.mubr.msk.f32.mxu1 %vm27748_vm1, %v31729_v10  ;;  %7433 = vmatprep.mubr.f32.mxu0 %v31729_v10 }
 0xbcb   :  { %24841 = vmatpush3.bf16.msra.mxu1 %v31909_v28  ;;  %25027 = vmatpush1.bf16.msra.mxu0 %v31910_v29  ;;  %v31924_v29 = vld [vmem:[#allocation23_spill] sm:$0xff]  ;;  %v31925_v28 = vld [vmem:[#allocation24_spill] sm:$0xff] }
 0xbcc   :  { %24842 = vmatprep.subr.bf16.mxu1 %v31814_v7  ;;  %25029 = vmatprep.subr.bf16.mxu0 %v31911_v41  ;;  %v31923_v41 = vld [vmem:[#allocation22_spill] sm:$0xff] }
 0xbcf   :  { %24844 = vmatpush3.bf16.msra.mxu1 %v31912_v35  ;;  %25031 = vmatpush1.bf16.msra.mxu0 %v31913_v8  ;;  %v31921_v8 = vld [vmem:[#allocation78_spill] sm:$0xff]  ;;  %v31922_v35 = vld [vmem:[#allocation21_spill] sm:$0xff] }
 0xbd0   :  { %24845 = vmatprep.subr.bf16.mxu1 %v31814_v7  ;;  %25033 = vmatprep.subr.bf16.mxu0 %v31914_v36  ;;  %v31920_v36 = vld [vmem:[#allocation20_spill] sm:$0xff] }
 0xbd3   :  { %24847 = vmatpush3.bf16.msra.mxu1 %v31915_v30  ;;  %25035 = vmatpush1.bf16.msra.mxu0 %v31916_v61  ;;  %v31918_v61 = vld [vmem:[#allocation18_spill] sm:$0xff]  ;;  %v31919_v30 = vld [vmem:[#allocation19_spill] sm:$0xff] }
 0xbd4   :  { %24848 = vmatprep.subr.bf16.mxu1 %v31814_v7  ;;  %25037 = vmatprep.subr.bf16.mxu0 %v28335_v12 }
 0xbd6   :  { %23339 = vmatmul.mubr.f32.vlgmr.msra.gmra.mrb[8].mxu1 %v29230_v48  ;;  %7435 = vmatmul.mubr.f32.vlgmr.msra.gmra.mrb[6].mxu0 %v29230_v48 }
 0xbd7   :  { %24850 = vmatpush3.bf16.msra.mxu1 %v28868_v43  ;;  %25039 = vmatpush1.bf16.msra.mxu0 %v28341_v11 }
 0xbd8   :  { %24851 = vmatprep.subr.bf16.mxu1 %v31814_v7  ;;  %25041 = vmatprep.subr.bf16.mxu0 %v28343_v0 }
 0xbd9   :  { %23357 = vmatprep.mubr.msk.f32.mxu1 %vm27748_vm1, %v31729_v10  ;;  %7521 = vmatprep.mubr.f32.mxu0 %v31729_v10 }
 0xbdb   :  { %24853 = vmatpush3.bf16.msra.mxu1 %v28872_v5  ;;  %25043 = vmatpush1.bf16.msra.mxu0 %v28351_v24 }
 0xbdc   :  { %24854 = vmatprep.subr.bf16.mxu1 %v31814_v7  ;;  %25045 = vmatprep.subr.bf16.mxu0 %v31794_v53 }
 0xbdf   :  { %24856 = vmatpush3.bf16.msra.mxu1 %v28879_v37  ;;  %25047 = vmatpush1.bf16.msra.mxu0 %v31795_v59 }
 0xbe0   :  { %24857 = vmatprep.subr.bf16.mxu1 %v31814_v7  ;;  %25049 = vmatprep.subr.bf16.mxu0 %v31796_v33 }
 0xbe3   :  { %24859 = vmatpush3.bf16.msra.mxu1 %v28885_v46  ;;  %25051 = vmatpush1.bf16.msra.mxu0 %v31797_v44 }
 0xbe4   :  { %24861 = vmatprep.subr.bf16.mxu1 %v31838_v9  ;;  %25053 = vmatprep.subr.bf16.mxu0 %v28626_v57 }
 0xbe6   :  { %23358 = vmatmul.mubr.f32.vlgmr.msra.gmra.mrb[8].mxu1 %v29230_v48  ;;  %7523 = vmatmul.mubr.f32.vlgmr.msra.gmra.mrb[6].mxu0 %v29230_v48  ;;  %v31917_v48 = vld [vmem:[#allocation17_spill] sm:$0xff] }
 0xbe7   :  { %24863 = vmatpush1.bf16.msra.mxu1 %v31839_v34  ;;  %6275 = vmatprep.mubr.f32.mxu1 %v31729_v10 }
 0xbe8   :  { %24865 = vmatprep.subr.bf16.mxu1 %v31840_v6  ;;  %25055 = vmatpush1.bf16.msra.mxu0 %v28633_v62 }
 0xbe9   :  { %25057 = vmatprep.subr.bf16.mxu0 %v28640_v23  ;;  %7612 = vmatprep.mubr.f32.mxu0 %v31729_v10 }
 0xbeb   :  { %24867 = vmatpush1.bf16.msra.mxu1 %v31841_v17 }
 0xbec   :  { %24869 = vmatprep.subr.bf16.mxu1 %v31842_v45  ;;  %25059 = vmatpush1.bf16.msra.mxu0 %v28642_v21 }
 0xbed   :  { %25061 = vmatprep.subr.bf16.mxu0 %v28649_v58 }
 0xbef   :  { %24871 = vmatpush1.bf16.msra.mxu1 %v31917_v48 }
 0xbf0   :  { %24873 = vmatprep.subr.bf16.mxu1 %v31918_v61  ;;  %25063 = vmatpush1.bf16.msra.mxu0 %v28655_v19 }
 0xbf1   :  { %25065 = vmatprep.subr.bf16.mxu0 %v28661_v54 }
 0xbf3   :  { %24875 = vmatpush1.bf16.msra.mxu1 %v31919_v30 }
 0xbf4   :  { %24877 = vmatprep.subr.bf16.mxu1 %v31920_v36  ;;  %25067 = vmatpush1.bf16.msra.mxu0 %v28669_v56  ;;  %v31928_v36 = vld [vmem:[#allocation27_spill] sm:$0xff] }
 0xbf5   :  { %25069 = vmatprep.subr.bf16.mxu0 %v31921_v8 }
 0xbf6   :  { %6281 = vmatmul.mubr.f32.vlgmr.msra.gmra.mrb[10].mxu1 %v29155_v49  ;;  %v31930_v49 = vld [vmem:[#allocation29_spill] sm:$0xff] }
 0xbf7   :  { %24879 = vmatpush1.bf16.msra.mxu1 %v31922_v35  ;;  %6431 = vmatprep.mubr.f32.mxu1 %v31729_v10  ;;  %v31931_v35 = vld [vmem:[#allocation30_spill] sm:$0xff] }
 0xbf8   :  { %24881 = vmatprep.subr.bf16.mxu1 %v31923_v41  ;;  %v31932_v41 = vld [vmem:[#allocation31_spill] sm:$0xff] }
 0xbfb   :  { %24883 = vmatpush1.bf16.msra.mxu1 %v31924_v29  ;;  %v31933_v29 = vld [vmem:[#allocation32_spill] sm:$0xff] }
 0xbfc   :  { %24885 = vmatprep.subr.bf16.mxu1 %v31925_v28  ;;  %v31934_v28 = vld [vmem:[#allocation33_spill] sm:$0xff] }
 0xbff   :  { %24887 = vmatpush1.bf16.msra.mxu1 %v31926_v47  ;;  %v31935_v47 = vld [vmem:[#allocation34_spill] sm:$0xff] }
 0xc00   :  { %24889 = vmatprep.subr.bf16.mxu1 %v31927_v40  ;;  %v31936_v40 = vld [vmem:[#allocation35_spill] sm:$0xff] }
 0xc03   :  { %24891 = vmatpush1.bf16.msra.mxu1 %v31928_v36 }
 0xc04   :  { %24893 = vmatprep.subr.bf16.mxu1 %v31929_v25 }
 0xc06   :  { %6433 = vmatmul.mubr.f32.vlgmr.msra.gmra.mrb[10].mxu1 %v29145_v14 }
 0xc07   :  { %24895 = vmatpush1.bf16.msra.mxu1 %v31930_v49  ;;  %6535 = vmatprep.mubr.f32.mxu1 %v31729_v10  ;;  %v31944_v49 = vld [vmem:[#allocation43_spill] sm:$0xff] }
 0xc08   :  { %24897 = vmatprep.subr.bf16.mxu1 %v31931_v35  ;;  %v31943_v35 = vld [vmem:[#allocation42_spill] sm:$0xff] }
 0xc0b   :  { %24899 = vmatpush1.bf16.msra.mxu1 %v31932_v41  ;;  %v31942_v41 = vld [vmem:[#allocation41_spill] sm:$0xff] }
 0xc0c   :  { %24901 = vmatprep.subr.bf16.mxu1 %v31933_v29  ;;  %v31941_v29 = vld [vmem:[#allocation40_spill] sm:$0xff] }
 0xc0f   :  { %24903 = vmatpush1.bf16.msra.mxu1 %v31934_v28  ;;  %v31940_v28 = vld [vmem:[#allocation39_spill] sm:$0xff] }
 0xc10   :  { %24905 = vmatprep.subr.bf16.mxu1 %v31935_v47  ;;  %v31939_v47 = vld [vmem:[#allocation38_spill] sm:$0xff] }
 0xc13   :  { %24907 = vmatpush1.bf16.msra.mxu1 %v31936_v40  ;;  %v31937_v40 = vld [vmem:[#allocation36_spill] sm:$0xff] }
 0xc14   :  { %24909 = vmatprep.subr.bf16.mxu1 %v31838_v9 }
 0xc16   :  { %6538 = vmatmul.mubr.f32.vlgmr.msra.gmra.mrb[10].mxu1 %v29148_v52  ;;  %v31938_v52 = vld [vmem:[#allocation37_spill] sm:$0xff] }
 0xc17   :  { %24911 = vmatpush1.bf16.msra.mxu1 %v31839_v34  ;;  %6624 = vmatprep.mubr.f32.mxu1 %v31729_v10 }
 0xc18   :  { %24913 = vmatprep.subr.bf16.mxu1 %v31840_v6 }
 0xc1b   :  { %24915 = vmatpush1.bf16.msra.mxu1 %v31841_v17 }
 0xc1c   :  { %24917 = vmatprep.subr.bf16.mxu1 %v31842_v45 }
 0xc1f   :  { %24919 = vmatpush1.bf16.msra.mxu1 %v31917_v48 }
 0xc20   :  { %24921 = vmatprep.subr.bf16.mxu1 %v31918_v61 }
 0xc23   :  { %24923 = vmatpush1.bf16.msra.mxu1 %v31919_v30 }
 0xc24   :  { %24925 = vmatprep.subr.bf16.mxu1 %v31937_v40 }
 0xc26   :  { %6628 = vmatmul.mubr.f32.vlgmr.msra.gmra.mrb[10].mxu1 %v29151_v13 }
 0xc27   :  { %24927 = vmatpush1.bf16.msra.mxu1 %v31938_v52  ;;  %6746 = vmatprep.mubr.f32.mxu1 %v31729_v10 }
 0xc28   :  { %24929 = vmatprep.subr.bf16.mxu1 %v31939_v47 }
 0xc2b   :  { %24931 = vmatpush1.bf16.msra.mxu1 %v31940_v28  ;;  %v31946_v28 = vld [vmem:[#allocation48_spill] sm:$0xff] }
 0xc2c   :  { %24933 = vmatprep.subr.bf16.mxu1 %v31941_v29  ;;  %v22502_v29 = vld [vmem:[%s31399_s0 + $0x8] sm:$0xf] }
 0xc2f   :  { %24935 = vmatpush1.bf16.msra.mxu1 %v31942_v41 }
 0xc30   :  { %24937 = vmatprep.subr.bf16.mxu1 %v31943_v35 }
 0xc33   :  { %24939 = vmatpush1.bf16.msra.mxu1 %v31944_v49 }
 0xc34   :  { %24941 = vmatprep.subr.bf16.mxu1 %v31838_v9 }
 0xc36   :  { %6748 = vmatmul.mubr.f32.vlgmr.msra.gmra.mrb[10].mxu1 %v29145_v14 }
 0xc37   :  { %24943 = vmatpush1.bf16.msra.mxu1 %v31839_v34  ;;  %6834 = vmatprep.mubr.f32.mxu1 %v31729_v10 }
 0xc38   :  { %24945 = vmatprep.subr.bf16.mxu1 %v31840_v6 }
 0xc3b   :  { %24947 = vmatpush1.bf16.msra.mxu1 %v31841_v17 }
 0xc3c   :  { %24949 = vmatprep.subr.bf16.mxu1 %v31842_v45 }
 0xc3f   :  { %24951 = vmatpush1.bf16.msra.mxu1 %v31917_v48 }
 0xc40   :  { %24953 = vmatprep.subr.bf16.mxu1 %v31918_v61 }
 0xc43   :  { %24955 = vmatpush1.bf16.msra.mxu1 %v31919_v30 }
 0xc44   :  { %25148 = vmatprep.subr.bf16.mxu1 %v31814_v7 }
 0xc46   :  { %6836 = vmatmul.mubr.f32.vlgmr.msra.gmra.mrb[10].mxu1 %v29145_v14 }
 0xc47   :  { %25150 = vmatpush3.bf16.msra.mxu1 %v28868_v43  ;;  %23376 = vmatprep.mubr.msk.f32.mxu1 %vm27748_vm1, %v31729_v10 }
 0xc48   :  { %25151 = vmatprep.subr.bf16.mxu1 %v31814_v7 }
 0xc4b   :  { %25153 = vmatpush3.bf16.msra.mxu1 %v28872_v5 }
 0xc4c   :  { %25154 = vmatprep.subr.bf16.mxu1 %v31814_v7 }
 0xc4f   :  { %25156 = vmatpush3.bf16.msra.mxu1 %v28879_v37 }
 0xc50   :  { %25157 = vmatprep.subr.bf16.mxu1 %v31814_v7 }
 0xc53   :  { %25159 = vmatpush3.bf16.msra.mxu1 %v28885_v46 }
 0xc54   :  { %25160 = vmatprep.subr.bf16.mxu1 %v31814_v7 }
 0xcb9   :  { %v29418_v14 = vpop.f32.mrb[8].mxu1 }
 0xcba   :  { %31945 = vst [vmem:[#allocation58_spill] sm:$0xff] %v29418_v14  ;;  %v23359_v13 = vpop.f32.mrb[9].mxu1 }
 0xd19   :  { %v6837_v49 = vpop.f32.mrb[10].mxu1 }
 0xd1a   :  { %v6839_v35 = vpop.f32.mrb[11].mxu1 }
 0xd1b   :  { %v6844_v41 = vcombine.low %v6837_v49, %v6839_v35  ;;  %v31947_v49 = vld [vmem:[#allocation56_spill] sm:$0xff] }
 0xd1d   :  { %v6851_v47 = vrot.slane %v6844_v41, %v31946_v28 }
 0xd1f   :  { %v6853_v52 = vadd.f32 %v22502_v29, %v6851_v47 }
 0xd21   :  { %6861 = vrot.lane.b32.xlu0 %v6853_v52, %s27746_s14  ;;  %v22503_v40 = vmul.f32 -1.442695, %v6853_v52 }
 0xd23   :  { %27423 = vpow2.f32 %v22503_v40 }
 0xd2d   :  { %v27424_v25 = vpop.eup %27423 }
 0xd2e   :  { %v6857_v36 = vadd.f32 1.0, %v27424_v25 }
 0xd30   :  { %27425 = vrcp.f32 %v6857_v36 }
 0xd3a   :  { %v27426_v13 = vpop.eup %27425 }
 0xd3b   :  { %v6866_v61 = vmul.f32 %v27426_v13, %v31947_v49  ;;  %v6875_v25 = vrot.slane %v27426_v13, 2  ;;  %v31953_v49 = vld [vmem:[#allocation81_spill] sm:$0xff] }
 0xd93   :  { %v6862_v8 = vpop.permute.xlu0 %6861 }
 0xd94   :  { %v6863_v30 = vrot.slane %v6862_v8, 2 }
 0xd96   :  { %27427 = vtanh.f32 %v6863_v30 }
 0xda0   :  { %v27428_v14 = vpop.eup %27427 }
 0xda1   :  { %v6867_v35 = vmul.f32 %v27428_v14, %v27426_v13  ;;  %v31950_v14 = vld [vmem:[#allocation99_spill] sm:$0xff] }
 0xda2   :  { %v31951_v13 = vld [vmem:[#allocation79_spill] sm:$0xff] }
 0xda3   :  { %6869 = vrot.lane.b32.xlu1 %v6867_v35, %s27746_s14  ;;  %v31952_v35 = vld [vmem:[#allocation80_spill] sm:$0xff] }
 0xe15   :  { %v6870_v48 = vpop.permute.xlu1 %6869 }
 0xe16   :  { %v29427_v41 = vadd.f32 %v6870_v48, %v6866_v61 }
 0xe18   :  { %31948 = vst [vmem:[#allocation59_spill] sm:$0xff] %v29427_v41  ;;  %27429 = vtanh.f32 %v29427_v41 }
 0xe22   :  { %v27430_v47 = vpop.eup %27429 }
 0xe23   :  { %6878 = vrot.lane.b32.xlu0 %v27430_v47, %s27746_s14  ;;  %v31954_v47 = vld [vmem:[#allocation82_spill] sm:$0xff] }
 0xe95   :  { %v6879_v40 = vpop.permute.xlu0 %6878 }
 0xe96   :  { %v6881_v29 = vmul.f32 %v6879_v40, %v6875_v25  ;;  %v31955_v25 = vld [vmem:[#allocation83_spill] sm:$0xff]  ;;  %v31956_v40 = vld [vmem:[#allocation84_spill] sm:$0xff] }
 0xe98   :  { %v7530_v30 = vsel %vm107_vm0, %v6881_v29, 0  ;;  %v31957_v29 = vld [vmem:[#allocation85_spill] sm:$0xff] }
 0xe99   :  { %v29432_v8 = vand.u32 4294901760, %v7530_v30 }
 0xe9b   :  { %v29435_v36 = vsub.f32 %v7530_v30, %v29432_v8  ;;  %v31958_v30 = vld [vmem:[#allocation100_spill] sm:$0xff] }
 0xe9d   :  { %v29438_v52 = vand.u32 4294901760, %v29435_v36 }
 0xe9f   :  { %31949 = vst [vmem:[#allocation60_spill] sm:$0xff] %v29438_v52  ;;  %v7616_v61 = vsub.f32 %v29435_v36, %v29438_v52 }
 0xea1   :  { %v29442_v48 = vand.u32 4294901760, %v7616_v61  ;;  %v31959_v61 = vld [vmem:[#allocation86_spill] sm:$0xff] }
 0xea3   :  { %7618 = vmatmul.mubr.f32.vlgmr.msra.gmra.mrb[6].mxu0 %v29442_v48 }
 0xea4   :  { %25071 = vmatpush1.bf16.msra.mxu0 %v31950_v14  ;;  %7768 = vmatprep.mubr.f32.mxu0 %v31729_v10 }
 0xea5   :  { %25073 = vmatprep.subr.bf16.mxu0 %v31951_v13  ;;  %v31960_v13 = vld [vmem:[#allocation87_spill] sm:$0xff] }
 0xea8   :  { %25075 = vmatpush1.bf16.msra.mxu0 %v31952_v35  ;;  %v31961_v35 = vld [vmem:[#allocation88_spill] sm:$0xff] }
 0xea9   :  { %25077 = vmatprep.subr.bf16.mxu0 %v31953_v49  ;;  %v31962_v49 = vld [vmem:[#allocation89_spill] sm:$0xff] }
 0xeac   :  { %25079 = vmatpush1.bf16.msra.mxu0 %v31954_v47  ;;  %v31963_v47 = vld [vmem:[#allocation90_spill] sm:$0xff] }
 0xead   :  { %25081 = vmatprep.subr.bf16.mxu0 %v31955_v25  ;;  %v31964_v25 = vld [vmem:[#allocation91_spill] sm:$0xff] }
 0xeb0   :  { %25083 = vmatpush1.bf16.msra.mxu0 %v31956_v40 }
 0xeb1   :  { %25085 = vmatprep.subr.bf16.mxu0 %v31957_v29  ;;  %v31972_v29 = vld [vmem:[#allocation98_spill] sm:$0xff] }
 0xeb3   :  { %7770 = vmatmul.mubr.f32.vlgmr.msra.gmra.mrb[6].mxu0 %v29432_v8 }
 0xeb4   :  { %25087 = vmatpush1.bf16.msra.mxu0 %v31958_v30  ;;  %7872 = vmatprep.mubr.f32.mxu0 %v31729_v10  ;;  %v31971_v30 = vld [vmem:[#allocation97_spill] sm:$0xff] }
 0xeb5   :  { %25089 = vmatprep.subr.bf16.mxu0 %v31959_v61  ;;  %v31970_v61 = vld [vmem:[#allocation96_spill] sm:$0xff] }
 0xeb8   :  { %25091 = vmatpush1.bf16.msra.mxu0 %v31960_v13  ;;  %v31969_v13 = vld [vmem:[#allocation95_spill] sm:$0xff] }
 0xeb9   :  { %25093 = vmatprep.subr.bf16.mxu0 %v31961_v35  ;;  %v31968_v35 = vld [vmem:[#allocation94_spill] sm:$0xff] }
 0xebc   :  { %25095 = vmatpush1.bf16.msra.mxu0 %v31962_v49  ;;  %v31967_v49 = vld [vmem:[#allocation93_spill] sm:$0xff] }
 0xebd   :  { %25097 = vmatprep.subr.bf16.mxu0 %v31963_v47  ;;  %v31966_v47 = vld [vmem:[#allocation101_spill] sm:$0xff] }
 0xec0   :  { %25099 = vmatpush1.bf16.msra.mxu0 %v31964_v25  ;;  %v31965_v25 = vld [vmem:[#allocation92_spill] sm:$0xff] }
 0xec1   :  { %25101 = vmatprep.subr.bf16.mxu0 %v28626_v57 }
 0xec3   :  { %7875 = vmatmul.mubr.f32.vlgmr.msra.gmra.mrb[6].mxu0 %v29435_v36 }
 0xec4   :  { %25103 = vmatpush1.bf16.msra.mxu0 %v28633_v62  ;;  %7961 = vmatprep.mubr.f32.mxu0 %v31729_v10 }
 0xec5   :  { %25105 = vmatprep.subr.bf16.mxu0 %v28640_v23 }
 0xec8   :  { %25107 = vmatpush1.bf16.msra.mxu0 %v28642_v21 }
 0xec9   :  { %25109 = vmatprep.subr.bf16.mxu0 %v28649_v58 }
 0xecc   :  { %25111 = vmatpush1.bf16.msra.mxu0 %v28655_v19 }
 0xecd   :  { %25113 = vmatprep.subr.bf16.mxu0 %v28661_v54 }
 0xed0   :  { %25115 = vmatpush1.bf16.msra.mxu0 %v28669_v56 }
 0xed1   :  { %25117 = vmatprep.subr.bf16.mxu0 %v31965_v25 }
 0xed3   :  { %7965 = vmatmul.mubr.f32.vlgmr.msra.gmra.mrb[6].mxu0 %v29438_v52 }
 0xed4   :  { %25119 = vmatpush1.bf16.msra.mxu0 %v31966_v47  ;;  %8083 = vmatprep.mubr.f32.mxu0 %v31729_v10 }
 0xed5   :  { %25121 = vmatprep.subr.bf16.mxu0 %v31967_v49 }
 0xed8   :  { %25123 = vmatpush1.bf16.msra.mxu0 %v31968_v35 }
 0xed9   :  { %25125 = vmatprep.subr.bf16.mxu0 %v31969_v13 }
 0xedc   :  { %25127 = vmatpush1.bf16.msra.mxu0 %v31970_v61 }
 0xedd   :  { %25129 = vmatprep.subr.bf16.mxu0 %v31971_v30 }
 0xee0   :  { %25131 = vmatpush1.bf16.msra.mxu0 %v31972_v29  ;;  %v31973_v29 = vld [vmem:[#allocation53_spill] sm:$0xff] }
 0xee1   :  { %25133 = vmatprep.subr.bf16.mxu0 %v28626_v57 }
 0xee3   :  { %8085 = vmatmul.mubr.f32.vlgmr.msra.gmra.mrb[6].mxu0 %v29432_v8 }
 0xee4   :  { %25135 = vmatpush1.bf16.msra.mxu0 %v28633_v62  ;;  %8171 = vmatprep.mubr.f32.mxu0 %v31729_v10 }
 0xee5   :  { %25137 = vmatprep.subr.bf16.mxu0 %v28640_v23 }
 0xee8   :  { %25139 = vmatpush1.bf16.msra.mxu0 %v28642_v21 }
 0xee9   :  { %25141 = vmatprep.subr.bf16.mxu0 %v28649_v58 }
 0xeec   :  { %25143 = vmatpush1.bf16.msra.mxu0 %v28655_v19 }
 0xeed   :  { %25145 = vmatprep.subr.bf16.mxu0 %v28661_v54 }
 0xef0   :  { %25147 = vmatpush1.bf16.msra.mxu0 %v28669_v56 }
 0xef1   :  { %25317 = vmatprep.subr.bf16.mxu0 %v28335_v12 }
 0xef3   :  { %8173 = vmatmul.mubr.f32.vlgmr.msra.gmra.mrb[6].mxu0 %v29432_v8 }
 0xef4   :  { %25319 = vmatpush1.bf16.msra.mxu0 %v28341_v11  ;;  %9664 = vmatprep.mubr.f32.mxu0 %v31729_v10 }
 0xef5   :  { %25321 = vmatprep.subr.bf16.mxu0 %v28343_v0 }
 0xef8   :  { %25323 = vmatpush1.bf16.msra.mxu0 %v28351_v24 }
 0xef9   :  { %25325 = vmatprep.subr.bf16.mxu0 %v31794_v53 }
 0xefc   :  { %25327 = vmatpush1.bf16.msra.mxu0 %v31795_v59 }
 0xefd   :  { %25329 = vmatprep.subr.bf16.mxu0 %v31796_v33 }
 0xf00   :  { %25331 = vmatpush1.bf16.msra.mxu0 %v31797_v44 }
 0xf01   :  { %25333 = vmatprep.subr.bf16.mxu0 %v31973_v29 }
 0xfc6   :  { %v8174_v30 = vpop.f32.mrb[6].mxu0 }
 0xfc7   :  { %v8176_v61 = vpop.f32.mrb[7].mxu0  ;;  %v8179_v49 = vadd.f32 %v8174_v30, %v31896_v22 }
 0xfc8   :  { %v8180_v13 = vadd.f32 %v8176_v61, %v31895_v1 }
 0xfc9   :  { %v22504_v47 = vmul.f32 -1.442695, %v8179_v49 }
 0xfca   :  { %27431 = vtanh.f32 %v8180_v13  ;;  %v22505_v49 = vmul.f32 -1.442695, %v8180_v13 }
 0xfcb   :  { %27433 = vpow2.f32 %v22504_v47 }
 0xfd4   :  { %v27432_v35 = vpop.eup %27431 }
 0xfd5   :  { %8196 = vrot.lane.b32.xlu1 %v27432_v35, %s27746_s14  ;;  %v27434_v25 = vpop.eup %27433 }
 0xfd6   :  { %v8187_v40 = vadd.f32 1.0, %v27434_v25 }
 0xfd8   :  { %27435 = vrcp.f32 %v8187_v40 }
 0xfe2   :  { %v27436_v14 = vpop.eup %27435 }
 0xfe3   :  { %v8194_v29 = vmul.f32 %v27436_v14, %v29222_v60 }
0x1047   :  { %v8197_v41 = vpop.permute.xlu1 %8196 }
0x1048   :  { %v8199_v28 = vmul.f32 %v27436_v14, %v8197_v41 }
0x104a   :  { %8201 = vrot.lane.b32.xlu0 %v8199_v28, %s27746_s14 }
0x10bc   :  { %v8202_v52 = vpop.permute.xlu0 %8201 }
0x10bd   :  { %v29509_v61 = vadd.f32 %v8202_v52, %v8194_v29 }
0x10bf   :  { %27437 = vtanh.f32 %v29509_v61 }
0x10c0   :  { %27439 = vpow2.f32 %v22505_v49  ;;  %v31976_v49 = vld [vmem:[#allocation66_spill] sm:$0xff] }
0x10c9   :  { %v27438_v35 = vpop.eup %27437 }
0x10ca   :  { %8207 = vrot.lane.b32.xlu1 %v27438_v35, %s27746_s14  ;;  %v27440_v47 = vpop.eup %27439  ;;  %v31975_v35 = vld [vmem:[#allocation103_spill] sm:$0xff] }
0x10cb   :  { %v8188_v25 = vadd.f32 1.0, %v27440_v47  ;;  %v31977_v47 = vld [vmem:[#allocation67_spill] sm:$0xff] }
0x10cd   :  { %27441 = vrcp.f32 %v8188_v25  ;;  %v31978_v25 = vld [vmem:[#allocation104_spill] sm:$0xff] }
0x10d7   :  { %v27442_v40 = vpop.eup %27441 }
0x113c   :  { %v8208_v30 = vpop.permute.xlu1 %8207 }
0x113d   :  { %v29513_v41 = vmul.f32 %v27442_v40, %v8208_v30  ;;  %v31979_v40 = vld [vmem:[#allocation68_spill] sm:$0xff]  ;;  %v31980_v30 = vld [vmem:[#allocation69_spill] sm:$0xff] }
0x113f   :  { %31974 = vst [vmem:[#allocation61_spill] sm:$0xff] %v29513_v41  ;;  %v8212_v60 = vsel %vm107_vm0, %v29513_v41, 0  ;;  %v31985_v41 = vld [vmem:[#allocation72_spill] sm:$0xff] }
0x1140   :  { %v29517_v28 = vand.u32 4294901760, %v8212_v60 }
0x1142   :  { %v8288_v52 = vsub.f32 %v8212_v60, %v29517_v28  ;;  %v31981_v60 = vld [vmem:[#allocation54_spill] sm:$0xff] }
0x1144   :  { %v29520_v14 = vand.u32 4294901760, %v8288_v52 }
0x1146   :  { %v8290_v29 = vsub.f32 %v8288_v52, %v29520_v14 }
0x1148   :  { %v8291_v13 = vand.u32 4294901760, %v8290_v29  ;;  %v31983_v29 = vld [vmem:[#allocation71_spill] sm:$0xff] }
0x114a   :  { %23377 = vmatmul.mubr.f32.vlgmr.msra.gmra.mrb[12].mxu1 %v8291_v13  ;;  %9670 = vmatmul.mubr.f32.vlgmr.msra.gmra.mrb[8].mxu0 %v8291_v13  ;;  %v31984_v13 = vld [vmem:[#allocation105_spill] sm:$0xff] }
0x114b   :  { %25162 = vmatpush3.bf16.msra.mxu1 %v28937_v27  ;;  %25335 = vmatpush1.bf16.msra.mxu0 %v31813_v55 }
0x114c   :  { %25163 = vmatprep.subr.bf16.mxu1 %v31814_v7  ;;  %25337 = vmatprep.subr.bf16.mxu0 %v31815_v20 }
0x114d   :  { %23395 = vmatprep.mubr.msk.f32.mxu1 %vm27748_vm1, %v31729_v10  ;;  %9820 = vmatprep.mubr.f32.mxu0 %v31729_v10 }
0x114f   :  { %25165 = vmatpush3.bf16.msra.mxu1 %v28890_v42  ;;  %25339 = vmatpush1.bf16.msra.mxu0 %v31816_v4 }
0x1150   :  { %25166 = vmatprep.subr.bf16.mxu1 %v31814_v7  ;;  %25341 = vmatprep.subr.bf16.mxu0 %v31817_v51 }
0x1153   :  { %25168 = vmatpush3.bf16.msra.mxu1 %v28892_v15  ;;  %25343 = vmatpush1.bf16.msra.mxu0 %v31818_v39 }
0x1154   :  { %25169 = vmatprep.subr.bf16.mxu1 %v31814_v7  ;;  %25345 = vmatprep.subr.bf16.mxu0 %v31819_v63 }
0x1157   :  { %25171 = vmatpush3.bf16.msra.mxu1 %v28894_v32  ;;  %25347 = vmatpush1.bf16.msra.mxu0 %v31820_v18 }
0x1158   :  { %25172 = vmatprep.subr.bf16.mxu1 %v31814_v7  ;;  %25349 = vmatprep.subr.bf16.mxu0 %v31821_v3 }
0x115a   :  { %23396 = vmatmul.mubr.f32.vlgmr.msra.gmra.mrb[12].mxu1 %v29517_v28  ;;  %9822 = vmatmul.mubr.f32.vlgmr.msra.gmra.mrb[8].mxu0 %v29517_v28 }
0x115b   :  { %25174 = vmatpush3.bf16.msra.mxu1 %v28958_v31  ;;  %25351 = vmatpush1.bf16.msra.mxu0 %v31822_v16 }
0x115c   :  { %25175 = vmatprep.subr.bf16.mxu1 %v31814_v7  ;;  %25353 = vmatprep.subr.bf16.mxu0 %v31823_v38 }
0x115d   :  { %23414 = vmatprep.mubr.msk.f32.mxu1 %vm27748_vm1, %v31729_v10  ;;  %9924 = vmatprep.mubr.f32.mxu0 %v31729_v10 }
0x115f   :  { %25177 = vmatpush3.bf16.msra.mxu1 %v28896_v26  ;;  %25355 = vmatpush1.bf16.msra.mxu0 %v31824_v2 }
0x1160   :  { %25178 = vmatprep.subr.bf16.mxu1 %v31814_v7  ;;  %25357 = vmatprep.subr.bf16.mxu0 %v31899_v50 }
0x1163   :  { %25180 = vmatpush3.bf16.msra.mxu1 %v31975_v35  ;;  %25359 = vmatpush1.bf16.msra.mxu0 %v31976_v49  ;;  %v32004_v49 = vld [vmem:[#allocation28_spill] sm:$0xff] }
0x1164   :  { %25181 = vmatprep.subr.bf16.mxu1 %v31814_v7  ;;  %25361 = vmatprep.subr.bf16.mxu0 %v31977_v47  ;;  %v32002_v47 = vld [vmem:[#allocation26_spill] sm:$0xff] }
0x1167   :  { %25183 = vmatpush3.bf16.msra.mxu1 %v31978_v25  ;;  %25363 = vmatpush1.bf16.msra.mxu0 %v31979_v40  ;;  %v31991_v40 = vld [vmem:[#allocation76_spill] sm:$0xff]  ;;  %v32001_v25 = vld [vmem:[#allocation25_spill] sm:$0xff] }
0x1168   :  { %25184 = vmatprep.subr.bf16.mxu1 %v31814_v7  ;;  %25365 = vmatprep.subr.bf16.mxu0 %v28335_v12 }
0x116a   :  { %23415 = vmatmul.mubr.f32.vlgmr.msra.gmra.mrb[12].mxu1 %v8288_v52  ;;  %9927 = vmatmul.mubr.f32.vlgmr.msra.gmra.mrb[8].mxu0 %v8288_v52  ;;  %v31982_v52 = vld [vmem:[#allocation70_spill] sm:$0xff] }
0x116b   :  { %25186 = vmatpush3.bf16.msra.mxu1 %v28868_v43  ;;  %25367 = vmatpush1.bf16.msra.mxu0 %v28341_v11 }
0x116c   :  { %25187 = vmatprep.subr.bf16.mxu1 %v31814_v7  ;;  %25369 = vmatprep.subr.bf16.mxu0 %v28343_v0 }
0x116d   :  { %23433 = vmatprep.mubr.msk.f32.mxu1 %vm27748_vm1, %v31729_v10  ;;  %10013 = vmatprep.mubr.f32.mxu0 %v31729_v10 }
0x116f   :  { %25189 = vmatpush3.bf16.msra.mxu1 %v28872_v5  ;;  %25371 = vmatpush1.bf16.msra.mxu0 %v28351_v24 }
0x1170   :  { %25190 = vmatprep.subr.bf16.mxu1 %v31814_v7  ;;  %25373 = vmatprep.subr.bf16.mxu0 %v31794_v53 }
0x1173   :  { %25192 = vmatpush3.bf16.msra.mxu1 %v28879_v37  ;;  %25375 = vmatpush1.bf16.msra.mxu0 %v31795_v59 }
0x1174   :  { %25193 = vmatprep.subr.bf16.mxu1 %v31814_v7  ;;  %25377 = vmatprep.subr.bf16.mxu0 %v31796_v33 }
0x1177   :  { %25195 = vmatpush3.bf16.msra.mxu1 %v28885_v46  ;;  %25379 = vmatpush1.bf16.msra.mxu0 %v31797_v44 }
0x1178   :  { %25196 = vmatprep.subr.bf16.mxu1 %v31814_v7  ;;  %25381 = vmatprep.subr.bf16.mxu0 %v31980_v30  ;;  %v31990_v30 = vld [vmem:[#allocation107_spill] sm:$0xff] }
0x117a   :  { %23434 = vmatmul.mubr.f32.vlgmr.msra.gmra.mrb[12].mxu1 %v29520_v14  ;;  %10017 = vmatmul.mubr.f32.vlgmr.msra.gmra.mrb[8].mxu0 %v29520_v14  ;;  %v31986_v14 = vld [vmem:[#allocation73_spill] sm:$0xff] }
0x117b   :  { %25198 = vmatpush3.bf16.msra.mxu1 %v31981_v60  ;;  %25383 = vmatpush1.bf16.msra.mxu0 %v31982_v52  ;;  %v31987_v60 = vld [vmem:[#allocation106_spill] sm:$0xff] }
0x117c   :  { %25199 = vmatprep.subr.bf16.mxu1 %v31814_v7  ;;  %25385 = vmatprep.subr.bf16.mxu0 %v31983_v29  ;;  %v31988_v52 = vld [vmem:[#allocation74_spill] sm:$0xff]  ;;  %v31989_v29 = vld [vmem:[#allocation75_spill] sm:$0xff] }
0x117d   :  { %23452 = vmatprep.mubr.msk.f32.mxu1 %vm27748_vm1, %v31729_v10  ;;  %10135 = vmatprep.mubr.f32.mxu0 %v31729_v10 }
0x117f   :  { %25201 = vmatpush3.bf16.msra.mxu1 %v31984_v13  ;;  %25387 = vmatpush1.bf16.msra.mxu0 %v31985_v41  ;;  %v31999_v41 = vld [vmem:[#allocation23_spill] sm:$0xff]  ;;  %v32000_v13 = vld [vmem:[#allocation24_spill] sm:$0xff] }
0x1180   :  { %25202 = vmatprep.subr.bf16.mxu1 %v31814_v7  ;;  %25389 = vmatprep.subr.bf16.mxu0 %v31986_v14  ;;  %v31998_v14 = vld [vmem:[#allocation22_spill] sm:$0xff] }
0x1183   :  { %25204 = vmatpush3.bf16.msra.mxu1 %v31987_v60  ;;  %25391 = vmatpush1.bf16.msra.mxu0 %v31988_v52  ;;  %v31996_v52 = vld [vmem:[#allocation78_spill] sm:$0xff]  ;;  %v31997_v60 = vld [vmem:[#allocation21_spill] sm:$0xff] }
0x1184   :  { %25205 = vmatprep.subr.bf16.mxu1 %v31814_v7  ;;  %25393 = vmatprep.subr.bf16.mxu0 %v31989_v29  ;;  %v31995_v29 = vld [vmem:[#allocation20_spill] sm:$0xff] }
0x1187   :  { %25207 = vmatpush3.bf16.msra.mxu1 %v31990_v30  ;;  %25395 = vmatpush1.bf16.msra.mxu0 %v31991_v40  ;;  %v31993_v40 = vld [vmem:[#allocation18_spill] sm:$0xff]  ;;  %v31994_v30 = vld [vmem:[#allocation19_spill] sm:$0xff] }
0x1188   :  { %25208 = vmatprep.subr.bf16.mxu1 %v31814_v7  ;;  %25397 = vmatprep.subr.bf16.mxu0 %v28335_v12 }
0x118a   :  { %23453 = vmatmul.mubr.f32.vlgmr.msra.gmra.mrb[12].mxu1 %v29517_v28  ;;  %10137 = vmatmul.mubr.f32.vlgmr.msra.gmra.mrb[8].mxu0 %v29517_v28 }
0x118b   :  { %25210 = vmatpush3.bf16.msra.mxu1 %v28868_v43  ;;  %25399 = vmatpush1.bf16.msra.mxu0 %v28341_v11 }
0x118c   :  { %25211 = vmatprep.subr.bf16.mxu1 %v31814_v7  ;;  %25401 = vmatprep.subr.bf16.mxu0 %v28343_v0 }
0x118d   :  { %23471 = vmatprep.mubr.msk.f32.mxu1 %vm27748_vm1, %v31729_v10  ;;  %10223 = vmatprep.mubr.f32.mxu0 %v31729_v10 }
0x118f   :  { %25213 = vmatpush3.bf16.msra.mxu1 %v28872_v5  ;;  %25403 = vmatpush1.bf16.msra.mxu0 %v28351_v24 }
0x1190   :  { %25214 = vmatprep.subr.bf16.mxu1 %v31814_v7  ;;  %25405 = vmatprep.subr.bf16.mxu0 %v31794_v53 }
0x1193   :  { %25216 = vmatpush3.bf16.msra.mxu1 %v28879_v37  ;;  %25407 = vmatpush1.bf16.msra.mxu0 %v31795_v59 }
0x1194   :  { %25217 = vmatprep.subr.bf16.mxu1 %v31814_v7  ;;  %25409 = vmatprep.subr.bf16.mxu0 %v31796_v33 }
0x1197   :  { %25219 = vmatpush3.bf16.msra.mxu1 %v28885_v46  ;;  %25411 = vmatpush1.bf16.msra.mxu0 %v31797_v44 }
0x1198   :  { %25221 = vmatprep.subr.bf16.mxu1 %v31838_v9  ;;  %25413 = vmatprep.subr.bf16.mxu0 %v28626_v57 }
0x119a   :  { %23472 = vmatmul.mubr.f32.vlgmr.msra.gmra.mrb[12].mxu1 %v29517_v28  ;;  %10225 = vmatmul.mubr.f32.vlgmr.msra.gmra.mrb[8].mxu0 %v29517_v28  ;;  %v31992_v28 = vld [vmem:[#allocation17_spill] sm:$0xff] }
0x119b   :  { %25223 = vmatpush1.bf16.msra.mxu1 %v31839_v34  ;;  %8977 = vmatprep.mubr.f32.mxu1 %v31729_v10 }
0x119c   :  { %25225 = vmatprep.subr.bf16.mxu1 %v31840_v6  ;;  %25415 = vmatpush1.bf16.msra.mxu0 %v28633_v62 }
0x119d   :  { %25417 = vmatprep.subr.bf16.mxu0 %v28640_v23  ;;  %10314 = vmatprep.mubr.f32.mxu0 %v31729_v10 }
0x119f   :  { %25227 = vmatpush1.bf16.msra.mxu1 %v31841_v17 }
0x11a0   :  { %25229 = vmatprep.subr.bf16.mxu1 %v31842_v45  ;;  %25419 = vmatpush1.bf16.msra.mxu0 %v28642_v21 }
0x11a1   :  { %25421 = vmatprep.subr.bf16.mxu0 %v28649_v58 }
0x11a3   :  { %25231 = vmatpush1.bf16.msra.mxu1 %v31992_v28 }
0x11a4   :  { %25233 = vmatprep.subr.bf16.mxu1 %v31993_v40  ;;  %25423 = vmatpush1.bf16.msra.mxu0 %v28655_v19 }
0x11a5   :  { %25425 = vmatprep.subr.bf16.mxu0 %v28661_v54 }
0x11a7   :  { %25235 = vmatpush1.bf16.msra.mxu1 %v31994_v30 }
0x11a8   :  { %25237 = vmatprep.subr.bf16.mxu1 %v31995_v29  ;;  %25427 = vmatpush1.bf16.msra.mxu0 %v28669_v56  ;;  %v32003_v29 = vld [vmem:[#allocation27_spill] sm:$0xff] }
0x11a9   :  { %25429 = vmatprep.subr.bf16.mxu0 %v31996_v52 }
0x11aa   :  { %8983 = vmatmul.mubr.f32.vlgmr.msra.gmra.mrb[14].mxu1 %v29442_v48  ;;  %v32005_v48 = vld [vmem:[#allocation29_spill] sm:$0xff] }
0x11ab   :  { %25239 = vmatpush1.bf16.msra.mxu1 %v31997_v60  ;;  %9133 = vmatprep.mubr.f32.mxu1 %v31729_v10  ;;  %v32006_v60 = vld [vmem:[#allocation30_spill] sm:$0xff] }
0x11ac   :  { %25241 = vmatprep.subr.bf16.mxu1 %v31998_v14  ;;  %v32007_v14 = vld [vmem:[#allocation31_spill] sm:$0xff] }
0x11af   :  { %25243 = vmatpush1.bf16.msra.mxu1 %v31999_v41  ;;  %v32008_v41 = vld [vmem:[#allocation32_spill] sm:$0xff] }
0x11b0   :  { %25245 = vmatprep.subr.bf16.mxu1 %v32000_v13  ;;  %v32009_v13 = vld [vmem:[#allocation33_spill] sm:$0xff] }
0x11b3   :  { %25247 = vmatpush1.bf16.msra.mxu1 %v32001_v25  ;;  %v32010_v25 = vld [vmem:[#allocation34_spill] sm:$0xff] }
0x11b4   :  { %25249 = vmatprep.subr.bf16.mxu1 %v32002_v47  ;;  %v32011_v47 = vld [vmem:[#allocation35_spill] sm:$0xff] }
0x11b7   :  { %25251 = vmatpush1.bf16.msra.mxu1 %v32003_v29 }
0x11b8   :  { %25253 = vmatprep.subr.bf16.mxu1 %v32004_v49  ;;  %v32020_v49 = vld [vmem:[#allocation43_spill] sm:$0xff] }
0x11ba   :  { %9135 = vmatmul.mubr.f32.vlgmr.msra.gmra.mrb[14].mxu1 %v29432_v8 }
0x11bb   :  { %25255 = vmatpush1.bf16.msra.mxu1 %v32005_v48  ;;  %9237 = vmatprep.mubr.f32.mxu1 %v31729_v10  ;;  %v32019_v48 = vld [vmem:[#allocation42_spill] sm:$0xff] }
0x11bc   :  { %25257 = vmatprep.subr.bf16.mxu1 %v32006_v60  ;;  %v32018_v60 = vld [vmem:[#allocation41_spill] sm:$0xff] }
0x11bf   :  { %25259 = vmatpush1.bf16.msra.mxu1 %v32007_v14  ;;  %v32017_v14 = vld [vmem:[#allocation40_spill] sm:$0xff] }
0x11c0   :  { %25261 = vmatprep.subr.bf16.mxu1 %v32008_v41  ;;  %v32016_v41 = vld [vmem:[#allocation39_spill] sm:$0xff] }
0x11c3   :  { %25263 = vmatpush1.bf16.msra.mxu1 %v32009_v13  ;;  %v32015_v13 = vld [vmem:[#allocation38_spill] sm:$0xff] }
0x11c4   :  { %25265 = vmatprep.subr.bf16.mxu1 %v32010_v25  ;;  %v32013_v25 = vld [vmem:[#allocation60_spill] sm:$0xff] }
0x11c7   :  { %25267 = vmatpush1.bf16.msra.mxu1 %v32011_v47  ;;  %v32012_v47 = vld [vmem:[#allocation36_spill] sm:$0xff] }
0x11c8   :  { %25269 = vmatprep.subr.bf16.mxu1 %v31838_v9 }
0x11ca   :  { %9240 = vmatmul.mubr.f32.vlgmr.msra.gmra.mrb[14].mxu1 %v29435_v36  ;;  %v32014_v36 = vld [vmem:[#allocation37_spill] sm:$0xff] }
0x11cb   :  { %25271 = vmatpush1.bf16.msra.mxu1 %v31839_v34  ;;  %9326 = vmatprep.mubr.f32.mxu1 %v31729_v10 }
0x11cc   :  { %25273 = vmatprep.subr.bf16.mxu1 %v31840_v6 }
0x11cf   :  { %25275 = vmatpush1.bf16.msra.mxu1 %v31841_v17 }
0x11d0   :  { %25277 = vmatprep.subr.bf16.mxu1 %v31842_v45 }
0x11d3   :  { %25279 = vmatpush1.bf16.msra.mxu1 %v31992_v28 }
0x11d4   :  { %25281 = vmatprep.subr.bf16.mxu1 %v31993_v40 }
0x11d7   :  { %25283 = vmatpush1.bf16.msra.mxu1 %v31994_v30 }
0x11d8   :  { %25285 = vmatprep.subr.bf16.mxu1 %v32012_v47 }
0x11da   :  { %9330 = vmatmul.mubr.f32.vlgmr.msra.gmra.mrb[14].mxu1 %v32013_v25 }
0x11db   :  { %25287 = vmatpush1.bf16.msra.mxu1 %v32014_v36  ;;  %9448 = vmatprep.mubr.f32.mxu1 %v31729_v10 }
0x11dc   :  { %25289 = vmatprep.subr.bf16.mxu1 %v32015_v13 }
0x11df   :  { %25291 = vmatpush1.bf16.msra.mxu1 %v32016_v41  ;;  %v32022_v41 = vld [vmem:[#allocation48_spill] sm:$0xff] }
0x11e0   :  { %25293 = vmatprep.subr.bf16.mxu1 %v32017_v14  ;;  %v22506_v14 = vld [vmem:[%s31399_s0 + $0xc] sm:$0xf] }
0x11e3   :  { %25295 = vmatpush1.bf16.msra.mxu1 %v32018_v60 }
0x11e4   :  { %25297 = vmatprep.subr.bf16.mxu1 %v32019_v48 }
0x11e7   :  { %25299 = vmatpush1.bf16.msra.mxu1 %v32020_v49 }
0x11e8   :  { %25301 = vmatprep.subr.bf16.mxu1 %v31838_v9 }
0x11ea   :  { %9450 = vmatmul.mubr.f32.vlgmr.msra.gmra.mrb[14].mxu1 %v29432_v8 }
0x11eb   :  { %25303 = vmatpush1.bf16.msra.mxu1 %v31839_v34  ;;  %9536 = vmatprep.mubr.f32.mxu1 %v31729_v10 }
0x11ec   :  { %25305 = vmatprep.subr.bf16.mxu1 %v31840_v6 }
0x11ef   :  { %25307 = vmatpush1.bf16.msra.mxu1 %v31841_v17 }
0x11f0   :  { %25309 = vmatprep.subr.bf16.mxu1 %v31842_v45 }
0x11f3   :  { %25311 = vmatpush1.bf16.msra.mxu1 %v31992_v28 }
0x11f4   :  { %25313 = vmatprep.subr.bf16.mxu1 %v31993_v40 }
0x11f7   :  { %25315 = vmatpush1.bf16.msra.mxu1 %v31994_v30 }
0x11f8   :  { %25508 = vmatprep.subr.bf16.mxu1 %v31814_v7 }
0x11fa   :  { %9538 = vmatmul.mubr.f32.vlgmr.msra.gmra.mrb[14].mxu1 %v29432_v8 }
0x11fb   :  { %25510 = vmatpush3.bf16.msra.mxu1 %v28868_v43  ;;  %23490 = vmatprep.mubr.msk.f32.mxu1 %vm27748_vm1, %v31729_v10 }
0x11fc   :  { %25511 = vmatprep.subr.bf16.mxu1 %v31814_v7 }
0x11ff   :  { %25513 = vmatpush3.bf16.msra.mxu1 %v28872_v5 }
0x1200   :  { %25514 = vmatprep.subr.bf16.mxu1 %v31814_v7 }
0x1203   :  { %25516 = vmatpush3.bf16.msra.mxu1 %v28879_v37 }
0x1204   :  { %25517 = vmatprep.subr.bf16.mxu1 %v31814_v7 }
0x1207   :  { %25519 = vmatpush3.bf16.msra.mxu1 %v28885_v46 }
0x1208   :  { %25520 = vmatprep.subr.bf16.mxu1 %v31814_v7 }
0x126d   :  { %v29705_v8 = vpop.f32.mrb[12].mxu1 }
0x126e   :  { %32021 = vst [vmem:[#allocation62_spill] sm:$0xff] %v29705_v8  ;;  %v23473_v25 = vpop.f32.mrb[13].mxu1 }
0x12cd   :  { %v9539_v49 = vpop.f32.mrb[14].mxu1 }
0x12ce   :  { %v9541_v48 = vpop.f32.mrb[15].mxu1 }
0x12cf   :  { %v9546_v60 = vcombine.low %v9539_v49, %v9541_v48  ;;  %v32023_v48 = vld [vmem:[#allocation59_spill] sm:$0xff] }
0x12d1   :  { %v9553_v13 = vrot.slane %v9546_v60, %v32022_v41 }
0x12d3   :  { %v9555_v36 = vadd.f32 %v22506_v14, %v9553_v13 }
0x12d5   :  { %9563 = vrot.lane.b32.xlu0 %v9555_v36, %s27746_s14  ;;  %v22507_v47 = vmul.f32 -1.442695, %v9555_v36 }
0x12d7   :  { %27443 = vpow2.f32 %v22507_v47 }
0x12e1   :  { %v27444_v29 = vpop.eup %27443 }
0x12e2   :  { %v9559_v52 = vadd.f32 1.0, %v27444_v29 }
0x12e4   :  { %27445 = vrcp.f32 %v9559_v52 }
0x12ee   :  { %v27446_v25 = vpop.eup %27445 }
0x12ef   :  { %v9568_v28 = vmul.f32 %v27446_v25, %v32023_v48  ;;  %v9577_v47 = vrot.slane %v27446_v25, 2  ;;  %v32029_v48 = vld [vmem:[#allocation81_spill] sm:$0xff] }
0x1347   :  { %v9564_v30 = vpop.permute.xlu0 %9563 }
0x1348   :  { %v9565_v40 = vrot.slane %v9564_v30, 2 }
0x134a   :  { %27447 = vtanh.f32 %v9565_v40 }
0x1354   :  { %v27448_v8 = vpop.eup %27447 }
0x1355   :  { %v9569_v49 = vmul.f32 %v27448_v8, %v27446_v25  ;;  %v32026_v8 = vld [vmem:[#allocation99_spill] sm:$0xff] }
0x1356   :  { %v32027_v25 = vld [vmem:[#allocation79_spill] sm:$0xff] }
0x1357   :  { %9571 = vrot.lane.b32.xlu1 %v9569_v49, %s27746_s14  ;;  %v32028_v49 = vld [vmem:[#allocation80_spill] sm:$0xff] }
0x13c9   :  { %v9572_v45 = vpop.permute.xlu1 %9571 }
0x13ca   :  { %v29714_v60 = vadd.f32 %v9572_v45, %v9568_v28 }
0x13cc   :  { %32024 = vst [vmem:[#allocation63_spill] sm:$0xff] %v29714_v60  ;;  %27449 = vtanh.f32 %v29714_v60 }
0x13d6   :  { %v27450_v13 = vpop.eup %27449 }
0x13d7   :  { %9580 = vrot.lane.b32.xlu0 %v27450_v13, %s27746_s14  ;;  %v32030_v13 = vld [vmem:[#allocation82_spill] sm:$0xff] }
0x1449   :  { %v9581_v29 = vpop.permute.xlu0 %9580 }
0x144a   :  { %v9583_v30 = vmul.f32 %v9581_v29, %v9577_v47  ;;  %v32031_v47 = vld [vmem:[#allocation83_spill] sm:$0xff]  ;;  %v32032_v29 = vld [vmem:[#allocation84_spill] sm:$0xff] }
0x144c   :  { %v10232_v40 = vsel %vm107_vm0, %v9583_v30, 0  ;;  %v32033_v30 = vld [vmem:[#allocation85_spill] sm:$0xff] }
0x144d   :  { %v29719_v52 = vand.u32 4294901760, %v10232_v40 }
0x144f   :  { %v29722_v14 = vsub.f32 %v10232_v40, %v29719_v52  ;;  %v32034_v40 = vld [vmem:[#allocation100_spill] sm:$0xff] }
0x1451   :  { %v29725_v36 = vand.u32 4294901760, %v29722_v14 }
0x1453   :  { %32025 = vst [vmem:[#allocation64_spill] sm:$0xff] %v29725_v36  ;;  %v10318_v45 = vsub.f32 %v29722_v14, %v29725_v36 }
0x1455   :  { %v29729_v28 = vand.u32 4294901760, %v10318_v45  ;;  %v32035_v45 = vld [vmem:[#allocation86_spill] sm:$0xff] }
0x1457   :  { %10320 = vmatmul.mubr.f32.vlgmr.msra.gmra.mrb[8].mxu0 %v29729_v28 }
0x1458   :  { %25431 = vmatpush1.bf16.msra.mxu0 %v32026_v8  ;;  %10470 = vmatprep.mubr.f32.mxu0 %v31729_v10 }
0x1459   :  { %25433 = vmatprep.subr.bf16.mxu0 %v32027_v25  ;;  %v32036_v25 = vld [vmem:[#allocation87_spill] sm:$0xff] }
0x145c   :  { %25435 = vmatpush1.bf16.msra.mxu0 %v32028_v49  ;;  %v32037_v49 = vld [vmem:[#allocation88_spill] sm:$0xff] }
0x145d   :  { %25437 = vmatprep.subr.bf16.mxu0 %v32029_v48  ;;  %v32038_v48 = vld [vmem:[#allocation89_spill] sm:$0xff] }
0x1460   :  { %25439 = vmatpush1.bf16.msra.mxu0 %v32030_v13  ;;  %v32039_v13 = vld [vmem:[#allocation90_spill] sm:$0xff] }
0x1461   :  { %25441 = vmatprep.subr.bf16.mxu0 %v32031_v47  ;;  %v32040_v47 = vld [vmem:[#allocation91_spill] sm:$0xff] }
0x1464   :  { %25443 = vmatpush1.bf16.msra.mxu0 %v32032_v29 }
0x1465   :  { %25445 = vmatprep.subr.bf16.mxu0 %v32033_v30  ;;  %v32048_v30 = vld [vmem:[#allocation98_spill] sm:$0xff] }
0x1467   :  { %10472 = vmatmul.mubr.f32.vlgmr.msra.gmra.mrb[8].mxu0 %v29719_v52 }
0x1468   :  { %25447 = vmatpush1.bf16.msra.mxu0 %v32034_v40  ;;  %10574 = vmatprep.mubr.f32.mxu0 %v31729_v10  ;;  %v32047_v40 = vld [vmem:[#allocation97_spill] sm:$0xff] }
0x1469   :  { %25449 = vmatprep.subr.bf16.mxu0 %v32035_v45  ;;  %v32046_v45 = vld [vmem:[#allocation96_spill] sm:$0xff] }
0x146c   :  { %25451 = vmatpush1.bf16.msra.mxu0 %v32036_v25  ;;  %v32045_v25 = vld [vmem:[#allocation95_spill] sm:$0xff] }
0x146d   :  { %25453 = vmatprep.subr.bf16.mxu0 %v32037_v49  ;;  %v32044_v49 = vld [vmem:[#allocation94_spill] sm:$0xff] }
0x1470   :  { %25455 = vmatpush1.bf16.msra.mxu0 %v32038_v48  ;;  %v32043_v48 = vld [vmem:[#allocation93_spill] sm:$0xff] }
0x1471   :  { %25457 = vmatprep.subr.bf16.mxu0 %v32039_v13  ;;  %v32042_v13 = vld [vmem:[#allocation101_spill] sm:$0xff] }
0x1474   :  { %25459 = vmatpush1.bf16.msra.mxu0 %v32040_v47  ;;  %v32041_v47 = vld [vmem:[#allocation92_spill] sm:$0xff] }
0x1475   :  { %25461 = vmatprep.subr.bf16.mxu0 %v28626_v57 }
0x1477   :  { %10577 = vmatmul.mubr.f32.vlgmr.msra.gmra.mrb[8].mxu0 %v29722_v14 }
0x1478   :  { %25463 = vmatpush1.bf16.msra.mxu0 %v28633_v62  ;;  %10663 = vmatprep.mubr.f32.mxu0 %v31729_v10 }
0x1479   :  { %25465 = vmatprep.subr.bf16.mxu0 %v28640_v23 }
0x147c   :  { %25467 = vmatpush1.bf16.msra.mxu0 %v28642_v21 }
0x147d   :  { %25469 = vmatprep.subr.bf16.mxu0 %v28649_v58 }
0x1480   :  { %25471 = vmatpush1.bf16.msra.mxu0 %v28655_v19 }
0x1481   :  { %25473 = vmatprep.subr.bf16.mxu0 %v28661_v54 }
0x1484   :  { %25475 = vmatpush1.bf16.msra.mxu0 %v28669_v56 }
0x1485   :  { %25477 = vmatprep.subr.bf16.mxu0 %v32041_v47 }
0x1487   :  { %10667 = vmatmul.mubr.f32.vlgmr.msra.gmra.mrb[8].mxu0 %v29725_v36 }
0x1488   :  { %25479 = vmatpush1.bf16.msra.mxu0 %v32042_v13  ;;  %10785 = vmatprep.mubr.f32.mxu0 %v31729_v10 }
0x1489   :  { %25481 = vmatprep.subr.bf16.mxu0 %v32043_v48 }
0x148c   :  { %25483 = vmatpush1.bf16.msra.mxu0 %v32044_v49 }
0x148d   :  { %25485 = vmatprep.subr.bf16.mxu0 %v32045_v25 }
0x1490   :  { %25487 = vmatpush1.bf16.msra.mxu0 %v32046_v45 }
0x1491   :  { %25489 = vmatprep.subr.bf16.mxu0 %v32047_v40 }
0x1494   :  { %25491 = vmatpush1.bf16.msra.mxu0 %v32048_v30  ;;  %v32049_v30 = vld [vmem:[#allocation53_spill] sm:$0xff] }
0x1495   :  { %25493 = vmatprep.subr.bf16.mxu0 %v28626_v57 }
0x1497   :  { %10787 = vmatmul.mubr.f32.vlgmr.msra.gmra.mrb[8].mxu0 %v29719_v52 }
0x1498   :  { %25495 = vmatpush1.bf16.msra.mxu0 %v28633_v62  ;;  %10873 = vmatprep.mubr.f32.mxu0 %v31729_v10 }
0x1499   :  { %25497 = vmatprep.subr.bf16.mxu0 %v28640_v23 }
0x149c   :  { %25499 = vmatpush1.bf16.msra.mxu0 %v28642_v21 }
0x149d   :  { %25501 = vmatprep.subr.bf16.mxu0 %v28649_v58 }
0x14a0   :  { %25503 = vmatpush1.bf16.msra.mxu0 %v28655_v19 }
0x14a1   :  { %25505 = vmatprep.subr.bf16.mxu0 %v28661_v54 }
0x14a4   :  { %25507 = vmatpush1.bf16.msra.mxu0 %v28669_v56 }
0x14a5   :  { %25677 = vmatprep.subr.bf16.mxu0 %v28335_v12 }
0x14a7   :  { %10875 = vmatmul.mubr.f32.vlgmr.msra.gmra.mrb[8].mxu0 %v29719_v52 }
0x14a8   :  { %25679 = vmatpush1.bf16.msra.mxu0 %v28341_v11  ;;  %12366 = vmatprep.mubr.f32.mxu0 %v31729_v10 }
0x14a9   :  { %25681 = vmatprep.subr.bf16.mxu0 %v28343_v0 }
0x14ac   :  { %25683 = vmatpush1.bf16.msra.mxu0 %v28351_v24 }
0x14ad   :  { %25685 = vmatprep.subr.bf16.mxu0 %v31794_v53 }
0x14b0   :  { %25687 = vmatpush1.bf16.msra.mxu0 %v31795_v59 }
0x14b1   :  { %25689 = vmatprep.subr.bf16.mxu0 %v31796_v33 }
0x14b4   :  { %25691 = vmatpush1.bf16.msra.mxu0 %v31797_v44 }
0x14b5   :  { %25693 = vmatprep.subr.bf16.mxu0 %v32049_v30 }
0x157a   :  { %v10876_v40 = vpop.f32.mrb[8].mxu0 }
0x157b   :  { %v10878_v45 = vpop.f32.mrb[9].mxu0  ;;  %v10881_v48 = vadd.f32 %v10876_v40, %v31896_v22 }
0x157c   :  { %v10882_v25 = vadd.f32 %v10878_v45, %v31895_v1 }
0x157d   :  { %v22508_v13 = vmul.f32 -1.442695, %v10881_v48 }
0x157e   :  { %27451 = vtanh.f32 %v10882_v25  ;;  %v22509_v48 = vmul.f32 -1.442695, %v10882_v25 }
0x157f   :  { %27453 = vpow2.f32 %v22508_v13 }
0x1588   :  { %v27452_v49 = vpop.eup %27451 }
0x1589   :  { %10898 = vrot.lane.b32.xlu1 %v27452_v49, %s27746_s14  ;;  %v27454_v47 = vpop.eup %27453 }
0x158a   :  { %v10889_v29 = vadd.f32 1.0, %v27454_v47 }
0x158c   :  { %27455 = vrcp.f32 %v10889_v29 }
0x1596   :  { %v27456_v8 = vpop.eup %27455 }
0x1597   :  { %v10896_v30 = vmul.f32 %v27456_v8, %v29509_v61 }
0x15fb   :  { %v10899_v60 = vpop.permute.xlu1 %10898 }
0x15fc   :  { %v10901_v41 = vmul.f32 %v27456_v8, %v10899_v60 }
0x15fe   :  { %10903 = vrot.lane.b32.xlu0 %v10901_v41, %s27746_s14 }
0x1670   :  { %v10904_v36 = vpop.permute.xlu0 %10903 }
0x1671   :  { %v29796_v45 = vadd.f32 %v10904_v36, %v10896_v30 }
0x1673   :  { %27457 = vtanh.f32 %v29796_v45 }
0x1674   :  { %27459 = vpow2.f32 %v22509_v48  ;;  %v32052_v48 = vld [vmem:[#allocation67_spill] sm:$0xff] }
0x167d   :  { %v27458_v49 = vpop.eup %27457 }
0x167e   :  { %10909 = vrot.lane.b32.xlu1 %v27458_v49, %s27746_s14  ;;  %v27460_v13 = vpop.eup %27459  ;;  %v32051_v49 = vld [vmem:[#allocation66_spill] sm:$0xff] }
0x167f   :  { %v10890_v47 = vadd.f32 1.0, %v27460_v13  ;;  %v32053_v13 = vld [vmem:[#allocation104_spill] sm:$0xff] }
0x1681   :  { %27461 = vrcp.f32 %v10890_v47  ;;  %v32054_v47 = vld [vmem:[#allocation68_spill] sm:$0xff] }
0x168b   :  { %v27462_v29 = vpop.eup %27461 }
0x16f0   :  { %v10910_v40 = vpop.permute.xlu1 %10909 }
0x16f1   :  { %v29800_v60 = vmul.f32 %v27462_v29, %v10910_v40  ;;  %v32055_v29 = vld [vmem:[#allocation69_spill] sm:$0xff]  ;;  %v32056_v40 = vld [vmem:[#allocation54_spill] sm:$0xff] }
0x16f3   :  { %32050 = vst [vmem:[#allocation12_spill] sm:$0xff] %v29800_v60  ;;  %v10914_v61 = vsel %vm107_vm0, %v29800_v60, 0  ;;  %v32062_v60 = vld [vmem:[#allocation106_spill] sm:$0xff] }
0x16f4   :  { %v29804_v41 = vand.u32 4294901760, %v10914_v61 }
0x16f6   :  { %v10990_v36 = vsub.f32 %v10914_v61, %v29804_v41  ;;  %v32057_v61 = vld [vmem:[#allocation70_spill] sm:$0xff] }
0x16f8   :  { %v29807_v8 = vand.u32 4294901760, %v10990_v36 }
0x16fa   :  { %v10992_v30 = vsub.f32 %v10990_v36, %v29807_v8 }
0x16fc   :  { %v10993_v25 = vand.u32 4294901760, %v10992_v30  ;;  %v32059_v30 = vld [vmem:[#allocation105_spill] sm:$0xff] }
0x16fe   :  { %23491 = vmatmul.mubr.f32.vlgmr.msra.gmra.mrb[16].mxu1 %v10993_v25  ;;  %12372 = vmatmul.mubr.f32.vlgmr.msra.gmra.mrb[10].mxu0 %v10993_v25  ;;  %v32060_v25 = vld [vmem:[#allocation72_spill] sm:$0xff] }
0x16ff   :  { %25522 = vmatpush3.bf16.msra.mxu1 %v28937_v27  ;;  %25695 = vmatpush1.bf16.msra.mxu0 %v31813_v55 }
0x1700   :  { %25523 = vmatprep.subr.bf16.mxu1 %v31814_v7  ;;  %25697 = vmatprep.subr.bf16.mxu0 %v31815_v20 }
0x1701   :  { %23509 = vmatprep.mubr.msk.f32.mxu1 %vm27748_vm1, %v31729_v10  ;;  %12522 = vmatprep.mubr.f32.mxu0 %v31729_v10 }
0x1703   :  { %25525 = vmatpush3.bf16.msra.mxu1 %v28890_v42  ;;  %25699 = vmatpush1.bf16.msra.mxu0 %v31816_v4 }
0x1704   :  { %25526 = vmatprep.subr.bf16.mxu1 %v31814_v7  ;;  %25701 = vmatprep.subr.bf16.mxu0 %v31817_v51 }
0x1707   :  { %25528 = vmatpush3.bf16.msra.mxu1 %v28892_v15  ;;  %25703 = vmatpush1.bf16.msra.mxu0 %v31818_v39 }
0x1708   :  { %25529 = vmatprep.subr.bf16.mxu1 %v31814_v7  ;;  %25705 = vmatprep.subr.bf16.mxu0 %v31819_v63 }
0x170b   :  { %25531 = vmatpush3.bf16.msra.mxu1 %v28894_v32  ;;  %25707 = vmatpush1.bf16.msra.mxu0 %v31820_v18 }
0x170c   :  { %25532 = vmatprep.subr.bf16.mxu1 %v31814_v7  ;;  %25709 = vmatprep.subr.bf16.mxu0 %v31821_v3 }
0x170e   :  { %23510 = vmatmul.mubr.f32.vlgmr.msra.gmra.mrb[16].mxu1 %v29804_v41  ;;  %12524 = vmatmul.mubr.f32.vlgmr.msra.gmra.mrb[10].mxu0 %v29804_v41 }
0x170f   :  { %25534 = vmatpush3.bf16.msra.mxu1 %v28958_v31  ;;  %25711 = vmatpush1.bf16.msra.mxu0 %v31822_v16 }
0x1710   :  { %25535 = vmatprep.subr.bf16.mxu1 %v31814_v7  ;;  %25713 = vmatprep.subr.bf16.mxu0 %v31823_v38 }
0x1711   :  { %23528 = vmatprep.mubr.msk.f32.mxu1 %vm27748_vm1, %v31729_v10  ;;  %12626 = vmatprep.mubr.f32.mxu0 %v31729_v10 }
0x1713   :  { %25537 = vmatpush3.bf16.msra.mxu1 %v28896_v26  ;;  %25715 = vmatpush1.bf16.msra.mxu0 %v31824_v2 }
0x1714   :  { %25538 = vmatprep.subr.bf16.mxu1 %v31814_v7  ;;  %25717 = vmatprep.subr.bf16.mxu0 %v31899_v50 }
0x1717   :  { %25540 = vmatpush3.bf16.msra.mxu1 %v31975_v35  ;;  %25719 = vmatpush1.bf16.msra.mxu0 %v32051_v49  ;;  %v32080_v49 = vld [vmem:[#allocation28_spill] sm:$0xff] }
0x1718   :  { %25541 = vmatprep.subr.bf16.mxu1 %v31814_v7  ;;  %25721 = vmatprep.subr.bf16.mxu0 %v32052_v48  ;;  %v32078_v48 = vld [vmem:[#allocation26_spill] sm:$0xff] }
0x171b   :  { %25543 = vmatpush3.bf16.msra.mxu1 %v32053_v13  ;;  %25723 = vmatpush1.bf16.msra.mxu0 %v32054_v47  ;;  %v32076_v47 = vld [vmem:[#allocation24_spill] sm:$0xff]  ;;  %v32077_v13 = vld [vmem:[#allocation25_spill] sm:$0xff] }
0x171c   :  { %25544 = vmatprep.subr.bf16.mxu1 %v31814_v7  ;;  %25725 = vmatprep.subr.bf16.mxu0 %v28335_v12 }
0x171e   :  { %23529 = vmatmul.mubr.f32.vlgmr.msra.gmra.mrb[16].mxu1 %v10990_v36  ;;  %12629 = vmatmul.mubr.f32.vlgmr.msra.gmra.mrb[10].mxu0 %v10990_v36  ;;  %v32058_v36 = vld [vmem:[#allocation71_spill] sm:$0xff] }
0x171f   :  { %25546 = vmatpush3.bf16.msra.mxu1 %v28868_v43  ;;  %25727 = vmatpush1.bf16.msra.mxu0 %v28341_v11 }
0x1720   :  { %25547 = vmatprep.subr.bf16.mxu1 %v31814_v7  ;;  %25729 = vmatprep.subr.bf16.mxu0 %v28343_v0 }
0x1721   :  { %23547 = vmatprep.mubr.msk.f32.mxu1 %vm27748_vm1, %v31729_v10  ;;  %12715 = vmatprep.mubr.f32.mxu0 %v31729_v10 }
0x1723   :  { %25549 = vmatpush3.bf16.msra.mxu1 %v28872_v5  ;;  %25731 = vmatpush1.bf16.msra.mxu0 %v28351_v24 }
0x1724   :  { %25550 = vmatprep.subr.bf16.mxu1 %v31814_v7  ;;  %25733 = vmatprep.subr.bf16.mxu0 %v31794_v53 }
0x1727   :  { %25552 = vmatpush3.bf16.msra.mxu1 %v28879_v37  ;;  %25735 = vmatpush1.bf16.msra.mxu0 %v31795_v59 }
0x1728   :  { %25553 = vmatprep.subr.bf16.mxu1 %v31814_v7  ;;  %25737 = vmatprep.subr.bf16.mxu0 %v31796_v33 }
0x172b   :  { %25555 = vmatpush3.bf16.msra.mxu1 %v28885_v46  ;;  %25739 = vmatpush1.bf16.msra.mxu0 %v31797_v44 }
0x172c   :  { %25556 = vmatprep.subr.bf16.mxu1 %v31814_v7  ;;  %25741 = vmatprep.subr.bf16.mxu0 %v32055_v29  ;;  %v32066_v29 = vld [vmem:[#allocation76_spill] sm:$0xff] }
0x172e   :  { %23548 = vmatmul.mubr.f32.vlgmr.msra.gmra.mrb[16].mxu1 %v29807_v8  ;;  %12719 = vmatmul.mubr.f32.vlgmr.msra.gmra.mrb[10].mxu0 %v29807_v8  ;;  %v32061_v8 = vld [vmem:[#allocation73_spill] sm:$0xff] }
0x172f   :  { %25558 = vmatpush3.bf16.msra.mxu1 %v32056_v40  ;;  %25743 = vmatpush1.bf16.msra.mxu0 %v32057_v61  ;;  %v32063_v61 = vld [vmem:[#allocation74_spill] sm:$0xff]  ;;  %v32065_v40 = vld [vmem:[#allocation107_spill] sm:$0xff] }
0x1730   :  { %25559 = vmatprep.subr.bf16.mxu1 %v31814_v7  ;;  %25745 = vmatprep.subr.bf16.mxu0 %v32058_v36  ;;  %v32064_v36 = vld [vmem:[#allocation75_spill] sm:$0xff] }
0x1731   :  { %23566 = vmatprep.mubr.msk.f32.mxu1 %vm27748_vm1, %v31729_v10  ;;  %12837 = vmatprep.mubr.f32.mxu0 %v31729_v10 }
0x1733   :  { %25561 = vmatpush3.bf16.msra.mxu1 %v32059_v30  ;;  %25747 = vmatpush1.bf16.msra.mxu0 %v32060_v25  ;;  %v32074_v25 = vld [vmem:[#allocation22_spill] sm:$0xff]  ;;  %v32075_v30 = vld [vmem:[#allocation23_spill] sm:$0xff] }
0x1734   :  { %25562 = vmatprep.subr.bf16.mxu1 %v31814_v7  ;;  %25749 = vmatprep.subr.bf16.mxu0 %v32061_v8  ;;  %v32073_v8 = vld [vmem:[#allocation21_spill] sm:$0xff] }
0x1737   :  { %25564 = vmatpush3.bf16.msra.mxu1 %v32062_v60  ;;  %25751 = vmatpush1.bf16.msra.mxu0 %v32063_v61  ;;  %v32071_v61 = vld [vmem:[#allocation20_spill] sm:$0xff]  ;;  %v32072_v60 = vld [vmem:[#allocation78_spill] sm:$0xff] }
0x1738   :  { %25565 = vmatprep.subr.bf16.mxu1 %v31814_v7  ;;  %25753 = vmatprep.subr.bf16.mxu0 %v32064_v36  ;;  %v32070_v36 = vld [vmem:[#allocation19_spill] sm:$0xff] }
0x173b   :  { %25567 = vmatpush3.bf16.msra.mxu1 %v32065_v40  ;;  %25755 = vmatpush1.bf16.msra.mxu0 %v32066_v29  ;;  %v32067_v29 = vld [vmem:[#allocation16_spill] sm:$0xff]  ;;  %v32069_v40 = vld [vmem:[#allocation18_spill] sm:$0xff] }
0x173c   :  { %25568 = vmatprep.subr.bf16.mxu1 %v31814_v7  ;;  %25757 = vmatprep.subr.bf16.mxu0 %v28335_v12 }
0x173e   :  { %23567 = vmatmul.mubr.f32.vlgmr.msra.gmra.mrb[16].mxu1 %v29804_v41  ;;  %12839 = vmatmul.mubr.f32.vlgmr.msra.gmra.mrb[10].mxu0 %v29804_v41 }
0x173f   :  { %25570 = vmatpush3.bf16.msra.mxu1 %v28868_v43  ;;  %25759 = vmatpush1.bf16.msra.mxu0 %v28341_v11 }
0x1740   :  { %25571 = vmatprep.subr.bf16.mxu1 %v31814_v7  ;;  %25761 = vmatprep.subr.bf16.mxu0 %v28343_v0 }
0x1741   :  { %23585 = vmatprep.mubr.msk.f32.mxu1 %vm27748_vm1, %v31729_v10  ;;  %12925 = vmatprep.mubr.f32.mxu0 %v31729_v10 }
0x1743   :  { %25573 = vmatpush3.bf16.msra.mxu1 %v28872_v5  ;;  %25763 = vmatpush1.bf16.msra.mxu0 %v28351_v24 }
0x1744   :  { %25574 = vmatprep.subr.bf16.mxu1 %v31814_v7  ;;  %25765 = vmatprep.subr.bf16.mxu0 %v31794_v53 }
0x1747   :  { %25576 = vmatpush3.bf16.msra.mxu1 %v28879_v37  ;;  %25767 = vmatpush1.bf16.msra.mxu0 %v31795_v59 }
0x1748   :  { %25577 = vmatprep.subr.bf16.mxu1 %v31814_v7  ;;  %25769 = vmatprep.subr.bf16.mxu0 %v31796_v33 }
0x174b   :  { %25579 = vmatpush3.bf16.msra.mxu1 %v28885_v46  ;;  %25771 = vmatpush1.bf16.msra.mxu0 %v31797_v44 }
0x174c   :  { %25581 = vmatprep.subr.bf16.mxu1 %v31838_v9  ;;  %25773 = vmatprep.subr.bf16.mxu0 %v28626_v57 }
0x174e   :  { %23586 = vmatmul.mubr.f32.vlgmr.msra.gmra.mrb[16].mxu1 %v29804_v41  ;;  %12927 = vmatmul.mubr.f32.vlgmr.msra.gmra.mrb[10].mxu0 %v29804_v41  ;;  %v32068_v41 = vld [vmem:[#allocation17_spill] sm:$0xff] }
0x174f   :  { %25583 = vmatpush1.bf16.msra.mxu1 %v31839_v34  ;;  %11679 = vmatprep.mubr.f32.mxu1 %v31729_v10 }
0x1750   :  { %25585 = vmatprep.subr.bf16.mxu1 %v31840_v6  ;;  %25775 = vmatpush1.bf16.msra.mxu0 %v28633_v62 }
0x1751   :  { %25777 = vmatprep.subr.bf16.mxu0 %v28640_v23  ;;  %13016 = vmatprep.mubr.f32.mxu0 %v31729_v10 }
0x1753   :  { %25587 = vmatpush1.bf16.msra.mxu1 %v31841_v17 }
0x1754   :  { %25589 = vmatprep.subr.bf16.mxu1 %v32067_v29  ;;  %25779 = vmatpush1.bf16.msra.mxu0 %v28642_v21 }
0x1755   :  { %25781 = vmatprep.subr.bf16.mxu0 %v28649_v58 }
0x1757   :  { %25591 = vmatpush1.bf16.msra.mxu1 %v32068_v41 }
0x1758   :  { %25593 = vmatprep.subr.bf16.mxu1 %v32069_v40  ;;  %25783 = vmatpush1.bf16.msra.mxu0 %v28655_v19 }
0x1759   :  { %25785 = vmatprep.subr.bf16.mxu0 %v28661_v54 }
0x175b   :  { %25595 = vmatpush1.bf16.msra.mxu1 %v32070_v36 }
0x175c   :  { %25597 = vmatprep.subr.bf16.mxu1 %v32071_v61  ;;  %25787 = vmatpush1.bf16.msra.mxu0 %v28669_v56  ;;  %v32079_v61 = vld [vmem:[#allocation27_spill] sm:$0xff] }
0x175d   :  { %25789 = vmatprep.subr.bf16.mxu0 %v32072_v60 }
0x175e   :  { %11685 = vmatmul.mubr.f32.vlgmr.msra.gmra.mrb[18].mxu1 %v29729_v28  ;;  %v32081_v28 = vld [vmem:[#allocation29_spill] sm:$0xff] }
0x175f   :  { %25599 = vmatpush1.bf16.msra.mxu1 %v32073_v8  ;;  %11835 = vmatprep.mubr.f32.mxu1 %v31729_v10  ;;  %v32082_v8 = vld [vmem:[#allocation30_spill] sm:$0xff] }
0x1760   :  { %25601 = vmatprep.subr.bf16.mxu1 %v32074_v25  ;;  %v32083_v25 = vld [vmem:[#allocation31_spill] sm:$0xff] }
0x1763   :  { %25603 = vmatpush1.bf16.msra.mxu1 %v32075_v30  ;;  %v32084_v30 = vld [vmem:[#allocation32_spill] sm:$0xff] }
0x1764   :  { %25605 = vmatprep.subr.bf16.mxu1 %v32076_v47  ;;  %v32085_v47 = vld [vmem:[#allocation33_spill] sm:$0xff] }
0x1767   :  { %25607 = vmatpush1.bf16.msra.mxu1 %v32077_v13  ;;  %v32086_v13 = vld [vmem:[#allocation34_spill] sm:$0xff] }
0x1768   :  { %25609 = vmatprep.subr.bf16.mxu1 %v32078_v48  ;;  %v32087_v48 = vld [vmem:[#allocation35_spill] sm:$0xff] }
0x176b   :  { %25611 = vmatpush1.bf16.msra.mxu1 %v32079_v61 }
0x176c   :  { %25613 = vmatprep.subr.bf16.mxu1 %v32080_v49  ;;  %v32096_v49 = vld [vmem:[#allocation43_spill] sm:$0xff] }
0x176e   :  { %11837 = vmatmul.mubr.f32.vlgmr.msra.gmra.mrb[18].mxu1 %v29719_v52 }
0x176f   :  { %25615 = vmatpush1.bf16.msra.mxu1 %v32081_v28  ;;  %11939 = vmatprep.mubr.f32.mxu1 %v31729_v10  ;;  %v32095_v28 = vld [vmem:[#allocation42_spill] sm:$0xff] }
0x1770   :  { %25617 = vmatprep.subr.bf16.mxu1 %v32082_v8  ;;  %v32094_v8 = vld [vmem:[#allocation41_spill] sm:$0xff] }
0x1773   :  { %25619 = vmatpush1.bf16.msra.mxu1 %v32083_v25  ;;  %v32093_v25 = vld [vmem:[#allocation40_spill] sm:$0xff] }
0x1774   :  { %25621 = vmatprep.subr.bf16.mxu1 %v32084_v30  ;;  %v32092_v30 = vld [vmem:[#allocation39_spill] sm:$0xff] }
0x1777   :  { %25623 = vmatpush1.bf16.msra.mxu1 %v32085_v47  ;;  %v32091_v47 = vld [vmem:[#allocation38_spill] sm:$0xff] }
0x1778   :  { %25625 = vmatprep.subr.bf16.mxu1 %v32086_v13  ;;  %v32089_v13 = vld [vmem:[#allocation64_spill] sm:$0xff] }
0x177b   :  { %25627 = vmatpush1.bf16.msra.mxu1 %v32087_v48  ;;  %v32088_v48 = vld [vmem:[#allocation36_spill] sm:$0xff] }
0x177c   :  { %25629 = vmatprep.subr.bf16.mxu1 %v31838_v9 }
0x177e   :  { %11942 = vmatmul.mubr.f32.vlgmr.msra.gmra.mrb[18].mxu1 %v29722_v14  ;;  %v32090_v14 = vld [vmem:[#allocation37_spill] sm:$0xff] }
0x177f   :  { %25631 = vmatpush1.bf16.msra.mxu1 %v31839_v34  ;;  %12028 = vmatprep.mubr.f32.mxu1 %v31729_v10 }
0x1780   :  { %25633 = vmatprep.subr.bf16.mxu1 %v31840_v6 }
0x1783   :  { %25635 = vmatpush1.bf16.msra.mxu1 %v31841_v17 }
0x1784   :  { %25637 = vmatprep.subr.bf16.mxu1 %v32067_v29 }
0x1787   :  { %25639 = vmatpush1.bf16.msra.mxu1 %v32068_v41 }
0x1788   :  { %25641 = vmatprep.subr.bf16.mxu1 %v32069_v40 }
0x178b   :  { %25643 = vmatpush1.bf16.msra.mxu1 %v32070_v36 }
0x178c   :  { %25645 = vmatprep.subr.bf16.mxu1 %v32088_v48 }
0x178e   :  { %12032 = vmatmul.mubr.f32.vlgmr.msra.gmra.mrb[18].mxu1 %v32089_v13 }
0x178f   :  { %25647 = vmatpush1.bf16.msra.mxu1 %v32090_v14  ;;  %12150 = vmatprep.mubr.f32.mxu1 %v31729_v10 }
0x1790   :  { %25649 = vmatprep.subr.bf16.mxu1 %v32091_v47 }
0x1793   :  { %25651 = vmatpush1.bf16.msra.mxu1 %v32092_v30  ;;  %v32098_v30 = vld [vmem:[#allocation48_spill] sm:$0xff] }
0x1794   :  { %25653 = vmatprep.subr.bf16.mxu1 %v32093_v25  ;;  %v22510_v25 = vld [vmem:[%s31399_s0 + $0x10] sm:$0xf] }
0x1797   :  { %25655 = vmatpush1.bf16.msra.mxu1 %v32094_v8 }
0x1798   :  { %25657 = vmatprep.subr.bf16.mxu1 %v32095_v28 }
0x179b   :  { %25659 = vmatpush1.bf16.msra.mxu1 %v32096_v49 }
0x179c   :  { %25661 = vmatprep.subr.bf16.mxu1 %v31838_v9 }
0x179e   :  { %12152 = vmatmul.mubr.f32.vlgmr.msra.gmra.mrb[18].mxu1 %v29719_v52 }
0x179f   :  { %25663 = vmatpush1.bf16.msra.mxu1 %v31839_v34  ;;  %12238 = vmatprep.mubr.f32.mxu1 %v31729_v10 }
0x17a0   :  { %25665 = vmatprep.subr.bf16.mxu1 %v31840_v6 }
0x17a3   :  { %25667 = vmatpush1.bf16.msra.mxu1 %v31841_v17 }
0x17a4   :  { %25669 = vmatprep.subr.bf16.mxu1 %v32067_v29 }
0x17a7   :  { %25671 = vmatpush1.bf16.msra.mxu1 %v32068_v41 }
0x17a8   :  { %25673 = vmatprep.subr.bf16.mxu1 %v32069_v40 }
0x17ab   :  { %25675 = vmatpush1.bf16.msra.mxu1 %v32070_v36 }
0x17ac   :  { %25868 = vmatprep.subr.bf16.mxu1 %v31814_v7 }
0x17ae   :  { %12240 = vmatmul.mubr.f32.vlgmr.msra.gmra.mrb[18].mxu1 %v29719_v52 }
0x17af   :  { %25870 = vmatpush3.bf16.msra.mxu1 %v28868_v43  ;;  %23604 = vmatprep.mubr.msk.f32.mxu1 %vm27748_vm1, %v31729_v10 }
0x17b0   :  { %25871 = vmatprep.subr.bf16.mxu1 %v31814_v7 }
0x17b3   :  { %25873 = vmatpush3.bf16.msra.mxu1 %v28872_v5 }
0x17b4   :  { %25874 = vmatprep.subr.bf16.mxu1 %v31814_v7 }
0x17b7   :  { %25876 = vmatpush3.bf16.msra.mxu1 %v28879_v37 }
0x17b8   :  { %25877 = vmatprep.subr.bf16.mxu1 %v31814_v7 }
0x17bb   :  { %25879 = vmatpush3.bf16.msra.mxu1 %v28885_v46 }
0x17bc   :  { %25880 = vmatprep.subr.bf16.mxu1 %v31814_v7 }
0x1821   :  { %v29992_v52 = vpop.f32.mrb[16].mxu1 }
0x1822   :  { %32097 = vst [vmem:[#allocation13_spill] sm:$0xff] %v29992_v52  ;;  %v23587_v13 = vpop.f32.mrb[17].mxu1 }
0x1881   :  { %v12241_v49 = vpop.f32.mrb[18].mxu1 }
0x1882   :  { %v12243_v28 = vpop.f32.mrb[19].mxu1 }
0x1883   :  { %v12248_v8 = vcombine.low %v12241_v49, %v12243_v28  ;;  %v32099_v28 = vld [vmem:[#allocation63_spill] sm:$0xff] }
0x1885   :  { %v12255_v47 = vrot.slane %v12248_v8, %v32098_v30 }
0x1887   :  { %v12257_v14 = vadd.f32 %v22510_v25, %v12255_v47 }
0x1889   :  { %12265 = vrot.lane.b32.xlu0 %v12257_v14, %s27746_s14  ;;  %v22511_v48 = vmul.f32 -1.442695, %v12257_v14 }
0x188b   :  { %27463 = vpow2.f32 %v22511_v48 }
0x1895   :  { %v27464_v61 = vpop.eup %27463 }
0x1896   :  { %v12261_v60 = vadd.f32 1.0, %v27464_v61 }
0x1898   :  { %27465 = vrcp.f32 %v12261_v60 }
0x18a2   :  { %v27466_v13 = vpop.eup %27465 }
0x18a3   :  { %v12270_v41 = vmul.f32 %v27466_v13, %v32099_v28  ;;  %v12279_v48 = vrot.slane %v27466_v13, 2  ;;  %v32105_v28 = vld [vmem:[#allocation81_spill] sm:$0xff] }
0x18fb   :  { %v12266_v36 = vpop.permute.xlu0 %12265 }
0x18fc   :  { %v12267_v40 = vrot.slane %v12266_v36, 2 }
0x18fe   :  { %27467 = vtanh.f32 %v12267_v40 }
0x1908   :  { %v27468_v52 = vpop.eup %27467 }
0x1909   :  { %v12271_v49 = vmul.f32 %v27468_v52, %v27466_v13  ;;  %v32102_v52 = vld [vmem:[#allocation99_spill] sm:$0xff] }
0x190a   :  { %v32103_v13 = vld [vmem:[#allocation79_spill] sm:$0xff] }
0x190b   :  { %12273 = vrot.lane.b32.xlu1 %v12271_v49, %s27746_s14  ;;  %v32104_v49 = vld [vmem:[#allocation80_spill] sm:$0xff] }
0x197d   :  { %v12274_v29 = vpop.permute.xlu1 %12273 }
0x197e   :  { %v30001_v8 = vadd.f32 %v12274_v29, %v12270_v41 }
0x1980   :  { %32100 = vst [vmem:[#allocation14_spill] sm:$0xff] %v30001_v8  ;;  %27469 = vtanh.f32 %v30001_v8 }
0x198a   :  { %v27470_v47 = vpop.eup %27469 }
0x198b   :  { %12282 = vrot.lane.b32.xlu0 %v27470_v47, %s27746_s14  ;;  %v32106_v47 = vld [vmem:[#allocation82_spill] sm:$0xff] }
0x19fd   :  { %v12283_v61 = vpop.permute.xlu0 %12282 }
0x19fe   :  { %v12285_v36 = vmul.f32 %v12283_v61, %v12279_v48  ;;  %v32107_v48 = vld [vmem:[#allocation83_spill] sm:$0xff]  ;;  %v32108_v61 = vld [vmem:[#allocation84_spill] sm:$0xff] }
0x1a00   :  { %v12934_v60 = vsel %vm107_vm0, %v12285_v36, 0  ;;  %v32109_v36 = vld [vmem:[#allocation85_spill] sm:$0xff] }
0x1a01   :  { %v30006_v40 = vand.u32 4294901760, %v12934_v60 }
0x1a03   :  { %v30009_v25 = vsub.f32 %v12934_v60, %v30006_v40  ;;  %v32110_v60 = vld [vmem:[#allocation100_spill] sm:$0xff] }
0x1a05   :  { %v30012_v14 = vand.u32 4294901760, %v30009_v25 }
0x1a07   :  { %32101 = vst [vmem:[#allocation15_spill] sm:$0xff] %v30012_v14  ;;  %v13020_v29 = vsub.f32 %v30009_v25, %v30012_v14 }
0x1a09   :  { %v30016_v41 = vand.u32 4294901760, %v13020_v29  ;;  %v32111_v29 = vld [vmem:[#allocation86_spill] sm:$0xff] }
0x1a0b   :  { %13022 = vmatmul.mubr.f32.vlgmr.msra.gmra.mrb[10].mxu0 %v30016_v41 }
0x1a0c   :  { %25791 = vmatpush1.bf16.msra.mxu0 %v32102_v52  ;;  %13172 = vmatprep.mubr.f32.mxu0 %v31729_v10 }
0x1a0d   :  { %25793 = vmatprep.subr.bf16.mxu0 %v32103_v13  ;;  %v32112_v13 = vld [vmem:[#allocation87_spill] sm:$0xff] }
0x1a10   :  { %25795 = vmatpush1.bf16.msra.mxu0 %v32104_v49  ;;  %v32113_v49 = vld [vmem:[#allocation88_spill] sm:$0xff] }
0x1a11   :  { %25797 = vmatprep.subr.bf16.mxu0 %v32105_v28  ;;  %v32114_v28 = vld [vmem:[#allocation89_spill] sm:$0xff] }
0x1a14   :  { %25799 = vmatpush1.bf16.msra.mxu0 %v32106_v47  ;;  %v32115_v47 = vld [vmem:[#allocation90_spill] sm:$0xff] }
0x1a15   :  { %25801 = vmatprep.subr.bf16.mxu0 %v32107_v48  ;;  %v32116_v48 = vld [vmem:[#allocation91_spill] sm:$0xff] }
0x1a18   :  { %25803 = vmatpush1.bf16.msra.mxu0 %v32108_v61 }
0x1a19   :  { %25805 = vmatprep.subr.bf16.mxu0 %v32109_v36  ;;  %v32124_v36 = vld [vmem:[#allocation98_spill] sm:$0xff] }
0x1a1b   :  { %13174 = vmatmul.mubr.f32.vlgmr.msra.gmra.mrb[10].mxu0 %v30006_v40 }
0x1a1c   :  { %25807 = vmatpush1.bf16.msra.mxu0 %v32110_v60  ;;  %13276 = vmatprep.mubr.f32.mxu0 %v31729_v10  ;;  %v32123_v60 = vld [vmem:[#allocation97_spill] sm:$0xff] }
0x1a1d   :  { %25809 = vmatprep.subr.bf16.mxu0 %v32111_v29  ;;  %v32122_v29 = vld [vmem:[#allocation96_spill] sm:$0xff] }
0x1a20   :  { %25811 = vmatpush1.bf16.msra.mxu0 %v32112_v13  ;;  %v32121_v13 = vld [vmem:[#allocation95_spill] sm:$0xff] }
0x1a21   :  { %25813 = vmatprep.subr.bf16.mxu0 %v32113_v49  ;;  %v32120_v49 = vld [vmem:[#allocation94_spill] sm:$0xff] }
0x1a24   :  { %25815 = vmatpush1.bf16.msra.mxu0 %v32114_v28  ;;  %v32119_v28 = vld [vmem:[#allocation93_spill] sm:$0xff] }
0x1a25   :  { %25817 = vmatprep.subr.bf16.mxu0 %v32115_v47  ;;  %v32118_v47 = vld [vmem:[#allocation101_spill] sm:$0xff] }
0x1a28   :  { %25819 = vmatpush1.bf16.msra.mxu0 %v32116_v48  ;;  %v32117_v48 = vld [vmem:[#allocation92_spill] sm:$0xff] }
0x1a29   :  { %25821 = vmatprep.subr.bf16.mxu0 %v28626_v57 }
0x1a2b   :  { %13279 = vmatmul.mubr.f32.vlgmr.msra.gmra.mrb[10].mxu0 %v30009_v25 }
0x1a2c   :  { %25823 = vmatpush1.bf16.msra.mxu0 %v28633_v62  ;;  %13365 = vmatprep.mubr.f32.mxu0 %v31729_v10 }
0x1a2d   :  { %25825 = vmatprep.subr.bf16.mxu0 %v28640_v23 }
0x1a30   :  { %25827 = vmatpush1.bf16.msra.mxu0 %v28642_v21 }
0x1a31   :  { %25829 = vmatprep.subr.bf16.mxu0 %v28649_v58 }
0x1a34   :  { %25831 = vmatpush1.bf16.msra.mxu0 %v28655_v19 }
0x1a35   :  { %25833 = vmatprep.subr.bf16.mxu0 %v28661_v54 }
0x1a38   :  { %25835 = vmatpush1.bf16.msra.mxu0 %v28669_v56 }
0x1a39   :  { %25837 = vmatprep.subr.bf16.mxu0 %v32117_v48 }
0x1a3b   :  { %13369 = vmatmul.mubr.f32.vlgmr.msra.gmra.mrb[10].mxu0 %v30012_v14 }
0x1a3c   :  { %25839 = vmatpush1.bf16.msra.mxu0 %v32118_v47  ;;  %13487 = vmatprep.mubr.f32.mxu0 %v31729_v10 }
0x1a3d   :  { %25841 = vmatprep.subr.bf16.mxu0 %v32119_v28 }
0x1a40   :  { %25843 = vmatpush1.bf16.msra.mxu0 %v32120_v49 }
0x1a41   :  { %25845 = vmatprep.subr.bf16.mxu0 %v32121_v13 }
0x1a44   :  { %25847 = vmatpush1.bf16.msra.mxu0 %v32122_v29 }
0x1a45   :  { %25849 = vmatprep.subr.bf16.mxu0 %v32123_v60 }
0x1a48   :  { %25851 = vmatpush1.bf16.msra.mxu0 %v32124_v36  ;;  %v32125_v36 = vld [vmem:[#allocation53_spill] sm:$0xff] }
0x1a49   :  { %25853 = vmatprep.subr.bf16.mxu0 %v28626_v57 }
0x1a4b   :  { %13489 = vmatmul.mubr.f32.vlgmr.msra.gmra.mrb[10].mxu0 %v30006_v40 }
0x1a4c   :  { %25855 = vmatpush1.bf16.msra.mxu0 %v28633_v62  ;;  %13575 = vmatprep.mubr.f32.mxu0 %v31729_v10 }
0x1a4d   :  { %25857 = vmatprep.subr.bf16.mxu0 %v28640_v23 }
0x1a50   :  { %25859 = vmatpush1.bf16.msra.mxu0 %v28642_v21 }
0x1a51   :  { %25861 = vmatprep.subr.bf16.mxu0 %v28649_v58 }
0x1a54   :  { %25863 = vmatpush1.bf16.msra.mxu0 %v28655_v19 }
0x1a55   :  { %25865 = vmatprep.subr.bf16.mxu0 %v28661_v54 }
0x1a58   :  { %25867 = vmatpush1.bf16.msra.mxu0 %v28669_v56 }
0x1a59   :  { %26037 = vmatprep.subr.bf16.mxu0 %v28335_v12 }
0x1a5b   :  { %13577 = vmatmul.mubr.f32.vlgmr.msra.gmra.mrb[10].mxu0 %v30006_v40 }
0x1a5c   :  { %26039 = vmatpush1.bf16.msra.mxu0 %v28341_v11  ;;  %15068 = vmatprep.mubr.f32.mxu0 %v31729_v10 }
0x1a5d   :  { %26041 = vmatprep.subr.bf16.mxu0 %v28343_v0 }
0x1a60   :  { %26043 = vmatpush1.bf16.msra.mxu0 %v28351_v24 }
0x1a61   :  { %26045 = vmatprep.subr.bf16.mxu0 %v31794_v53 }
0x1a64   :  { %26047 = vmatpush1.bf16.msra.mxu0 %v31795_v59 }
0x1a65   :  { %26049 = vmatprep.subr.bf16.mxu0 %v31796_v33 }
0x1a68   :  { %26051 = vmatpush1.bf16.msra.mxu0 %v31797_v44 }
0x1a69   :  { %26053 = vmatprep.subr.bf16.mxu0 %v32125_v36 }
0x1b2e   :  { %v13578_v60 = vpop.f32.mrb[10].mxu0 }
0x1b2f   :  { %v13580_v29 = vpop.f32.mrb[11].mxu0  ;;  %v13583_v28 = vadd.f32 %v13578_v60, %v31896_v22 }
0x1b30   :  { %v13584_v13 = vadd.f32 %v13580_v29, %v31895_v1 }
0x1b31   :  { %v22512_v47 = vmul.f32 -1.442695, %v13583_v28 }
0x1b32   :  { %27471 = vtanh.f32 %v13584_v13  ;;  %v22513_v28 = vmul.f32 -1.442695, %v13584_v13 }
0x1b33   :  { %27473 = vpow2.f32 %v22512_v47 }
0x1b3c   :  { %v27472_v49 = vpop.eup %27471 }
0x1b3d   :  { %13600 = vrot.lane.b32.xlu1 %v27472_v49, %s27746_s14  ;;  %v27474_v48 = vpop.eup %27473 }
0x1b3e   :  { %v13591_v61 = vadd.f32 1.0, %v27474_v48 }
0x1b40   :  { %27475 = vrcp.f32 %v13591_v61 }
0x1b4a   :  { %v27476_v52 = vpop.eup %27475 }
0x1b4b   :  { %v13598_v36 = vmul.f32 %v27476_v52, %v29796_v45 }
0x1baf   :  { %v13601_v8 = vpop.permute.xlu1 %13600 }
0x1bb0   :  { %v13603_v30 = vmul.f32 %v27476_v52, %v13601_v8 }
0x1bb2   :  { %13605 = vrot.lane.b32.xlu0 %v13603_v30, %s27746_s14 }
0x1c24   :  { %v13606_v14 = vpop.permute.xlu0 %13605 }
0x1c25   :  { %v30083_v29 = vadd.f32 %v13606_v14, %v13598_v36 }
0x1c27   :  { %27477 = vtanh.f32 %v30083_v29 }
0x1c28   :  { %27479 = vpow2.f32 %v22513_v28  ;;  %v32128_v28 = vld [vmem:[#allocation67_spill] sm:$0xff] }
0x1c31   :  { %v27478_v49 = vpop.eup %27477 }
0x1c32   :  { %13611 = vrot.lane.b32.xlu1 %v27478_v49, %s27746_s14  ;;  %v27480_v47 = vpop.eup %27479  ;;  %v32127_v49 = vld [vmem:[#allocation66_spill] sm:$0xff] }
0x1c33   :  { %v13592_v48 = vadd.f32 1.0, %v27480_v47  ;;  %v32129_v47 = vld [vmem:[#allocation104_spill] sm:$0xff] }
0x1c35   :  { %27481 = vrcp.f32 %v13592_v48  ;;  %v32130_v48 = vld [vmem:[#allocation68_spill] sm:$0xff] }
0x1c3f   :  { %v27482_v61 = vpop.eup %27481 }
0x1ca4   :  { %v13612_v60 = vpop.permute.xlu1 %13611 }
0x1ca5   :  { %v30087_v8 = vmul.f32 %v27482_v61, %v13612_v60  ;;  %v32131_v61 = vld [vmem:[#allocation69_spill] sm:$0xff]  ;;  %v32132_v60 = vld [vmem:[#allocation54_spill] sm:$0xff] }
0x1ca7   :  { %32126 = vst [vmem:[#allocation77_spill] sm:$0xff] %v30087_v8  ;;  %v13616_v45 = vsel %vm107_vm0, %v30087_v8, 0  ;;  %v32138_v8 = vld [vmem:[#allocation106_spill] sm:$0xff] }
0x1ca8   :  { %v30091_v30 = vand.u32 4294901760, %v13616_v45 }
0x1caa   :  { %v13692_v14 = vsub.f32 %v13616_v45, %v30091_v30  ;;  %v32133_v45 = vld [vmem:[#allocation70_spill] sm:$0xff] }
0x1cac   :  { %v30094_v52 = vand.u32 4294901760, %v13692_v14 }
0x1cae   :  { %v13694_v36 = vsub.f32 %v13692_v14, %v30094_v52 }
0x1cb0   :  { %v13695_v13 = vand.u32 4294901760, %v13694_v36  ;;  %v32135_v36 = vld [vmem:[#allocation105_spill] sm:$0xff] }
0x1cb2   :  { %23605 = vmatmul.mubr.f32.vlgmr.msra.gmra.mrb[20].mxu1 %v13695_v13  ;;  %15074 = vmatmul.mubr.f32.vlgmr.msra.gmra.mrb[12].mxu0 %v13695_v13  ;;  %v32136_v13 = vld [vmem:[#allocation72_spill] sm:$0xff] }
0x1cb3   :  { %25882 = vmatpush3.bf16.msra.mxu1 %v28937_v27  ;;  %26055 = vmatpush1.bf16.msra.mxu0 %v31813_v55 }
0x1cb4   :  { %25883 = vmatprep.subr.bf16.mxu1 %v31814_v7  ;;  %26057 = vmatprep.subr.bf16.mxu0 %v31815_v20 }
0x1cb5   :  { %23623 = vmatprep.mubr.msk.f32.mxu1 %vm27748_vm1, %v31729_v10  ;;  %15224 = vmatprep.mubr.f32.mxu0 %v31729_v10 }
0x1cb7   :  { %25885 = vmatpush3.bf16.msra.mxu1 %v28890_v42  ;;  %26059 = vmatpush1.bf16.msra.mxu0 %v31816_v4 }
0x1cb8   :  { %25886 = vmatprep.subr.bf16.mxu1 %v31814_v7  ;;  %26061 = vmatprep.subr.bf16.mxu0 %v31817_v51 }
0x1cbb   :  { %25888 = vmatpush3.bf16.msra.mxu1 %v28892_v15  ;;  %26063 = vmatpush1.bf16.msra.mxu0 %v31818_v39 }
0x1cbc   :  { %25889 = vmatprep.subr.bf16.mxu1 %v31814_v7  ;;  %26065 = vmatprep.subr.bf16.mxu0 %v31819_v63 }
0x1cbf   :  { %25891 = vmatpush3.bf16.msra.mxu1 %v28894_v32  ;;  %26067 = vmatpush1.bf16.msra.mxu0 %v31820_v18 }
0x1cc0   :  { %25892 = vmatprep.subr.bf16.mxu1 %v31814_v7  ;;  %26069 = vmatprep.subr.bf16.mxu0 %v31821_v3 }
0x1cc2   :  { %23624 = vmatmul.mubr.f32.vlgmr.msra.gmra.mrb[20].mxu1 %v30091_v30  ;;  %15226 = vmatmul.mubr.f32.vlgmr.msra.gmra.mrb[12].mxu0 %v30091_v30 }
0x1cc3   :  { %25894 = vmatpush3.bf16.msra.mxu1 %v28958_v31  ;;  %26071 = vmatpush1.bf16.msra.mxu0 %v31822_v16 }
0x1cc4   :  { %25895 = vmatprep.subr.bf16.mxu1 %v31814_v7  ;;  %26073 = vmatprep.subr.bf16.mxu0 %v31823_v38 }
0x1cc5   :  { %23642 = vmatprep.mubr.msk.f32.mxu1 %vm27748_vm1, %v31729_v10  ;;  %15328 = vmatprep.mubr.f32.mxu0 %v31729_v10 }
0x1cc7   :  { %25897 = vmatpush3.bf16.msra.mxu1 %v28896_v26  ;;  %26075 = vmatpush1.bf16.msra.mxu0 %v31824_v2 }
0x1cc8   :  { %25898 = vmatprep.subr.bf16.mxu1 %v31814_v7  ;;  %26077 = vmatprep.subr.bf16.mxu0 %v31899_v50 }
0x1ccb   :  { %25900 = vmatpush3.bf16.msra.mxu1 %v31975_v35  ;;  %26079 = vmatpush1.bf16.msra.mxu0 %v32127_v49  ;;  %v32156_v49 = vld [vmem:[#allocation28_spill] sm:$0xff] }
0x1ccc   :  { %25901 = vmatprep.subr.bf16.mxu1 %v31814_v7  ;;  %26081 = vmatprep.subr.bf16.mxu0 %v32128_v28  ;;  %v32154_v28 = vld [vmem:[#allocation26_spill] sm:$0xff] }
0x1ccf   :  { %25903 = vmatpush3.bf16.msra.mxu1 %v32129_v47  ;;  %26083 = vmatpush1.bf16.msra.mxu0 %v32130_v48  ;;  %v32152_v48 = vld [vmem:[#allocation24_spill] sm:$0xff]  ;;  %v32153_v47 = vld [vmem:[#allocation25_spill] sm:$0xff] }
0x1cd0   :  { %25904 = vmatprep.subr.bf16.mxu1 %v31814_v7  ;;  %26085 = vmatprep.subr.bf16.mxu0 %v28335_v12 }
0x1cd2   :  { %23643 = vmatmul.mubr.f32.vlgmr.msra.gmra.mrb[20].mxu1 %v13692_v14  ;;  %15331 = vmatmul.mubr.f32.vlgmr.msra.gmra.mrb[12].mxu0 %v13692_v14  ;;  %v32134_v14 = vld [vmem:[#allocation71_spill] sm:$0xff] }
0x1cd3   :  { %25906 = vmatpush3.bf16.msra.mxu1 %v28868_v43  ;;  %26087 = vmatpush1.bf16.msra.mxu0 %v28341_v11 }
0x1cd4   :  { %25907 = vmatprep.subr.bf16.mxu1 %v31814_v7  ;;  %26089 = vmatprep.subr.bf16.mxu0 %v28343_v0 }
0x1cd5   :  { %23661 = vmatprep.mubr.msk.f32.mxu1 %vm27748_vm1, %v31729_v10  ;;  %15417 = vmatprep.mubr.f32.mxu0 %v31729_v10 }
0x1cd7   :  { %25909 = vmatpush3.bf16.msra.mxu1 %v28872_v5  ;;  %26091 = vmatpush1.bf16.msra.mxu0 %v28351_v24 }
0x1cd8   :  { %25910 = vmatprep.subr.bf16.mxu1 %v31814_v7  ;;  %26093 = vmatprep.subr.bf16.mxu0 %v31794_v53 }
0x1cdb   :  { %25912 = vmatpush3.bf16.msra.mxu1 %v28879_v37  ;;  %26095 = vmatpush1.bf16.msra.mxu0 %v31795_v59 }
0x1cdc   :  { %25913 = vmatprep.subr.bf16.mxu1 %v31814_v7  ;;  %26097 = vmatprep.subr.bf16.mxu0 %v31796_v33 }
0x1cdf   :  { %25915 = vmatpush3.bf16.msra.mxu1 %v28885_v46  ;;  %26099 = vmatpush1.bf16.msra.mxu0 %v31797_v44 }
0x1ce0   :  { %25916 = vmatprep.subr.bf16.mxu1 %v31814_v7  ;;  %26101 = vmatprep.subr.bf16.mxu0 %v32131_v61  ;;  %v32142_v61 = vld [vmem:[#allocation76_spill] sm:$0xff] }
0x1ce2   :  { %23662 = vmatmul.mubr.f32.vlgmr.msra.gmra.mrb[20].mxu1 %v30094_v52  ;;  %15421 = vmatmul.mubr.f32.vlgmr.msra.gmra.mrb[12].mxu0 %v30094_v52  ;;  %v32137_v52 = vld [vmem:[#allocation73_spill] sm:$0xff] }
0x1ce3   :  { %25918 = vmatpush3.bf16.msra.mxu1 %v32132_v60  ;;  %26103 = vmatpush1.bf16.msra.mxu0 %v32133_v45  ;;  %v32139_v45 = vld [vmem:[#allocation74_spill] sm:$0xff]  ;;  %v32141_v60 = vld [vmem:[#allocation107_spill] sm:$0xff] }
0x1ce4   :  { %25919 = vmatprep.subr.bf16.mxu1 %v31814_v7  ;;  %26105 = vmatprep.subr.bf16.mxu0 %v32134_v14  ;;  %v32140_v14 = vld [vmem:[#allocation75_spill] sm:$0xff] }
0x1ce5   :  { %23680 = vmatprep.mubr.msk.f32.mxu1 %vm27748_vm1, %v31729_v10  ;;  %15539 = vmatprep.mubr.f32.mxu0 %v31729_v10 }
0x1ce7   :  { %25921 = vmatpush3.bf16.msra.mxu1 %v32135_v36  ;;  %26107 = vmatpush1.bf16.msra.mxu0 %v32136_v13  ;;  %v32150_v13 = vld [vmem:[#allocation22_spill] sm:$0xff]  ;;  %v32151_v36 = vld [vmem:[#allocation23_spill] sm:$0xff] }
0x1ce8   :  { %25922 = vmatprep.subr.bf16.mxu1 %v31814_v7  ;;  %26109 = vmatprep.subr.bf16.mxu0 %v32137_v52  ;;  %v32149_v52 = vld [vmem:[#allocation21_spill] sm:$0xff] }
0x1ceb   :  { %25924 = vmatpush3.bf16.msra.mxu1 %v32138_v8  ;;  %26111 = vmatpush1.bf16.msra.mxu0 %v32139_v45  ;;  %v32147_v45 = vld [vmem:[#allocation20_spill] sm:$0xff]  ;;  %v32148_v8 = vld [vmem:[#allocation78_spill] sm:$0xff] }
0x1cec   :  { %25925 = vmatprep.subr.bf16.mxu1 %v31814_v7  ;;  %26113 = vmatprep.subr.bf16.mxu0 %v32140_v14  ;;  %v32146_v14 = vld [vmem:[#allocation19_spill] sm:$0xff] }
0x1cef   :  { %25927 = vmatpush3.bf16.msra.mxu1 %v32141_v60  ;;  %26115 = vmatpush1.bf16.msra.mxu0 %v32142_v61  ;;  %v32143_v61 = vld [vmem:[#allocation16_spill] sm:$0xff]  ;;  %v32145_v60 = vld [vmem:[#allocation18_spill] sm:$0xff] }
0x1cf0   :  { %25928 = vmatprep.subr.bf16.mxu1 %v31814_v7  ;;  %26117 = vmatprep.subr.bf16.mxu0 %v28335_v12 }
0x1cf2   :  { %23681 = vmatmul.mubr.f32.vlgmr.msra.gmra.mrb[20].mxu1 %v30091_v30  ;;  %15541 = vmatmul.mubr.f32.vlgmr.msra.gmra.mrb[12].mxu0 %v30091_v30 }
0x1cf3   :  { %25930 = vmatpush3.bf16.msra.mxu1 %v28868_v43  ;;  %26119 = vmatpush1.bf16.msra.mxu0 %v28341_v11 }
0x1cf4   :  { %25931 = vmatprep.subr.bf16.mxu1 %v31814_v7  ;;  %26121 = vmatprep.subr.bf16.mxu0 %v28343_v0 }
0x1cf5   :  { %23699 = vmatprep.mubr.msk.f32.mxu1 %vm27748_vm1, %v31729_v10  ;;  %15627 = vmatprep.mubr.f32.mxu0 %v31729_v10 }
0x1cf7   :  { %25933 = vmatpush3.bf16.msra.mxu1 %v28872_v5  ;;  %26123 = vmatpush1.bf16.msra.mxu0 %v28351_v24 }
0x1cf8   :  { %25934 = vmatprep.subr.bf16.mxu1 %v31814_v7  ;;  %26125 = vmatprep.subr.bf16.mxu0 %v31794_v53 }
0x1cfb   :  { %25936 = vmatpush3.bf16.msra.mxu1 %v28879_v37  ;;  %26127 = vmatpush1.bf16.msra.mxu0 %v31795_v59 }
0x1cfc   :  { %25937 = vmatprep.subr.bf16.mxu1 %v31814_v7  ;;  %26129 = vmatprep.subr.bf16.mxu0 %v31796_v33 }
0x1cff   :  { %25939 = vmatpush3.bf16.msra.mxu1 %v28885_v46  ;;  %26131 = vmatpush1.bf16.msra.mxu0 %v31797_v44 }
0x1d00   :  { %25941 = vmatprep.subr.bf16.mxu1 %v31838_v9  ;;  %26133 = vmatprep.subr.bf16.mxu0 %v28626_v57 }
0x1d02   :  { %23700 = vmatmul.mubr.f32.vlgmr.msra.gmra.mrb[20].mxu1 %v30091_v30  ;;  %15629 = vmatmul.mubr.f32.vlgmr.msra.gmra.mrb[12].mxu0 %v30091_v30  ;;  %v32144_v30 = vld [vmem:[#allocation17_spill] sm:$0xff] }
0x1d03   :  { %25943 = vmatpush1.bf16.msra.mxu1 %v31839_v34  ;;  %14381 = vmatprep.mubr.f32.mxu1 %v31729_v10 }
0x1d04   :  { %25945 = vmatprep.subr.bf16.mxu1 %v31840_v6  ;;  %26135 = vmatpush1.bf16.msra.mxu0 %v28633_v62 }
0x1d05   :  { %26137 = vmatprep.subr.bf16.mxu0 %v28640_v23  ;;  %15718 = vmatprep.mubr.f32.mxu0 %v31729_v10 }
0x1d07   :  { %25947 = vmatpush1.bf16.msra.mxu1 %v31841_v17 }
0x1d08   :  { %25949 = vmatprep.subr.bf16.mxu1 %v32143_v61  ;;  %26139 = vmatpush1.bf16.msra.mxu0 %v28642_v21 }
0x1d09   :  { %26141 = vmatprep.subr.bf16.mxu0 %v28649_v58 }
0x1d0b   :  { %25951 = vmatpush1.bf16.msra.mxu1 %v32144_v30 }
0x1d0c   :  { %25953 = vmatprep.subr.bf16.mxu1 %v32145_v60  ;;  %26143 = vmatpush1.bf16.msra.mxu0 %v28655_v19 }
0x1d0d   :  { %26145 = vmatprep.subr.bf16.mxu0 %v28661_v54 }
0x1d0f   :  { %25955 = vmatpush1.bf16.msra.mxu1 %v32146_v14 }
0x1d10   :  { %25957 = vmatprep.subr.bf16.mxu1 %v32147_v45  ;;  %26147 = vmatpush1.bf16.msra.mxu0 %v28669_v56  ;;  %v32155_v45 = vld [vmem:[#allocation27_spill] sm:$0xff] }
0x1d11   :  { %26149 = vmatprep.subr.bf16.mxu0 %v32148_v8 }
0x1d12   :  { %14387 = vmatmul.mubr.f32.vlgmr.msra.gmra.mrb[22].mxu1 %v30016_v41  ;;  %v32157_v41 = vld [vmem:[#allocation29_spill] sm:$0xff] }
0x1d13   :  { %25959 = vmatpush1.bf16.msra.mxu1 %v32149_v52  ;;  %14537 = vmatprep.mubr.f32.mxu1 %v31729_v10  ;;  %v32158_v52 = vld [vmem:[#allocation30_spill] sm:$0xff] }
0x1d14   :  { %25961 = vmatprep.subr.bf16.mxu1 %v32150_v13  ;;  %v32159_v13 = vld [vmem:[#allocation31_spill] sm:$0xff] }
0x1d17   :  { %25963 = vmatpush1.bf16.msra.mxu1 %v32151_v36  ;;  %v32160_v36 = vld [vmem:[#allocation32_spill] sm:$0xff] }
0x1d18   :  { %25965 = vmatprep.subr.bf16.mxu1 %v32152_v48  ;;  %v32161_v48 = vld [vmem:[#allocation33_spill] sm:$0xff] }
0x1d1b   :  { %25967 = vmatpush1.bf16.msra.mxu1 %v32153_v47  ;;  %v32162_v47 = vld [vmem:[#allocation34_spill] sm:$0xff] }
0x1d1c   :  { %25969 = vmatprep.subr.bf16.mxu1 %v32154_v28  ;;  %v32163_v28 = vld [vmem:[#allocation35_spill] sm:$0xff] }
0x1d1f   :  { %25971 = vmatpush1.bf16.msra.mxu1 %v32155_v45 }
0x1d20   :  { %25973 = vmatprep.subr.bf16.mxu1 %v32156_v49  ;;  %v32172_v49 = vld [vmem:[#allocation43_spill] sm:$0xff] }
0x1d22   :  { %14539 = vmatmul.mubr.f32.vlgmr.msra.gmra.mrb[22].mxu1 %v30006_v40 }
0x1d23   :  { %25975 = vmatpush1.bf16.msra.mxu1 %v32157_v41  ;;  %14641 = vmatprep.mubr.f32.mxu1 %v31729_v10  ;;  %v32171_v41 = vld [vmem:[#allocation42_spill] sm:$0xff] }
0x1d24   :  { %25977 = vmatprep.subr.bf16.mxu1 %v32158_v52  ;;  %v32170_v52 = vld [vmem:[#allocation41_spill] sm:$0xff] }
0x1d27   :  { %25979 = vmatpush1.bf16.msra.mxu1 %v32159_v13  ;;  %v32169_v13 = vld [vmem:[#allocation40_spill] sm:$0xff] }
0x1d28   :  { %25981 = vmatprep.subr.bf16.mxu1 %v32160_v36  ;;  %v32168_v36 = vld [vmem:[#allocation39_spill] sm:$0xff] }
0x1d2b   :  { %25983 = vmatpush1.bf16.msra.mxu1 %v32161_v48  ;;  %v32167_v48 = vld [vmem:[#allocation38_spill] sm:$0xff] }
0x1d2c   :  { %25985 = vmatprep.subr.bf16.mxu1 %v32162_v47  ;;  %v32165_v47 = vld [vmem:[#allocation15_spill] sm:$0xff] }
0x1d2f   :  { %25987 = vmatpush1.bf16.msra.mxu1 %v32163_v28  ;;  %v32164_v28 = vld [vmem:[#allocation36_spill] sm:$0xff] }
0x1d30   :  { %25989 = vmatprep.subr.bf16.mxu1 %v31838_v9 }
0x1d32   :  { %14644 = vmatmul.mubr.f32.vlgmr.msra.gmra.mrb[22].mxu1 %v30009_v25  ;;  %v32166_v25 = vld [vmem:[#allocation37_spill] sm:$0xff] }
0x1d33   :  { %25991 = vmatpush1.bf16.msra.mxu1 %v31839_v34  ;;  %14730 = vmatprep.mubr.f32.mxu1 %v31729_v10 }
0x1d34   :  { %25993 = vmatprep.subr.bf16.mxu1 %v31840_v6 }
0x1d37   :  { %25995 = vmatpush1.bf16.msra.mxu1 %v31841_v17 }
0x1d38   :  { %25997 = vmatprep.subr.bf16.mxu1 %v32143_v61 }
0x1d3b   :  { %25999 = vmatpush1.bf16.msra.mxu1 %v32144_v30 }
0x1d3c   :  { %26001 = vmatprep.subr.bf16.mxu1 %v32145_v60 }
0x1d3f   :  { %26003 = vmatpush1.bf16.msra.mxu1 %v32146_v14 }
0x1d40   :  { %26005 = vmatprep.subr.bf16.mxu1 %v32164_v28 }
0x1d42   :  { %14734 = vmatmul.mubr.f32.vlgmr.msra.gmra.mrb[22].mxu1 %v32165_v47 }
0x1d43   :  { %26007 = vmatpush1.bf16.msra.mxu1 %v32166_v25  ;;  %14852 = vmatprep.mubr.f32.mxu1 %v31729_v10 }
0x1d44   :  { %26009 = vmatprep.subr.bf16.mxu1 %v32167_v48 }
0x1d47   :  { %26011 = vmatpush1.bf16.msra.mxu1 %v32168_v36  ;;  %v32174_v36 = vld [vmem:[#allocation48_spill] sm:$0xff] }
0x1d48   :  { %26013 = vmatprep.subr.bf16.mxu1 %v32169_v13  ;;  %v22514_v13 = vld [vmem:[%s31399_s0 + $0x14] sm:$0xf] }
0x1d4b   :  { %26015 = vmatpush1.bf16.msra.mxu1 %v32170_v52 }
0x1d4c   :  { %26017 = vmatprep.subr.bf16.mxu1 %v32171_v41 }
0x1d4f   :  { %26019 = vmatpush1.bf16.msra.mxu1 %v32172_v49 }
0x1d50   :  { %26021 = vmatprep.subr.bf16.mxu1 %v31838_v9 }
0x1d52   :  { %14854 = vmatmul.mubr.f32.vlgmr.msra.gmra.mrb[22].mxu1 %v30006_v40 }
0x1d53   :  { %26023 = vmatpush1.bf16.msra.mxu1 %v31839_v34  ;;  %14940 = vmatprep.mubr.f32.mxu1 %v31729_v10 }
0x1d54   :  { %26025 = vmatprep.subr.bf16.mxu1 %v31840_v6 }
0x1d57   :  { %26027 = vmatpush1.bf16.msra.mxu1 %v31841_v17 }
0x1d58   :  { %26029 = vmatprep.subr.bf16.mxu1 %v32143_v61 }
0x1d5b   :  { %26031 = vmatpush1.bf16.msra.mxu1 %v32144_v30 }
0x1d5c   :  { %26033 = vmatprep.subr.bf16.mxu1 %v32145_v60 }
0x1d5f   :  { %26035 = vmatpush1.bf16.msra.mxu1 %v32146_v14 }
0x1d60   :  { %26228 = vmatprep.subr.bf16.mxu1 %v31814_v7 }
0x1d62   :  { %14942 = vmatmul.mubr.f32.vlgmr.msra.gmra.mrb[22].mxu1 %v30006_v40 }
0x1d63   :  { %26230 = vmatpush3.bf16.msra.mxu1 %v28868_v43  ;;  %23718 = vmatprep.mubr.msk.f32.mxu1 %vm27748_vm1, %v31729_v10 }
0x1d64   :  { %26231 = vmatprep.subr.bf16.mxu1 %v31814_v7 }
0x1d67   :  { %26233 = vmatpush3.bf16.msra.mxu1 %v28872_v5 }
0x1d68   :  { %26234 = vmatprep.subr.bf16.mxu1 %v31814_v7 }
0x1d6b   :  { %26236 = vmatpush3.bf16.msra.mxu1 %v28879_v37 }
0x1d6c   :  { %26237 = vmatprep.subr.bf16.mxu1 %v31814_v7 }
0x1d6f   :  { %26239 = vmatpush3.bf16.msra.mxu1 %v28885_v46 }
0x1d70   :  { %26240 = vmatprep.subr.bf16.mxu1 %v31814_v7 }
0x1dd5   :  { %v30279_v40 = vpop.f32.mrb[20].mxu1 }
0x1dd6   :  { %32173 = vst [vmem:[#allocation50_spill] sm:$0xff] %v30279_v40  ;;  %v23701_v47 = vpop.f32.mrb[21].mxu1 }
0x1e35   :  { %v14943_v49 = vpop.f32.mrb[22].mxu1 }
0x1e36   :  { %v14945_v41 = vpop.f32.mrb[23].mxu1 }
0x1e37   :  { %v14950_v52 = vcombine.low %v14943_v49, %v14945_v41  ;;  %v32175_v41 = vld [vmem:[#allocation14_spill] sm:$0xff] }
0x1e39   :  { %v14957_v48 = vrot.slane %v14950_v52, %v32174_v36 }
0x1e3b   :  { %v14959_v25 = vadd.f32 %v22514_v13, %v14957_v48 }
0x1e3d   :  { %14967 = vrot.lane.b32.xlu0 %v14959_v25, %s27746_s14  ;;  %v22515_v28 = vmul.f32 -1.442695, %v14959_v25 }
0x1e3f   :  { %27483 = vpow2.f32 %v22515_v28 }
0x1e49   :  { %v27484_v45 = vpop.eup %27483 }
0x1e4a   :  { %v14963_v8 = vadd.f32 1.0, %v27484_v45 }
0x1e4c   :  { %27485 = vrcp.f32 %v14963_v8 }
0x1e56   :  { %v27486_v47 = vpop.eup %27485 }
0x1e57   :  { %v14972_v30 = vmul.f32 %v27486_v47, %v32175_v41  ;;  %v14981_v28 = vrot.slane %v27486_v47, 2  ;;  %v32181_v41 = vld [vmem:[#allocation81_spill] sm:$0xff] }
0x1eaf   :  { %v14968_v14 = vpop.permute.xlu0 %14967 }
0x1eb0   :  { %v14969_v60 = vrot.slane %v14968_v14, 2 }
0x1eb2   :  { %27487 = vtanh.f32 %v14969_v60 }
0x1ebc   :  { %v27488_v40 = vpop.eup %27487 }
0x1ebd   :  { %v14973_v49 = vmul.f32 %v27488_v40, %v27486_v47  ;;  %v32178_v40 = vld [vmem:[#allocation99_spill] sm:$0xff] }
0x1ebe   :  { %v32179_v47 = vld [vmem:[#allocation79_spill] sm:$0xff] }
0x1ebf   :  { %14975 = vrot.lane.b32.xlu1 %v14973_v49, %s27746_s14  ;;  %v32180_v49 = vld [vmem:[#allocation80_spill] sm:$0xff] }
0x1f31   :  { %v14976_v61 = vpop.permute.xlu1 %14975 }
0x1f32   :  { %v30288_v52 = vadd.f32 %v14976_v61, %v14972_v30 }
0x1f34   :  { %32176 = vst [vmem:[#allocation52_spill] sm:$0xff] %v30288_v52  ;;  %27489 = vtanh.f32 %v30288_v52 }
0x1f3e   :  { %v27490_v48 = vpop.eup %27489 }
0x1f3f   :  { %14984 = vrot.lane.b32.xlu0 %v27490_v48, %s27746_s14  ;;  %v32182_v48 = vld [vmem:[#allocation82_spill] sm:$0xff] }
0x1fb1   :  { %v14985_v45 = vpop.permute.xlu0 %14984 }
0x1fb2   :  { %v14987_v14 = vmul.f32 %v14985_v45, %v14981_v28  ;;  %v32183_v28 = vld [vmem:[#allocation83_spill] sm:$0xff]  ;;  %v32184_v45 = vld [vmem:[#allocation84_spill] sm:$0xff] }
0x1fb4   :  { %v15636_v8 = vsel %vm107_vm0, %v14987_v14, 0  ;;  %v32185_v14 = vld [vmem:[#allocation85_spill] sm:$0xff] }
0x1fb5   :  { %v30293_v60 = vand.u32 4294901760, %v15636_v8 }
0x1fb7   :  { %v30296_v13 = vsub.f32 %v15636_v8, %v30293_v60  ;;  %v32186_v8 = vld [vmem:[#allocation100_spill] sm:$0xff] }
0x1fb9   :  { %v30299_v25 = vand.u32 4294901760, %v30296_v13 }
0x1fbb   :  { %32177 = vst [vmem:[#allocation102_spill] sm:$0xff] %v30299_v25  ;;  %v15722_v61 = vsub.f32 %v30296_v13, %v30299_v25 }
0x1fbd   :  { %v30303_v30 = vand.u32 4294901760, %v15722_v61  ;;  %v32187_v61 = vld [vmem:[#allocation86_spill] sm:$0xff] }
0x1fbf   :  { %15724 = vmatmul.mubr.f32.vlgmr.msra.gmra.mrb[12].mxu0 %v30303_v30 }
0x1fc0   :  { %26151 = vmatpush1.bf16.msra.mxu0 %v32178_v40  ;;  %15874 = vmatprep.mubr.f32.mxu0 %v31729_v10 }
0x1fc1   :  { %26153 = vmatprep.subr.bf16.mxu0 %v32179_v47  ;;  %v32188_v47 = vld [vmem:[#allocation87_spill] sm:$0xff] }
0x1fc4   :  { %26155 = vmatpush1.bf16.msra.mxu0 %v32180_v49  ;;  %v32189_v49 = vld [vmem:[#allocation88_spill] sm:$0xff] }
0x1fc5   :  { %26157 = vmatprep.subr.bf16.mxu0 %v32181_v41  ;;  %v32190_v41 = vld [vmem:[#allocation89_spill] sm:$0xff] }
0x1fc8   :  { %26159 = vmatpush1.bf16.msra.mxu0 %v32182_v48  ;;  %v32191_v48 = vld [vmem:[#allocation90_spill] sm:$0xff] }
0x1fc9   :  { %26161 = vmatprep.subr.bf16.mxu0 %v32183_v28  ;;  %v32192_v28 = vld [vmem:[#allocation91_spill] sm:$0xff] }
0x1fcc   :  { %26163 = vmatpush1.bf16.msra.mxu0 %v32184_v45 }
0x1fcd   :  { %26165 = vmatprep.subr.bf16.mxu0 %v32185_v14  ;;  %v32200_v14 = vld [vmem:[#allocation98_spill] sm:$0xff] }
0x1fcf   :  { %15876 = vmatmul.mubr.f32.vlgmr.msra.gmra.mrb[12].mxu0 %v30293_v60 }
0x1fd0   :  { %26167 = vmatpush1.bf16.msra.mxu0 %v32186_v8  ;;  %15978 = vmatprep.mubr.f32.mxu0 %v31729_v10  ;;  %v32199_v8 = vld [vmem:[#allocation97_spill] sm:$0xff] }
0x1fd1   :  { %26169 = vmatprep.subr.bf16.mxu0 %v32187_v61  ;;  %v32198_v61 = vld [vmem:[#allocation96_spill] sm:$0xff] }
0x1fd4   :  { %26171 = vmatpush1.bf16.msra.mxu0 %v32188_v47  ;;  %v32197_v47 = vld [vmem:[#allocation95_spill] sm:$0xff] }
0x1fd5   :  { %26173 = vmatprep.subr.bf16.mxu0 %v32189_v49  ;;  %v32196_v49 = vld [vmem:[#allocation94_spill] sm:$0xff] }
0x1fd8   :  { %26175 = vmatpush1.bf16.msra.mxu0 %v32190_v41  ;;  %v32195_v41 = vld [vmem:[#allocation93_spill] sm:$0xff] }
0x1fd9   :  { %26177 = vmatprep.subr.bf16.mxu0 %v32191_v48  ;;  %v32194_v48 = vld [vmem:[#allocation101_spill] sm:$0xff] }
0x1fdc   :  { %26179 = vmatpush1.bf16.msra.mxu0 %v32192_v28  ;;  %v32193_v28 = vld [vmem:[#allocation92_spill] sm:$0xff] }
0x1fdd   :  { %26181 = vmatprep.subr.bf16.mxu0 %v28626_v57 }
0x1fdf   :  { %15981 = vmatmul.mubr.f32.vlgmr.msra.gmra.mrb[12].mxu0 %v30296_v13 }
0x1fe0   :  { %26183 = vmatpush1.bf16.msra.mxu0 %v28633_v62  ;;  %16067 = vmatprep.mubr.f32.mxu0 %v31729_v10 }
0x1fe1   :  { %26185 = vmatprep.subr.bf16.mxu0 %v28640_v23 }
0x1fe4   :  { %26187 = vmatpush1.bf16.msra.mxu0 %v28642_v21 }
0x1fe5   :  { %26189 = vmatprep.subr.bf16.mxu0 %v28649_v58 }
0x1fe8   :  { %26191 = vmatpush1.bf16.msra.mxu0 %v28655_v19 }
0x1fe9   :  { %26193 = vmatprep.subr.bf16.mxu0 %v28661_v54 }
0x1fec   :  { %26195 = vmatpush1.bf16.msra.mxu0 %v28669_v56 }
0x1fed   :  { %26197 = vmatprep.subr.bf16.mxu0 %v32193_v28 }
0x1fef   :  { %16071 = vmatmul.mubr.f32.vlgmr.msra.gmra.mrb[12].mxu0 %v30299_v25 }
0x1ff0   :  { %26199 = vmatpush1.bf16.msra.mxu0 %v32194_v48  ;;  %16189 = vmatprep.mubr.f32.mxu0 %v31729_v10 }
0x1ff1   :  { %26201 = vmatprep.subr.bf16.mxu0 %v32195_v41 }
0x1ff4   :  { %26203 = vmatpush1.bf16.msra.mxu0 %v32196_v49 }
0x1ff5   :  { %26205 = vmatprep.subr.bf16.mxu0 %v32197_v47 }
0x1ff8   :  { %26207 = vmatpush1.bf16.msra.mxu0 %v32198_v61 }
0x1ff9   :  { %26209 = vmatprep.subr.bf16.mxu0 %v32199_v8 }
0x1ffc   :  { %26211 = vmatpush1.bf16.msra.mxu0 %v32200_v14  ;;  %v32201_v14 = vld [vmem:[#allocation53_spill] sm:$0xff] }
0x1ffd   :  { %26213 = vmatprep.subr.bf16.mxu0 %v28626_v57 }
0x1fff   :  { %16191 = vmatmul.mubr.f32.vlgmr.msra.gmra.mrb[12].mxu0 %v30293_v60 }
0x2000   :  { %26215 = vmatpush1.bf16.msra.mxu0 %v28633_v62  ;;  %16277 = vmatprep.mubr.f32.mxu0 %v31729_v10 }
0x2001   :  { %26217 = vmatprep.subr.bf16.mxu0 %v28640_v23 }
0x2004   :  { %26219 = vmatpush1.bf16.msra.mxu0 %v28642_v21 }
0x2005   :  { %26221 = vmatprep.subr.bf16.mxu0 %v28649_v58 }
0x2008   :  { %26223 = vmatpush1.bf16.msra.mxu0 %v28655_v19 }
0x2009   :  { %26225 = vmatprep.subr.bf16.mxu0 %v28661_v54 }
0x200c   :  { %26227 = vmatpush1.bf16.msra.mxu0 %v28669_v56 }
0x200d   :  { %26397 = vmatprep.subr.bf16.mxu0 %v28335_v12 }
0x200f   :  { %16279 = vmatmul.mubr.f32.vlgmr.msra.gmra.mrb[12].mxu0 %v30293_v60 }
0x2010   :  { %26399 = vmatpush1.bf16.msra.mxu0 %v28341_v11  ;;  %17770 = vmatprep.mubr.f32.mxu0 %v31729_v10 }
0x2011   :  { %26401 = vmatprep.subr.bf16.mxu0 %v28343_v0 }
0x2014   :  { %26403 = vmatpush1.bf16.msra.mxu0 %v28351_v24 }
0x2015   :  { %26405 = vmatprep.subr.bf16.mxu0 %v31794_v53 }
0x2018   :  { %26407 = vmatpush1.bf16.msra.mxu0 %v31795_v59 }
0x2019   :  { %26409 = vmatprep.subr.bf16.mxu0 %v31796_v33 }
0x201c   :  { %26411 = vmatpush1.bf16.msra.mxu0 %v31797_v44 }
0x201d   :  { %26413 = vmatprep.subr.bf16.mxu0 %v32201_v14 }
0x20e2   :  { %v16280_v8 = vpop.f32.mrb[12].mxu0 }
0x20e3   :  { %v16282_v61 = vpop.f32.mrb[13].mxu0  ;;  %v16285_v41 = vadd.f32 %v16280_v8, %v31896_v22 }
0x20e4   :  { %v16286_v47 = vadd.f32 %v16282_v61, %v31895_v1 }
0x20e5   :  { %v22516_v48 = vmul.f32 -1.442695, %v16285_v41 }
0x20e6   :  { %27491 = vtanh.f32 %v16286_v47  ;;  %v22517_v41 = vmul.f32 -1.442695, %v16286_v47 }
0x20e7   :  { %27493 = vpow2.f32 %v22516_v48 }
0x20f0   :  { %v27492_v49 = vpop.eup %27491 }
0x20f1   :  { %16302 = vrot.lane.b32.xlu1 %v27492_v49, %s27746_s14  ;;  %v27494_v28 = vpop.eup %27493 }
0x20f2   :  { %v16293_v45 = vadd.f32 1.0, %v27494_v28 }
0x20f4   :  { %27495 = vrcp.f32 %v16293_v45 }
0x20fe   :  { %v27496_v40 = vpop.eup %27495 }
0x20ff   :  { %v16300_v14 = vmul.f32 %v27496_v40, %v30083_v29 }
0x2163   :  { %v16303_v52 = vpop.permute.xlu1 %16302 }
0x2164   :  { %v16305_v36 = vmul.f32 %v27496_v40, %v16303_v52 }
0x2166   :  { %16307 = vrot.lane.b32.xlu0 %v16305_v36, %s27746_s14 }
0x21d8   :  { %v16308_v25 = vpop.permute.xlu0 %16307 }
0x21d9   :  { %v30370_v61 = vadd.f32 %v16308_v25, %v16300_v14 }
0x21db   :  { %27497 = vtanh.f32 %v30370_v61 }
0x21dc   :  { %27499 = vpow2.f32 %v22517_v41  ;;  %v32204_v41 = vld [vmem:[#allocation67_spill] sm:$0xff] }
0x21e5   :  { %v27498_v49 = vpop.eup %27497 }
0x21e6   :  { %16313 = vrot.lane.b32.xlu1 %v27498_v49, %s27746_s14  ;;  %v27500_v48 = vpop.eup %27499  ;;  %v32203_v49 = vld [vmem:[#allocation66_spill] sm:$0xff] }
0x21e7   :  { %v16294_v28 = vadd.f32 1.0, %v27500_v48  ;;  %v32205_v48 = vld [vmem:[#allocation104_spill] sm:$0xff] }
0x21e9   :  { %27501 = vrcp.f32 %v16294_v28  ;;  %v32206_v28 = vld [vmem:[#allocation68_spill] sm:$0xff] }
0x21f3   :  { %v27502_v45 = vpop.eup %27501 }
0x2258   :  { %v16314_v8 = vpop.permute.xlu1 %16313 }
0x2259   :  { %v30374_v52 = vmul.f32 %v27502_v45, %v16314_v8  ;;  %v32207_v45 = vld [vmem:[#allocation69_spill] sm:$0xff]  ;;  %v32208_v8 = vld [vmem:[#allocation54_spill] sm:$0xff] }
0x225b   :  { %32202 = vst [vmem:[#allocation65_spill] sm:$0xff] %v30374_v52  ;;  %v16318_v29 = vsel %vm107_vm0, %v30374_v52, 0  ;;  %v32214_v52 = vld [vmem:[#allocation106_spill] sm:$0xff] }
0x225c   :  { %v30378_v36 = vand.u32 4294901760, %v16318_v29 }
0x225e   :  { %v16394_v25 = vsub.f32 %v16318_v29, %v30378_v36  ;;  %v32209_v29 = vld [vmem:[#allocation70_spill] sm:$0xff] }
0x2260   :  { %v30381_v40 = vand.u32 4294901760, %v16394_v25 }
0x2262   :  { %v16396_v14 = vsub.f32 %v16394_v25, %v30381_v40 }
0x2264   :  { %v16397_v47 = vand.u32 4294901760, %v16396_v14  ;;  %v32211_v14 = vld [vmem:[#allocation105_spill] sm:$0xff] }
0x2266   :  { %23719 = vmatmul.mubr.f32.vlgmr.msra.gmra.mrb[24].mxu1 %v16397_v47  ;;  %17776 = vmatmul.mubr.f32.vlgmr.msra.gmra.mrb[14].mxu0 %v16397_v47  ;;  %v32212_v47 = vld [vmem:[#allocation72_spill] sm:$0xff] }
0x2267   :  { %26242 = vmatpush3.bf16.msra.mxu1 %v28937_v27  ;;  %26415 = vmatpush1.bf16.msra.mxu0 %v31813_v55 }
0x2268   :  { %26243 = vmatprep.subr.bf16.mxu1 %v31814_v7  ;;  %26417 = vmatprep.subr.bf16.mxu0 %v31815_v20 }
0x2269   :  { %23737 = vmatprep.mubr.msk.f32.mxu1 %vm27748_vm1, %v31729_v10  ;;  %17926 = vmatprep.mubr.f32.mxu0 %v31729_v10 }
0x226b   :  { %26245 = vmatpush3.bf16.msra.mxu1 %v28890_v42  ;;  %26419 = vmatpush1.bf16.msra.mxu0 %v31816_v4 }
0x226c   :  { %26246 = vmatprep.subr.bf16.mxu1 %v31814_v7  ;;  %26421 = vmatprep.subr.bf16.mxu0 %v31817_v51 }
0x226f   :  { %26248 = vmatpush3.bf16.msra.mxu1 %v28892_v15  ;;  %26423 = vmatpush1.bf16.msra.mxu0 %v31818_v39 }
0x2270   :  { %26249 = vmatprep.subr.bf16.mxu1 %v31814_v7  ;;  %26425 = vmatprep.subr.bf16.mxu0 %v31819_v63 }
0x2273   :  { %26251 = vmatpush3.bf16.msra.mxu1 %v28894_v32  ;;  %26427 = vmatpush1.bf16.msra.mxu0 %v31820_v18 }
0x2274   :  { %26252 = vmatprep.subr.bf16.mxu1 %v31814_v7  ;;  %26429 = vmatprep.subr.bf16.mxu0 %v31821_v3 }
0x2276   :  { %23738 = vmatmul.mubr.f32.vlgmr.msra.gmra.mrb[24].mxu1 %v30378_v36  ;;  %17928 = vmatmul.mubr.f32.vlgmr.msra.gmra.mrb[14].mxu0 %v30378_v36 }
0x2277   :  { %26254 = vmatpush3.bf16.msra.mxu1 %v28958_v31  ;;  %26431 = vmatpush1.bf16.msra.mxu0 %v31822_v16 }
0x2278   :  { %26255 = vmatprep.subr.bf16.mxu1 %v31814_v7  ;;  %26433 = vmatprep.subr.bf16.mxu0 %v31823_v38 }
0x2279   :  { %23756 = vmatprep.mubr.msk.f32.mxu1 %vm27748_vm1, %v31729_v10  ;;  %18030 = vmatprep.mubr.f32.mxu0 %v31729_v10 }
0x227b   :  { %26257 = vmatpush3.bf16.msra.mxu1 %v28896_v26  ;;  %26435 = vmatpush1.bf16.msra.mxu0 %v31824_v2 }
0x227c   :  { %26258 = vmatprep.subr.bf16.mxu1 %v31814_v7  ;;  %26437 = vmatprep.subr.bf16.mxu0 %v31899_v50 }
0x227f   :  { %26260 = vmatpush3.bf16.msra.mxu1 %v31975_v35  ;;  %26439 = vmatpush1.bf16.msra.mxu0 %v32203_v49  ;;  %v32232_v49 = vld [vmem:[#allocation28_spill] sm:$0xff] }
0x2280   :  { %26261 = vmatprep.subr.bf16.mxu1 %v31814_v7  ;;  %26441 = vmatprep.subr.bf16.mxu0 %v32204_v41  ;;  %v32230_v41 = vld [vmem:[#allocation26_spill] sm:$0xff] }
0x2283   :  { %26263 = vmatpush3.bf16.msra.mxu1 %v32205_v48  ;;  %26443 = vmatpush1.bf16.msra.mxu0 %v32206_v28  ;;  %v32228_v28 = vld [vmem:[#allocation24_spill] sm:$0xff]  ;;  %v32229_v48 = vld [vmem:[#allocation25_spill] sm:$0xff] }
0x2284   :  { %26264 = vmatprep.subr.bf16.mxu1 %v31814_v7  ;;  %26445 = vmatprep.subr.bf16.mxu0 %v28335_v12 }
0x2286   :  { %23757 = vmatmul.mubr.f32.vlgmr.msra.gmra.mrb[24].mxu1 %v16394_v25  ;;  %18033 = vmatmul.mubr.f32.vlgmr.msra.gmra.mrb[14].mxu0 %v16394_v25  ;;  %v32210_v25 = vld [vmem:[#allocation71_spill] sm:$0xff] }
0x2287   :  { %26266 = vmatpush3.bf16.msra.mxu1 %v28868_v43  ;;  %26447 = vmatpush1.bf16.msra.mxu0 %v28341_v11 }
0x2288   :  { %26267 = vmatprep.subr.bf16.mxu1 %v31814_v7  ;;  %26449 = vmatprep.subr.bf16.mxu0 %v28343_v0 }
0x2289   :  { %23775 = vmatprep.mubr.msk.f32.mxu1 %vm27748_vm1, %v31729_v10  ;;  %18119 = vmatprep.mubr.f32.mxu0 %v31729_v10 }
0x228b   :  { %26269 = vmatpush3.bf16.msra.mxu1 %v28872_v5  ;;  %26451 = vmatpush1.bf16.msra.mxu0 %v28351_v24 }
0x228c   :  { %26270 = vmatprep.subr.bf16.mxu1 %v31814_v7  ;;  %26453 = vmatprep.subr.bf16.mxu0 %v31794_v53 }
0x228f   :  { %26272 = vmatpush3.bf16.msra.mxu1 %v28879_v37  ;;  %26455 = vmatpush1.bf16.msra.mxu0 %v31795_v59 }
0x2290   :  { %26273 = vmatprep.subr.bf16.mxu1 %v31814_v7  ;;  %26457 = vmatprep.subr.bf16.mxu0 %v31796_v33 }
0x2293   :  { %26275 = vmatpush3.bf16.msra.mxu1 %v28885_v46  ;;  %26459 = vmatpush1.bf16.msra.mxu0 %v31797_v44 }
0x2294   :  { %26276 = vmatprep.subr.bf16.mxu1 %v31814_v7  ;;  %26461 = vmatprep.subr.bf16.mxu0 %v32207_v45  ;;  %v32218_v45 = vld [vmem:[#allocation76_spill] sm:$0xff] }
0x2296   :  { %23776 = vmatmul.mubr.f32.vlgmr.msra.gmra.mrb[24].mxu1 %v30381_v40  ;;  %18123 = vmatmul.mubr.f32.vlgmr.msra.gmra.mrb[14].mxu0 %v30381_v40  ;;  %v32213_v40 = vld [vmem:[#allocation73_spill] sm:$0xff] }
0x2297   :  { %26278 = vmatpush3.bf16.msra.mxu1 %v32208_v8  ;;  %26463 = vmatpush1.bf16.msra.mxu0 %v32209_v29  ;;  %v32215_v29 = vld [vmem:[#allocation74_spill] sm:$0xff]  ;;  %v32217_v8 = vld [vmem:[#allocation107_spill] sm:$0xff] }
0x2298   :  { %26279 = vmatprep.subr.bf16.mxu1 %v31814_v7  ;;  %26465 = vmatprep.subr.bf16.mxu0 %v32210_v25  ;;  %v32216_v25 = vld [vmem:[#allocation75_spill] sm:$0xff] }
0x2299   :  { %23794 = vmatprep.mubr.msk.f32.mxu1 %vm27748_vm1, %v31729_v10  ;;  %18241 = vmatprep.mubr.f32.mxu0 %v31729_v10 }
0x229b   :  { %26281 = vmatpush3.bf16.msra.mxu1 %v32211_v14  ;;  %26467 = vmatpush1.bf16.msra.mxu0 %v32212_v47  ;;  %v32226_v47 = vld [vmem:[#allocation22_spill] sm:$0xff]  ;;  %v32227_v14 = vld [vmem:[#allocation23_spill] sm:$0xff] }
0x229c   :  { %26282 = vmatprep.subr.bf16.mxu1 %v31814_v7  ;;  %26469 = vmatprep.subr.bf16.mxu0 %v32213_v40  ;;  %v32225_v40 = vld [vmem:[#allocation21_spill] sm:$0xff] }
0x229f   :  { %26284 = vmatpush3.bf16.msra.mxu1 %v32214_v52  ;;  %26471 = vmatpush1.bf16.msra.mxu0 %v32215_v29  ;;  %v32223_v29 = vld [vmem:[#allocation20_spill] sm:$0xff]  ;;  %v32224_v52 = vld [vmem:[#allocation78_spill] sm:$0xff] }
0x22a0   :  { %26285 = vmatprep.subr.bf16.mxu1 %v31814_v7  ;;  %26473 = vmatprep.subr.bf16.mxu0 %v32216_v25  ;;  %v32222_v25 = vld [vmem:[#allocation19_spill] sm:$0xff] }
0x22a3   :  { %26287 = vmatpush3.bf16.msra.mxu1 %v32217_v8  ;;  %26475 = vmatpush1.bf16.msra.mxu0 %v32218_v45  ;;  %v32219_v45 = vld [vmem:[#allocation16_spill] sm:$0xff]  ;;  %v32221_v8 = vld [vmem:[#allocation18_spill] sm:$0xff] }
0x22a4   :  { %26288 = vmatprep.subr.bf16.mxu1 %v31814_v7  ;;  %26477 = vmatprep.subr.bf16.mxu0 %v28335_v12 }
0x22a6   :  { %23795 = vmatmul.mubr.f32.vlgmr.msra.gmra.mrb[24].mxu1 %v30378_v36  ;;  %18243 = vmatmul.mubr.f32.vlgmr.msra.gmra.mrb[14].mxu0 %v30378_v36 }
0x22a7   :  { %26290 = vmatpush3.bf16.msra.mxu1 %v28868_v43  ;;  %26479 = vmatpush1.bf16.msra.mxu0 %v28341_v11 }
0x22a8   :  { %26291 = vmatprep.subr.bf16.mxu1 %v31814_v7  ;;  %26481 = vmatprep.subr.bf16.mxu0 %v28343_v0 }
0x22a9   :  { %23813 = vmatprep.mubr.msk.f32.mxu1 %vm27748_vm1, %v31729_v10  ;;  %18329 = vmatprep.mubr.f32.mxu0 %v31729_v10 }
0x22ab   :  { %26293 = vmatpush3.bf16.msra.mxu1 %v28872_v5  ;;  %26483 = vmatpush1.bf16.msra.mxu0 %v28351_v24 }
0x22ac   :  { %26294 = vmatprep.subr.bf16.mxu1 %v31814_v7  ;;  %26485 = vmatprep.subr.bf16.mxu0 %v31794_v53 }
0x22af   :  { %26296 = vmatpush3.bf16.msra.mxu1 %v28879_v37  ;;  %26487 = vmatpush1.bf16.msra.mxu0 %v31795_v59 }
0x22b0   :  { %26297 = vmatprep.subr.bf16.mxu1 %v31814_v7  ;;  %26489 = vmatprep.subr.bf16.mxu0 %v31796_v33 }
0x22b3   :  { %26299 = vmatpush3.bf16.msra.mxu1 %v28885_v46  ;;  %26491 = vmatpush1.bf16.msra.mxu0 %v31797_v44 }
0x22b4   :  { %26301 = vmatprep.subr.bf16.mxu1 %v31838_v9  ;;  %26493 = vmatprep.subr.bf16.mxu0 %v28626_v57 }
0x22b6   :  { %23814 = vmatmul.mubr.f32.vlgmr.msra.gmra.mrb[24].mxu1 %v30378_v36  ;;  %18331 = vmatmul.mubr.f32.vlgmr.msra.gmra.mrb[14].mxu0 %v30378_v36  ;;  %v32220_v36 = vld [vmem:[#allocation17_spill] sm:$0xff] }
0x22b7   :  { %26303 = vmatpush1.bf16.msra.mxu1 %v31839_v34  ;;  %17083 = vmatprep.mubr.f32.mxu1 %v31729_v10 }
0x22b8   :  { %26305 = vmatprep.subr.bf16.mxu1 %v31840_v6  ;;  %26495 = vmatpush1.bf16.msra.mxu0 %v28633_v62 }
0x22b9   :  { %26497 = vmatprep.subr.bf16.mxu0 %v28640_v23  ;;  %18420 = vmatprep.mubr.f32.mxu0 %v31729_v10 }
0x22bb   :  { %26307 = vmatpush1.bf16.msra.mxu1 %v31841_v17 }
0x22bc   :  { %26309 = vmatprep.subr.bf16.mxu1 %v32219_v45  ;;  %26499 = vmatpush1.bf16.msra.mxu0 %v28642_v21 }
0x22bd   :  { %26501 = vmatprep.subr.bf16.mxu0 %v28649_v58 }
0x22bf   :  { %26311 = vmatpush1.bf16.msra.mxu1 %v32220_v36 }
0x22c0   :  { %26313 = vmatprep.subr.bf16.mxu1 %v32221_v8  ;;  %26503 = vmatpush1.bf16.msra.mxu0 %v28655_v19 }
0x22c1   :  { %26505 = vmatprep.subr.bf16.mxu0 %v28661_v54 }
0x22c3   :  { %26315 = vmatpush1.bf16.msra.mxu1 %v32222_v25 }
0x22c4   :  { %26317 = vmatprep.subr.bf16.mxu1 %v32223_v29  ;;  %26507 = vmatpush1.bf16.msra.mxu0 %v28669_v56  ;;  %v32231_v29 = vld [vmem:[#allocation27_spill] sm:$0xff] }
0x22c5   :  { %26509 = vmatprep.subr.bf16.mxu0 %v32224_v52 }
0x22c6   :  { %17089 = vmatmul.mubr.f32.vlgmr.msra.gmra.mrb[26].mxu1 %v30303_v30  ;;  %v32233_v30 = vld [vmem:[#allocation29_spill] sm:$0xff] }
0x22c7   :  { %26319 = vmatpush1.bf16.msra.mxu1 %v32225_v40  ;;  %17239 = vmatprep.mubr.f32.mxu1 %v31729_v10  ;;  %v32234_v40 = vld [vmem:[#allocation30_spill] sm:$0xff] }
0x22c8   :  { %26321 = vmatprep.subr.bf16.mxu1 %v32226_v47  ;;  %v32235_v47 = vld [vmem:[#allocation31_spill] sm:$0xff] }
0x22cb   :  { %26323 = vmatpush1.bf16.msra.mxu1 %v32227_v14  ;;  %v32236_v14 = vld [vmem:[#allocation32_spill] sm:$0xff] }
0x22cc   :  { %26325 = vmatprep.subr.bf16.mxu1 %v32228_v28  ;;  %v32237_v28 = vld [vmem:[#allocation33_spill] sm:$0xff] }
0x22cf   :  { %26327 = vmatpush1.bf16.msra.mxu1 %v32229_v48  ;;  %v32238_v48 = vld [vmem:[#allocation34_spill] sm:$0xff] }
0x22d0   :  { %26329 = vmatprep.subr.bf16.mxu1 %v32230_v41  ;;  %v32239_v41 = vld [vmem:[#allocation35_spill] sm:$0xff] }
0x22d3   :  { %26331 = vmatpush1.bf16.msra.mxu1 %v32231_v29 }
0x22d4   :  { %26333 = vmatprep.subr.bf16.mxu1 %v32232_v49  ;;  %v32248_v49 = vld [vmem:[#allocation43_spill] sm:$0xff] }
0x22d6   :  { %17241 = vmatmul.mubr.f32.vlgmr.msra.gmra.mrb[26].mxu1 %v30293_v60 }
0x22d7   :  { %26335 = vmatpush1.bf16.msra.mxu1 %v32233_v30  ;;  %17343 = vmatprep.mubr.f32.mxu1 %v31729_v10  ;;  %v32247_v30 = vld [vmem:[#allocation42_spill] sm:$0xff] }
0x22d8   :  { %26337 = vmatprep.subr.bf16.mxu1 %v32234_v40  ;;  %v32246_v40 = vld [vmem:[#allocation41_spill] sm:$0xff] }
0x22db   :  { %26339 = vmatpush1.bf16.msra.mxu1 %v32235_v47  ;;  %v32245_v47 = vld [vmem:[#allocation40_spill] sm:$0xff] }
0x22dc   :  { %26341 = vmatprep.subr.bf16.mxu1 %v32236_v14  ;;  %v32244_v14 = vld [vmem:[#allocation39_spill] sm:$0xff] }
0x22df   :  { %26343 = vmatpush1.bf16.msra.mxu1 %v32237_v28  ;;  %v32243_v28 = vld [vmem:[#allocation38_spill] sm:$0xff] }
0x22e0   :  { %26345 = vmatprep.subr.bf16.mxu1 %v32238_v48  ;;  %v32241_v48 = vld [vmem:[#allocation102_spill] sm:$0xff] }
0x22e3   :  { %26347 = vmatpush1.bf16.msra.mxu1 %v32239_v41  ;;  %v32240_v41 = vld [vmem:[#allocation36_spill] sm:$0xff] }
0x22e4   :  { %26349 = vmatprep.subr.bf16.mxu1 %v31838_v9 }
0x22e6   :  { %17346 = vmatmul.mubr.f32.vlgmr.msra.gmra.mrb[26].mxu1 %v30296_v13  ;;  %v32242_v13 = vld [vmem:[#allocation37_spill] sm:$0xff] }
0x22e7   :  { %26351 = vmatpush1.bf16.msra.mxu1 %v31839_v34  ;;  %17432 = vmatprep.mubr.f32.mxu1 %v31729_v10 }
0x22e8   :  { %26353 = vmatprep.subr.bf16.mxu1 %v31840_v6 }
0x22eb   :  { %26355 = vmatpush1.bf16.msra.mxu1 %v31841_v17 }
0x22ec   :  { %26357 = vmatprep.subr.bf16.mxu1 %v32219_v45 }
0x22ef   :  { %26359 = vmatpush1.bf16.msra.mxu1 %v32220_v36 }
0x22f0   :  { %26361 = vmatprep.subr.bf16.mxu1 %v32221_v8 }
0x22f3   :  { %26363 = vmatpush1.bf16.msra.mxu1 %v32222_v25 }
0x22f4   :  { %26365 = vmatprep.subr.bf16.mxu1 %v32240_v41 }
0x22f6   :  { %17436 = vmatmul.mubr.f32.vlgmr.msra.gmra.mrb[26].mxu1 %v32241_v48 }
0x22f7   :  { %26367 = vmatpush1.bf16.msra.mxu1 %v32242_v13  ;;  %17554 = vmatprep.mubr.f32.mxu1 %v31729_v10 }
0x22f8   :  { %26369 = vmatprep.subr.bf16.mxu1 %v32243_v28 }
0x22fb   :  { %26371 = vmatpush1.bf16.msra.mxu1 %v32244_v14  ;;  %v32250_v14 = vld [vmem:[#allocation48_spill] sm:$0xff] }
0x22fc   :  { %26373 = vmatprep.subr.bf16.mxu1 %v32245_v47  ;;  %v22518_v47 = vld [vmem:[%s31399_s0 + $0x18] sm:$0xf] }
0x22ff   :  { %26375 = vmatpush1.bf16.msra.mxu1 %v32246_v40 }
0x2300   :  { %26377 = vmatprep.subr.bf16.mxu1 %v32247_v30 }
0x2303   :  { %26379 = vmatpush1.bf16.msra.mxu1 %v32248_v49 }
0x2304   :  { %26381 = vmatprep.subr.bf16.mxu1 %v31838_v9 }
0x2306   :  { %17556 = vmatmul.mubr.f32.vlgmr.msra.gmra.mrb[26].mxu1 %v30293_v60 }
0x2307   :  { %26383 = vmatpush1.bf16.msra.mxu1 %v31839_v34  ;;  %17642 = vmatprep.mubr.f32.mxu1 %v31729_v10 }
0x2308   :  { %26385 = vmatprep.subr.bf16.mxu1 %v31840_v6 }
0x230b   :  { %26387 = vmatpush1.bf16.msra.mxu1 %v31841_v17 }
0x230c   :  { %26389 = vmatprep.subr.bf16.mxu1 %v32219_v45 }
0x230f   :  { %26391 = vmatpush1.bf16.msra.mxu1 %v32220_v36 }
0x2310   :  { %26393 = vmatprep.subr.bf16.mxu1 %v32221_v8 }
0x2313   :  { %26395 = vmatpush1.bf16.msra.mxu1 %v32222_v25 }
0x2314   :  { %26588 = vmatprep.subr.bf16.mxu1 %v31814_v7 }
0x2316   :  { %17644 = vmatmul.mubr.f32.vlgmr.msra.gmra.mrb[26].mxu1 %v30293_v60 }
0x2317   :  { %26590 = vmatpush3.bf16.msra.mxu1 %v28868_v43  ;;  %23832 = vmatprep.mubr.msk.f32.mxu1 %vm27748_vm1, %v31729_v10 }
0x2318   :  { %26591 = vmatprep.subr.bf16.mxu1 %v31814_v7 }
0x231b   :  { %26593 = vmatpush3.bf16.msra.mxu1 %v28872_v5 }
0x231c   :  { %26594 = vmatprep.subr.bf16.mxu1 %v31814_v7 }
0x231f   :  { %26596 = vmatpush3.bf16.msra.mxu1 %v28879_v37 }
0x2320   :  { %26597 = vmatprep.subr.bf16.mxu1 %v31814_v7 }
0x2323   :  { %26599 = vmatpush3.bf16.msra.mxu1 %v28885_v46 }
0x2324   :  { %26600 = vmatprep.subr.bf16.mxu1 %v31814_v7 }
0x2389   :  { %v30566_v60 = vpop.f32.mrb[24].mxu1 }
0x238a   :  { %32249 = vst [vmem:[#allocation56_spill] sm:$0xff] %v30566_v60  ;;  %v23815_v48 = vpop.f32.mrb[25].mxu1 }
0x23e9   :  { %v17645_v49 = vpop.f32.mrb[26].mxu1 }
0x23ea   :  { %v17647_v30 = vpop.f32.mrb[27].mxu1 }
0x23eb   :  { %v17652_v40 = vcombine.low %v17645_v49, %v17647_v30  ;;  %v32251_v30 = vld [vmem:[#allocation52_spill] sm:$0xff] }
0x23ed   :  { %v17659_v28 = vrot.slane %v17652_v40, %v32250_v14 }
0x23ef   :  { %v17661_v13 = vadd.f32 %v22518_v47, %v17659_v28 }
0x23f1   :  { %17669 = vrot.lane.b32.xlu0 %v17661_v13, %s27746_s14  ;;  %v22519_v41 = vmul.f32 -1.442695, %v17661_v13 }
0x23f3   :  { %27503 = vpow2.f32 %v22519_v41 }
0x23fd   :  { %v27504_v29 = vpop.eup %27503 }
0x23fe   :  { %v17665_v52 = vadd.f32 1.0, %v27504_v29 }
0x2400   :  { %27505 = vrcp.f32 %v17665_v52 }
0x240a   :  { %v27506_v48 = vpop.eup %27505 }
0x240b   :  { %v17674_v36 = vmul.f32 %v27506_v48, %v32251_v30  ;;  %v17683_v41 = vrot.slane %v27506_v48, 2  ;;  %v32257_v30 = vld [vmem:[#allocation81_spill] sm:$0xff] }
0x2463   :  { %v17670_v25 = vpop.permute.xlu0 %17669 }
0x2464   :  { %v17671_v8 = vrot.slane %v17670_v25, 2 }
0x2466   :  { %27507 = vtanh.f32 %v17671_v8 }
0x2470   :  { %v27508_v60 = vpop.eup %27507 }
0x2471   :  { %v17675_v49 = vmul.f32 %v27508_v60, %v27506_v48  ;;  %v32254_v60 = vld [vmem:[#allocation99_spill] sm:$0xff] }
0x2472   :  { %v32255_v48 = vld [vmem:[#allocation79_spill] sm:$0xff] }
0x2473   :  { %17677 = vrot.lane.b32.xlu1 %v17675_v49, %s27746_s14  ;;  %v32256_v49 = vld [vmem:[#allocation80_spill] sm:$0xff] }
0x24e5   :  { %v17678_v45 = vpop.permute.xlu1 %17677 }
0x24e6   :  { %v30575_v40 = vadd.f32 %v17678_v45, %v17674_v36 }
0x24e8   :  { %32252 = vst [vmem:[#allocation103_spill] sm:$0xff] %v30575_v40  ;;  %27509 = vtanh.f32 %v30575_v40 }
0x24f2   :  { %v27510_v28 = vpop.eup %27509 }
0x24f3   :  { %17686 = vrot.lane.b32.xlu0 %v27510_v28, %s27746_s14  ;;  %v32258_v28 = vld [vmem:[#allocation82_spill] sm:$0xff] }
0x2565   :  { %v17687_v29 = vpop.permute.xlu0 %17686 }
0x2566   :  { %v17689_v25 = vmul.f32 %v17687_v29, %v17683_v41  ;;  %v32259_v41 = vld [vmem:[#allocation83_spill] sm:$0xff]  ;;  %v32260_v29 = vld [vmem:[#allocation84_spill] sm:$0xff] }
0x2568   :  { %v18338_v52 = vsel %vm107_vm0, %v17689_v25, 0  ;;  %v32261_v25 = vld [vmem:[#allocation85_spill] sm:$0xff] }
0x2569   :  { %v30580_v8 = vand.u32 4294901760, %v18338_v52 }
0x256b   :  { %v30583_v47 = vsub.f32 %v18338_v52, %v30580_v8  ;;  %v32262_v52 = vld [vmem:[#allocation100_spill] sm:$0xff] }
0x256d   :  { %v30586_v13 = vand.u32 4294901760, %v30583_v47 }
0x256f   :  { %32253 = vst [vmem:[#allocation60_spill] sm:$0xff] %v30586_v13  ;;  %v18424_v45 = vsub.f32 %v30583_v47, %v30586_v13 }
0x2571   :  { %v30590_v36 = vand.u32 4294901760, %v18424_v45  ;;  %v32263_v45 = vld [vmem:[#allocation86_spill] sm:$0xff] }
0x2573   :  { %18426 = vmatmul.mubr.f32.vlgmr.msra.gmra.mrb[14].mxu0 %v30590_v36 }
0x2574   :  { %26511 = vmatpush1.bf16.msra.mxu0 %v32254_v60  ;;  %18576 = vmatprep.mubr.f32.mxu0 %v31729_v10 }
0x2575   :  { %26513 = vmatprep.subr.bf16.mxu0 %v32255_v48  ;;  %v32264_v48 = vld [vmem:[#allocation87_spill] sm:$0xff] }
0x2578   :  { %26515 = vmatpush1.bf16.msra.mxu0 %v32256_v49  ;;  %v32265_v49 = vld [vmem:[#allocation88_spill] sm:$0xff] }
0x2579   :  { %26517 = vmatprep.subr.bf16.mxu0 %v32257_v30  ;;  %v32266_v30 = vld [vmem:[#allocation89_spill] sm:$0xff] }
0x257c   :  { %26519 = vmatpush1.bf16.msra.mxu0 %v32258_v28  ;;  %v32267_v28 = vld [vmem:[#allocation90_spill] sm:$0xff] }
0x257d   :  { %26521 = vmatprep.subr.bf16.mxu0 %v32259_v41  ;;  %v32268_v41 = vld [vmem:[#allocation91_spill] sm:$0xff] }
0x2580   :  { %26523 = vmatpush1.bf16.msra.mxu0 %v32260_v29 }
0x2581   :  { %26525 = vmatprep.subr.bf16.mxu0 %v32261_v25  ;;  %v32276_v25 = vld [vmem:[#allocation98_spill] sm:$0xff] }
0x2583   :  { %18578 = vmatmul.mubr.f32.vlgmr.msra.gmra.mrb[14].mxu0 %v30580_v8 }
0x2584   :  { %26527 = vmatpush1.bf16.msra.mxu0 %v32262_v52  ;;  %18680 = vmatprep.mubr.f32.mxu0 %v31729_v10  ;;  %v32275_v52 = vld [vmem:[#allocation97_spill] sm:$0xff] }
0x2585   :  { %26529 = vmatprep.subr.bf16.mxu0 %v32263_v45  ;;  %v32274_v45 = vld [vmem:[#allocation96_spill] sm:$0xff] }
0x2588   :  { %26531 = vmatpush1.bf16.msra.mxu0 %v32264_v48  ;;  %v32273_v48 = vld [vmem:[#allocation95_spill] sm:$0xff] }
0x2589   :  { %26533 = vmatprep.subr.bf16.mxu0 %v32265_v49  ;;  %v32272_v49 = vld [vmem:[#allocation94_spill] sm:$0xff] }
0x258c   :  { %26535 = vmatpush1.bf16.msra.mxu0 %v32266_v30  ;;  %v32271_v30 = vld [vmem:[#allocation93_spill] sm:$0xff] }
0x258d   :  { %26537 = vmatprep.subr.bf16.mxu0 %v32267_v28  ;;  %v32270_v28 = vld [vmem:[#allocation101_spill] sm:$0xff] }
0x2590   :  { %26539 = vmatpush1.bf16.msra.mxu0 %v32268_v41  ;;  %v32269_v41 = vld [vmem:[#allocation92_spill] sm:$0xff] }
0x2591   :  { %26541 = vmatprep.subr.bf16.mxu0 %v28626_v57 }
0x2593   :  { %18683 = vmatmul.mubr.f32.vlgmr.msra.gmra.mrb[14].mxu0 %v30583_v47 }
0x2594   :  { %26543 = vmatpush1.bf16.msra.mxu0 %v28633_v62  ;;  %18769 = vmatprep.mubr.f32.mxu0 %v31729_v10 }
0x2595   :  { %26545 = vmatprep.subr.bf16.mxu0 %v28640_v23 }
0x2598   :  { %26547 = vmatpush1.bf16.msra.mxu0 %v28642_v21 }
0x2599   :  { %26549 = vmatprep.subr.bf16.mxu0 %v28649_v58 }
0x259c   :  { %26551 = vmatpush1.bf16.msra.mxu0 %v28655_v19 }
0x259d   :  { %26553 = vmatprep.subr.bf16.mxu0 %v28661_v54 }
0x25a0   :  { %26555 = vmatpush1.bf16.msra.mxu0 %v28669_v56 }
0x25a1   :  { %26557 = vmatprep.subr.bf16.mxu0 %v32269_v41 }
0x25a3   :  { %18773 = vmatmul.mubr.f32.vlgmr.msra.gmra.mrb[14].mxu0 %v30586_v13 }
0x25a4   :  { %26559 = vmatpush1.bf16.msra.mxu0 %v32270_v28  ;;  %18891 = vmatprep.mubr.f32.mxu0 %v31729_v10 }
0x25a5   :  { %26561 = vmatprep.subr.bf16.mxu0 %v32271_v30 }
0x25a8   :  { %26563 = vmatpush1.bf16.msra.mxu0 %v32272_v49 }
0x25a9   :  { %26565 = vmatprep.subr.bf16.mxu0 %v32273_v48 }
0x25ac   :  { %26567 = vmatpush1.bf16.msra.mxu0 %v32274_v45 }
0x25ad   :  { %26569 = vmatprep.subr.bf16.mxu0 %v32275_v52 }
0x25b0   :  { %26571 = vmatpush1.bf16.msra.mxu0 %v32276_v25  ;;  %v32277_v25 = vld [vmem:[#allocation53_spill] sm:$0xff] }
0x25b1   :  { %26573 = vmatprep.subr.bf16.mxu0 %v28626_v57 }
0x25b3   :  { %18893 = vmatmul.mubr.f32.vlgmr.msra.gmra.mrb[14].mxu0 %v30580_v8 }
0x25b4   :  { %26575 = vmatpush1.bf16.msra.mxu0 %v28633_v62  ;;  %18979 = vmatprep.mubr.f32.mxu0 %v31729_v10 }
0x25b5   :  { %26577 = vmatprep.subr.bf16.mxu0 %v28640_v23 }
0x25b8   :  { %26579 = vmatpush1.bf16.msra.mxu0 %v28642_v21 }
0x25b9   :  { %26581 = vmatprep.subr.bf16.mxu0 %v28649_v58 }
0x25bc   :  { %26583 = vmatpush1.bf16.msra.mxu0 %v28655_v19 }
0x25bd   :  { %26585 = vmatprep.subr.bf16.mxu0 %v28661_v54 }
0x25c0   :  { %26587 = vmatpush1.bf16.msra.mxu0 %v28669_v56 }
0x25c1   :  { %26757 = vmatprep.subr.bf16.mxu0 %v28335_v12 }
0x25c3   :  { %18981 = vmatmul.mubr.f32.vlgmr.msra.gmra.mrb[14].mxu0 %v30580_v8 }
0x25c4   :  { %26759 = vmatpush1.bf16.msra.mxu0 %v28341_v11  ;;  %20472 = vmatprep.mubr.f32.mxu0 %v31729_v10 }
0x25c5   :  { %26761 = vmatprep.subr.bf16.mxu0 %v28343_v0 }
0x25c8   :  { %26763 = vmatpush1.bf16.msra.mxu0 %v28351_v24 }
0x25c9   :  { %26765 = vmatprep.subr.bf16.mxu0 %v31794_v53 }
0x25cc   :  { %26767 = vmatpush1.bf16.msra.mxu0 %v31795_v59 }
0x25cd   :  { %26769 = vmatprep.subr.bf16.mxu0 %v31796_v33 }
0x25d0   :  { %26771 = vmatpush1.bf16.msra.mxu0 %v31797_v44 }
0x25d1   :  { %26773 = vmatprep.subr.bf16.mxu0 %v32277_v25 }
0x2696   :  { %v18982_v52 = vpop.f32.mrb[14].mxu0 }
0x2697   :  { %v18984_v45 = vpop.f32.mrb[15].mxu0  ;;  %v18987_v30 = vadd.f32 %v18982_v52, %v31896_v22 }
0x2698   :  { %v18988_v48 = vadd.f32 %v18984_v45, %v31895_v1 }
0x2699   :  { %v22520_v28 = vmul.f32 -1.442695, %v18987_v30 }
0x269a   :  { %27511 = vtanh.f32 %v18988_v48  ;;  %v22521_v30 = vmul.f32 -1.442695, %v18988_v48 }
0x269b   :  { %27513 = vpow2.f32 %v22520_v28 }
0x26a4   :  { %v27512_v49 = vpop.eup %27511 }
0x26a5   :  { %19004 = vrot.lane.b32.xlu1 %v27512_v49, %s27746_s14  ;;  %v27514_v41 = vpop.eup %27513 }
0x26a6   :  { %v18995_v29 = vadd.f32 1.0, %v27514_v41 }
0x26a8   :  { %27515 = vrcp.f32 %v18995_v29 }
0x26b2   :  { %v27516_v60 = vpop.eup %27515 }
0x26b3   :  { %v19002_v25 = vmul.f32 %v27516_v60, %v30370_v61 }
0x2717   :  { %v19005_v40 = vpop.permute.xlu1 %19004 }
0x2718   :  { %v19007_v14 = vmul.f32 %v27516_v60, %v19005_v40 }
0x271a   :  { %19009 = vrot.lane.b32.xlu0 %v19007_v14, %s27746_s14 }
0x278c   :  { %v19010_v13 = vpop.permute.xlu0 %19009 }
0x278d   :  { %v30657_v45 = vadd.f32 %v19010_v13, %v19002_v25 }
0x278f   :  { %27517 = vtanh.f32 %v30657_v45 }
0x2790   :  { %27519 = vpow2.f32 %v22521_v30  ;;  %v32291_v30 = vld [vmem:[#allocation75_spill] sm:$0xff] }
0x2799   :  { %v27518_v49 = vpop.eup %27517 }
0x279a   :  { %19015 = vrot.lane.b32.xlu1 %v27518_v49, %s27746_s14  ;;  %v27520_v28 = vpop.eup %27519  ;;  %v32290_v49 = vld [vmem:[#allocation74_spill] sm:$0xff] }
0x279b   :  { %v18996_v41 = vadd.f32 1.0, %v27520_v28  ;;  %v32292_v28 = vld [vmem:[#allocation107_spill] sm:$0xff] }
0x279d   :  { %27521 = vrcp.f32 %v18996_v41  ;;  %v32293_v41 = vld [vmem:[#allocation76_spill] sm:$0xff] }
0x27a7   :  { %v27522_v29 = vpop.eup %27521 }
0x280c   :  { %v19016_v52 = vpop.permute.xlu1 %19015 }
0x280d   :  { %v30661_v40 = vmul.f32 %v27522_v29, %v19016_v52  ;;  %v32302_v29 = vld [vmem:[#allocation23_spill] sm:$0xff]  ;;  %v32303_v52 = vld [vmem:[#allocation24_spill] sm:$0xff] }
0x280f   :  { %v19020_v61 = vsel %vm107_vm0, %v30661_v40, 0 }
0x2810   :  { %v30665_v14 = vand.u32 4294901760, %v19020_v61 }
0x2812   :  { %v19096_v13 = vsub.f32 %v19020_v61, %v30665_v14  ;;  %v32304_v61 = vld [vmem:[#allocation25_spill] sm:$0xff] }
0x2814   :  { %v30668_v60 = vand.u32 4294901760, %v19096_v13 }
0x2816   :  { %v19098_v25 = vsub.f32 %v19096_v13, %v30668_v60 }
0x2818   :  { %v19099_v48 = vand.u32 4294901760, %v19098_v25  ;;  %v32309_v25 = vld [vmem:[#allocation30_spill] sm:$0xff] }
0x281a   :  { %23833 = vmatmul.mubr.f32.vlgmr.msra.gmra.mrb[28].mxu1 %v19099_v48  ;;  %20478 = vmatmul.mubr.f32.vlgmr.msra.gmra.mrb[16].mxu0 %v19099_v48  ;;  %v32310_v48 = vld [vmem:[#allocation31_spill] sm:$0xff] }
0x281b   :  { %26602 = vmatpush3.bf16.msra.mxu1 %v28937_v27  ;;  %26775 = vmatpush1.bf16.msra.mxu0 %v31813_v55  ;;  %v32278_v55 = vld [vmem:[#allocation66_spill] sm:$0xff] }
0x281c   :  { %26603 = vmatprep.subr.bf16.mxu1 %v31814_v7  ;;  %26777 = vmatprep.subr.bf16.mxu0 %v31815_v20  ;;  %v32279_v20 = vld [vmem:[#allocation67_spill] sm:$0xff] }
0x281d   :  { %23851 = vmatprep.mubr.msk.f32.mxu1 %vm27748_vm1, %v31729_v10  ;;  %20628 = vmatprep.mubr.f32.mxu0 %v31729_v10 }
0x281f   :  { %26605 = vmatpush3.bf16.msra.mxu1 %v28890_v42  ;;  %26779 = vmatpush1.bf16.msra.mxu0 %v31816_v4  ;;  %v32280_v4 = vld [vmem:[#allocation104_spill] sm:$0xff] }
0x2820   :  { %26606 = vmatprep.subr.bf16.mxu1 %v31814_v7  ;;  %26781 = vmatprep.subr.bf16.mxu0 %v31817_v51  ;;  %v32281_v51 = vld [vmem:[#allocation68_spill] sm:$0xff] }
0x2823   :  { %26608 = vmatpush3.bf16.msra.mxu1 %v28892_v15  ;;  %26783 = vmatpush1.bf16.msra.mxu0 %v31818_v39  ;;  %v32282_v39 = vld [vmem:[#allocation69_spill] sm:$0xff] }
0x2824   :  { %26609 = vmatprep.subr.bf16.mxu1 %v31814_v7  ;;  %26785 = vmatprep.subr.bf16.mxu0 %v31819_v63  ;;  %v32283_v63 = vld [vmem:[#allocation54_spill] sm:$0xff] }
0x2827   :  { %26611 = vmatpush3.bf16.msra.mxu1 %v28894_v32  ;;  %26787 = vmatpush1.bf16.msra.mxu0 %v31820_v18  ;;  %v32284_v18 = vld [vmem:[#allocation70_spill] sm:$0xff] }
0x2828   :  { %26612 = vmatprep.subr.bf16.mxu1 %v31814_v7  ;;  %26789 = vmatprep.subr.bf16.mxu0 %v31821_v3  ;;  %v32285_v3 = vld [vmem:[#allocation71_spill] sm:$0xff] }
0x282a   :  { %23852 = vmatmul.mubr.f32.vlgmr.msra.gmra.mrb[28].mxu1 %v30665_v14  ;;  %20630 = vmatmul.mubr.f32.vlgmr.msra.gmra.mrb[16].mxu0 %v30665_v14 }
0x282b   :  { %26614 = vmatpush3.bf16.msra.mxu1 %v28958_v31  ;;  %26791 = vmatpush1.bf16.msra.mxu0 %v31822_v16  ;;  %v32286_v16 = vld [vmem:[#allocation105_spill] sm:$0xff] }
0x282c   :  { %26615 = vmatprep.subr.bf16.mxu1 %v31814_v7  ;;  %26793 = vmatprep.subr.bf16.mxu0 %v31823_v38  ;;  %v32287_v38 = vld [vmem:[#allocation72_spill] sm:$0xff] }
0x282d   :  { %23870 = vmatprep.mubr.msk.f32.mxu1 %vm27748_vm1, %v31729_v10  ;;  %20732 = vmatprep.mubr.f32.mxu0 %v31729_v10 }
0x282f   :  { %26617 = vmatpush3.bf16.msra.mxu1 %v28896_v26  ;;  %26795 = vmatpush1.bf16.msra.mxu0 %v31824_v2  ;;  %v32288_v2 = vld [vmem:[#allocation73_spill] sm:$0xff] }
0x2830   :  { %26618 = vmatprep.subr.bf16.mxu1 %v31814_v7  ;;  %26797 = vmatprep.subr.bf16.mxu0 %v31899_v50  ;;  %v32289_v50 = vld [vmem:[#allocation106_spill] sm:$0xff] }
0x2833   :  { %26620 = vmatpush3.bf16.msra.mxu1 %v31975_v35  ;;  %26799 = vmatpush1.bf16.msra.mxu0 %v32278_v55  ;;  %v32311_v55 = vld [vmem:[#allocation32_spill] sm:$0xff] }
0x2834   :  { %26621 = vmatprep.subr.bf16.mxu1 %v31814_v7  ;;  %26801 = vmatprep.subr.bf16.mxu0 %v32279_v20  ;;  %v32312_v20 = vld [vmem:[#allocation33_spill] sm:$0xff] }
0x2837   :  { %26623 = vmatpush3.bf16.msra.mxu1 %v32280_v4  ;;  %26803 = vmatpush1.bf16.msra.mxu0 %v32281_v51  ;;  %v32313_v51 = vld [vmem:[#allocation34_spill] sm:$0xff] }
0x2838   :  { %26624 = vmatprep.subr.bf16.mxu1 %v31814_v7  ;;  %26805 = vmatprep.subr.bf16.mxu0 %v28335_v12 }
0x283a   :  { %23871 = vmatmul.mubr.f32.vlgmr.msra.gmra.mrb[28].mxu1 %v19096_v13  ;;  %20735 = vmatmul.mubr.f32.vlgmr.msra.gmra.mrb[16].mxu0 %v19096_v13  ;;  %v32306_v13 = vld [vmem:[#allocation27_spill] sm:$0xff] }
0x283b   :  { %26626 = vmatpush3.bf16.msra.mxu1 %v28868_v43  ;;  %26807 = vmatpush1.bf16.msra.mxu0 %v28341_v11 }
0x283c   :  { %26627 = vmatprep.subr.bf16.mxu1 %v31814_v7  ;;  %26809 = vmatprep.subr.bf16.mxu0 %v28343_v0 }
0x283d   :  { %23889 = vmatprep.mubr.msk.f32.mxu1 %vm27748_vm1, %v31729_v10  ;;  %20821 = vmatprep.mubr.f32.mxu0 %v31729_v10 }
0x283f   :  { %26629 = vmatpush3.bf16.msra.mxu1 %v28872_v5  ;;  %26811 = vmatpush1.bf16.msra.mxu0 %v28351_v24 }
0x2840   :  { %26630 = vmatprep.subr.bf16.mxu1 %v31814_v7  ;;  %26813 = vmatprep.subr.bf16.mxu0 %v31794_v53 }
0x2843   :  { %26632 = vmatpush3.bf16.msra.mxu1 %v28879_v37  ;;  %26815 = vmatpush1.bf16.msra.mxu0 %v31795_v59 }
0x2844   :  { %26633 = vmatprep.subr.bf16.mxu1 %v31814_v7  ;;  %26817 = vmatprep.subr.bf16.mxu0 %v31796_v33 }
0x2847   :  { %26635 = vmatpush3.bf16.msra.mxu1 %v28885_v46  ;;  %26819 = vmatpush1.bf16.msra.mxu0 %v31797_v44 }
0x2848   :  { %26636 = vmatprep.subr.bf16.mxu1 %v31814_v7  ;;  %26821 = vmatprep.subr.bf16.mxu0 %v32282_v39  ;;  %v32314_v39 = vld [vmem:[#allocation35_spill] sm:$0xff] }
0x284a   :  { %23890 = vmatmul.mubr.f32.vlgmr.msra.gmra.mrb[28].mxu1 %v30668_v60  ;;  %20825 = vmatmul.mubr.f32.vlgmr.msra.gmra.mrb[16].mxu0 %v30668_v60  ;;  %v32307_v60 = vld [vmem:[#allocation28_spill] sm:$0xff] }
0x284b   :  { %26638 = vmatpush3.bf16.msra.mxu1 %v32283_v63  ;;  %26823 = vmatpush1.bf16.msra.mxu0 %v32284_v18  ;;  %v32315_v18 = vld [vmem:[#allocation36_spill] sm:$0xff] }
0x284c   :  { %26639 = vmatprep.subr.bf16.mxu1 %v31814_v7  ;;  %26825 = vmatprep.subr.bf16.mxu0 %v32285_v3  ;;  %v32316_v3 = vld [vmem:[#allocation60_spill] sm:$0xff] }
0x284d   :  { %23908 = vmatprep.mubr.msk.f32.mxu1 %vm27748_vm1, %v31729_v10  ;;  %20943 = vmatprep.mubr.f32.mxu0 %v31729_v10 }
0x284f   :  { %26641 = vmatpush3.bf16.msra.mxu1 %v32286_v16  ;;  %26827 = vmatpush1.bf16.msra.mxu0 %v32287_v38  ;;  %v32318_v38 = vld [vmem:[#allocation38_spill] sm:$0xff] }
0x2850   :  { %26642 = vmatprep.subr.bf16.mxu1 %v31814_v7  ;;  %26829 = vmatprep.subr.bf16.mxu0 %v32288_v2  ;;  %v32319_v2 = vld [vmem:[#allocation39_spill] sm:$0xff] }
0x2853   :  { %26644 = vmatpush3.bf16.msra.mxu1 %v32289_v50  ;;  %26831 = vmatpush1.bf16.msra.mxu0 %v32290_v49  ;;  %v32320_v49 = vld [vmem:[#allocation40_spill] sm:$0xff] }
0x2854   :  { %26645 = vmatprep.subr.bf16.mxu1 %v31814_v7  ;;  %26833 = vmatprep.subr.bf16.mxu0 %v32291_v30  ;;  %v32321_v30 = vld [vmem:[#allocation41_spill] sm:$0xff] }
0x2857   :  { %26647 = vmatpush3.bf16.msra.mxu1 %v32292_v28  ;;  %26835 = vmatpush1.bf16.msra.mxu0 %v32293_v41  ;;  %v32322_v41 = vld [vmem:[#allocation42_spill] sm:$0xff] }
0x2858   :  { %26648 = vmatprep.subr.bf16.mxu1 %v31814_v7  ;;  %26837 = vmatprep.subr.bf16.mxu0 %v28335_v12  ;;  %v32297_v12 = vld [vmem:[#allocation19_spill] sm:$0xff] }
0x285a   :  { %23909 = vmatmul.mubr.f32.vlgmr.msra.gmra.mrb[28].mxu1 %v30665_v14  ;;  %20945 = vmatmul.mubr.f32.vlgmr.msra.gmra.mrb[16].mxu0 %v30665_v14 }
0x285b   :  { %26650 = vmatpush3.bf16.msra.mxu1 %v28868_v43  ;;  %26839 = vmatpush1.bf16.msra.mxu0 %v28341_v11  ;;  %v32296_v11 = vld [vmem:[#allocation18_spill] sm:$0xff] }
0x285c   :  { %26651 = vmatprep.subr.bf16.mxu1 %v31814_v7  ;;  %26841 = vmatprep.subr.bf16.mxu0 %v28343_v0  ;;  %v32295_v0 = vld [vmem:[#allocation17_spill] sm:$0xff] }
0x285d   :  { %23927 = vmatprep.mubr.msk.f32.mxu1 %vm27748_vm1, %v31729_v10  ;;  %21031 = vmatprep.mubr.f32.mxu0 %v31729_v10 }
0x285f   :  { %26653 = vmatpush3.bf16.msra.mxu1 %v28872_v5  ;;  %26843 = vmatpush1.bf16.msra.mxu0 %v28351_v24  ;;  %v32294_v24 = vld [vmem:[#allocation16_spill] sm:$0xff] }
0x2860   :  { %26654 = vmatprep.subr.bf16.mxu1 %v31814_v7  ;;  %26845 = vmatprep.subr.bf16.mxu0 %v31794_v53  ;;  %v32298_v53 = vld [vmem:[#allocation20_spill] sm:$0xff] }
0x2863   :  { %26656 = vmatpush3.bf16.msra.mxu1 %v28879_v37  ;;  %26847 = vmatpush1.bf16.msra.mxu0 %v31795_v59  ;;  %v32299_v59 = vld [vmem:[#allocation78_spill] sm:$0xff] }
0x2864   :  { %26657 = vmatprep.subr.bf16.mxu1 %v31814_v7  ;;  %26849 = vmatprep.subr.bf16.mxu0 %v31796_v33  ;;  %v32300_v33 = vld [vmem:[#allocation21_spill] sm:$0xff] }
0x2867   :  { %26659 = vmatpush3.bf16.msra.mxu1 %v28885_v46  ;;  %26851 = vmatpush1.bf16.msra.mxu0 %v31797_v44  ;;  %v32301_v44 = vld [vmem:[#allocation22_spill] sm:$0xff] }
0x2868   :  { %26661 = vmatprep.subr.bf16.mxu1 %v31838_v9  ;;  %26853 = vmatprep.subr.bf16.mxu0 %v28626_v57 }
0x286a   :  { %23928 = vmatmul.mubr.f32.vlgmr.msra.gmra.mrb[28].mxu1 %v30665_v14  ;;  %21033 = vmatmul.mubr.f32.vlgmr.msra.gmra.mrb[16].mxu0 %v30665_v14  ;;  %v32305_v14 = vld [vmem:[#allocation26_spill] sm:$0xff] }
0x286b   :  { %26663 = vmatpush1.bf16.msra.mxu1 %v31839_v34  ;;  %19785 = vmatprep.mubr.f32.mxu1 %v31729_v10 }
0x286c   :  { %26665 = vmatprep.subr.bf16.mxu1 %v31840_v6  ;;  %26855 = vmatpush1.bf16.msra.mxu0 %v28633_v62 }
0x286d   :  { %26857 = vmatprep.subr.bf16.mxu0 %v28640_v23  ;;  %21122 = vmatprep.mubr.f32.mxu0 %v31729_v10 }
0x286f   :  { %26667 = vmatpush1.bf16.msra.mxu1 %v31841_v17 }
0x2870   :  { %26669 = vmatprep.subr.bf16.mxu1 %v32294_v24  ;;  %26859 = vmatpush1.bf16.msra.mxu0 %v28642_v21 }
0x2871   :  { %26861 = vmatprep.subr.bf16.mxu0 %v28649_v58 }
0x2873   :  { %26671 = vmatpush1.bf16.msra.mxu1 %v32295_v0 }
0x2874   :  { %26673 = vmatprep.subr.bf16.mxu1 %v32296_v11  ;;  %26863 = vmatpush1.bf16.msra.mxu0 %v28655_v19 }
0x2875   :  { %26865 = vmatprep.subr.bf16.mxu0 %v28661_v54 }
0x2877   :  { %26675 = vmatpush1.bf16.msra.mxu1 %v32297_v12 }
0x2878   :  { %26677 = vmatprep.subr.bf16.mxu1 %v32298_v53  ;;  %26867 = vmatpush1.bf16.msra.mxu0 %v28669_v56  ;;  %v32323_v53 = vld [vmem:[#allocation43_spill] sm:$0xff] }
0x2879   :  { %26869 = vmatprep.subr.bf16.mxu0 %v32299_v59 }
0x287a   :  { %19791 = vmatmul.mubr.f32.vlgmr.msra.gmra.mrb[30].mxu1 %v30590_v36  ;;  %v32308_v36 = vld [vmem:[#allocation29_spill] sm:$0xff] }
0x287b   :  { %26679 = vmatpush1.bf16.msra.mxu1 %v32300_v33  ;;  %19941 = vmatprep.mubr.f32.mxu1 %v31729_v10 }
0x287c   :  { %26681 = vmatprep.subr.bf16.mxu1 %v32301_v44 }
0x287f   :  { %26683 = vmatpush1.bf16.msra.mxu1 %v32302_v29 }
0x2880   :  { %26685 = vmatprep.subr.bf16.mxu1 %v32303_v52 }
0x2883   :  { %26687 = vmatpush1.bf16.msra.mxu1 %v32304_v61 }
0x2884   :  { %26689 = vmatprep.subr.bf16.mxu1 %v32305_v14 }
0x2887   :  { %26691 = vmatpush1.bf16.msra.mxu1 %v32306_v13 }
0x2888   :  { %26693 = vmatprep.subr.bf16.mxu1 %v32307_v60  ;;  %v27749_v60 = vmov 1966171168  }
0x288a   :  { %19943 = vmatmul.mubr.f32.vlgmr.msra.gmra.mrb[30].mxu1 %v30580_v8 }
0x288b   :  { %26695 = vmatpush1.bf16.msra.mxu1 %v32308_v36  ;;  %20045 = vmatprep.mubr.f32.mxu1 %v31729_v10  ;;  %v3338_v36 = vunpack.c.l.s4 %v27749_v60 }
0x288c   :  { %26697 = vmatprep.subr.bf16.mxu1 %v32309_v25 }
0x288d   :  { %v3339_v25 = vunpack.c.0.s8 %v3338_v36 }
0x288f   :  { %26699 = vmatpush1.bf16.msra.mxu1 %v32310_v48  ;;  %v32325_v48 = vld [vmem:[#allocation44_spill] sm:$0xff] }
0x2890   :  { %26701 = vmatprep.subr.bf16.mxu1 %v32311_v55  ;;  %v30862_v55 = vsub.s32 %v3339_v25, %v32325_v48  ;;  %v32329_v25 = vld [vmem:[#allocation99_spill] sm:$0xff] }
0x2891   :  { %v32330_v48 = vld [vmem:[#allocation79_spill] sm:$0xff] }
0x2893   :  { %26703 = vmatpush1.bf16.msra.mxu1 %v32312_v20  ;;  %v32326_v20 = vld [vmem:[#allocation108_spill] sm:$0xff] }
0x2894   :  { %26705 = vmatprep.subr.bf16.mxu1 %v32313_v51  ;;  %v3343_v51 = vrot.slane %v32326_v20, %v30862_v55  ;;  %v32331_v20 = vld [vmem:[#allocation80_spill] sm:$0xff] }
0x2897   :  { %26707 = vmatpush1.bf16.msra.mxu1 %v32314_v39  ;;  %v3351_v39 = vrot.slane %v3343_v51, %v30862_v55 }
0x2898   :  { %26709 = vmatprep.subr.bf16.mxu1 %v31838_v9 }
0x289a   :  { %20048 = vmatmul.mubr.f32.vlgmr.msra.gmra.mrb[30].mxu1 %v30583_v47  ;;  %v32317_v47 = vld [vmem:[#allocation37_spill] sm:$0xff] }
0x289b   :  { %26711 = vmatpush1.bf16.msra.mxu1 %v31839_v34  ;;  %20134 = vmatprep.mubr.f32.mxu1 %v31729_v10 }
0x289c   :  { %26713 = vmatprep.subr.bf16.mxu1 %v31840_v6 }
0x289f   :  { %26715 = vmatpush1.bf16.msra.mxu1 %v31841_v17 }
0x28a0   :  { %26717 = vmatprep.subr.bf16.mxu1 %v32294_v24 }
0x28a3   :  { %26719 = vmatpush1.bf16.msra.mxu1 %v32295_v0 }
0x28a4   :  { %26721 = vmatprep.subr.bf16.mxu1 %v32296_v11 }
0x28a7   :  { %26723 = vmatpush1.bf16.msra.mxu1 %v32297_v12 }
0x28a8   :  { %26725 = vmatprep.subr.bf16.mxu1 %v32315_v18  ;;  %v32327_v18 = vld [vmem:[#allocation51_spill] sm:$0xff] }
0x28aa   :  { %20138 = vmatmul.mubr.f32.vlgmr.msra.gmra.mrb[30].mxu1 %v32316_v3  ;;  %v3362_v3 = vrot.slane %v3351_v39, %v32327_v18  ;;  %v32334_v39 = vld [vmem:[#allocation83_spill] sm:$0xff] }
0x28ab   :  { %26727 = vmatpush1.bf16.msra.mxu1 %v32317_v47  ;;  %20256 = vmatprep.mubr.f32.mxu1 %v31729_v10  ;;  %v30871_v47 = vld [vmem:[%s31400_s1] sm:$0xff] }
0x28ac   :  { %26729 = vmatprep.subr.bf16.mxu1 %v32318_v38  ;;  %v3369_v38 = vmul.f32 %v30871_v47, %v3362_v3  ;;  %v32335_v3 = vld [vmem:[#allocation84_spill] sm:$0xff] }
0x28af   :  { %26731 = vmatpush1.bf16.msra.mxu1 %v32319_v2  ;;  %v3371_v2 = vsel %vm107_vm0, %v3369_v38, 0.0  ;;  %v32336_v38 = vld [vmem:[#allocation85_spill] sm:$0xff] }
0x28b0   :  { %26733 = vmatprep.subr.bf16.mxu1 %v32320_v49  ;;  %v32328_v49 = vld [vmem:[#allocation103_spill] sm:$0xff] }
0x28b3   :  { %26735 = vmatpush1.bf16.msra.mxu1 %v32321_v30 }
0x28b4   :  { %26737 = vmatprep.subr.bf16.mxu1 %v32322_v41 }
0x28b7   :  { %26739 = vmatpush1.bf16.msra.mxu1 %v32323_v53 }
0x28b8   :  { %26741 = vmatprep.subr.bf16.mxu1 %v31838_v9 }
0x28ba   :  { %20258 = vmatmul.mubr.f32.vlgmr.msra.gmra.mrb[30].mxu1 %v30580_v8 }
0x28bb   :  { %26743 = vmatpush1.bf16.msra.mxu1 %v31839_v34  ;;  %20344 = vmatprep.mubr.f32.mxu1 %v31729_v10 }
0x28bc   :  { %26745 = vmatprep.subr.bf16.mxu1 %v31840_v6 }
0x28bf   :  { %26747 = vmatpush1.bf16.msra.mxu1 %v31841_v17 }
0x28c0   :  { %26749 = vmatprep.subr.bf16.mxu1 %v32294_v24  ;;  %v22522_v24 = vld [vmem:[%s31399_s0 + $0x1c] sm:$0xf] }
0x28c3   :  { %26751 = vmatpush1.bf16.msra.mxu1 %v32295_v0  ;;  %v32324_v0 = vld [vmem:[#allocation48_spill] sm:$0xff] }
0x28c4   :  { %26753 = vmatprep.subr.bf16.mxu1 %v32296_v11 }
0x28c7   :  { %26755 = vmatpush1.bf16.msra.mxu1 %v32297_v12 }
0x28c8   :  { %26948 = vmatprep.subr.bf16.mxu1 %v31814_v7 }
0x28ca   :  { %20346 = vmatmul.mubr.f32.vlgmr.msra.gmra.mrb[30].mxu1 %v30580_v8 }
0x28cb   :  { %26950 = vmatpush3.bf16.msra.mxu1 %v28868_v43  ;;  %23946 = vmatprep.mubr.msk.f32.mxu1 %vm27748_vm1, %v31729_v10 }
0x28cc   :  { %26951 = vmatprep.subr.bf16.mxu1 %v31814_v7 }
0x28cf   :  { %26953 = vmatpush3.bf16.msra.mxu1 %v28872_v5 }
0x28d0   :  { %26954 = vmatprep.subr.bf16.mxu1 %v31814_v7 }
0x28d3   :  { %26956 = vmatpush3.bf16.msra.mxu1 %v28879_v37 }
0x28d4   :  { %26957 = vmatprep.subr.bf16.mxu1 %v31814_v7 }
0x28d7   :  { %26959 = vmatpush3.bf16.msra.mxu1 %v28885_v46 }
0x28d8   :  { %26960 = vmatprep.subr.bf16.mxu1 %v31814_v7 }
0x293d   :  { %v30853_v34 = vpop.f32.mrb[28].mxu1 }
0x293e   :  { %v23929_v17 = vpop.f32.mrb[29].mxu1 }
0x299d   :  { %v20347_v6 = vpop.f32.mrb[30].mxu1 }
0x299e   :  { %v20349_v9 = vpop.f32.mrb[31].mxu1 }
0x299f   :  { %v20354_v8 = vcombine.low %v20347_v6, %v20349_v9  ;;  %v3344_v6 = vcombine.high %v3343_v51, %v3343_v51  ;;  %v32333_v51 = vld [vmem:[#allocation82_spill] sm:$0xff] }
0x29a1   :  { %v20361_v11 = vrot.slane %v20354_v8, %v32324_v0  ;;  %v3358_v9 = vrot.slane %v3344_v6, %v30862_v55  ;;  %v32343_v6 = vld [vmem:[#allocation91_spill] sm:$0xff] }
0x29a3   :  { %v20363_v12 = vadd.f32 %v22522_v24, %v20361_v11  ;;  %v3366_v8 = vrot.slane %v3358_v9, %v32327_v18  ;;  %v30882_v24 = vld [vmem:[%s31400_s1 + $0x8] sm:$0xff] }
0x29a5   :  { %20371 = vrot.lane.b32.xlu0 %v20363_v12, %s27746_s14  ;;  %v22523_v59 = vmul.f32 -1.442695, %v20363_v12  ;;  %v3370_v11 = vmul.f32 %v30882_v24, %v3366_v8 }
0x29a7   :  { %27523 = vpow2.f32 %v22523_v59  ;;  %v3374_v12 = vsel %vm107_vm0, %v3370_v11, 0.0  ;;  %v32344_v11 = vld [vmem:[#allocation45_spill] sm:$0xff] }
0x29b1   :  { %v27524_v33 = vpop.eup %27523 }
0x29b2   :  { %v20367_v44 = vadd.f32 1.0, %v27524_v33 }
0x29b4   :  { %27525 = vrcp.f32 %v20367_v44 }
0x29be   :  { %v27526_v61 = vpop.eup %27525 }
0x29bf   :  { %v20376_v30 = vmul.f32 %v27526_v61, %v32328_v49  ;;  %v20385_v59 = vrot.slane %v27526_v61, 2  ;;  %v32338_v49 = vld [vmem:[#allocation86_spill] sm:$0xff] }
0x2a17   :  { %v20372_v29 = vpop.permute.xlu0 %20371 }
0x2a18   :  { %v20373_v52 = vrot.slane %v20372_v29, 2 }
0x2a1a   :  { %27527 = vtanh.f32 %v20373_v52 }
0x2a24   :  { %v27528_v14 = vpop.eup %27527 }
0x2a25   :  { %v20377_v13 = vmul.f32 %v27528_v14, %v27526_v61  ;;  %v32332_v61 = vld [vmem:[#allocation81_spill] sm:$0xff] }
0x2a27   :  { %20379 = vrot.lane.b32.xlu1 %v20377_v13, %s27746_s14 }
0x2a4b   :  { %3372 = vadd.xlane.f32.xlu1 %v3371_v2  ;;  %v32337_v2 = vld [vmem:[#allocation100_spill] sm:$0xff] }
0x2a99   :  { %v20380_v41 = vpop.permute.xlu1 %20379 }
0x2a9a   :  { %v20382_v53 = vadd.f32 %v20380_v41, %v20376_v30  ;;  %v32339_v30 = vld [vmem:[#allocation87_spill] sm:$0xff]  ;;  %v32340_v41 = vld [vmem:[#allocation88_spill] sm:$0xff] }
0x2a9c   :  { %27529 = vtanh.f32 %v20382_v53  ;;  %v32341_v53 = vld [vmem:[#allocation89_spill] sm:$0xff] }
0x2aa6   :  { %v27530_v17 = vpop.eup %27529 }
0x2aa7   :  { %20388 = vrot.lane.b32.xlu0 %v27530_v17, %s27746_s14  ;;  %v32342_v17 = vld [vmem:[#allocation90_spill] sm:$0xff] }
0x2ac6   :  { %3375 = vadd.xlane.f32.xlu0 %v3374_v12 }
0x2ad8   :  { %v3373_v9 = vpop.xlane.xlu1 %3372 }
0x2ad9   :  { %v3384_v12 = vrot.slane %v3373_v9, %v32344_v11 }
0x2b19   :  { %v20389_v33 = vpop.permute.xlu0 %20388 }
0x2b1a   :  { %v20391_v44 = vmul.f32 %v20389_v33, %v20385_v59  ;;  %v32345_v33 = vld [vmem:[#allocation92_spill] sm:$0xff] }
0x2b1c   :  { %v21040_v29 = vsel %vm107_vm0, %v20391_v44, 0 }
0x2b1d   :  { %v30887_v52 = vand.u32 4294901760, %v21040_v29 }
0x2b1f   :  { %v21124_v14 = vsub.f32 %v21040_v29, %v30887_v52 }
0x2b21   :  { %v21125_v13 = vand.u32 4294901760, %v21124_v14 }
0x2b23   :  { %v21126_v60 = vsub.f32 %v21124_v14, %v21125_v13 }
0x2b25   :  { %v21127_v36 = vand.u32 4294901760, %v21126_v60  ;;  %v32347_v60 = vld [vmem:[#allocation93_spill] sm:$0xff] }
0x2b27   :  { %21128 = vmatmul.mubr.f32.vlgmr.msra.gmra.mrb[16].mxu0 %v21127_v36  ;;  %v32348_v36 = vld [vmem:[#allocation94_spill] sm:$0xff] }
0x2b28   :  { %26871 = vmatpush1.bf16.msra.mxu0 %v32329_v25  ;;  %21278 = vmatprep.mubr.f32.mxu0 %v31729_v10  ;;  %v32349_v25 = vld [vmem:[#allocation95_spill] sm:$0xff] }
0x2b29   :  { %26873 = vmatprep.subr.bf16.mxu0 %v32330_v48  ;;  %v32350_v48 = vld [vmem:[#allocation96_spill] sm:$0xff] }
0x2b2c   :  { %26875 = vmatpush1.bf16.msra.mxu0 %v32331_v20  ;;  %v32351_v20 = vld [vmem:[#allocation97_spill] sm:$0xff] }
0x2b2d   :  { %26877 = vmatprep.subr.bf16.mxu0 %v32332_v61  ;;  %v32352_v61 = vld [vmem:[#allocation98_spill] sm:$0xff] }
0x2b30   :  { %26879 = vmatpush1.bf16.msra.mxu0 %v32333_v51  ;;  %v32353_v51 = vld [vmem:[#allocation49_spill] sm:$0xff] }
0x2b31   :  { %26881 = vmatprep.subr.bf16.mxu0 %v32334_v39 }
0x2b34   :  { %26883 = vmatpush1.bf16.msra.mxu0 %v32335_v3 }
0x2b35   :  { %26885 = vmatprep.subr.bf16.mxu0 %v32336_v38 }
0x2b37   :  { %21280 = vmatmul.mubr.f32.vlgmr.msra.gmra.mrb[16].mxu0 %v30887_v52 }
0x2b38   :  { %26887 = vmatpush1.bf16.msra.mxu0 %v32337_v2  ;;  %21382 = vmatprep.mubr.f32.mxu0 %v31729_v10 }
0x2b39   :  { %26889 = vmatprep.subr.bf16.mxu0 %v32338_v49  ;;  %v32354_v49 = vld [vmem:[#allocation57_spill] sm:$0xff] }
0x2b3c   :  { %26891 = vmatpush1.bf16.msra.mxu0 %v32339_v30  ;;  %v6055_v30 = vrot.slane %v32354_v49, %v30862_v55 }
0x2b3d   :  { %26893 = vmatprep.subr.bf16.mxu0 %v32340_v41 }
0x2b3e   :  { %v6056_v41 = vcombine.high %v6055_v30, %v6055_v30 }
0x2b40   :  { %26895 = vmatpush1.bf16.msra.mxu0 %v32341_v53  ;;  %v6063_v53 = vrot.slane %v6055_v30, %v30862_v55 }
0x2b41   :  { %26897 = vmatprep.subr.bf16.mxu0 %v32342_v17 }
0x2b42   :  { %v6074_v17 = vrot.slane %v6063_v53, %v32327_v18 }
0x2b44   :  { %26899 = vmatpush1.bf16.msra.mxu0 %v32343_v6  ;;  %v6070_v6 = vrot.slane %v6056_v41, %v30862_v55 }
0x2b45   :  { %26901 = vmatprep.subr.bf16.mxu0 %v28626_v57 }
0x2b47   :  { %21385 = vmatmul.mubr.f32.vlgmr.msra.gmra.mrb[16].mxu0 %v21124_v14  ;;  %v32346_v14 = vld [vmem:[#allocation101_spill] sm:$0xff] }
0x2b48   :  { %26903 = vmatpush1.bf16.msra.mxu0 %v28633_v62  ;;  %21471 = vmatprep.mubr.f32.mxu0 %v31729_v10 }
0x2b49   :  { %26905 = vmatprep.subr.bf16.mxu0 %v28640_v23 }
0x2b4c   :  { %26907 = vmatpush1.bf16.msra.mxu0 %v28642_v21 }
0x2b4d   :  { %26909 = vmatprep.subr.bf16.mxu0 %v28649_v58 }
0x2b50   :  { %26911 = vmatpush1.bf16.msra.mxu0 %v28655_v19 }
0x2b51   :  { %26913 = vmatprep.subr.bf16.mxu0 %v28661_v54 }
0x2b53   :  { %v3376_v8 = vpop.xlane.xlu0 %3375 }
0x2b54   :  { %26915 = vmatpush1.bf16.msra.mxu0 %v28669_v56  ;;  %v3388_v59 = vrot.slane %v3376_v8, %v32344_v11 }
0x2b55   :  { %26917 = vmatprep.subr.bf16.mxu0 %v32345_v33 }
0x2b56   :  { %v3390_v44 = vsel %vm3389_vm2, %v3388_v59, %v3384_v12 }
0x2b57   :  { %21475 = vmatmul.mubr.f32.vlgmr.msra.gmra.mrb[16].mxu0 %v21125_v13  ;;  %v3393_v29 = vsel %vm3392_vm3, %v3390_v44, -inf  ;;  %v27750_v13 = vmov 0  }
0x2b58   :  { %26919 = vmatpush1.bf16.msra.mxu0 %v32346_v14  ;;  %3394 = vmax.xlane.f32.xlu0 %v3393_v29 }
0x2b59   :  { %26921 = vmatprep.subr.bf16.mxu0 %v32347_v60  ;;  %21593 = vmatprep.mubr.f32.mxu0 %v31729_v10 }
0x2b5a   :  { %27381 = vset.pattern.permute.xlu1 %v27750_v13  ;;  %27382 = vset.pattern.permute.xlu0 %v27750_v13 }
0x2b5c   :  { %26923 = vmatpush1.bf16.msra.mxu0 %v32348_v36 }
0x2b5d   :  { %26925 = vmatprep.subr.bf16.mxu0 %v32349_v25 }
0x2b60   :  { %26927 = vmatpush1.bf16.msra.mxu0 %v32350_v48 }
0x2b61   :  { %26929 = vmatprep.subr.bf16.mxu0 %v32351_v20 }
0x2b64   :  { %26931 = vmatpush1.bf16.msra.mxu0 %v32352_v61 }
0x2b65   :  { %26933 = vmatprep.subr.bf16.mxu0 %v28626_v57 }
0x2b67   :  { %21595 = vmatmul.mubr.f32.vlgmr.msra.gmra.mrb[16].mxu0 %v30887_v52 }
0x2b68   :  { %26935 = vmatpush1.bf16.msra.mxu0 %v28633_v62  ;;  %21681 = vmatprep.mubr.f32.mxu0 %v31729_v10 }
0x2b69   :  { %26937 = vmatprep.subr.bf16.mxu0 %v28640_v23 }
0x2b6c   :  { %26939 = vmatpush1.bf16.msra.mxu0 %v28642_v21 }
0x2b6d   :  { %26941 = vmatprep.subr.bf16.mxu0 %v28649_v58 }
0x2b70   :  { %26943 = vmatpush1.bf16.msra.mxu0 %v28655_v19 }
0x2b71   :  { %26945 = vmatprep.subr.bf16.mxu0 %v28661_v54 }
0x2b74   :  { %26947 = vmatpush1.bf16.msra.mxu0 %v28669_v56 }
0x2b77   :  { %21683 = vmatmul.mubr.f32.vlgmr.msra.gmra.mrb[16].mxu0 %v30887_v52 }
0x2be5   :  { %v3395_v57 = vpop.xlane.xlu0 %3394 }
0x2be6   :  { %v3400_v62 = vrot.slane %v3395_v57, %v32327_v18  ;;  %v3404_v23 = vrot.slane %v3395_v57, %v32353_v51 }
0x2be8   :  { %v3407_v39 = vsub.f32 %v3373_v9, %v3400_v62  ;;  %v3408_v21 = vsub.f32 %v3376_v8, %v3404_v23  ;;  %v6081_v9 = vmul.f32 %v30871_v47, %v6074_v17 }
0x2bea   :  { %v3409_v3 = vmul.f32 1.442695, %v3407_v39  ;;  %v3411_v58 = vmul.f32 1.442695, %v3408_v21  ;;  %v6083_v12 = vsel %vm107_vm0, %v6081_v9, 0.0 }
0x2bec   :  { %27531 = vpow2.f32 %v3409_v3 }
0x2bed   :  { %27533 = vpow2.f32 %v3411_v58 }
0x2bf6   :  { %v27532_v38 = vpop.eup %27531 }
0x2bf7   :  { %3416 = vperm.xlu1 %27381, %v27532_v38   ;;  %v27534_v19 = vpop.eup %27533 }
0x2bfb   :  { %3419 = vperm.xlu1 %27381, %v27534_v19  }
0x2c4a   :  { %v21684_v54 = vpop.f32.mrb[16].mxu0 }
0x2c4b   :  { %v21686_v2 = vpop.f32.mrb[17].mxu0  ;;  %v21689_v25 = vadd.f32 %v21684_v54, %v31896_v22 }
0x2c4c   :  { %v30944_v56 = vadd.f32 %v21686_v2, %v31895_v1  ;;  %v6078_v1 = vrot.slane %v6070_v6, %v32327_v18 }
0x2c4d   :  { %v22524_v48 = vmul.f32 -1.442695, %v21689_v25 }
0x2c4e   :  { %27535 = vtanh.f32 %v30944_v56  ;;  %v6082_v59 = vmul.f32 %v30882_v24, %v6078_v1 }
0x2c4f   :  { %27537 = vpow2.f32 %v22524_v48  ;;  %v32356_v48 = vld [vmem:[#allocation46_spill] sm:$0xff] }
0x2c50   :  { %v6086_v14 = vsel %vm107_vm0, %v6082_v59, 0.0 }
0x2c58   :  { %v27536_v52 = vpop.eup %27535 }
0x2c59   :  { %21706 = vrot.lane.b32.xlu0 %v27536_v52, %s27746_s14  ;;  %v27538_v20 = vpop.eup %27537 }
0x2c5a   :  { %v21697_v61 = vadd.f32 1.0, %v27538_v20 }
0x2c5c   :  { %27539 = vrcp.f32 %v21697_v61 }
0x2c66   :  { %v27540_v13 = vpop.eup %27539 }
0x2c76   :  { %v3417_v8 = vpop.permute.xlu1 %3416 }
0x2c77   :  { %v3424_v44 = vrot.slane %v3417_v8, %v32344_v11 }
0x2c78   :  { %6084 = vadd.xlane.f32.xlu0 %v6083_v12 }
0x2c7a   :  { %v3420_v33 = vpop.permute.xlu1 %3419 }
0x2c7b   :  { %v3428_v29 = vrot.slane %v3420_v33, %v32344_v11 }
0x2c7c   :  { %6087 = vadd.xlane.f32.xlu0 %v6086_v14  ;;  %v32355_v14 = vld [vmem:[#allocation47_spill] sm:$0xff] }
0x2c7d   :  { %v3429_v60 = vsel %vm3389_vm2, %v3428_v29, %v3424_v44  ;;  %v21704_v44 = vmul.f32 %v27540_v13, %v30657_v45 }
0x2c7e   :  { %v3431_v36 = vsel %vm3392_vm3, %v3429_v60, 0.0 }
0x2c7f   :  { %3432 = vadd.xlane.f32.xlu1 %v3431_v36 }
0x2ccb   :  { %v21707_v57 = vpop.permute.xlu0 %21706 }
0x2ccc   :  { %v21709_v62 = vmul.f32 %v27540_v13, %v21707_v57 }
0x2cce   :  { %21711 = vrot.lane.b32.xlu1 %v21709_v62, %s27746_s14 }
0x2d05   :  { %v6085_v23 = vpop.xlane.xlu0 %6084 }
0x2d06   :  { %v6094_v21 = vrot.slane %v6085_v23, %v32344_v11 }
0x2d09   :  { %v6088_v39 = vpop.xlane.xlu0 %6087 }
0x2d0a   :  { %v6098_v3 = vrot.slane %v6088_v39, %v32344_v11 }
0x2d0c   :  { %v6099_v58 = vsel %vm3389_vm2, %v6098_v3, %v6094_v21  ;;  %v3433_v54 = vpop.xlane.xlu1 %3432 }
0x2d0d   :  { %v6101_v22 = vsel %vm3392_vm3, %v6099_v58, -inf  ;;  %v3438_v2 = vrot.slane %v3433_v54, %v32327_v18  ;;  %v3442_v52 = vrot.slane %v3433_v54, %v32353_v51 }
0x2d0e   :  { %6102 = vmax.xlane.f32.xlu0 %v6101_v22 }
0x2d0f   :  { %27541 = vrcp.f32 %v3438_v2 }
0x2d10   :  { %27543 = vrcp.f32 %v3442_v52  ;;  %v32357_v52 = vld [vmem:[#allocation55_spill] sm:$0xff] }
0x2d19   :  { %v27542_v49 = vpop.eup %27541 }
0x2d1a   :  { %v3446_v30 = vmul.f32 %v27542_v49, %v27532_v38  ;;  %v27544_v41 = vpop.eup %27543 }
0x2d1b   :  { %v3448_v53 = vmul.f32 %v27544_v41, %v27534_v19  ;;  %v3476_v41 = vrot.slane %v32357_v52, 1 }
0x2d24   :  { %3451 = vperm.xlu0 %27382, %v3446_v30  }
0x2d28   :  { %3456 = vperm.xlu0 %27382, %v3448_v53  }
0x2d40   :  { %v21712_v12 = vpop.permute.xlu1 %21711 }
0x2d41   :  { %v30973_v29 = vadd.f32 %v21712_v12, %v21704_v44 }
0x2d9b   :  { %v6103_v17 = vpop.xlane.xlu0 %6102 }
0x2d9c   :  { %v6108_v6 = vrot.slane %v6103_v17, %v32327_v18  ;;  %v6112_v9 = vrot.slane %v6103_v17, %v32353_v51  ;;  %v30992_v17 = vld [vmem:[%s31409_s10] ss:$0 sm:$0xff] }
0x2d9e   :  { %v6115_v1 = vsub.f32 %v6085_v23, %v6108_v6  ;;  %v6116_v8 = vsub.f32 %v6088_v39, %v6112_v9 }
0x2da0   :  { %v6117_v59 = vmul.f32 1.442695, %v6115_v1  ;;  %v6119_v33 = vmul.f32 1.442695, %v6116_v8  ;;  %v32358_v8 = vld [vmem:[#allocation61_spill] sm:$0xff] }
0x2da1   :  { %v8757_v12 = vrot.slane %v32358_v8, %v30862_v55 }
0x2da2   :  { %27545 = vpow2.f32 %v6117_v59  ;;  %v32359_v59 = vld [vmem:[#allocation12_spill] sm:$0xff] }
0x2da3   :  { %27547 = vpow2.f32 %v6119_v33  ;;  %v3452_v38 = vpop.permute.xlu0 %3451  ;;  %v31000_v33 = vrot.slane %v32359_v59, %v30862_v55  ;;  %v8765_v44 = vrot.slane %v8757_v12, %v30862_v55  ;;  %v8758_v59 = vcombine.high %v8757_v12, %v8757_v12 }
0x2da4   :  { %v3459_v19 = vmul.f32 %v32355_v14, %v3452_v38  ;;  %27549 = vtanh.f32 %v30973_v29 }
0x2da5   :  { %v11460_v38 = vcombine.high %v31000_v33, %v31000_v33 }
0x2da6   :  { %v3461_v60 = vsel %vm107_vm0, %v3459_v19, 0.0 }
0x2da7   :  { %v3462_v36 = vrot.slane %v3461_v60, 4  ;;  %v3457_v25 = vpop.permute.xlu0 %3456 }
0x2da8   :  { %v3460_v20 = vmul.f32 %v32356_v48, %v3457_v25  ;;  %v32360_v25 = vld [vmem:[#allocation65_spill] sm:$0xff] }
0x2da9   :  { %v3463_v61 = vadd.f32 %v3462_v36, %v3461_v60 }
0x2daa   :  { %v3468_v57 = vsel %vm107_vm0, %v3460_v20, 0.0  ;;  %v16863_v20 = vrot.slane %v32360_v25, %v30862_v55 }
0x2dab   :  { %v3464_v62 = vrot.slane %v3463_v61, 2  ;;  %v3469_v45 = vrot.slane %v3468_v57, 4 }
0x2dac   :  { %v30980_v13 = vpop.eup %27545 }
0x2dad   :  { %v30982_v23 = vpop.eup %27547  ;;  %v3465_v39 = vadd.f32 %v3464_v62, %v3463_v61  ;;  %v3470_v21 = vadd.f32 %v3469_v45, %v3468_v57  ;;  %6124 = vperm.xlu1 %27381, %v30980_v13   ;;  %v8776_v61 = vrot.slane %v8765_v44, %v32327_v18  ;;  %v11474_v57 = vrot.slane %v11460_v38, %v30862_v55 }
0x2dae   :  { %6127 = vperm.xlu0 %27382, %v30982_v23   ;;  %v27550_v22 = vpop.eup %27549  ;;  %v16864_v45 = vcombine.high %v16863_v20, %v16863_v20  ;;  %v8772_v44 = vrot.slane %v8758_v59, %v30862_v55 }
0x2daf   :  { %v3466_v3 = vrot.slane %v3465_v39, 1  ;;  %v3471_v58 = vrot.slane %v3470_v21, 2 }
0x2db1   :  { %v3467_v54 = vadd.f32 %v3466_v3, %v3465_v39  ;;  %v3472_v2 = vadd.f32 %v3471_v58, %v3470_v21  ;;  %v16871_v39 = vrot.slane %v16863_v20, %v30862_v55  ;;  %v8783_v21 = vmul.f32 %v30871_v47, %v8776_v61 }
0x2db2   :  { %21717 = vrot.lane.b32.xlu0 %v27550_v22, %s27746_s14  ;;  %v11482_v3 = vrot.slane %v11474_v57, %v32327_v18 }
0x2db3   :  { %v3479_v49 = vadd.f32 %v3467_v54, %v32357_v52  ;;  %v3473_v30 = vrot.slane %v3472_v2, 1  ;;  %v8785_v58 = vsel %vm107_vm0, %v8783_v21, 0.0  ;;  %v16882_v54 = vrot.slane %v16871_v39, %v32327_v18 }
0x2db4   :  { %v11486_v22 = vmul.f32 %v30882_v24, %v11482_v3 }
0x2db5   :  { %v3474_v53 = vadd.f32 %v3473_v30, %v3472_v2  ;;  %v3487_v9 = vadd.f32 %v30992_v17, %v3479_v49  ;;  %v16878_v2 = vrot.slane %v16864_v45, %v30862_v55  ;;  %v16889_v49 = vmul.f32 %v30871_v47, %v16882_v54 }
0x2db6   :  { %v11490_v52 = vsel %vm107_vm0, %v11486_v22, 0.0 }
0x2db7   :  { %v3480_v6 = vadd.f32 %v3476_v41, %v3474_v53  ;;  %v16886_v30 = vrot.slane %v16878_v2, %v32327_v18  ;;  %v16891_v41 = vsel %vm107_vm0, %v16889_v49, 0.0 }
0x2db9   :  { %v3488_v1 = vadd.f32 %v30992_v17, %v3480_v6  ;;  %v16890_v53 = vmul.f32 %v30882_v24, %v16886_v30 }
0x2dbb   :  { %27551 = vtanh.f32 %v3488_v1  ;;  %v16894_v6 = vsel %vm107_vm0, %v16890_v53, 0.0 }
0x2dbc   :  { %27553 = vtanh.f32 %v3487_v9  ;;  %v22525_v9 = vmul.f32 -1.442695, %v30944_v56 }
0x2dbe   :  { %27555 = vpow2.f32 %v22525_v9 }
0x2dc5   :  { %v27552_v19 = vpop.eup %27551 }
0x2dc6   :  { %v22407_v60 = vrot.slane %v27552_v19, 7  ;;  %v27554_v36 = vpop.eup %27553 }
0x2dc8   :  { %v31010_v62 = vsel %vm3389_vm2, %v22407_v60, %v27554_v36  ;;  %v27556_v1 = vpop.eup %27555  ;;  %v8780_v36 = vrot.slane %v8772_v44, %v32327_v18 }
0x2dc9   :  { %v21698_v8 = vadd.f32 1.0, %v27556_v1 }
0x2dca   :  { %v8784_v45 = vmul.f32 %v30882_v24, %v8780_v36 }
0x2dcb   :  { %27557 = vrcp.f32 %v21698_v8 }
0x2dd1   :  { %8786 = vadd.xlane.f32.xlu0 %v8785_v58  ;;  %v8788_v58 = vsel %vm107_vm0, %v8784_v45, 0.0 }
0x2dd5   :  { %11491 = vadd.xlane.f32.xlu0 %v11490_v52  ;;  %v27558_v61 = vpop.eup %27557 }
0x2dd9   :  { %16892 = vadd.xlane.f32.xlu0 %v16891_v41 }
0x2ddd   :  { %16895 = vadd.xlane.f32.xlu0 %v16894_v6 }
0x2e2c   :  { %v6125_v38 = vpop.permute.xlu1 %6124 }
0x2e2d   :  { %v6132_v19 = vrot.slane %v6125_v38, %v32344_v11  ;;  %v6128_v60 = vpop.permute.xlu0 %6127 }
0x2e2e   :  { %v6136_v25 = vrot.slane %v6128_v60, %v32344_v11 }
0x2e30   :  { %v6137_v20 = vsel %vm3389_vm2, %v6136_v25, %v6132_v19 }
0x2e31   :  { %v21718_v57 = vpop.permute.xlu0 %21717  ;;  %v6139_v56 = vsel %vm3392_vm3, %v6137_v20, 0.0 }
0x2e32   :  { %v21720_v12 = vmul.f32 %v27558_v61, %v21718_v57  ;;  %6140 = vadd.xlane.f32.xlu1 %v6139_v56 }
0x2e34   :  { %v21722_v39 = vsel %vm107_vm0, %v21720_v12, 0  ;;  %v22267_v21 = vrot.slane %v21720_v12, %v30862_v55 }
0x2e35   :  { %v31035_v3 = vand.u32 4294901760, %v21722_v39 }
0x2e36   :  { %v22268_v22 = vcombine.high %v22267_v21, %v22267_v21  ;;  %v22275_v54 = vrot.slane %v22267_v21, %v30862_v55  ;;  %8789 = vadd.xlane.f32.xlu1 %v8788_v58 }
0x2e37   :  { %v21798_v2 = vsub.f32 %v21722_v39, %v31035_v3 }
0x2e38   :  { %v22286_v52 = vrot.slane %v22275_v54, %v32327_v18  ;;  %v22282_v49 = vrot.slane %v22268_v22, %v30862_v55 }
0x2e39   :  { %v21799_v30 = vand.u32 4294901760, %v21798_v2 }
0x2e3a   :  { %v22293_v41 = vmul.f32 %v30871_v47, %v22286_v52  ;;  %v22290_v53 = vrot.slane %v22282_v49, %v32327_v18 }
0x2e3b   :  { %v21800_v6 = vsub.f32 %v21798_v2, %v21799_v30 }
0x2e3c   :  { %v22295_v9 = vsel %vm107_vm0, %v22293_v41, 0.0  ;;  %v22294_v1 = vmul.f32 %v30882_v24, %v22290_v53 }
0x2e3d   :  { %22296 = vadd.xlane.f32.xlu0 %v22295_v9  ;;  %v21801_v8 = vand.u32 4294901760, %v21800_v6 }
0x2e3e   :  { %v22298_v59 = vsel %vm107_vm0, %v22294_v1, 0.0 }
0x2e3f   :  { %23947 = vmatmul.mubr.f32.vlgmr.msra.gmra.mrb[32].mxu1 %v21801_v8 }
0x2e40   :  { %26962 = vmatpush3.bf16.msra.mxu1 %v28937_v27  ;;  %23965 = vmatprep.mubr.msk.f32.mxu1 %vm27748_vm1, %v31729_v10 }
0x2e41   :  { %22299 = vadd.xlane.f32.xlu0 %v22298_v59  ;;  %26963 = vmatprep.subr.bf16.mxu1 %v31814_v7 }
0x2e44   :  { %26965 = vmatpush3.bf16.msra.mxu1 %v28890_v42 }
0x2e45   :  { %26966 = vmatprep.subr.bf16.mxu1 %v31814_v7 }
0x2e48   :  { %26968 = vmatpush3.bf16.msra.mxu1 %v28892_v15 }
0x2e49   :  { %26969 = vmatprep.subr.bf16.mxu1 %v31814_v7 }
0x2e4c   :  { %26971 = vmatpush3.bf16.msra.mxu1 %v28894_v32 }
0x2e4d   :  { %26972 = vmatprep.subr.bf16.mxu1 %v31814_v7 }
0x2e4f   :  { %23966 = vmatmul.mubr.f32.vlgmr.msra.gmra.mrb[32].mxu1 %v31035_v3 }
0x2e50   :  { %26974 = vmatpush3.bf16.msra.mxu1 %v28958_v31  ;;  %23984 = vmatprep.mubr.msk.f32.mxu1 %vm27748_vm1, %v31729_v10 }
0x2e51   :  { %26975 = vmatprep.subr.bf16.mxu1 %v31814_v7 }
0x2e54   :  { %26977 = vmatpush3.bf16.msra.mxu1 %v28896_v26 }
0x2e55   :  { %26978 = vmatprep.subr.bf16.mxu1 %v31814_v7 }
0x2e58   :  { %26980 = vmatpush3.bf16.msra.mxu1 %v31975_v35 }
0x2e59   :  { %26981 = vmatprep.subr.bf16.mxu1 %v31814_v7 }
0x2e5c   :  { %26983 = vmatpush3.bf16.msra.mxu1 %v32280_v4 }
0x2e5d   :  { %26984 = vmatprep.subr.bf16.mxu1 %v31814_v7 }
0x2e5f   :  { %23985 = vmatmul.mubr.f32.vlgmr.msra.gmra.mrb[32].mxu1 %v21798_v2 }
0x2e60   :  { %26986 = vmatpush3.bf16.msra.mxu1 %v28868_v43  ;;  %24003 = vmatprep.mubr.msk.f32.mxu1 %vm27748_vm1, %v31729_v10 }
0x2e61   :  { %26987 = vmatprep.subr.bf16.mxu1 %v31814_v7 }
0x2e64   :  { %26989 = vmatpush3.bf16.msra.mxu1 %v28872_v5 }
0x2e65   :  { %26990 = vmatprep.subr.bf16.mxu1 %v31814_v7 }
0x2e68   :  { %26992 = vmatpush3.bf16.msra.mxu1 %v28879_v37 }
0x2e69   :  { %26993 = vmatprep.subr.bf16.mxu1 %v31814_v7 }
0x2e6c   :  { %26995 = vmatpush3.bf16.msra.mxu1 %v28885_v46 }
0x2e6d   :  { %26996 = vmatprep.subr.bf16.mxu1 %v31814_v7 }
0x2e6f   :  { %24004 = vmatmul.mubr.f32.vlgmr.msra.gmra.mrb[32].mxu1 %v21799_v30  ;;  %v32361_v30 = vld [vmem:[#allocation58_spill] sm:$0xff] }
0x2e70   :  { %26998 = vmatpush3.bf16.msra.mxu1 %v32283_v63  ;;  %24022 = vmatprep.mubr.msk.f32.mxu1 %vm27748_vm1, %v31729_v10  ;;  %v6184_v6 = vrot.slane %v32361_v30, 1 }
0x2e71   :  { %26999 = vmatprep.subr.bf16.mxu1 %v31814_v7 }
0x2e74   :  { %27001 = vmatpush3.bf16.msra.mxu1 %v32286_v16 }
0x2e75   :  { %27002 = vmatprep.subr.bf16.mxu1 %v31814_v7 }
0x2e78   :  { %27004 = vmatpush3.bf16.msra.mxu1 %v32289_v50 }
0x2e79   :  { %27005 = vmatprep.subr.bf16.mxu1 %v31814_v7 }
0x2e7c   :  { %27007 = vmatpush3.bf16.msra.mxu1 %v32292_v28 }
0x2e7d   :  { %27008 = vmatprep.subr.bf16.mxu1 %v31814_v7 }
0x2e7f   :  { %24023 = vmatmul.mubr.f32.vlgmr.msra.gmra.mrb[32].mxu1 %v31035_v3 }
0x2e80   :  { %27010 = vmatpush3.bf16.msra.mxu1 %v28868_v43  ;;  %24041 = vmatprep.mubr.msk.f32.mxu1 %vm27748_vm1, %v31729_v10  ;;  %v8787_v10 = vpop.xlane.xlu0 %8786 }
0x2e81   :  { %27011 = vmatprep.subr.bf16.mxu1 %v31814_v7 }
0x2e84   :  { %27013 = vmatpush3.bf16.msra.mxu1 %v28872_v5  ;;  %v8796_v5 = vrot.slane %v8787_v10, %v32344_v11  ;;  %v31107_v4 = vpop.xlane.xlu0 %11491 }
0x2e85   :  { %27014 = vmatprep.subr.bf16.mxu1 %v31814_v7 }
0x2e88   :  { %27016 = vmatpush3.bf16.msra.mxu1 %v28879_v37  ;;  %v31109_v63 = vpop.xlane.xlu0 %16892 }
0x2e89   :  { %27017 = vmatprep.subr.bf16.mxu1 %v31814_v7 }
0x2e8c   :  { %27019 = vmatpush3.bf16.msra.mxu1 %v28885_v46  ;;  %v31111_v16 = vpop.xlane.xlu0 %16895 }
0x2e8f   :  { %24042 = vmatmul.mubr.f32.vlgmr.msra.gmra.mrb[32].mxu1 %v31035_v3 }
0x2ebf   :  { %v6141_v42 = vpop.xlane.xlu1 %6140 }
0x2ec0   :  { %v6146_v43 = vrot.slane %v6141_v42, %v32327_v18  ;;  %v6150_v15 = vrot.slane %v6141_v42, %v32353_v51 }
0x2ec2   :  { %27559 = vrcp.f32 %v6146_v43 }
0x2ec3   :  { %v8790_v32 = vpop.xlane.xlu1 %8789  ;;  %27561 = vrcp.f32 %v6150_v15 }
0x2ec4   :  { %v8800_v26 = vrot.slane %v8790_v32, %v32344_v11 }
0x2ec6   :  { %v8801_v37 = vsel %vm3389_vm2, %v8800_v26, %v8796_v5 }
0x2ec7   :  { %v8803_v27 = vsel %vm3392_vm3, %v8801_v37, -inf  ;;  %v32362_v37 = vld [vmem:[#allocation77_spill] sm:$0xff] }
0x2ec8   :  { %8804 = vmax.xlane.f32.xlu1 %v8803_v27  ;;  %v14161_v27 = vrot.slane %v32362_v37, %v30862_v55 }
0x2eca   :  { %v31113_v50 = vpop.xlane.xlu0 %22296 }
0x2ecc   :  { %v27560_v46 = vpop.eup %27559 }
0x2ecd   :  { %v6154_v7 = vmul.f32 %v27560_v46, %v30980_v13  ;;  %v27562_v31 = vpop.eup %27561 }
0x2ece   :  { %v6156_v35 = vmul.f32 %v27562_v31, %v30982_v23  ;;  %v31115_v28 = vpop.xlane.xlu0 %22299 }
0x2ecf   :  { %6159 = vperm.xlu0 %27382, %v6154_v7   ;;  %v14162_v7 = vcombine.high %v14161_v27, %v14161_v27 }
0x2ed1   :  { %v14176_v31 = vrot.slane %v14162_v7, %v30862_v55 }
0x2ed3   :  { %6164 = vperm.xlu0 %27382, %v6156_v35   ;;  %v11467_v35 = vrot.slane %v31000_v33, %v30862_v55 }
0x2f4e   :  { %v6160_v44 = vpop.permute.xlu0 %6159 }
0x2f4f   :  { %v6167_v38 = vmul.f32 %v32355_v14, %v6160_v44  ;;  %v14184_v44 = vrot.slane %v14176_v31, %v32327_v18 }
0x2f51   :  { %v6169_v13 = vsel %vm107_vm0, %v6167_v38, 0.0  ;;  %v14188_v38 = vmul.f32 %v30882_v24, %v14184_v44 }
0x2f52   :  { %v6170_v19 = vrot.slane %v6169_v13, 4  ;;  %v6165_v60 = vpop.permute.xlu0 %6164 }
0x2f53   :  { %v6168_v23 = vmul.f32 %v32356_v48, %v6165_v60 }
0x2f54   :  { %v6171_v36 = vadd.f32 %v6170_v19, %v6169_v13  ;;  %v11478_v13 = vrot.slane %v11467_v35, %v32327_v18  ;;  %v14192_v19 = vsel %vm107_vm0, %v14188_v38, 0.0 }
0x2f55   :  { %v6176_v25 = vsel %vm107_vm0, %v6168_v23, 0.0  ;;  %v8805_v20 = vpop.xlane.xlu1 %8804 }
0x2f56   :  { %v6172_v61 = vrot.slane %v6171_v36, 2  ;;  %v6177_v57 = vrot.slane %v6176_v25, 4  ;;  %v8810_v56 = vrot.slane %v8805_v20, %v32327_v18  ;;  %v8814_v45 = vrot.slane %v8805_v20, %v32353_v51 }
0x2f57   :  { %v11485_v60 = vmul.f32 %v30871_v47, %v11478_v13 }
0x2f58   :  { %v6173_v12 = vadd.f32 %v6172_v61, %v6171_v36  ;;  %v6178_v39 = vadd.f32 %v6177_v57, %v6176_v25  ;;  %v8817_v21 = vsub.f32 %v8787_v10, %v8810_v56  ;;  %v8818_v3 = vsub.f32 %v8790_v32, %v8814_v45 }
0x2f59   :  { %v11487_v23 = vsel %vm107_vm0, %v11485_v60, 0.0  ;;  %v14169_v36 = vrot.slane %v14161_v27, %v30862_v55  ;;  %v19565_v25 = vrot.slane %v30661_v40, %v30862_v55 }
0x2f5a   :  { %v6174_v58 = vrot.slane %v6173_v12, 1  ;;  %v6179_v22 = vrot.slane %v6178_v39, 2  ;;  %v8819_v54 = vmul.f32 1.442695, %v8817_v21  ;;  %v8821_v2 = vmul.f32 1.442695, %v8818_v3 }
0x2f5b   :  { %v19566_v20 = vcombine.high %v19565_v25, %v19565_v25  ;;  %v19573_v61 = vrot.slane %v19565_v25, %v30862_v55  ;;  %v14180_v45 = vrot.slane %v14169_v36, %v32327_v18 }
0x2f5c   :  { %v6175_v52 = vadd.f32 %v6174_v58, %v6173_v12  ;;  %v6180_v49 = vadd.f32 %v6179_v22, %v6178_v39  ;;  %27563 = vpow2.f32 %v8819_v54 }
0x2f5d   :  { %27565 = vpow2.f32 %v8821_v2  ;;  %v14187_v3 = vmul.f32 %v30871_v47, %v14180_v45  ;;  %v19584_v58 = vrot.slane %v19573_v61, %v32327_v18  ;;  %v19580_v40 = vrot.slane %v19566_v20, %v30862_v55 }
0x2f5e   :  { %v6187_v41 = vadd.f32 %v6175_v52, %v32361_v30  ;;  %v6181_v53 = vrot.slane %v6180_v49, 1  ;;  %v11502_v55 = vrot.slane %v31107_v4, %v32344_v11 }
0x2f5f   :  { %v14189_v22 = vsel %vm107_vm0, %v14187_v3, 0.0  ;;  %v19591_v54 = vmul.f32 %v30871_v47, %v19584_v58  ;;  %v19588_v2 = vrot.slane %v19580_v40, %v32327_v18 }
0x2f60   :  { %v6182_v9 = vadd.f32 %v6181_v53, %v6180_v49  ;;  %v6189_v42 = vadd.f32 %v30992_v17, %v6187_v41  ;;  %v16906_v53 = vrot.slane %v31111_v16, %v32344_v11 }
0x2f61   :  { %v19593_v52 = vsel %vm107_vm0, %v19591_v54, 0.0  ;;  %v19592_v49 = vmul.f32 %v30882_v24, %v19588_v2 }
0x2f62   :  { %v6188_v1 = vadd.f32 %v6184_v6, %v6182_v9  ;;  %v31125_v8 = vpop.f32.mrb[32].mxu1  ;;  %v16902_v6 = vrot.slane %v31109_v63, %v32344_v11 }
0x2f63   :  { %v24043_v59 = vpop.f32.mrb[33].mxu1  ;;  %v19596_v30 = vsel %vm107_vm0, %v19592_v49, 0.0 }
0x2f64   :  { %v6190_v43 = vadd.f32 %v30992_v17, %v6188_v1  ;;  %v16907_v1 = vsel %vm3389_vm2, %v16906_v53, %v16902_v6 }
0x2f65   :  { %v16909_v59 = vsel %vm3392_vm3, %v16907_v1, -inf }
0x2f66   :  { %v31129_v15 = vpop.eup %27563  ;;  %27567 = vtanh.f32 %v6190_v43 }
0x2f67   :  { %v31131_v10 = vpop.eup %27565  ;;  %8826 = vperm.xlu1 %27381, %v31129_v15   ;;  %27569 = vtanh.f32 %v6189_v42 }
0x2f68   :  { %8829 = vperm.xlu0 %27382, %v31131_v10  }
0x2f70   :  { %v27568_v32 = vpop.eup %27567 }
0x2f71   :  { %v22412_v5 = vrot.slane %v27568_v32, 7  ;;  %v27570_v26 = vpop.eup %27569 }
0x2f73   :  { %v31138_v46 = vsel %vm3389_vm2, %v22412_v5, %v27570_v26 }
0x2f87   :  { %14193 = vadd.xlane.f32.xlu0 %v14192_v19 }
0x2f8b   :  { %11488 = vadd.xlane.f32.xlu1 %v11487_v23 }
0x2fe6   :  { %v8827_v33 = vpop.permute.xlu1 %8826 }
0x2fe7   :  { %v8834_v57 = vrot.slane %v8827_v33, %v32344_v11  ;;  %v8830_v56 = vpop.permute.xlu0 %8829 }
0x2fe8   :  { %v8838_v12 = vrot.slane %v8830_v56, %v32344_v11 }
0x2fea   :  { %v8839_v39 = vsel %vm3389_vm2, %v8838_v12, %v8834_v57 }
0x2feb   :  { %v8841_v21 = vsel %vm3392_vm3, %v8839_v39, 0.0 }
0x2fec   :  { %8842 = vadd.xlane.f32.xlu1 %v8841_v21 }
0x2ff0   :  { %14190 = vadd.xlane.f32.xlu1 %v14189_v22 }
0x2ff4   :  { %19594 = vadd.xlane.f32.xlu1 %v19593_v52 }
0x2ff8   :  { %19597 = vadd.xlane.f32.xlu1 %v19596_v30 }
0x3014   :  { %v31179_v32 = vpop.xlane.xlu0 %14193 }
0x3015   :  { %v14204_v26 = vrot.slane %v31179_v32, %v32344_v11 }
0x3018   :  { %v11489_v41 = vpop.xlane.xlu1 %11488 }
0x3019   :  { %v11498_v47 = vrot.slane %v11489_v41, %v32344_v11 }
0x301b   :  { %v11503_v9 = vsel %vm3389_vm2, %v11502_v55, %v11498_v47  ;;  %v32363_v55 = vld [vmem:[#allocation62_spill] sm:$0xff] }
0x301c   :  { %v11505_v24 = vsel %vm3392_vm3, %v11503_v9, -inf }
0x301d   :  { %11506 = vmax.xlane.f32.xlu1 %v11505_v24 }
0x3021   :  { %16910 = vmax.xlane.f32.xlu1 %v16909_v59 }
0x3079   :  { %v8843_v42 = vpop.xlane.xlu1 %8842 }
0x307a   :  { %v8848_v43 = vrot.slane %v8843_v42, %v32327_v18  ;;  %v8852_v31 = vrot.slane %v8843_v42, %v32353_v51 }
0x307c   :  { %27571 = vrcp.f32 %v8848_v43  ;;  %v8886_v43 = vrot.slane %v32363_v55, 1 }
0x307d   :  { %v31181_v5 = vpop.xlane.xlu1 %14190  ;;  %27573 = vrcp.f32 %v8852_v31 }
0x307e   :  { %v14200_v37 = vrot.slane %v31181_v5, %v32344_v11 }
0x3080   :  { %v14205_v27 = vsel %vm3389_vm2, %v14204_v26, %v14200_v37 }
0x3081   :  { %v14207_v7 = vsel %vm3392_vm3, %v14205_v27, -inf  ;;  %v31192_v19 = vpop.xlane.xlu1 %19594 }
0x3082   :  { %14208 = vmax.xlane.f32.xlu0 %v14207_v7 }
0x3085   :  { %v31194_v60 = vpop.xlane.xlu1 %19597 }
0x3086   :  { %v27572_v35 = vpop.eup %27571 }
0x3087   :  { %v8856_v44 = vmul.f32 %v27572_v35, %v31129_v15  ;;  %v27574_v38 = vpop.eup %27573  ;;  %v22310_v15 = vrot.slane %v31115_v28, %v32344_v11 }
0x3088   :  { %v8858_v13 = vmul.f32 %v27574_v38, %v31131_v10  ;;  %v22306_v10 = vrot.slane %v31113_v50, %v32344_v11 }
0x3089   :  { %8861 = vperm.xlu1 %27381, %v8856_v44  }
0x308a   :  { %v22311_v57 = vsel %vm3389_vm2, %v22310_v15, %v22306_v10  ;;  %v19604_v10 = vrot.slane %v31192_v19, %v32344_v11 }
0x308b   :  { %v22313_v45 = vsel %vm3392_vm3, %v22311_v57, -inf }
0x3098   :  { %8866 = vperm.xlu0 %27382, %v8858_v13  }
0x30aa   :  { %v11507_v23 = vpop.xlane.xlu1 %11506 }
0x30ab   :  { %v11512_v36 = vrot.slane %v11507_v23, %v32327_v18  ;;  %v11516_v61 = vrot.slane %v11507_v23, %v32353_v51 }
0x30ad   :  { %v11519_v25 = vsub.f32 %v11489_v41, %v11512_v36  ;;  %v11520_v56 = vsub.f32 %v31107_v4, %v11516_v61 }
0x30ae   :  { %v31211_v21 = vpop.xlane.xlu1 %16910 }
0x30af   :  { %v11521_v33 = vmul.f32 1.442695, %v11519_v25  ;;  %v11523_v12 = vmul.f32 1.442695, %v11520_v56  ;;  %v19608_v25 = vrot.slane %v31194_v60, %v32344_v11  ;;  %v16916_v61 = vrot.slane %v31211_v21, %v32327_v18 }
0x30b1   :  { %27575 = vpow2.f32 %v11521_v33 }
0x30b2   :  { %27577 = vpow2.f32 %v11523_v12  ;;  %v16923_v12 = vsub.f32 %v31109_v63, %v16916_v61 }
0x30bb   :  { %v31197_v20 = vpop.eup %27575 }
0x30bc   :  { %11528 = vperm.xlu1 %27381, %v31197_v20   ;;  %v31208_v39 = vpop.eup %27577 }
0x30e0   :  { %22314 = vmax.xlane.f32.xlu1 %v22313_v45  ;;  %v19609_v45 = vsel %vm3389_vm2, %v19608_v25, %v19604_v10 }
0x30f1   :  { %11531 = vperm.xlu1 %27381, %v31208_v39  }
0x3108   :  { %v8862_v3 = vpop.permute.xlu1 %8861 }
0x3109   :  { %v8869_v58 = vmul.f32 %v32355_v14, %v8862_v3 }
0x310b   :  { %v8871_v40 = vsel %vm107_vm0, %v8869_v58, 0.0  ;;  %v19611_v58 = vsel %vm3392_vm3, %v19609_v45, -inf }
0x310c   :  { %v8872_v22 = vrot.slane %v8871_v40, 4 }
0x310e   :  { %v8873_v54 = vadd.f32 %v8872_v22, %v8871_v40  ;;  %v16925_v40 = vmul.f32 1.442695, %v16923_v12 }
0x310f   :  { %v31215_v52 = vpop.xlane.xlu0 %14208 }
0x3110   :  { %v8874_v2 = vrot.slane %v8873_v54, 2 }
0x3112   :  { %v8875_v4 = vadd.f32 %v8874_v2, %v8873_v54  ;;  %v14214_v2 = vrot.slane %v31215_v52, %v32327_v18 }
0x3114   :  { %v8876_v49 = vrot.slane %v8875_v4, 1 }
0x3116   :  { %v8877_v30 = vadd.f32 %v8876_v49, %v8875_v4 }
0x3117   :  { %v8867_v41 = vpop.permute.xlu0 %8866 }
0x3118   :  { %v8889_v53 = vadd.f32 %v8877_v30, %v32363_v55  ;;  %v8870_v47 = vmul.f32 %v32356_v48, %v8867_v41  ;;  %v14221_v30 = vsub.f32 %v31181_v5, %v14214_v2  ;;  %v16920_v5 = vrot.slane %v31211_v21, %v32353_v51 }
0x311a   :  { %v8878_v6 = vsel %vm107_vm0, %v8870_v47, 0.0  ;;  %v8891_v27 = vadd.f32 %v30992_v17, %v8889_v53  ;;  %v14223_v41 = vmul.f32 1.442695, %v14221_v30  ;;  %v16924_v47 = vsub.f32 %v31111_v16, %v16920_v5 }
0x311b   :  { %v8879_v9 = vrot.slane %v8878_v6, 4 }
0x311d   :  { %v8880_v24 = vadd.f32 %v8879_v9, %v8878_v6 }
0x311f   :  { %v8881_v1 = vrot.slane %v8880_v24, 2 }
0x3121   :  { %v8882_v59 = vadd.f32 %v8881_v1, %v8880_v24  ;;  %v16927_v24 = vmul.f32 1.442695, %v16924_v47  ;;  %v14218_v1 = vrot.slane %v31215_v52, %v32353_v51 }
0x3123   :  { %v8883_v42 = vrot.slane %v8882_v59, 1 }
0x3125   :  { %v8884_v26 = vadd.f32 %v8883_v42, %v8882_v59 }
0x3127   :  { %v8890_v37 = vadd.f32 %v8886_v43, %v8884_v26  ;;  %v14222_v43 = vsub.f32 %v31179_v32, %v14218_v1 }
0x3129   :  { %v8892_v7 = vadd.f32 %v30992_v17, %v8890_v37  ;;  %v14225_v37 = vmul.f32 1.442695, %v14222_v43 }
0x312b   :  { %27579 = vtanh.f32 %v8892_v7 }
0x312c   :  { %27581 = vtanh.f32 %v8891_v27 }
0x312d   :  { %27583 = vpow2.f32 %v16925_v40 }
0x3135   :  { %v27580_v31 = vpop.eup %27579 }
0x3136   :  { %v22419_v35 = vrot.slane %v27580_v31, 7  ;;  %v27582_v44 = vpop.eup %27581 }
0x3137   :  { %v31246_v55 = vpop.eup %27583 }
0x3138   :  { %v31224_v38 = vsel %vm3389_vm2, %v22419_v35, %v27582_v44 }
0x313b   :  { %v11529_v13 = vpop.permute.xlu1 %11528 }
0x313c   :  { %v11536_v33 = vrot.slane %v11529_v13, %v32344_v11 }
0x316d   :  { %v22315_v23 = vpop.xlane.xlu1 %22314 }
0x316e   :  { %v22320_v3 = vrot.slane %v22315_v23, %v32327_v18  ;;  %v22324_v22 = vrot.slane %v22315_v23, %v32353_v51 }
0x3170   :  { %v22327_v54 = vsub.f32 %v31113_v50, %v22320_v3  ;;  %v22328_v4 = vsub.f32 %v31115_v28, %v22324_v22 }
0x3171   :  { %v11532_v36 = vpop.permute.xlu1 %11531 }
0x3172   :  { %v11540_v15 = vrot.slane %v11532_v36, %v32344_v11  ;;  %v22329_v49 = vmul.f32 1.442695, %v22327_v54  ;;  %v22331_v63 = vmul.f32 1.442695, %v22328_v4 }
0x3174   :  { %v11541_v57 = vsel %vm3389_vm2, %v11540_v15, %v11536_v33  ;;  %27585 = vpow2.f32 %v22329_v49 }
0x3175   :  { %v11543_v56 = vsel %vm3392_vm3, %v11541_v57, 0.0  ;;  %27587 = vpow2.f32 %v22331_v63 }
0x3176   :  { %11544 = vadd.xlane.f32.xlu1 %v11543_v56  ;;  %27589 = vpow2.f32 %v14223_v41 }
0x317a   :  { %19612 = vmax.xlane.f32.xlu1 %v19611_v58 }
0x317e   :  { %v31249_v53 = vpop.eup %27585 }
0x317f   :  { %v31252_v50 = vpop.eup %27587 }
0x3180   :  { %v31255_v28 = vpop.eup %27589 }
0x318b   :  { %16932 = vperm.xlu1 %27381, %v31246_v55  }
0x318f   :  { %22336 = vperm.xlu1 %27381, %v31249_v53  }
0x3193   :  { %22339 = vperm.xlu1 %27381, %v31252_v50  }
0x3197   :  { %14230 = vperm.xlu1 %27381, %v31255_v28  }
0x3203   :  { %v11545_v6 = vpop.xlane.xlu1 %11544 }
0x3204   :  { %v11550_v9 = vrot.slane %v11545_v6, %v32327_v18  ;;  %v11554_v59 = vrot.slane %v11545_v6, %v32353_v51 }
0x3206   :  { %27591 = vrcp.f32 %v11550_v9 }
0x3207   :  { %v19613_v42 = vpop.xlane.xlu1 %19612  ;;  %27593 = vpow2.f32 %v16927_v24 }
0x3208   :  { %27595 = vrcp.f32 %v11554_v59  ;;  %v19618_v26 = vrot.slane %v19613_v42, %v32327_v18  ;;  %v19622_v16 = vrot.slane %v19613_v42, %v32353_v51  ;;  %v32364_v59 = vld [vmem:[#allocation13_spill] sm:$0xff] }
0x3209   :  { %27597 = vpow2.f32 %v14225_v37 }
0x320a   :  { %v19625_v27 = vsub.f32 %v31192_v19, %v19618_v26  ;;  %v19626_v52 = vsub.f32 %v31194_v60, %v19622_v16 }
0x320c   :  { %v19627_v31 = vmul.f32 1.442695, %v19625_v27  ;;  %v19629_v32 = vmul.f32 1.442695, %v19626_v52 }
0x320e   :  { %27599 = vpow2.f32 %v19627_v31 }
0x320f   :  { %27601 = vpow2.f32 %v19629_v32  ;;  %v11588_v32 = vrot.slane %v32364_v59, 1 }
0x3210   :  { %v27592_v21 = vpop.eup %27591 }
0x3211   :  { %v11558_v7 = vmul.f32 %v27592_v21, %v31197_v20  ;;  %v31271_v35 = vpop.eup %27593  ;;  %v16933_v20 = vpop.permute.xlu1 %16932 }
0x3212   :  { %v27596_v44 = vpop.eup %27595  ;;  %v16940_v57 = vrot.slane %v16933_v20, %v32344_v11 }
0x3213   :  { %11563 = vperm.xlu0 %27382, %v11558_v7   ;;  %v11560_v13 = vmul.f32 %v27596_v44, %v31208_v39  ;;  %v31275_v23 = vpop.eup %27597 }
0x3215   :  { %v22337_v36 = vpop.permute.xlu1 %22336 }
0x3216   :  { %v22344_v24 = vrot.slane %v22337_v36, %v32344_v11 }
0x3217   :  { %16935 = vperm.xlu0 %27382, %v31271_v35  }
0x3218   :  { %v31278_v19 = vpop.eup %27599 }
0x3219   :  { %v31281_v60 = vpop.eup %27601  ;;  %v22340_v15 = vpop.permute.xlu1 %22339 }
0x321a   :  { %v22348_v41 = vrot.slane %v22340_v15, %v32344_v11 }
0x321b   :  { %11568 = vperm.xlu0 %27382, %v11560_v13  }
0x321c   :  { %v22349_v37 = vsel %vm3389_vm2, %v22348_v41, %v22344_v24 }
0x321d   :  { %v14231_v54 = vpop.permute.xlu1 %14230  ;;  %v22351_v52 = vsel %vm3392_vm3, %v22349_v37, 0.0 }
0x321e   :  { %v14238_v5 = vrot.slane %v14231_v54, %v32344_v11 }
0x321f   :  { %14233 = vperm.xlu0 %27382, %v31275_v23  }
0x3223   :  { %19634 = vperm.xlu0 %27382, %v31278_v19  }
0x3227   :  { %19637 = vperm.xlu0 %27382, %v31281_v60  }
0x3292   :  { %v11564_v25 = vpop.permute.xlu0 %11563 }
0x3293   :  { %v11571_v33 = vmul.f32 %v32355_v14, %v11564_v25 }
0x3295   :  { %v11573_v39 = vsel %vm107_vm0, %v11571_v33, 0.0 }
0x3296   :  { %v11574_v10 = vrot.slane %v11573_v39, 4  ;;  %v16936_v61 = vpop.permute.xlu0 %16935 }
0x3297   :  { %v16944_v56 = vrot.slane %v16936_v61, %v32344_v11 }
0x3298   :  { %v11575_v45 = vadd.f32 %v11574_v10, %v11573_v39 }
0x3299   :  { %v16945_v12 = vsel %vm3389_vm2, %v16944_v56, %v16940_v57 }
0x329a   :  { %v11576_v3 = vrot.slane %v11575_v45, 2  ;;  %v11569_v58 = vpop.permute.xlu0 %11568  ;;  %v16947_v40 = vsel %vm3392_vm3, %v16945_v12, 0.0 }
0x329b   :  { %v11572_v22 = vmul.f32 %v32356_v48, %v11569_v58  ;;  %16948 = vadd.xlane.f32.xlu0 %v16947_v40 }
0x329c   :  { %v11577_v2 = vadd.f32 %v11576_v3, %v11575_v45 }
0x329d   :  { %v11580_v4 = vsel %vm107_vm0, %v11572_v22, 0.0 }
0x329e   :  { %v11578_v49 = vrot.slane %v11577_v2, 1  ;;  %v11581_v30 = vrot.slane %v11580_v4, 4  ;;  %v14234_v63 = vpop.permute.xlu0 %14233 }
0x329f   :  { %v14242_v47 = vrot.slane %v14234_v63, %v32344_v11 }
0x32a0   :  { %v11579_v6 = vadd.f32 %v11578_v49, %v11577_v2  ;;  %v11582_v9 = vadd.f32 %v11581_v30, %v11580_v4 }
0x32a1   :  { %v14243_v1 = vsel %vm3389_vm2, %v14242_v47, %v14238_v5 }
0x32a2   :  { %v11591_v42 = vadd.f32 %v11579_v6, %v32364_v59  ;;  %v11583_v43 = vrot.slane %v11582_v9, 2  ;;  %v19635_v26 = vpop.permute.xlu0 %19634  ;;  %v14245_v21 = vsel %vm3392_vm3, %v14243_v1, 0.0 }
0x32a3   :  { %14246 = vadd.xlane.f32.xlu1 %v14245_v21  ;;  %v19642_v31 = vrot.slane %v19635_v26, %v32344_v11 }
0x32a4   :  { %v11584_v16 = vadd.f32 %v11583_v43, %v11582_v9  ;;  %v11593_v33 = vadd.f32 %v30992_v17, %v11591_v42 }
0x32a6   :  { %v11585_v27 = vrot.slane %v11584_v16, 1  ;;  %v19638_v7 = vpop.permute.xlu0 %19637 }
0x32a7   :  { %v19646_v44 = vrot.slane %v19638_v7, %v32344_v11  ;;  %22352 = vadd.xlane.f32.xlu1 %v22351_v52 }
0x32a8   :  { %v11586_v13 = vadd.f32 %v11585_v27, %v11584_v16 }
0x32a9   :  { %v19647_v20 = vsel %vm3389_vm2, %v19646_v44, %v19642_v31 }
0x32aa   :  { %v11592_v36 = vadd.f32 %v11588_v32, %v11586_v13  ;;  %v19649_v25 = vsel %vm3392_vm3, %v19647_v20, 0.0 }
0x32ab   :  { %19650 = vadd.xlane.f32.xlu0 %v19649_v25 }
0x32ac   :  { %v11594_v39 = vadd.f32 %v30992_v17, %v11592_v36 }
0x32ae   :  { %27603 = vtanh.f32 %v11594_v39 }
0x32af   :  { %27605 = vtanh.f32 %v11593_v33 }
0x32b8   :  { %v27604_v15 = vpop.eup %27603 }
0x32b9   :  { %v22424_v10 = vrot.slane %v27604_v15, 7  ;;  %v27606_v61 = vpop.eup %27605 }
0x32bb   :  { %v22425_v11 = vsel %vm3389_vm2, %v22424_v10, %v27606_v61 }
0x3328   :  { %v16949_v57 = vpop.xlane.xlu0 %16948 }
0x3329   :  { %v16958_v45 = vrot.slane %v16949_v57, %v32353_v51  ;;  %v16954_v54 = vrot.slane %v16949_v57, %v32327_v18 }
0x3330   :  { %v14247_v56 = vpop.xlane.xlu1 %14246 }
0x3331   :  { %v14252_v12 = vrot.slane %v14247_v56, %v32327_v18  ;;  %v14256_v3 = vrot.slane %v14247_v56, %v32353_v51 }
0x3333   :  { %27607 = vrcp.f32 %v14252_v12 }
0x3334   :  { %27609 = vrcp.f32 %v14256_v3  ;;  %v22353_v58 = vpop.xlane.xlu1 %22352 }
0x3335   :  { %27611 = vrcp.f32 %v16958_v45  ;;  %v22358_v17 = vrot.slane %v22353_v58, %v32327_v18  ;;  %v22362_v40 = vrot.slane %v22353_v58, %v32353_v51 }
0x3337   :  { %27613 = vrcp.f32 %v22358_v17 }
0x3338   :  { %v19651_v22 = vpop.xlane.xlu0 %19650  ;;  %27615 = vrcp.f32 %v22362_v40 }
0x3339   :  { %v19660_v2 = vrot.slane %v19651_v22, %v32353_v51  ;;  %v19656_v49 = vrot.slane %v19651_v22, %v32327_v18 }
0x333b   :  { %27617 = vrcp.f32 %v19660_v2  ;;  %v32365_v2 = vld [vmem:[#allocation50_spill] sm:$0xff] }
0x333c   :  { %27619 = vrcp.f32 %v16954_v54 }
0x333d   :  { %v27608_v4 = vpop.eup %27607  ;;  %27621 = vrcp.f32 %v19656_v49 }
0x333e   :  { %v27610_v30 = vpop.eup %27609  ;;  %v14260_v63 = vmul.f32 %v27608_v4, %v31255_v28  ;;  %v14290_v4 = vrot.slane %v32365_v2, 1 }
0x333f   :  { %v27612_v41 = vpop.eup %27611  ;;  %v14262_v5 = vmul.f32 %v27610_v30, %v31275_v23 }
0x3340   :  { %14265 = vperm.xlu1 %27381, %v14260_v63   ;;  %v16964_v9 = vmul.f32 %v27612_v41, %v31271_v35 }
0x3341   :  { %v27614_v47 = vpop.eup %27613  ;;  %14270 = vperm.xlu0 %27382, %v14262_v5  }
0x3342   :  { %v22366_v6 = vmul.f32 %v27614_v47, %v31249_v53  ;;  %v27616_v51 = vpop.eup %27615 }
0x3343   :  { %v22368_v18 = vmul.f32 %v27616_v51, %v31252_v50 }
0x3344   :  { %16972 = vperm.xlu1 %27381, %v16964_v9  }
0x3345   :  { %22371 = vperm.xlu0 %27382, %v22366_v6   ;;  %v27618_v24 = vpop.eup %27617 }
0x3346   :  { %v27620_v1 = vpop.eup %27619  ;;  %v19666_v28 = vmul.f32 %v27618_v24, %v31281_v60 }
0x3347   :  { %v16962_v23 = vmul.f32 %v27620_v1, %v31246_v55  ;;  %v27622_v59 = vpop.eup %27621 }
0x3348   :  { %22376 = vperm.xlu1 %27381, %v22368_v18   ;;  %v19664_v53 = vmul.f32 %v27622_v59, %v31278_v19  ;;  %v32366_v18 = vld [vmem:[#allocation56_spill] sm:$0xff] }
0x3349   :  { %19674 = vperm.xlu0 %27382, %v19666_v28   ;;  %v16992_v1 = vrot.slane %v32366_v18, 1 }
0x334c   :  { %16967 = vperm.xlu1 %27381, %v16962_v23  }
0x334d   :  { %22426 = vrot.lane.b32.xlu0 %v22425_v11, %s27746_s14 }
0x3350   :  { %19669 = vperm.xlu1 %27381, %v19664_v53  }
0x3354   :  { %22414 = vrot.lane.b32.xlu1 %v31138_v46, %s27746_s14 }
0x33bf   :  { %v14266_v35 = vpop.permute.xlu1 %14265 }
0x33c0   :  { %v14273_v50 = vmul.f32 %v32355_v14, %v14266_v35  ;;  %v14271_v42 = vpop.permute.xlu0 %14270  ;;  %v31348_v35 = vld [vmem:[%s31409_s10] ss:$0 sm:$0xff] }
0x33c1   :  { %v14274_v60 = vmul.f32 %v32356_v48, %v14271_v42 }
0x33c2   :  { %v14275_v43 = vsel %vm107_vm0, %v14273_v50, 0.0 }
0x33c3   :  { %v14276_v26 = vrot.slane %v14275_v43, 4  ;;  %v14282_v55 = vsel %vm107_vm0, %v14274_v60, 0.0  ;;  %v16973_v21 = vpop.permute.xlu1 %16972 }
0x33c4   :  { %v14283_v37 = vrot.slane %v14282_v55, 4  ;;  %v16976_v16 = vmul.f32 %v32356_v48, %v16973_v21  ;;  %v22372_v19 = vpop.permute.xlu0 %22371  ;;  %v22396_v21 = vrot.slane %v31125_v8, 1 }
0x33c5   :  { %v14277_v27 = vadd.f32 %v14276_v26, %v14275_v43  ;;  %v22379_v7 = vmul.f32 %v32355_v14, %v22372_v19 }
0x33c6   :  { %v14284_v46 = vadd.f32 %v14283_v37, %v14282_v55  ;;  %v16984_v52 = vsel %vm107_vm0, %v16976_v16, 0.0 }
0x33c7   :  { %v14278_v31 = vrot.slane %v14277_v27, 2  ;;  %v16985_v44 = vrot.slane %v16984_v52, 4  ;;  %v22381_v32 = vsel %vm107_vm0, %v22379_v7, 0.0  ;;  %v22377_v13 = vpop.permute.xlu1 %22376 }
0x33c8   :  { %v14285_v20 = vrot.slane %v14284_v46, 2  ;;  %v22382_v36 = vrot.slane %v22381_v32, 4  ;;  %v22380_v25 = vmul.f32 %v32356_v48, %v22377_v13  ;;  %v31338_v45 = vpop.permute.xlu0 %19674 }
0x33c9   :  { %v14279_v33 = vadd.f32 %v14278_v31, %v14277_v27  ;;  %v16986_v39 = vadd.f32 %v16985_v44, %v16984_v52 }
0x33ca   :  { %v14286_v15 = vadd.f32 %v14285_v20, %v14284_v46  ;;  %v22383_v10 = vadd.f32 %v22382_v36, %v22381_v32  ;;  %v22388_v61 = vsel %vm107_vm0, %v22380_v25, 0.0 }
0x33cb   :  { %v14280_v11 = vrot.slane %v14279_v33, 1  ;;  %v16987_v57 = vrot.slane %v16986_v39, 2  ;;  %v22389_v56 = vrot.slane %v22388_v61, 4  ;;  %v16968_v12 = vpop.permute.xlu1 %16967 }
0x33cc   :  { %v14287_v3 = vrot.slane %v14286_v15, 1  ;;  %v22384_v58 = vrot.slane %v22383_v10, 2  ;;  %v16975_v17 = vmul.f32 %v32355_v14, %v16968_v12  ;;  %v22427_v53 = vpop.permute.xlu0 %22426 }
0x33cd   :  { %v14281_v40 = vadd.f32 %v14280_v11, %v14279_v33  ;;  %v16988_v22 = vadd.f32 %v16987_v57, %v16986_v39  ;;  %v22390_v54 = vadd.f32 %v22389_v56, %v22388_v61  ;;  %v31355_v16 = vsel %vm107_vm0, %v31224_v38, %v22427_v53 }
0x33ce   :  { %v14288_v49 = vadd.f32 %v14287_v3, %v14286_v15  ;;  %v22385_v30 = vadd.f32 %v22384_v58, %v22383_v10  ;;  %v16977_v63 = vsel %vm107_vm0, %v16975_v17, 0.0  ;;  %v19678_v17 = vmul.f32 %v32356_v48, %v31338_v45 }
0x33cf   :  { %v14293_v41 = vadd.f32 %v14281_v40, %v32365_v2  ;;  %v16989_v5 = vrot.slane %v16988_v22, 1  ;;  %v22391_v47 = vrot.slane %v22390_v54, 2  ;;  %v16978_v6 = vrot.slane %v16977_v63, 4  ;;  %v19670_v9 = vpop.permute.xlu1 %19669 }
0x33d0   :  { %v14294_v51 = vadd.f32 %v14290_v4, %v14288_v49  ;;  %v22386_v24 = vrot.slane %v22385_v30, 1  ;;  %v19677_v40 = vmul.f32 %v32355_v14, %v19670_v9 }
0x33d1   :  { %v16990_v28 = vadd.f32 %v16989_v5, %v16988_v22  ;;  %v22392_v23 = vadd.f32 %v22391_v47, %v22390_v54  ;;  %v16979_v59 = vadd.f32 %v16978_v6, %v16977_v63  ;;  %v14295_v37 = vadd.f32 %v31348_v35, %v14293_v41 }
0x33d2   :  { %v14296_v50 = vadd.f32 %v31348_v35, %v14294_v51  ;;  %v22387_v42 = vadd.f32 %v22386_v24, %v22385_v30  ;;  %v19686_v22 = vsel %vm107_vm0, %v19678_v17, 0.0  ;;  %v19679_v54 = vsel %vm107_vm0, %v19677_v40, 0.0 }
0x33d3   :  { %v16996_v60 = vadd.f32 %v16992_v1, %v16990_v28  ;;  %v22393_v43 = vrot.slane %v22392_v23, 1  ;;  %v16980_v26 = vrot.slane %v16979_v59, 2  ;;  %v22415_v55 = vpop.permute.xlu1 %22414  ;;  %v19680_v2 = vrot.slane %v19679_v54, 4 }
0x33d4   :  { %v31359_v19 = vsel %vm107_vm0, %v31010_v62, %v22415_v55  ;;  %v22399_v27 = vadd.f32 %v22387_v42, %v31125_v8  ;;  %27623 = vtanh.f32 %v14296_v50  ;;  %v19694_v24 = vrot.slane %v30853_v34, 1 }
0x33d5   :  { %v22394_v7 = vadd.f32 %v22393_v43, %v22392_v23  ;;  %v16981_v46 = vadd.f32 %v16980_v26, %v16979_v59  ;;  %v22461_v52 = vcombine.low %v31359_v19, %v31355_v16  ;;  %v16998_v31 = vadd.f32 %v31348_v35, %v16996_v60 }
0x33d6   :  { %27625 = vtanh.f32 %v14295_v37  ;;  %v22401_v38 = vadd.f32 %v31348_v35, %v22399_v27  ;;  %v19681_v49 = vadd.f32 %v19680_v2, %v19679_v54 }
0x33d7   :  { %v22400_v44 = vadd.f32 %v22396_v21, %v22394_v7  ;;  %v16982_v32 = vrot.slane %v16981_v46, 1  ;;  %27627 = vtanh.f32 %v16998_v31 }
0x33d8   :  { %v19682_v63 = vrot.slane %v19681_v49, 2 }
0x33d9   :  { %v16983_v13 = vadd.f32 %v16982_v32, %v16981_v46  ;;  %v22402_v20 = vadd.f32 %v31348_v35, %v22400_v44 }
0x33da   :  { %v19683_v5 = vadd.f32 %v19682_v63, %v19681_v49 }
0x33db   :  { %v16995_v62 = vadd.f32 %v16983_v13, %v32366_v18  ;;  %27629 = vtanh.f32 %v22402_v20 }
0x33dc   :  { %27631 = vtanh.f32 %v22401_v38  ;;  %v19684_v6 = vrot.slane %v19683_v5, 1 }
0x33dd   :  { %v16997_v8 = vadd.f32 %v31348_v35, %v16995_v62 }
0x33de   :  { %v27624_v36 = vpop.eup %27623  ;;  %v19685_v48 = vadd.f32 %v19684_v6, %v19683_v5 }
0x33df   :  { %27633 = vtanh.f32 %v16997_v8  ;;  %v22431_v25 = vrot.slane %v27624_v36, 7 }
0x33e0   :  { %v27626_v33 = vpop.eup %27625  ;;  %v19697_v14 = vadd.f32 %v19685_v48, %v30853_v34  ;;  %v22469_v34 = vrot.slane %v22461_v52, %v32324_v0 }
0x33e1   :  { %v22432_v39 = vsel %vm3389_vm2, %v22431_v25, %v27626_v33  ;;  %v27628_v15 = vpop.eup %27627 }
0x33e2   :  { %v22436_v56 = vrot.slane %v27628_v15, 7  ;;  %v19699_v18 = vadd.f32 %v31348_v35, %v19697_v14 }
0x33e5   :  { %v27630_v10 = vpop.eup %27629 }
0x33e6   :  { %v22448_v61 = vrot.slane %v27630_v10, 7  ;;  %v27632_v11 = vpop.eup %27631 }
0x33e8   :  { %v22449_v57 = vsel %vm3389_vm2, %v22448_v61, %v27632_v11 }
0x33e9   :  { %v27634_v12 = vpop.eup %27633  ;;  %v22481_v3 = vsel %vm107_vm0, %v22449_v57, %v30973_v29  ;;  %22450 = vrot.lane.b32.xlu0 %v22449_v57, %s27746_s14  ;;  %v19687_v29 = vrot.slane %v19686_v22, 4 }
0x33ea   :  { %22482 = vst [vmem:[%s31411_s12] sm:$0x3] %v22481_v3  ;;  %v22437_v58 = vsel %vm3389_vm2, %v22436_v56, %v27634_v12 }
0x33eb   :  { %22438 = vrot.lane.b32.xlu1 %v22437_v58, %s27746_s14  ;;  %v19688_v4 = vadd.f32 %v19687_v29, %v19686_v22 }
0x33ed   :  { %v19689_v30 = vrot.slane %v19688_v4, 2 }
0x33ef   :  { %v19690_v41 = vadd.f32 %v19689_v30, %v19688_v4 }
0x33f1   :  { %v19691_v47 = vrot.slane %v19690_v41, 1 }
0x33f3   :  { %v19692_v51 = vadd.f32 %v19691_v47, %v19690_v41 }
0x33f5   :  { %v19698_v45 = vadd.f32 %v19694_v24, %v19692_v51 }
0x33f7   :  { %v19700_v9 = vadd.f32 %v31348_v35, %v19698_v45 }
0x33f9   :  { %27635 = vtanh.f32 %v19700_v9 }
0x33fa   :  { %27637 = vtanh.f32 %v19699_v18 }
0x3403   :  { %v27636_v1 = vpop.eup %27635 }
0x3404   :  { %v27638_v28 = vpop.eup %27637  ;;  %v22443_v23 = vrot.slane %v27636_v1, 7 }
0x3406   :  { %v22444_v53 = vsel %vm3389_vm2, %v22443_v23, %v27638_v28 }
0x345b   :  { %v22451_v59 = vpop.permute.xlu0 %22450 }
0x345c   :  { %v22456_v42 = vsel %vm107_vm0, %v22444_v53, %v22451_v59 }
0x345d   :  { %v22439_v50 = vpop.permute.xlu1 %22438 }
0x345e   :  { %v22455_v60 = vsel %vm107_vm0, %v22432_v39, %v22439_v50 }
0x345f   :  { %v22462_v43 = vcombine.low %v22455_v60, %v22456_v42 }
0x3461   :  { %v22476_v35 = vrot.slane %v22462_v43, %v32324_v0 }
0x3463   :  { %v22477_v26 = vcombine.low %v22469_v34, %v22476_v35 }
0x3465   :  { %22479 = vst [vmem:[%s31410_s11] sm:$0xff] %v22477_v26 }
0x3466   :  { %22491 = vsyncpa [#allocation3], 1 }
0x3467   :  { %22492 = vsyncpa [#allocation5], 1 }
0x3468   :  { %22493 = vsyncpa [#allocation8], 1 }

</bundles_post_ra>
